<compile_context>
chip_gen: v7x
topology: tpu7x:2x2x1
jax: 0.10.0
libtpu: 0.0.40
codegen_flags: <defaults>
</compile_context>

<pallas_src>
import functools

import numpy as np
import jax
import jax.numpy as jnp
from jax.experimental import pallas as pl
from jax.experimental.pallas import tpu as pltpu


# ---------------------------------------------------------------------------
# In-kernel building blocks (pure functions on VMEM-resident values/refs).
# ---------------------------------------------------------------------------
def _conv_relu(x, m_ref, b_ref):
    """3x3 stride-1 conv + bias + ReLU on an (Hin, Win*Cin) slab.

    m_ref: (KH, Win*Cin, WoutBlocks*Cout) banded weight matrices (one per ky).
    b_ref: (1, WoutBlocks*Cout) pre-tiled bias row.
    Returns (Hout, WoutBlocks*Cout) with Hout = Hin - KH + 1.
    """
    kh = m_ref.shape[0]
    hout = x.shape[0] - (kh - 1)
    acc = jnp.dot(x[0:hout, :], m_ref[0], preferred_element_type=jnp.float32)
    for ky in range(1, kh):
        acc = acc + jnp.dot(x[ky:ky + hout, :], m_ref[ky],
                            preferred_element_type=jnp.float32)
    return jnp.maximum(acc + b_ref[...], 0.0)


def _maxpool_2x2(x, sr_ref, sc_ref):
    """2x2/stride-2 max pool on an (Hin, Win*C) slab.

    Shifted maxima give the window max anchored at every (r, w); the tiny 0/1
    matrices sr (rows) and sc (lane blocks) pick the even anchors and, when
    sized for it, also place the result inside a zero border (padding=1 prep).
    """
    c = x.shape[1] - sc_ref.shape[0]            # channel count (lane block size)
    mv = jnp.maximum(x[:-1, :], x[1:, :])       # vertical pair max
    mvh = jnp.maximum(mv[:, :-c], mv[:, c:])    # + horizontal pair max
    t = jnp.dot(sr_ref[...], mvh, preferred_element_type=jnp.float32)
    return jnp.dot(t, sc_ref[...], preferred_element_type=jnp.float32)


def _tiny_vgg_kernel(x_ref, m1_ref, b1_ref, m2_ref, b2_ref,
                     sr1_ref, sc1_ref, m3_ref, b3_ref, rpad_ref,
                     m4_ref, b4_ref, sr2_ref, sc2_ref, wl_ref, bl_ref,
                     o_ref):
    x0 = x_ref[0]                                             # (64, 64*Cin)

    # block_1: conv(valid)+ReLU, conv(valid)+ReLU, maxpool2
    a1 = _conv_relu(x0, m1_ref, b1_ref)                       # (62, 62*C)
    a2 = _conv_relu(a1, m2_ref, b2_ref)                       # (60, 60*C)
    p1 = _maxpool_2x2(a2, sr1_ref, sc1_ref)                   # (32, 32*C) zero-bordered

    # block_2: conv(pad=1)+ReLU, conv(pad=1)+ReLU, maxpool2
    a3 = _conv_relu(p1, m3_ref, b3_ref)                       # (30, 32*C) zero lane border
    a3 = jnp.dot(rpad_ref[...], a3,
                 preferred_element_type=jnp.float32)          # (32, 32*C) zero row border
    a4 = _conv_relu(a3, m4_ref, b4_ref)                       # (30, 30*C)
    p2 = _maxpool_2x2(a4, sr2_ref, sc2_ref)                   # (15, 15*C)

    # classifier (weights already permuted to our (h, w, c) flatten order)
    logits = bl_ref[...]                                      # (1, O)
    for i in range(p2.shape[0]):
        logits = logits + jnp.dot(p2[i:i + 1, :], wl_ref[i],
                                  preferred_element_type=jnp.float32)
    o_ref[0] = logits


# ---------------------------------------------------------------------------
# One-time weight preprocessing (host-side, outside the hot path).
# ---------------------------------------------------------------------------
def prepare_params(params, *, H=64, W=64):
    C = params["b1"].shape[0]                 # hidden units
    O = params["bl"].shape[0]

    def banded(w, win, wout, pad_out):
        # w: (KH, KW, cin, cout).  M[ky][(wi*cin+ci), (vo*cout+co)] = w[ky,kx,ci,co]
        # where wi == wo + kx and vo == wo (+1 if lane-padded output).
        KH, KW, ci, co = w.shape
        off = 1 if pad_out else 0
        vb = wout + 2 * off
        T = np.zeros((KW, win, vb), np.float32)
        for kx in range(KW):
            for wo in range(wout):
                T[kx, wo + kx, wo + off] = 1.0
        M = jnp.einsum("xwv,kxio->kwivo", jnp.asarray(T), w)
        return M.reshape(KH, win * ci, vb * co)

    def bias_row(b, wout, pad_out):
        row = jnp.tile(b, wout)
        if pad_out:
            z = jnp.zeros((C,), row.dtype)
            row = jnp.concatenate([z, row, z])
        return row.reshape(1, -1)

    def pool_mats(hin, win, pad_out):
        ho, wo = hin // 2, win // 2
        off = 1 if pad_out else 0
        Sr = np.zeros((ho + 2 * off, hin - 1), np.float32)
        for i in range(ho):
            Sr[i + off, 2 * i] = 1.0
        Sc = np.zeros(((win - 1) * C, (wo + 2 * off) * C), np.float32)
        for j in range(wo):
            for c in range(C):
                Sc[2 * j * C + c, (j + off) * C + c] = 1.0
        return jnp.asarray(Sr), jnp.asarray(Sc)

    w1o = W - 2                 # conv1 out: 62x62
    w2o = w1o - 2               # conv2 out: 60x60
    wp1 = w2o // 2              # pool1 out: 30x30 (stored zero-padded as 32x32)
    w3o = wp1                   # conv3/conv4 out: 30x30
    wp2 = w3o // 2              # pool2 out: 15x15

    rpad = np.zeros((w3o + 2, w3o), np.float32)
    for i in range(w3o):
        rpad[i + 1, i] = 1.0

    sr1, sc1 = pool_mats(w2o, w2o, True)
    sr2, sc2 = pool_mats(w3o, w3o, False)

    # classifier weights: torch flattens (C, 15, 15); permute to our (h, w, c).
    wl3 = jnp.reshape(
        jnp.transpose(jnp.reshape(params["wl"], (C, wp2, wp2, O)), (1, 2, 0, 3)),
        (wp2, wp2 * C, O))

    return dict(
        m1=banded(params["w1"], W, w1o, False), b1=bias_row(params["b1"], w1o, False),
        m2=banded(params["w2"], w1o, w2o, False), b2=bias_row(params["b2"], w2o, False),
        sr1=sr1, sc1=sc1,
        m3=banded(params["w3"], wp1 + 2, w3o, True), b3=bias_row(params["b3"], w3o, True),
        rpad=jnp.asarray(rpad),
        m4=banded(params["w4"], wp1 + 2, w3o, False), b4=bias_row(params["b4"], w3o, False),
        sr2=sr2, sc2=sc2,
        wl=wl3, bl=params["bl"].reshape(1, O),
    )


# ---------------------------------------------------------------------------
# Forward pass: one pallas_call for the whole network.
# ---------------------------------------------------------------------------
def tiny_vgg_forward(x_nchw, prep):
    B, cin, H, W = x_nchw.shape
    O = prep["bl"].shape[1]
    # NCHW -> per-image (H, W*Cin) slab (the only XLA op on activations).
    x = jnp.transpose(x_nchw, (0, 2, 3, 1)).reshape(B, H, W * cin)

    args = (x, prep["m1"], prep["b1"], prep["m2"], prep["b2"],
            prep["sr1"], prep["sc1"], prep["m3"], prep["b3"], prep["rpad"],
            prep["m4"], prep["b4"], prep["sr2"], prep["sc2"],
            prep["wl"], prep["bl"])

    def const_spec(a):
        n = a.ndim
        return pl.BlockSpec(a.shape, lambda b, _n=n: (0,) * _n)

    in_specs = [pl.BlockSpec((1, H, W * cin), lambda b: (b, 0, 0))]
    in_specs += [const_spec(a) for a in args[1:]]

    out = pl.pallas_call(
        _tiny_vgg_kernel,
        out_shape=jax.ShapeDtypeStruct((B, 1, O), jnp.float32),
        grid=(B,),
        in_specs=in_specs,
        out_specs=pl.BlockSpec((1, 1, O), lambda b: (b, 0, 0)),
        compiler_params=pltpu.CompilerParams(
            dimension_semantics=("parallel",),
            vmem_limit_bytes=48 * 1024 * 1024),
    )(*args)
    return out[:, 0, :]


# ---------------------------------------------------------------------------
# Deterministic synthetic parameters (same shapes as the PyTorch module).
# ---------------------------------------------------------------------------
def init_params(key, in_ch, hidden, out_dim):
    ks = jax.random.split(key, 10)

    def uinit(k, shape, fan_in):
        bound = 1.0 / jnp.sqrt(jnp.float32(fan_in))
        return jax.random.uniform(k, shape, jnp.float32, -bound, bound)

    def conv(kw, kb, cin, cout):
        # torch Conv2d weight (cout, cin, 3, 3) -> HWIO (3, 3, cin, cout)
        w_t = uinit(kw, (cout, cin, 3, 3), cin * 9)
        b = uinit(kb, (cout,), cin * 9)
        return jnp.transpose(w_t, (2, 3, 1, 0)), b

    w1, b1 = conv(ks[0], ks[1], in_ch, hidden)
    w2, b2 = conv(ks[2], ks[3], hidden, hidden)
    w3, b3 = conv(ks[4], ks[5], hidden, hidden)
    w4, b4 = conv(ks[6], ks[7], hidden, hidden)
    feat = hidden * 15 * 15
    wl_t = uinit(ks[8], (out_dim, feat), feat)   # torch Linear layout (out, in)
    bl = uinit(ks[9], (out_dim,), feat)
    return dict(w1=w1, b1=b1, w2=w2, b2=b2, w3=w3, b3=b3, w4=w4, b4=b4,
                wl=jnp.transpose(wl_t), bl=bl)


# Pure-JAX reference (correctness check only).
def _ref_forward(x_nchw, params):
    dn = ("NHWC", "HWIO", "NHWC")
    x = jnp.transpose(x_nchw, (0, 2, 3, 1))

    def conv(x, w, b, pad):
        y = jax.lax.conv_general_dilated(x, w, (1, 1), [(pad, pad), (pad, pad)],
                                         dimension_numbers=dn)
        return jnp.maximum(y + b, 0.0)

    def pool(x):
        return jax.lax.reduce_window(x, -jnp.inf, jax.lax.max,
                                     (1, 2, 2, 1), (1, 2, 2, 1), "VALID")

    x = conv(x, params["w1"], params["b1"], 0)
    x = conv(x, params["w2"], params["b2"], 0)
    x = pool(x)
    x = conv(x, params["w3"], params["b3"], 1)
    x = conv(x, params["w4"], params["b4"], 1)
    x = pool(x)
    x = jnp.transpose(x, (0, 3, 1, 2)).reshape(x.shape[0], -1)
    return x @ params["wl"] + params["bl"]


if __name__ == "__main__":
    root = jax.random.PRNGKey(0)
    kx, kp = jax.random.split(root)
    in_ch, hidden, out_dim = 3, 8, 10
    # Spatial 64x64 is implied by the classifier's hidden*15*15 input features.
    x = jax.random.normal(kx, (2, in_ch, 64, 64), dtype=jnp.float32)  # NCHW like PyTorch
    params = init_params(kp, in_ch, hidden, out_dim)
    prep = prepare_params(params)            # one-time weight-only preprocessing

    fwd = jax.jit(tiny_vgg_forward)
    y = fwd(x, prep)
    jax.block_until_ready(y)
    assert y.shape == (2, out_dim) and y.dtype == jnp.float32

    y_ref = _ref_forward(x, params)
    assert bool(jnp.allclose(y, y_ref, atol=2e-3, rtol=2e-3)), "mismatch vs reference"
    print("KERNEL_OK")
</pallas_src>

<mosaic_0001>
module attributes {stable_mosaic.version = 11 : i64} {
  func.func @_tiny_vgg_kernel(%arg0: i32, %arg1: memref<1x64x192xf32, #tpu.memory_space<vmem>>, %arg2: memref<3x192x496xf32, #tpu.memory_space<vmem>>, %arg3: memref<1x496xf32, #tpu.memory_space<vmem>>, %arg4: memref<3x496x480xf32, #tpu.memory_space<vmem>>, %arg5: memref<1x480xf32, #tpu.memory_space<vmem>>, %arg6: memref<32x59xf32, #tpu.memory_space<vmem>>, %arg7: memref<472x256xf32, #tpu.memory_space<vmem>>, %arg8: memref<3x256x256xf32, #tpu.memory_space<vmem>>, %arg9: memref<1x256xf32, #tpu.memory_space<vmem>>, %arg10: memref<32x30xf32, #tpu.memory_space<vmem>>, %arg11: memref<3x256x240xf32, #tpu.memory_space<vmem>>, %arg12: memref<1x240xf32, #tpu.memory_space<vmem>>, %arg13: memref<15x29xf32, #tpu.memory_space<vmem>>, %arg14: memref<232x120xf32, #tpu.memory_space<vmem>>, %arg15: memref<15x120x10xf32, #tpu.memory_space<vmem>>, %arg16: memref<1x10xf32, #tpu.memory_space<vmem>>, %arg17: memref<1x1x10xf32, #tpu.memory_space<vmem>>) attributes {dimension_semantics = [#tpu.dimension_semantics<parallel>], iteration_bounds = array<i64: 2>, scalar_prefetch = 0 : i64, scratch_operands = 0 : i64, tpu.core_type = #tpu.core_type<tc>, window_params = [{transform_indices = @transform_0, window_bounds = array<i64: 1, 64, 192>}, {pipeline_mode = #tpu.pipeline_mode<synchronous>, transform_indices = @transform_1, window_bounds = array<i64: 3, 192, 496>}, {pipeline_mode = #tpu.pipeline_mode<synchronous>, transform_indices = @transform_2, window_bounds = array<i64: 1, 496>}, {pipeline_mode = #tpu.pipeline_mode<synchronous>, transform_indices = @transform_3, window_bounds = array<i64: 3, 496, 480>}, {pipeline_mode = #tpu.pipeline_mode<synchronous>, transform_indices = @transform_4, window_bounds = array<i64: 1, 480>}, {pipeline_mode = #tpu.pipeline_mode<synchronous>, transform_indices = @transform_5, window_bounds = array<i64: 32, 59>}, {pipeline_mode = #tpu.pipeline_mode<synchronous>, transform_indices = @transform_6, window_bounds = array<i64: 472, 256>}, {pipeline_mode = #tpu.pipeline_mode<synchronous>, transform_indices = @transform_7, window_bounds = array<i64: 3, 256, 256>}, {pipeline_mode = #tpu.pipeline_mode<synchronous>, transform_indices = @transform_8, window_bounds = array<i64: 1, 256>}, {pipeline_mode = #tpu.pipeline_mode<synchronous>, transform_indices = @transform_9, window_bounds = array<i64: 32, 30>}, {pipeline_mode = #tpu.pipeline_mode<synchronous>, transform_indices = @transform_10, window_bounds = array<i64: 3, 256, 240>}, {pipeline_mode = #tpu.pipeline_mode<synchronous>, transform_indices = @transform_11, window_bounds = array<i64: 1, 240>}, {pipeline_mode = #tpu.pipeline_mode<synchronous>, transform_indices = @transform_12, window_bounds = array<i64: 15, 29>}, {pipeline_mode = #tpu.pipeline_mode<synchronous>, transform_indices = @transform_13, window_bounds = array<i64: 232, 120>}, {pipeline_mode = #tpu.pipeline_mode<synchronous>, transform_indices = @transform_14, window_bounds = array<i64: 15, 120, 10>}, {pipeline_mode = #tpu.pipeline_mode<synchronous>, transform_indices = @transform_15, window_bounds = array<i64: 1, 10>}, {transform_indices = @transform_16, window_bounds = array<i64: 1, 1, 10>}]} {
    %c0 = arith.constant 0 : index
    %c0_0 = arith.constant 0 : index
    %c0_1 = arith.constant 0 : index
    %0 = vector.load %arg1[%c0, %c0_0, %c0_1] : memref<1x64x192xf32, #tpu.memory_space<vmem>>, vector<1x64x192xf32>
    %1 = vector.shape_cast %0 : vector<1x64x192xf32> to vector<64x192xf32>
    %2 = vector.extract_strided_slice %1 {offsets = [0, 0], sizes = [62, 192], strides = [1, 1]} : vector<64x192xf32> to vector<62x192xf32>
    %c0_2 = arith.constant 0 : index
    %c0_3 = arith.constant 0 : index
    %c0_4 = arith.constant 0 : index
    %3 = vector.load %arg2[%c0_2, %c0_3, %c0_4] : memref<3x192x496xf32, #tpu.memory_space<vmem>>, vector<1x192x496xf32>
    %4 = vector.shape_cast %3 : vector<1x192x496xf32> to vector<192x496xf32>
    %cst = arith.constant dense<0.000000e+00> : vector<62x496xf32>
    %5 = tpu.matmul %2, %4, %cst {dimension_numbers = #tpu.dot_dimension_numbers<[1], [0], [0], [1], [0, 0, 1, 1], [], []>} : vector<62x192xf32>, vector<192x496xf32>, vector<62x496xf32> -> vector<62x496xf32>
    %6 = vector.extract_strided_slice %1 {offsets = [1, 0], sizes = [62, 192], strides = [1, 1]} : vector<64x192xf32> to vector<62x192xf32>
    %c1 = arith.constant 1 : index
    %c0_5 = arith.constant 0 : index
    %c0_6 = arith.constant 0 : index
    %7 = vector.load %arg2[%c1, %c0_5, %c0_6] : memref<3x192x496xf32, #tpu.memory_space<vmem>>, vector<1x192x496xf32>
    %8 = vector.shape_cast %7 : vector<1x192x496xf32> to vector<192x496xf32>
    %cst_7 = arith.constant dense<0.000000e+00> : vector<62x496xf32>
    %9 = tpu.matmul %6, %8, %cst_7 {dimension_numbers = #tpu.dot_dimension_numbers<[1], [0], [0], [1], [0, 0, 1, 1], [], []>} : vector<62x192xf32>, vector<192x496xf32>, vector<62x496xf32> -> vector<62x496xf32>
    %10 = arith.addf %5, %9 : vector<62x496xf32>
    %11 = vector.extract_strided_slice %1 {offsets = [2, 0], sizes = [62, 192], strides = [1, 1]} : vector<64x192xf32> to vector<62x192xf32>
    %c2 = arith.constant 2 : index
    %c0_8 = arith.constant 0 : index
    %c0_9 = arith.constant 0 : index
    %12 = vector.load %arg2[%c2, %c0_8, %c0_9] : memref<3x192x496xf32, #tpu.memory_space<vmem>>, vector<1x192x496xf32>
    %13 = vector.shape_cast %12 : vector<1x192x496xf32> to vector<192x496xf32>
    %cst_10 = arith.constant dense<0.000000e+00> : vector<62x496xf32>
    %14 = tpu.matmul %11, %13, %cst_10 {dimension_numbers = #tpu.dot_dimension_numbers<[1], [0], [0], [1], [0, 0, 1, 1], [], []>} : vector<62x192xf32>, vector<192x496xf32>, vector<62x496xf32> -> vector<62x496xf32>
    %15 = arith.addf %10, %14 : vector<62x496xf32>
    %c0_11 = arith.constant 0 : index
    %c0_12 = arith.constant 0 : index
    %16 = vector.load %arg3[%c0_11, %c0_12] : memref<1x496xf32, #tpu.memory_space<vmem>>, vector<1x496xf32>
    %17 = vector.broadcast %16 : vector<1x496xf32> to vector<62x496xf32>
    %18 = arith.addf %15, %17 : vector<62x496xf32>
    %cst_13 = arith.constant 0.000000e+00 : f32
    %19 = vector.broadcast %cst_13 : f32 to vector<62x496xf32>
    %20 = arith.maximumf %18, %19 : vector<62x496xf32>
    %21 = vector.extract_strided_slice %20 {offsets = [0, 0], sizes = [60, 496], strides = [1, 1]} : vector<62x496xf32> to vector<60x496xf32>
    %c0_14 = arith.constant 0 : index
    %c0_15 = arith.constant 0 : index
    %c0_16 = arith.constant 0 : index
    %22 = vector.load %arg4[%c0_14, %c0_15, %c0_16] : memref<3x496x480xf32, #tpu.memory_space<vmem>>, vector<1x496x480xf32>
    %23 = vector.shape_cast %22 : vector<1x496x480xf32> to vector<496x480xf32>
    %cst_17 = arith.constant dense<0.000000e+00> : vector<60x480xf32>
    %24 = tpu.matmul %21, %23, %cst_17 {dimension_numbers = #tpu.dot_dimension_numbers<[1], [0], [0], [1], [0, 0, 1, 1], [], []>} : vector<60x496xf32>, vector<496x480xf32>, vector<60x480xf32> -> vector<60x480xf32>
    %25 = vector.extract_strided_slice %20 {offsets = [1, 0], sizes = [60, 496], strides = [1, 1]} : vector<62x496xf32> to vector<60x496xf32>
    %c1_18 = arith.constant 1 : index
    %c0_19 = arith.constant 0 : index
    %c0_20 = arith.constant 0 : index
    %26 = vector.load %arg4[%c1_18, %c0_19, %c0_20] : memref<3x496x480xf32, #tpu.memory_space<vmem>>, vector<1x496x480xf32>
    %27 = vector.shape_cast %26 : vector<1x496x480xf32> to vector<496x480xf32>
    %cst_21 = arith.constant dense<0.000000e+00> : vector<60x480xf32>
    %28 = tpu.matmul %25, %27, %cst_21 {dimension_numbers = #tpu.dot_dimension_numbers<[1], [0], [0], [1], [0, 0, 1, 1], [], []>} : vector<60x496xf32>, vector<496x480xf32>, vector<60x480xf32> -> vector<60x480xf32>
    %29 = arith.addf %24, %28 : vector<60x480xf32>
    %30 = vector.extract_strided_slice %20 {offsets = [2, 0], sizes = [60, 496], strides = [1, 1]} : vector<62x496xf32> to vector<60x496xf32>
    %c2_22 = arith.constant 2 : index
    %c0_23 = arith.constant 0 : index
    %c0_24 = arith.constant 0 : index
    %31 = vector.load %arg4[%c2_22, %c0_23, %c0_24] : memref<3x496x480xf32, #tpu.memory_space<vmem>>, vector<1x496x480xf32>
    %32 = vector.shape_cast %31 : vector<1x496x480xf32> to vector<496x480xf32>
    %cst_25 = arith.constant dense<0.000000e+00> : vector<60x480xf32>
    %33 = tpu.matmul %30, %32, %cst_25 {dimension_numbers = #tpu.dot_dimension_numbers<[1], [0], [0], [1], [0, 0, 1, 1], [], []>} : vector<60x496xf32>, vector<496x480xf32>, vector<60x480xf32> -> vector<60x480xf32>
    %34 = arith.addf %29, %33 : vector<60x480xf32>
    %c0_26 = arith.constant 0 : index
    %c0_27 = arith.constant 0 : index
    %35 = vector.load %arg5[%c0_26, %c0_27] : memref<1x480xf32, #tpu.memory_space<vmem>>, vector<1x480xf32>
    %36 = vector.broadcast %35 : vector<1x480xf32> to vector<60x480xf32>
    %37 = arith.addf %34, %36 : vector<60x480xf32>
    %cst_28 = arith.constant 0.000000e+00 : f32
    %38 = vector.broadcast %cst_28 : f32 to vector<60x480xf32>
    %39 = arith.maximumf %37, %38 : vector<60x480xf32>
    %40 = vector.extract_strided_slice %39 {offsets = [0, 0], sizes = [59, 480], strides = [1, 1]} : vector<60x480xf32> to vector<59x480xf32>
    %41 = vector.extract_strided_slice %39 {offsets = [1, 0], sizes = [59, 480], strides = [1, 1]} : vector<60x480xf32> to vector<59x480xf32>
    %42 = arith.maximumf %40, %41 : vector<59x480xf32>
    %43 = vector.extract_strided_slice %42 {offsets = [0, 0], sizes = [59, 472], strides = [1, 1]} : vector<59x480xf32> to vector<59x472xf32>
    %44 = vector.extract_strided_slice %42 {offsets = [0, 8], sizes = [59, 472], strides = [1, 1]} : vector<59x480xf32> to vector<59x472xf32>
    %45 = arith.maximumf %43, %44 : vector<59x472xf32>
    %c0_29 = arith.constant 0 : index
    %c0_30 = arith.constant 0 : index
    %46 = vector.load %arg6[%c0_29, %c0_30] : memref<32x59xf32, #tpu.memory_space<vmem>>, vector<32x59xf32>
    %cst_31 = arith.constant dense<0.000000e+00> : vector<32x472xf32>
    %47 = tpu.matmul %46, %45, %cst_31 {dimension_numbers = #tpu.dot_dimension_numbers<[1], [0], [0], [1], [0, 0, 1, 1], [], []>} : vector<32x59xf32>, vector<59x472xf32>, vector<32x472xf32> -> vector<32x472xf32>
    %c0_32 = arith.constant 0 : index
    %c0_33 = arith.constant 0 : index
    %48 = vector.load %arg7[%c0_32, %c0_33] : memref<472x256xf32, #tpu.memory_space<vmem>>, vector<472x256xf32>
    %cst_34 = arith.constant dense<0.000000e+00> : vector<32x256xf32>
    %49 = tpu.matmul %47, %48, %cst_34 {dimension_numbers = #tpu.dot_dimension_numbers<[1], [0], [0], [1], [0, 0, 1, 1], [], []>} : vector<32x472xf32>, vector<472x256xf32>, vector<32x256xf32> -> vector<32x256xf32>
    %50 = vector.extract_strided_slice %49 {offsets = [0, 0], sizes = [30, 256], strides = [1, 1]} : vector<32x256xf32> to vector<30x256xf32>
    %c0_35 = arith.constant 0 : index
    %c0_36 = arith.constant 0 : index
    %c0_37 = arith.constant 0 : index
    %51 = vector.load %arg8[%c0_35, %c0_36, %c0_37] : memref<3x256x256xf32, #tpu.memory_space<vmem>>, vector<1x256x256xf32>
    %52 = vector.shape_cast %51 : vector<1x256x256xf32> to vector<256x256xf32>
    %cst_38 = arith.constant dense<0.000000e+00> : vector<30x256xf32>
    %53 = tpu.matmul %50, %52, %cst_38 {dimension_numbers = #tpu.dot_dimension_numbers<[1], [0], [0], [1], [0, 0, 1, 1], [], []>} : vector<30x256xf32>, vector<256x256xf32>, vector<30x256xf32> -> vector<30x256xf32>
    %54 = vector.extract_strided_slice %49 {offsets = [1, 0], sizes = [30, 256], strides = [1, 1]} : vector<32x256xf32> to vector<30x256xf32>
    %c1_39 = arith.constant 1 : index
    %c0_40 = arith.constant 0 : index
    %c0_41 = arith.constant 0 : index
    %55 = vector.load %arg8[%c1_39, %c0_40, %c0_41] : memref<3x256x256xf32, #tpu.memory_space<vmem>>, vector<1x256x256xf32>
    %56 = vector.shape_cast %55 : vector<1x256x256xf32> to vector<256x256xf32>
    %cst_42 = arith.constant dense<0.000000e+00> : vector<30x256xf32>
    %57 = tpu.matmul %54, %56, %cst_42 {dimension_numbers = #tpu.dot_dimension_numbers<[1], [0], [0], [1], [0, 0, 1, 1], [], []>} : vector<30x256xf32>, vector<256x256xf32>, vector<30x256xf32> -> vector<30x256xf32>
    %58 = arith.addf %53, %57 : vector<30x256xf32>
    %59 = vector.extract_strided_slice %49 {offsets = [2, 0], sizes = [30, 256], strides = [1, 1]} : vector<32x256xf32> to vector<30x256xf32>
    %c2_43 = arith.constant 2 : index
    %c0_44 = arith.constant 0 : index
    %c0_45 = arith.constant 0 : index
    %60 = vector.load %arg8[%c2_43, %c0_44, %c0_45] : memref<3x256x256xf32, #tpu.memory_space<vmem>>, vector<1x256x256xf32>
    %61 = vector.shape_cast %60 : vector<1x256x256xf32> to vector<256x256xf32>
    %cst_46 = arith.constant dense<0.000000e+00> : vector<30x256xf32>
    %62 = tpu.matmul %59, %61, %cst_46 {dimension_numbers = #tpu.dot_dimension_numbers<[1], [0], [0], [1], [0, 0, 1, 1], [], []>} : vector<30x256xf32>, vector<256x256xf32>, vector<30x256xf32> -> vector<30x256xf32>
    %63 = arith.addf %58, %62 : vector<30x256xf32>
    %c0_47 = arith.constant 0 : index
    %c0_48 = arith.constant 0 : index
    %64 = vector.load %arg9[%c0_47, %c0_48] : memref<1x256xf32, #tpu.memory_space<vmem>>, vector<1x256xf32>
    %65 = vector.broadcast %64 : vector<1x256xf32> to vector<30x256xf32>
    %66 = arith.addf %63, %65 : vector<30x256xf32>
    %cst_49 = arith.constant 0.000000e+00 : f32
    %67 = vector.broadcast %cst_49 : f32 to vector<30x256xf32>
    %68 = arith.maximumf %66, %67 : vector<30x256xf32>
    %c0_50 = arith.constant 0 : index
    %c0_51 = arith.constant 0 : index
    %69 = vector.load %arg10[%c0_50, %c0_51] : memref<32x30xf32, #tpu.memory_space<vmem>>, vector<32x30xf32>
    %cst_52 = arith.constant dense<0.000000e+00> : vector<32x256xf32>
    %70 = tpu.matmul %69, %68, %cst_52 {dimension_numbers = #tpu.dot_dimension_numbers<[1], [0], [0], [1], [0, 0, 1, 1], [], []>} : vector<32x30xf32>, vector<30x256xf32>, vector<32x256xf32> -> vector<32x256xf32>
    %71 = vector.extract_strided_slice %70 {offsets = [0, 0], sizes = [30, 256], strides = [1, 1]} : vector<32x256xf32> to vector<30x256xf32>
    %c0_53 = arith.constant 0 : index
    %c0_54 = arith.constant 0 : index
    %c0_55 = arith.constant 0 : index
    %72 = vector.load %arg11[%c0_53, %c0_54, %c0_55] : memref<3x256x240xf32, #tpu.memory_space<vmem>>, vector<1x256x240xf32>
    %73 = vector.shape_cast %72 : vector<1x256x240xf32> to vector<256x240xf32>
    %cst_56 = arith.constant dense<0.000000e+00> : vector<30x240xf32>
    %74 = tpu.matmul %71, %73, %cst_56 {dimension_numbers = #tpu.dot_dimension_numbers<[1], [0], [0], [1], [0, 0, 1, 1], [], []>} : vector<30x256xf32>, vector<256x240xf32>, vector<30x240xf32> -> vector<30x240xf32>
    %75 = vector.extract_strided_slice %70 {offsets = [1, 0], sizes = [30, 256], strides = [1, 1]} : vector<32x256xf32> to vector<30x256xf32>
    %c1_57 = arith.constant 1 : index
    %c0_58 = arith.constant 0 : index
    %c0_59 = arith.constant 0 : index
    %76 = vector.load %arg11[%c1_57, %c0_58, %c0_59] : memref<3x256x240xf32, #tpu.memory_space<vmem>>, vector<1x256x240xf32>
    %77 = vector.shape_cast %76 : vector<1x256x240xf32> to vector<256x240xf32>
    %cst_60 = arith.constant dense<0.000000e+00> : vector<30x240xf32>
    %78 = tpu.matmul %75, %77, %cst_60 {dimension_numbers = #tpu.dot_dimension_numbers<[1], [0], [0], [1], [0, 0, 1, 1], [], []>} : vector<30x256xf32>, vector<256x240xf32>, vector<30x240xf32> -> vector<30x240xf32>
    %79 = arith.addf %74, %78 : vector<30x240xf32>
    %80 = vector.extract_strided_slice %70 {offsets = [2, 0], sizes = [30, 256], strides = [1, 1]} : vector<32x256xf32> to vector<30x256xf32>
    %c2_61 = arith.constant 2 : index
    %c0_62 = arith.constant 0 : index
    %c0_63 = arith.constant 0 : index
    %81 = vector.load %arg11[%c2_61, %c0_62, %c0_63] : memref<3x256x240xf32, #tpu.memory_space<vmem>>, vector<1x256x240xf32>
    %82 = vector.shape_cast %81 : vector<1x256x240xf32> to vector<256x240xf32>
    %cst_64 = arith.constant dense<0.000000e+00> : vector<30x240xf32>
    %83 = tpu.matmul %80, %82, %cst_64 {dimension_numbers = #tpu.dot_dimension_numbers<[1], [0], [0], [1], [0, 0, 1, 1], [], []>} : vector<30x256xf32>, vector<256x240xf32>, vector<30x240xf32> -> vector<30x240xf32>
    %84 = arith.addf %79, %83 : vector<30x240xf32>
    %c0_65 = arith.constant 0 : index
    %c0_66 = arith.constant 0 : index
    %85 = vector.load %arg12[%c0_65, %c0_66] : memref<1x240xf32, #tpu.memory_space<vmem>>, vector<1x240xf32>
    %86 = vector.broadcast %85 : vector<1x240xf32> to vector<30x240xf32>
    %87 = arith.addf %84, %86 : vector<30x240xf32>
    %cst_67 = arith.constant 0.000000e+00 : f32
    %88 = vector.broadcast %cst_67 : f32 to vector<30x240xf32>
    %89 = arith.maximumf %87, %88 : vector<30x240xf32>
    %90 = vector.extract_strided_slice %89 {offsets = [0, 0], sizes = [29, 240], strides = [1, 1]} : vector<30x240xf32> to vector<29x240xf32>
    %91 = vector.extract_strided_slice %89 {offsets = [1, 0], sizes = [29, 240], strides = [1, 1]} : vector<30x240xf32> to vector<29x240xf32>
    %92 = arith.maximumf %90, %91 : vector<29x240xf32>
    %93 = vector.extract_strided_slice %92 {offsets = [0, 0], sizes = [29, 232], strides = [1, 1]} : vector<29x240xf32> to vector<29x232xf32>
    %94 = vector.extract_strided_slice %92 {offsets = [0, 8], sizes = [29, 232], strides = [1, 1]} : vector<29x240xf32> to vector<29x232xf32>
    %95 = arith.maximumf %93, %94 : vector<29x232xf32>
    %c0_68 = arith.constant 0 : index
    %c0_69 = arith.constant 0 : index
    %96 = vector.load %arg13[%c0_68, %c0_69] : memref<15x29xf32, #tpu.memory_space<vmem>>, vector<15x29xf32>
    %cst_70 = arith.constant dense<0.000000e+00> : vector<15x232xf32>
    %97 = tpu.matmul %96, %95, %cst_70 {dimension_numbers = #tpu.dot_dimension_numbers<[1], [0], [0], [1], [0, 0, 1, 1], [], []>} : vector<15x29xf32>, vector<29x232xf32>, vector<15x232xf32> -> vector<15x232xf32>
    %c0_71 = arith.constant 0 : index
    %c0_72 = arith.constant 0 : index
    %98 = vector.load %arg14[%c0_71, %c0_72] : memref<232x120xf32, #tpu.memory_space<vmem>>, vector<232x120xf32>
    %cst_73 = arith.constant dense<0.000000e+00> : vector<15x120xf32>
    %99 = tpu.matmul %97, %98, %cst_73 {dimension_numbers = #tpu.dot_dimension_numbers<[1], [0], [0], [1], [0, 0, 1, 1], [], []>} : vector<15x232xf32>, vector<232x120xf32>, vector<15x120xf32> -> vector<15x120xf32>
    %c0_74 = arith.constant 0 : index
    %c0_75 = arith.constant 0 : index
    %100 = vector.load %arg16[%c0_74, %c0_75] : memref<1x10xf32, #tpu.memory_space<vmem>>, vector<1x10xf32>
    %101 = vector.extract_strided_slice %99 {offsets = [0, 0], sizes = [1, 120], strides = [1, 1]} : vector<15x120xf32> to vector<1x120xf32>
    %c0_76 = arith.constant 0 : index
    %c0_77 = arith.constant 0 : index
    %c0_78 = arith.constant 0 : index
    %102 = vector.load %arg15[%c0_76, %c0_77, %c0_78] : memref<15x120x10xf32, #tpu.memory_space<vmem>>, vector<1x120x10xf32>
    %103 = vector.shape_cast %102 : vector<1x120x10xf32> to vector<120x10xf32>
    %cst_79 = arith.constant dense<0.000000e+00> : vector<1x10xf32>
    %104 = tpu.matmul %101, %103, %cst_79 {dimension_numbers = #tpu.dot_dimension_numbers<[1], [0], [0], [1], [0, 0, 1, 1], [], []>} : vector<1x120xf32>, vector<120x10xf32>, vector<1x10xf32> -> vector<1x10xf32>
    %105 = arith.addf %100, %104 : vector<1x10xf32>
    %106 = vector.extract_strided_slice %99 {offsets = [1, 0], sizes = [1, 120], strides = [1, 1]} : vector<15x120xf32> to vector<1x120xf32>
    %c1_80 = arith.constant 1 : index
    %c0_81 = arith.constant 0 : index
    %c0_82 = arith.constant 0 : index
    %107 = vector.load %arg15[%c1_80, %c0_81, %c0_82] : memref<15x120x10xf32, #tpu.memory_space<vmem>>, vector<1x120x10xf32>
    %108 = vector.shape_cast %107 : vector<1x120x10xf32> to vector<120x10xf32>
    %cst_83 = arith.constant dense<0.000000e+00> : vector<1x10xf32>
    %109 = tpu.matmul %106, %108, %cst_83 {dimension_numbers = #tpu.dot_dimension_numbers<[1], [0], [0], [1], [0, 0, 1, 1], [], []>} : vector<1x120xf32>, vector<120x10xf32>, vector<1x10xf32> -> vector<1x10xf32>
    %110 = arith.addf %105, %109 : vector<1x10xf32>
    %111 = vector.extract_strided_slice %99 {offsets = [2, 0], sizes = [1, 120], strides = [1, 1]} : vector<15x120xf32> to vector<1x120xf32>
    %c2_84 = arith.constant 2 : index
    %c0_85 = arith.constant 0 : index
    %c0_86 = arith.constant 0 : index
    %112 = vector.load %arg15[%c2_84, %c0_85, %c0_86] : memref<15x120x10xf32, #tpu.memory_space<vmem>>, vector<1x120x10xf32>
    %113 = vector.shape_cast %112 : vector<1x120x10xf32> to vector<120x10xf32>
    %cst_87 = arith.constant dense<0.000000e+00> : vector<1x10xf32>
    %114 = tpu.matmul %111, %113, %cst_87 {dimension_numbers = #tpu.dot_dimension_numbers<[1], [0], [0], [1], [0, 0, 1, 1], [], []>} : vector<1x120xf32>, vector<120x10xf32>, vector<1x10xf32> -> vector<1x10xf32>
    %115 = arith.addf %110, %114 : vector<1x10xf32>
    %116 = vector.extract_strided_slice %99 {offsets = [3, 0], sizes = [1, 120], strides = [1, 1]} : vector<15x120xf32> to vector<1x120xf32>
    %c3 = arith.constant 3 : index
    %c0_88 = arith.constant 0 : index
    %c0_89 = arith.constant 0 : index
    %117 = vector.load %arg15[%c3, %c0_88, %c0_89] : memref<15x120x10xf32, #tpu.memory_space<vmem>>, vector<1x120x10xf32>
    %118 = vector.shape_cast %117 : vector<1x120x10xf32> to vector<120x10xf32>
    %cst_90 = arith.constant dense<0.000000e+00> : vector<1x10xf32>
    %119 = tpu.matmul %116, %118, %cst_90 {dimension_numbers = #tpu.dot_dimension_numbers<[1], [0], [0], [1], [0, 0, 1, 1], [], []>} : vector<1x120xf32>, vector<120x10xf32>, vector<1x10xf32> -> vector<1x10xf32>
    %120 = arith.addf %115, %119 : vector<1x10xf32>
    %121 = vector.extract_strided_slice %99 {offsets = [4, 0], sizes = [1, 120], strides = [1, 1]} : vector<15x120xf32> to vector<1x120xf32>
    %c4 = arith.constant 4 : index
    %c0_91 = arith.constant 0 : index
    %c0_92 = arith.constant 0 : index
    %122 = vector.load %arg15[%c4, %c0_91, %c0_92] : memref<15x120x10xf32, #tpu.memory_space<vmem>>, vector<1x120x10xf32>
    %123 = vector.shape_cast %122 : vector<1x120x10xf32> to vector<120x10xf32>
    %cst_93 = arith.constant dense<0.000000e+00> : vector<1x10xf32>
    %124 = tpu.matmul %121, %123, %cst_93 {dimension_numbers = #tpu.dot_dimension_numbers<[1], [0], [0], [1], [0, 0, 1, 1], [], []>} : vector<1x120xf32>, vector<120x10xf32>, vector<1x10xf32> -> vector<1x10xf32>
    %125 = arith.addf %120, %124 : vector<1x10xf32>
    %126 = vector.extract_strided_slice %99 {offsets = [5, 0], sizes = [1, 120], strides = [1, 1]} : vector<15x120xf32> to vector<1x120xf32>
    %c5 = arith.constant 5 : index
    %c0_94 = arith.constant 0 : index
    %c0_95 = arith.constant 0 : index
    %127 = vector.load %arg15[%c5, %c0_94, %c0_95] : memref<15x120x10xf32, #tpu.memory_space<vmem>>, vector<1x120x10xf32>
    %128 = vector.shape_cast %127 : vector<1x120x10xf32> to vector<120x10xf32>
    %cst_96 = arith.constant dense<0.000000e+00> : vector<1x10xf32>
    %129 = tpu.matmul %126, %128, %cst_96 {dimension_numbers = #tpu.dot_dimension_numbers<[1], [0], [0], [1], [0, 0, 1, 1], [], []>} : vector<1x120xf32>, vector<120x10xf32>, vector<1x10xf32> -> vector<1x10xf32>
    %130 = arith.addf %125, %129 : vector<1x10xf32>
    %131 = vector.extract_strided_slice %99 {offsets = [6, 0], sizes = [1, 120], strides = [1, 1]} : vector<15x120xf32> to vector<1x120xf32>
    %c6 = arith.constant 6 : index
    %c0_97 = arith.constant 0 : index
    %c0_98 = arith.constant 0 : index
    %132 = vector.load %arg15[%c6, %c0_97, %c0_98] : memref<15x120x10xf32, #tpu.memory_space<vmem>>, vector<1x120x10xf32>
    %133 = vector.shape_cast %132 : vector<1x120x10xf32> to vector<120x10xf32>
    %cst_99 = arith.constant dense<0.000000e+00> : vector<1x10xf32>
    %134 = tpu.matmul %131, %133, %cst_99 {dimension_numbers = #tpu.dot_dimension_numbers<[1], [0], [0], [1], [0, 0, 1, 1], [], []>} : vector<1x120xf32>, vector<120x10xf32>, vector<1x10xf32> -> vector<1x10xf32>
    %135 = arith.addf %130, %134 : vector<1x10xf32>
    %136 = vector.extract_strided_slice %99 {offsets = [7, 0], sizes = [1, 120], strides = [1, 1]} : vector<15x120xf32> to vector<1x120xf32>
    %c7 = arith.constant 7 : index
    %c0_100 = arith.constant 0 : index
    %c0_101 = arith.constant 0 : index
    %137 = vector.load %arg15[%c7, %c0_100, %c0_101] : memref<15x120x10xf32, #tpu.memory_space<vmem>>, vector<1x120x10xf32>
    %138 = vector.shape_cast %137 : vector<1x120x10xf32> to vector<120x10xf32>
    %cst_102 = arith.constant dense<0.000000e+00> : vector<1x10xf32>
    %139 = tpu.matmul %136, %138, %cst_102 {dimension_numbers = #tpu.dot_dimension_numbers<[1], [0], [0], [1], [0, 0, 1, 1], [], []>} : vector<1x120xf32>, vector<120x10xf32>, vector<1x10xf32> -> vector<1x10xf32>
    %140 = arith.addf %135, %139 : vector<1x10xf32>
    %141 = vector.extract_strided_slice %99 {offsets = [8, 0], sizes = [1, 120], strides = [1, 1]} : vector<15x120xf32> to vector<1x120xf32>
    %c8 = arith.constant 8 : index
    %c0_103 = arith.constant 0 : index
    %c0_104 = arith.constant 0 : index
    %142 = vector.load %arg15[%c8, %c0_103, %c0_104] : memref<15x120x10xf32, #tpu.memory_space<vmem>>, vector<1x120x10xf32>
    %143 = vector.shape_cast %142 : vector<1x120x10xf32> to vector<120x10xf32>
    %cst_105 = arith.constant dense<0.000000e+00> : vector<1x10xf32>
    %144 = tpu.matmul %141, %143, %cst_105 {dimension_numbers = #tpu.dot_dimension_numbers<[1], [0], [0], [1], [0, 0, 1, 1], [], []>} : vector<1x120xf32>, vector<120x10xf32>, vector<1x10xf32> -> vector<1x10xf32>
    %145 = arith.addf %140, %144 : vector<1x10xf32>
    %146 = vector.extract_strided_slice %99 {offsets = [9, 0], sizes = [1, 120], strides = [1, 1]} : vector<15x120xf32> to vector<1x120xf32>
    %c9 = arith.constant 9 : index
    %c0_106 = arith.constant 0 : index
    %c0_107 = arith.constant 0 : index
    %147 = vector.load %arg15[%c9, %c0_106, %c0_107] : memref<15x120x10xf32, #tpu.memory_space<vmem>>, vector<1x120x10xf32>
    %148 = vector.shape_cast %147 : vector<1x120x10xf32> to vector<120x10xf32>
    %cst_108 = arith.constant dense<0.000000e+00> : vector<1x10xf32>
    %149 = tpu.matmul %146, %148, %cst_108 {dimension_numbers = #tpu.dot_dimension_numbers<[1], [0], [0], [1], [0, 0, 1, 1], [], []>} : vector<1x120xf32>, vector<120x10xf32>, vector<1x10xf32> -> vector<1x10xf32>
    %150 = arith.addf %145, %149 : vector<1x10xf32>
    %151 = vector.extract_strided_slice %99 {offsets = [10, 0], sizes = [1, 120], strides = [1, 1]} : vector<15x120xf32> to vector<1x120xf32>
    %c10 = arith.constant 10 : index
    %c0_109 = arith.constant 0 : index
    %c0_110 = arith.constant 0 : index
    %152 = vector.load %arg15[%c10, %c0_109, %c0_110] : memref<15x120x10xf32, #tpu.memory_space<vmem>>, vector<1x120x10xf32>
    %153 = vector.shape_cast %152 : vector<1x120x10xf32> to vector<120x10xf32>
    %cst_111 = arith.constant dense<0.000000e+00> : vector<1x10xf32>
    %154 = tpu.matmul %151, %153, %cst_111 {dimension_numbers = #tpu.dot_dimension_numbers<[1], [0], [0], [1], [0, 0, 1, 1], [], []>} : vector<1x120xf32>, vector<120x10xf32>, vector<1x10xf32> -> vector<1x10xf32>
    %155 = arith.addf %150, %154 : vector<1x10xf32>
    %156 = vector.extract_strided_slice %99 {offsets = [11, 0], sizes = [1, 120], strides = [1, 1]} : vector<15x120xf32> to vector<1x120xf32>
    %c11 = arith.constant 11 : index
    %c0_112 = arith.constant 0 : index
    %c0_113 = arith.constant 0 : index
    %157 = vector.load %arg15[%c11, %c0_112, %c0_113] : memref<15x120x10xf32, #tpu.memory_space<vmem>>, vector<1x120x10xf32>
    %158 = vector.shape_cast %157 : vector<1x120x10xf32> to vector<120x10xf32>
    %cst_114 = arith.constant dense<0.000000e+00> : vector<1x10xf32>
    %159 = tpu.matmul %156, %158, %cst_114 {dimension_numbers = #tpu.dot_dimension_numbers<[1], [0], [0], [1], [0, 0, 1, 1], [], []>} : vector<1x120xf32>, vector<120x10xf32>, vector<1x10xf32> -> vector<1x10xf32>
    %160 = arith.addf %155, %159 : vector<1x10xf32>
    %161 = vector.extract_strided_slice %99 {offsets = [12, 0], sizes = [1, 120], strides = [1, 1]} : vector<15x120xf32> to vector<1x120xf32>
    %c12 = arith.constant 12 : index
    %c0_115 = arith.constant 0 : index
    %c0_116 = arith.constant 0 : index
    %162 = vector.load %arg15[%c12, %c0_115, %c0_116] : memref<15x120x10xf32, #tpu.memory_space<vmem>>, vector<1x120x10xf32>
    %163 = vector.shape_cast %162 : vector<1x120x10xf32> to vector<120x10xf32>
    %cst_117 = arith.constant dense<0.000000e+00> : vector<1x10xf32>
    %164 = tpu.matmul %161, %163, %cst_117 {dimension_numbers = #tpu.dot_dimension_numbers<[1], [0], [0], [1], [0, 0, 1, 1], [], []>} : vector<1x120xf32>, vector<120x10xf32>, vector<1x10xf32> -> vector<1x10xf32>
    %165 = arith.addf %160, %164 : vector<1x10xf32>
    %166 = vector.extract_strided_slice %99 {offsets = [13, 0], sizes = [1, 120], strides = [1, 1]} : vector<15x120xf32> to vector<1x120xf32>
    %c13 = arith.constant 13 : index
    %c0_118 = arith.constant 0 : index
    %c0_119 = arith.constant 0 : index
    %167 = vector.load %arg15[%c13, %c0_118, %c0_119] : memref<15x120x10xf32, #tpu.memory_space<vmem>>, vector<1x120x10xf32>
    %168 = vector.shape_cast %167 : vector<1x120x10xf32> to vector<120x10xf32>
    %cst_120 = arith.constant dense<0.000000e+00> : vector<1x10xf32>
    %169 = tpu.matmul %166, %168, %cst_120 {dimension_numbers = #tpu.dot_dimension_numbers<[1], [0], [0], [1], [0, 0, 1, 1], [], []>} : vector<1x120xf32>, vector<120x10xf32>, vector<1x10xf32> -> vector<1x10xf32>
    %170 = arith.addf %165, %169 : vector<1x10xf32>
    %171 = vector.extract_strided_slice %99 {offsets = [14, 0], sizes = [1, 120], strides = [1, 1]} : vector<15x120xf32> to vector<1x120xf32>
    %c14 = arith.constant 14 : index
    %c0_121 = arith.constant 0 : index
    %c0_122 = arith.constant 0 : index
    %172 = vector.load %arg15[%c14, %c0_121, %c0_122] : memref<15x120x10xf32, #tpu.memory_space<vmem>>, vector<1x120x10xf32>
    %173 = vector.shape_cast %172 : vector<1x120x10xf32> to vector<120x10xf32>
    %cst_123 = arith.constant dense<0.000000e+00> : vector<1x10xf32>
    %174 = tpu.matmul %171, %173, %cst_123 {dimension_numbers = #tpu.dot_dimension_numbers<[1], [0], [0], [1], [0, 0, 1, 1], [], []>} : vector<1x120xf32>, vector<120x10xf32>, vector<1x10xf32> -> vector<1x10xf32>
    %175 = arith.addf %170, %174 : vector<1x10xf32>
    %c0_124 = arith.constant 0 : index
    %c0_125 = arith.constant 0 : index
    %c0_126 = arith.constant 0 : index
    %176 = vector.load %arg17[%c0_124, %c0_125, %c0_126] : memref<1x1x10xf32, #tpu.memory_space<vmem>>, vector<1x1x10xf32>
    %177 = vector.shape_cast %176 : vector<1x1x10xf32> to vector<1x10xf32>
    %178 = vector.shape_cast %175 : vector<1x10xf32> to vector<1x1x10xf32>
    tpu.vector_store %arg17[%c0_124, %c0_125, %c0_126], %178 {strides = array<i32>} : memref<1x1x10xf32, #tpu.memory_space<vmem>>, vector<1x1x10xf32>,
    return
  }
  func.func @transform_0(%arg0: i32) -> (i32, i32, i32) {
    %c0_i32 = arith.constant 0 : i32
    %c0_i32_0 = arith.constant 0 : i32
    %c0_i32_1 = arith.constant 0 : i32
    return %arg0, %c0_i32, %c0_i32_0 : i32, i32, i32
  }
  func.func @transform_1(%arg0: i32) -> (i32, i32, i32) {
    %c0_i32 = arith.constant 0 : i32
    %c0_i32_0 = arith.constant 0 : i32
    %c0_i32_1 = arith.constant 0 : i32
    %c0_i32_2 = arith.constant 0 : i32
    return %c0_i32, %c0_i32_0, %c0_i32_1 : i32, i32, i32
  }
  func.func @transform_2(%arg0: i32) -> (i32, i32) {
    %c0_i32 = arith.constant 0 : i32
    %c0_i32_0 = arith.constant 0 : i32
    %c0_i32_1 = arith.constant 0 : i32
    return %c0_i32, %c0_i32_0 : i32, i32
  }
  func.func @transform_3(%arg0: i32) -> (i32, i32, i32) {
    %c0_i32 = arith.constant 0 : i32
    %c0_i32_0 = arith.constant 0 : i32
    %c0_i32_1 = arith.constant 0 : i32
    %c0_i32_2 = arith.constant 0 : i32
    return %c0_i32, %c0_i32_0, %c0_i32_1 : i32, i32, i32
  }
  func.func @transform_4(%arg0: i32) -> (i32, i32) {
    %c0_i32 = arith.constant 0 : i32
    %c0_i32_0 = arith.constant 0 : i32
    %c0_i32_1 = arith.constant 0 : i32
    return %c0_i32, %c0_i32_0 : i32, i32
  }
  func.func @transform_5(%arg0: i32) -> (i32, i32) {
    %c0_i32 = arith.constant 0 : i32
    %c0_i32_0 = arith.constant 0 : i32
    %c0_i32_1 = arith.constant 0 : i32
    return %c0_i32, %c0_i32_0 : i32, i32
  }
  func.func @transform_6(%arg0: i32) -> (i32, i32) {
    %c0_i32 = arith.constant 0 : i32
    %c0_i32_0 = arith.constant 0 : i32
    %c0_i32_1 = arith.constant 0 : i32
    return %c0_i32, %c0_i32_0 : i32, i32
  }
  func.func @transform_7(%arg0: i32) -> (i32, i32, i32) {
    %c0_i32 = arith.constant 0 : i32
    %c0_i32_0 = arith.constant 0 : i32
    %c0_i32_1 = arith.constant 0 : i32
    %c0_i32_2 = arith.constant 0 : i32
    return %c0_i32, %c0_i32_0, %c0_i32_1 : i32, i32, i32
  }
  func.func @transform_8(%arg0: i32) -> (i32, i32) {
    %c0_i32 = arith.constant 0 : i32
    %c0_i32_0 = arith.constant 0 : i32
    %c0_i32_1 = arith.constant 0 : i32
    return %c0_i32, %c0_i32_0 : i32, i32
  }
  func.func @transform_9(%arg0: i32) -> (i32, i32) {
    %c0_i32 = arith.constant 0 : i32
    %c0_i32_0 = arith.constant 0 : i32
    %c0_i32_1 = arith.constant 0 : i32
    return %c0_i32, %c0_i32_0 : i32, i32
  }
  func.func @transform_10(%arg0: i32) -> (i32, i32, i32) {
    %c0_i32 = arith.constant 0 : i32
    %c0_i32_0 = arith.constant 0 : i32
    %c0_i32_1 = arith.constant 0 : i32
    %c0_i32_2 = arith.constant 0 : i32
    return %c0_i32, %c0_i32_0, %c0_i32_1 : i32, i32, i32
  }
  func.func @transform_11(%arg0: i32) -> (i32, i32) {
    %c0_i32 = arith.constant 0 : i32
    %c0_i32_0 = arith.constant 0 : i32
    %c0_i32_1 = arith.constant 0 : i32
    return %c0_i32, %c0_i32_0 : i32, i32
  }
  func.func @transform_12(%arg0: i32) -> (i32, i32) {
    %c0_i32 = arith.constant 0 : i32
    %c0_i32_0 = arith.constant 0 : i32
    %c0_i32_1 = arith.constant 0 : i32
    return %c0_i32, %c0_i32_0 : i32, i32
  }
  func.func @transform_13(%arg0: i32) -> (i32, i32) {
    %c0_i32 = arith.constant 0 : i32
    %c0_i32_0 = arith.constant 0 : i32
    %c0_i32_1 = arith.constant 0 : i32
    return %c0_i32, %c0_i32_0 : i32, i32
  }
  func.func @transform_14(%arg0: i32) -> (i32, i32, i32) {
    %c0_i32 = arith.constant 0 : i32
    %c0_i32_0 = arith.constant 0 : i32
    %c0_i32_1 = arith.constant 0 : i32
    %c0_i32_2 = arith.constant 0 : i32
    return %c0_i32, %c0_i32_0, %c0_i32_1 : i32, i32, i32
  }
  func.func @transform_15(%arg0: i32) -> (i32, i32) {
    %c0_i32 = arith.constant 0 : i32
    %c0_i32_0 = arith.constant 0 : i32
    %c0_i32_1 = arith.constant 0 : i32
    return %c0_i32, %c0_i32_0 : i32, i32
  }
  func.func @transform_16(%arg0: i32) -> (i32, i32, i32) {
    %c0_i32 = arith.constant 0 : i32
    %c0_i32_0 = arith.constant 0 : i32
    %c0_i32_1 = arith.constant 0 : i32
    return %arg0, %c0_i32, %c0_i32_0 : i32, i32, i32
  }
}

</mosaic_0001>

<bundles_post_ra>
// kernel: tiny_vgg_forward.1
= control target key start
LH: loop header
LB: loop body
LE: loop exit
PB: predicated region body
PF: predicated region fallthrough
CT: control target
= control target key end

     0   :  { %s19957_s0 = inlined_call_operand.vmem [shape: f32[2,64,192], index: 0, kind: input, shape index: {}]   ;;  %s19958_s1 = inlined_call_operand.vmem [shape: f32[3,192,496], index: 1, kind: input, shape index: {}]   ;;  %s19959_s2 = inlined_call_operand.vmem [shape: f32[1,496], index: 2, kind: input, shape index: {}]   ;;  %s19960_s3 = inlined_call_operand.vmem [shape: f32[3,496,480], index: 3, kind: input, shape index: {}]   ;;  %s19961_s4 = inlined_call_operand.vmem [shape: f32[1,480], index: 4, kind: input, shape index: {}]   ;;  %s19962_s5 = inlined_call_operand.vmem [shape: f32[32,59], index: 5, kind: input, shape index: {}]   ;;  %s19963_s6 = inlined_call_operand.vmem [shape: f32[472,256], index: 6, kind: input, shape index: {}]   ;;  %s19964_s7 = inlined_call_operand.vmem [shape: f32[3,256,256], index: 7, kind: input, shape index: {}]   ;;  %s19965_s8 = inlined_call_operand.vmem [shape: f32[1,256], index: 8, kind: input, shape index: {}]   ;;  %s19966_s9 = inlined_call_operand.vmem [shape: f32[32,30], index: 9, kind: input, shape index: {}]   ;;  %s19967_s10 = inlined_call_operand.vmem [shape: f32[3,256,240], index: 10, kind: input, shape index: {}]   ;;  %s19968_s11 = inlined_call_operand.vmem [shape: f32[1,240], index: 11, kind: input, shape index: {}]   ;;  %s19969_s12 = inlined_call_operand.vmem [shape: f32[15,29], index: 12, kind: input, shape index: {}]   ;;  %s19970_s13 = inlined_call_operand.vmem [shape: f32[232,120], index: 13, kind: input, shape index: {}]   ;;  %s19971_s14 = inlined_call_operand.vmem [shape: f32[15,120,10], index: 14, kind: input, shape index: {}]   ;;  %s19972_s15 = inlined_call_operand.vmem [shape: f32[1,10], index: 15, kind: input, shape index: {}]   ;;  %s19973_s16 = inlined_call_operand.hbm [shape: f32[2,1,10], index: 16, kind: output, shape index: {}]  }
   0x1   :  { %20041 = sst [smem:[#allocation50_spill]] %s19957_s0 }
   0x2   :  { %21 = vsyncpa [#allocation3], 0 }
   0x3   :  { %23 = vsyncpa [#allocation3 + $0x1], 0  ;;  %s12584_s21 = smov 0   ;;  %s12586_s22 = smov 0  }
   0x4   :  { %s12588_s23 = smov 0   ;;  %s12590_s24 = smov 0  }
   0x5 LB: > { %20042 = sst [smem:[#allocation5_spill]] %s12479_s21  ;;  %s12605_s25 = sadd.s32 4294967295, %s12491_s24   ;;  %s12491_s24 = sphi %s12590_s24, %s20144_s24   ;;  %s12487_s23 = sphi %s12588_s23, %s20146_s23   ;;  %s12483_s22 = sphi %s12586_s22, %s20148_s22   ;;  %s12479_s21 = sphi %s12584_s21, %s20147_s21  }
   0x6   : > { %20043 = sst [smem:[#allocation6_spill]] %s12487_s23  ;;  %s8007_s26 = sadd.s32 4294967294, %s12491_s24  }
   0x7   : > { %20044 = sst [smem:[#allocation7_spill]] %s12491_s24  ;;  %s12609_s27 = sadd.s32 1, %s12491_s24  }
   0x8   : > { %20045 = sst [smem:[#allocation8_spill]] %s12609_s27  ;;  %s377_s28 = sadd.s32 1, %s12487_s23 }
   0x9   : > { %s374_s29 = ssub.s32 %s12491_s24, %s12609_s27  ;;  %p387_p0 = scmp.ne.s32.totalorder %s12487_s23, %s12483_s22 }
   0xa   : > { %p375_p1 = scmp.eq.s32.totalorder %s374_s29, 0  ;;  %p388_p2 = scmp.eq.s32.totalorder %s12605_s25, 1 }
   0xb   : > { %p393_p3 = scmp.ne.s32.totalorder %s12483_s22, %s12479_s21  ;;  %p394_p4 = scmp.eq.s32.totalorder %s8007_s26, 1 }
   0xc   : > { %s12620_s30 = scalar_select %p375_p1, %s12487_s23, %s377_s28  }
   0xd   : > { %p12622_p5 = por %p388_p2, %p387_p0  ;;  %p12626_p6 = por %p394_p4, %p393_p3 }
   0xe   : > { %20046 = sst [smem:[#allocation9_spill]] %s12620_s30  ;;  %p8010_p7 = scmp.ge.s32.totalorder %s12491_s24, 1 }
   0xf   : > { %s20048_s17 = scalar_select %p12626_p6, 1, 0 }
  0x10   : > { %p465_p8 = scmp.lt.s32.totalorder %s12491_s24, 3 }
  0x11   : > { %20049 = sst [smem:[#allocation10_spill]] %s20048_s17 }
  0x12   : > { %p466_p9 = pnand %p8010_p7, %p465_p8 }
  0x14   : > { %469 = sbr.rel (%p466_p9) target bundleno = 3915 (0xf4b), region = 84 }
  0x1b   : > { %v8014_v0 = vld [vmem:[%s19958_s1 + $0x308] sm:$0xff]  ;;  %v8016_v2 = vld [vmem:[%s19958_s1 + $0x318] sm:$0xff]  ;;  %v8013_v5 = vld [vmem:[%s19958_s1 + $0x300] sm:$0xff]  ;;  %p514_p10 = scmp.lt.s32.totalorder %s12605_s25, 1  ;;  %s20050_s21 = sld [smem:[#allocation50_spill]]  ;;  %vm744_vm0 = vcmask 1046528  }
  0x1c   : > { %v8018_v1 = vld [vmem:[%s19958_s1 + $0x328] sm:$0xff]  ;;  %v8020_v4 = vld [vmem:[%s19958_s1 + $0x338] sm:$0xff]  ;;  %v8017_v6 = vld [vmem:[%s19958_s1 + $0x320] sm:$0xff]  ;;  %vm783_vm1 = vcmask 523264   ;;  %vm1365_vm2 = vcmask 1045504   ;;  %vm2377_vm3 = vcmask 916480  }
  0x1d   : > { %v10045_v3 = vpack.c.bf16 %v8018_v1, %v8014_v0  ;;  %v10093_v7 = vpack.c.bf16 %v8020_v4, %v8016_v2  ;;  %v10047_v8 = vpack.c.bf16 %v8017_v6, %v8013_v5  ;;  %v8015_v9 = vld [vmem:[%s19958_s1 + $0x310] sm:$0xff]  ;;  %v8022_v11 = vld [vmem:[%s19958_s1 + $0x348] sm:$0xff]  ;;  %v8024_v14 = vld [vmem:[%s19958_s1 + $0x358] sm:$0xff]  ;;  %s12810_s19 = scalar_select %p514_p10, %s12605_s25, 1  ;;  %vm4485_vm4 = vcmask 982016  }
  0x1e   : > { %v8019_v10 = vld [vmem:[%s19958_s1 + $0x330] sm:$0xff]  ;;  %v8026_v13 = vld [vmem:[%s19958_s1 + $0x368] sm:$0xff]  ;;  %v8028_v15 = vld [vmem:[%s19958_s1 + $0x378] sm:$0xff]  ;;  %s12493_s17 = smov 120   ;;  %vm4591_vm5 = vcmask 1042432   ;;  %vm12495_vm6 = vmmov 1  }
  0x1f   : > { %10046 = vmatprep.subr.bf16.mxu0 %v10045_v3  ;;  %v10095_v12 = vpack.c.bf16 %v8019_v10, %v8015_v9  ;;  %10094 = vmatprep.subr.bf16.mxu1 %v10093_v7  ;;  %v10049_v16 = vpack.c.bf16 %v8026_v13, %v8022_v11  ;;  %v10097_v17 = vpack.c.bf16 %v8028_v15, %v8024_v14  ;;  %v8021_v18 = vld [vmem:[%s19958_s1 + $0x340] sm:$0xff]  ;;  %v8023_v20 = vld [vmem:[%s19958_s1 + $0x350] sm:$0xff]  ;;  %v8030_v23 = vld [vmem:[%s19958_s1 + $0x388] sm:$0xff]  ;;  %s9309_s27 = sshll.u32 %s12810_s19, 7  ;;  %vm4578_vm8 = vcmask 482304   ;;  %s512_s30 = sand.u32 1, %s12483_s22  }
  0x20   : > { %10048 = vmatpush1.bf16.msra.mxu0 %v10047_v8  ;;  %v8025_v19 = vld [vmem:[%s19958_s1 + $0x360] sm:$0xff]  ;;  %v8027_v22 = vld [vmem:[%s19958_s1 + $0x370] sm:$0xff]  ;;  %v8034_v24 = vld [vmem:[%s19958_s1 + $0x3a8] sm:$0xff]  ;;  %vm4900_vm9 = vcmask 719872   ;;  %vm5644_vm11 = vcmask 244736   ;;  %vm6392_vm12 = vcmask 1044480  }
  0x21   : > { %10096 = vmatpush1.bf16.msra.mxu1 %v10095_v12  ;;  %v10051_v21 = vpack.c.bf16 %v8025_v19, %v8021_v18  ;;  %10050 = vmatprep.subr.bf16.mxu0 %v10049_v16  ;;  %v10099_v25 = vpack.c.bf16 %v8027_v22, %v8023_v20  ;;  %v10053_v26 = vpack.c.bf16 %v8034_v24, %v8030_v23  ;;  %v8032_v27 = vld [vmem:[%s19958_s1 + $0x398] sm:$0xff]  ;;  %v8029_v29 = vld [vmem:[%s19958_s1 + $0x380] sm:$0xff]  ;;  %v8031_v32 = vld [vmem:[%s19958_s1 + $0x390] sm:$0xff]  ;;  %s12855_s29 = scalar_lea.vmem %s20050_s21, %s9309_s27  ;;  %vm6385_vm14 = vcmask 236544   ;;  %s9306_s21 = sshll.u32 %s12605_s25, 4 }
  0x22   : > { %10098 = vmatprep.subr.bf16.mxu1 %v10097_v17  ;;  %v8036_v28 = vld [vmem:[%s19958_s1 + $0x3b8] sm:$0xff]  ;;  %v8033_v31 = vld [vmem:[%s19958_s1 + $0x3a0] sm:$0xff]  ;;  %v8035_v33 = vld [vmem:[%s19958_s1 + $0x3b0] sm:$0xff]  ;;  %vm6505_vm15 = vcmask 850944   ;;  %s19915_s26 = scalar_lea.hbm %s19973_s16, %s9306_s21  ;;  %s7940_s19 = scalar_lea.sflag [#allocation3], %s512_s30 }
  0x23   : > { %v10101_v30 = vpack.c.bf16 %v8036_v28, %v8032_v27  ;;  %v10055_v34 = vpack.c.bf16 %v8033_v31, %v8029_v29  ;;  %v8038_v35 = vld [vmem:[%s19958_s1 + $0x3c8] sm:$0xff]  ;;  %v8040_v37 = vld [vmem:[%s19958_s1 + $0x3d8] sm:$0xff]  ;;  %v10103_v38 = vpack.c.bf16 %v8035_v33, %v8031_v32  ;;  %v8037_v41 = vld [vmem:[%s19958_s1 + $0x3c0] sm:$0xff]  ;;  %s12498_s25 = smov [#allocation2]  }
  0x24   : > { %10052 = vmatpush1.bf16.msra.mxu0 %v10051_v21  ;;  %v8042_v36 = vld [vmem:[%s19958_s1 + $0x3e8] sm:$0xff]  ;;  %v8044_v40 = vld [vmem:[%s19958_s1 + $0x3f8] sm:$0xff]  ;;  %v8041_v42 = vld [vmem:[%s19958_s1 + $0x3e0] sm:$0xff]  ;;  %s12433_s23 = sshll.u32 %s12498_s25, 4  ;;  %s12434_s23 = int_to_ptr.vmem [resolvable:$false] %s12433_s23 }
  0x25   : > { %10100 = vmatpush1.bf16.msra.mxu1 %v10099_v25  ;;  %10054 = vmatprep.subr.bf16.mxu0 %v10053_v26  ;;  %v10057_v39 = vpack.c.bf16 %v8042_v36, %v8038_v35  ;;  %v10105_v43 = vpack.c.bf16 %v8044_v40, %v8040_v37  ;;  %v8039_v44 = vld [vmem:[%s19958_s1 + $0x3d0] sm:$0xff]  ;;  %v8046_v46 = vld [vmem:[%s19958_s1 + $0x408] sm:$0xff]  ;;  %v8048_v48 = vld [vmem:[%s19958_s1 + $0x418] sm:$0xff]  ;;  %v10059_v50 = vpack.c.bf16 %v8041_v42, %v8037_v41 }
  0x26   : > { %10102 = vmatprep.subr.bf16.mxu1 %v10101_v30  ;;  %v8043_v45 = vld [vmem:[%s19958_s1 + $0x3f0] sm:$0xff]  ;;  %v8050_v47 = vld [vmem:[%s19958_s1 + $0x428] sm:$0xff]  ;;  %v8052_v49 = vld [vmem:[%s19958_s1 + $0x438] sm:$0xff] }
  0x27   : > { %v10107_v51 = vpack.c.bf16 %v8043_v45, %v8039_v44  ;;  %v10061_v52 = vpack.c.bf16 %v8050_v47, %v8046_v46  ;;  %v8045_v53 = vld [vmem:[%s19958_s1 + $0x400] sm:$0xff]  ;;  %v8047_v55 = vld [vmem:[%s19958_s1 + $0x410] sm:$0xff]  ;;  %v10109_v56 = vpack.c.bf16 %v8052_v49, %v8048_v48  ;;  %v8054_v58 = vld [vmem:[%s19958_s1 + $0x448] sm:$0xff] }
  0x28   : > { %10056 = vmatpush1.bf16.msra.mxu0 %v10055_v34  ;;  %v8049_v54 = vld [vmem:[%s19958_s1 + $0x420] sm:$0xff]  ;;  %v8051_v57 = vld [vmem:[%s19958_s1 + $0x430] sm:$0xff]  ;;  %v8058_v59 = vld [vmem:[%s19958_s1 + $0x468] sm:$0xff] }
  0x29   : > { %10104 = vmatpush1.bf16.msra.mxu1 %v10103_v38  ;;  %10058 = vmatprep.subr.bf16.mxu0 %v10057_v39  ;;  %v8056_v60 = vld [vmem:[%s19958_s1 + $0x458] sm:$0xff]  ;;  %v10063_v62 = vpack.c.bf16 %v8049_v54, %v8045_v53  ;;  %v10111_v63 = vpack.c.bf16 %v8051_v57, %v8047_v55  ;;  %v10065_v0 = vpack.c.bf16 %v8058_v59, %v8054_v58  ;;  %v8053_v1 = vld [vmem:[%s19958_s1 + $0x440] sm:$0xff]  ;;  %v8055_v3 = vld [vmem:[%s19958_s1 + $0x450] sm:$0xff] }
  0x2a   : > { %10106 = vmatprep.subr.bf16.mxu1 %v10105_v43  ;;  %v8060_v61 = vld [vmem:[%s19958_s1 + $0x478] sm:$0xff]  ;;  %v8057_v2 = vld [vmem:[%s19958_s1 + $0x460] sm:$0xff]  ;;  %v8059_v5 = vld [vmem:[%s19958_s1 + $0x470] sm:$0xff] }
  0x2b   : > { %v10113_v4 = vpack.c.bf16 %v8060_v61, %v8056_v60  ;;  %v8062_v6 = vld [vmem:[%s19958_s1 + $0x488] sm:$0xff]  ;;  %v8064_v8 = vld [vmem:[%s19958_s1 + $0x498] sm:$0xff]  ;;  %v10067_v10 = vpack.c.bf16 %v8057_v2, %v8053_v1  ;;  %v10115_v11 = vpack.c.bf16 %v8059_v5, %v8055_v3  ;;  %v8061_v13 = vld [vmem:[%s19958_s1 + $0x480] sm:$0xff] }
  0x2c   : > { %10060 = vmatpush1.bf16.msra.mxu0 %v10059_v50  ;;  %v8066_v7 = vld [vmem:[%s19958_s1 + $0x4a8] sm:$0xff]  ;;  %v8068_v9 = vld [vmem:[%s19958_s1 + $0x4b8] sm:$0xff]  ;;  %v8065_v14 = vld [vmem:[%s19958_s1 + $0x4a0] sm:$0xff] }
  0x2d   : > { %10108 = vmatpush1.bf16.msra.mxu1 %v10107_v51  ;;  %10062 = vmatprep.subr.bf16.mxu0 %v10061_v52  ;;  %v10069_v12 = vpack.c.bf16 %v8066_v7, %v8062_v6  ;;  %v8063_v15 = vld [vmem:[%s19958_s1 + $0x490] sm:$0xff]  ;;  %v10117_v16 = vpack.c.bf16 %v8068_v9, %v8064_v8  ;;  %v8070_v18 = vld [vmem:[%s19958_s1 + $0x4c8] sm:$0xff]  ;;  %v8072_v20 = vld [vmem:[%s19958_s1 + $0x4d8] sm:$0xff]  ;;  %v10071_v22 = vpack.c.bf16 %v8065_v14, %v8061_v13 }
  0x2e   : > { %10110 = vmatprep.subr.bf16.mxu1 %v10109_v56  ;;  %v8067_v17 = vld [vmem:[%s19958_s1 + $0x4b0] sm:$0xff]  ;;  %v8074_v19 = vld [vmem:[%s19958_s1 + $0x4e8] sm:$0xff]  ;;  %v8076_v21 = vld [vmem:[%s19958_s1 + $0x4f8] sm:$0xff] }
  0x2f   : > { %v10119_v23 = vpack.c.bf16 %v8067_v17, %v8063_v15  ;;  %v10073_v24 = vpack.c.bf16 %v8074_v19, %v8070_v18  ;;  %v8069_v25 = vld [vmem:[%s19958_s1 + $0x4c0] sm:$0xff]  ;;  %v8071_v27 = vld [vmem:[%s19958_s1 + $0x4d0] sm:$0xff]  ;;  %v10121_v28 = vpack.c.bf16 %v8076_v21, %v8072_v20  ;;  %v8078_v30 = vld [vmem:[%s19958_s1 + $0x508] sm:$0xff] }
  0x30   : > { %10064 = vmatpush1.bf16.msra.mxu0 %v10063_v62  ;;  %v8073_v26 = vld [vmem:[%s19958_s1 + $0x4e0] sm:$0xff]  ;;  %v8075_v29 = vld [vmem:[%s19958_s1 + $0x4f0] sm:$0xff]  ;;  %v8082_v31 = vld [vmem:[%s19958_s1 + $0x528] sm:$0xff] }
  0x31   : > { %10112 = vmatpush1.bf16.msra.mxu1 %v10111_v63  ;;  %10066 = vmatprep.subr.bf16.mxu0 %v10065_v0  ;;  %v8080_v32 = vld [vmem:[%s19958_s1 + $0x518] sm:$0xff]  ;;  %v10075_v34 = vpack.c.bf16 %v8073_v26, %v8069_v25  ;;  %v10123_v35 = vpack.c.bf16 %v8075_v29, %v8071_v27  ;;  %v10077_v36 = vpack.c.bf16 %v8082_v31, %v8078_v30  ;;  %v8077_v37 = vld [vmem:[%s19958_s1 + $0x500] sm:$0xff]  ;;  %v8079_v39 = vld [vmem:[%s19958_s1 + $0x510] sm:$0xff] }
  0x32   : > { %10114 = vmatprep.subr.bf16.mxu1 %v10113_v4  ;;  %v8084_v33 = vld [vmem:[%s19958_s1 + $0x538] sm:$0xff]  ;;  %v8081_v38 = vld [vmem:[%s19958_s1 + $0x520] sm:$0xff]  ;;  %v8083_v41 = vld [vmem:[%s19958_s1 + $0x530] sm:$0xff] }
  0x33   : > { %v10125_v40 = vpack.c.bf16 %v8084_v33, %v8080_v32  ;;  %v8086_v42 = vld [vmem:[%s19958_s1 + $0x548] sm:$0xff]  ;;  %v8088_v44 = vld [vmem:[%s19958_s1 + $0x558] sm:$0xff]  ;;  %v10079_v46 = vpack.c.bf16 %v8081_v38, %v8077_v37  ;;  %v10127_v49 = vpack.c.bf16 %v8083_v41, %v8079_v39  ;;  %v8085_v51 = vld [vmem:[%s19958_s1 + $0x540] sm:$0xff] }
  0x34   : > { %10068 = vmatpush1.bf16.msra.mxu0 %v10067_v10  ;;  %v8090_v43 = vld [vmem:[%s19958_s1 + $0x568] sm:$0xff]  ;;  %v8092_v45 = vld [vmem:[%s19958_s1 + $0x578] sm:$0xff]  ;;  %v8089_v52 = vld [vmem:[%s19958_s1 + $0x560] sm:$0xff] }
  0x35   : > { %10116 = vmatpush1.bf16.msra.mxu1 %v10115_v11  ;;  %10070 = vmatprep.subr.bf16.mxu0 %v10069_v12  ;;  %v12873_v47 = vld [vmem:[%s12855_s29 + $0x8] sm:$0xff]  ;;  %v12876_v48 = vld [vmem:[%s12855_s29 + $0x18] sm:$0xff]  ;;  %v10081_v50 = vpack.c.bf16 %v8090_v43, %v8086_v42  ;;  %v8087_v53 = vld [vmem:[%s19958_s1 + $0x550] sm:$0xff]  ;;  %v10129_v56 = vpack.c.bf16 %v8092_v45, %v8088_v44  ;;  %v10083_v63 = vpack.c.bf16 %v8089_v52, %v8085_v51 }
  0x36   : > { %10118 = vmatprep.subr.bf16.mxu1 %v10117_v16  ;;  %v748_v54 = vrot.slane %v12873_v47, 1  ;;  %v749_v55 = vrot.slane %v12876_v48, 1  ;;  %v8091_v57 = vld [vmem:[%s19958_s1 + $0x570] sm:$0xff]  ;;  %v8094_v58 = vld [vmem:[%s19958_s1 + $0x588] sm:$0xff]  ;;  %v8096_v60 = vld [vmem:[%s19958_s1 + $0x598] sm:$0xff] }
  0x37   : > { %v8098_v59 = vld [vmem:[%s19958_s1 + $0x5a8] sm:$0xff]  ;;  %v8100_v61 = vld [vmem:[%s19958_s1 + $0x5b8] sm:$0xff]  ;;  %v10131_v0 = vpack.c.bf16 %v8091_v57, %v8087_v53  ;;  %v8093_v2 = vld [vmem:[%s19958_s1 + $0x580] sm:$0xff] }
  0x38   : > { %10072 = vmatpush1.bf16.msra.mxu0 %v10071_v22  ;;  %v750_v62 = vsel %vm744_vm0, %v748_v54, %v749_v55  ;;  %v10085_v1 = vpack.c.bf16 %v8098_v59, %v8094_v58  ;;  %v8097_v3 = vld [vmem:[%s19958_s1 + $0x5a0] sm:$0xff]  ;;  %v8095_v4 = vld [vmem:[%s19958_s1 + $0x590] sm:$0xff]  ;;  %v10133_v5 = vpack.c.bf16 %v8100_v61, %v8096_v60  ;;  %v8102_v7 = vld [vmem:[%s19958_s1 + $0x5c8] sm:$0xff] }
  0x39   : > { %10120 = vmatpush1.bf16.msra.mxu1 %v10119_v23  ;;  %10074 = vmatprep.subr.bf16.mxu0 %v10073_v24  ;;  %v8099_v6 = vld [vmem:[%s19958_s1 + $0x5b0] sm:$0xff]  ;;  %v8106_v8 = vld [vmem:[%s19958_s1 + $0x5e8] sm:$0xff]  ;;  %v8104_v9 = vld [vmem:[%s19958_s1 + $0x5d8] sm:$0xff]  ;;  %v10087_v11 = vpack.c.bf16 %v8097_v3, %v8093_v2 }
  0x3a   : > { %10122 = vmatprep.subr.bf16.mxu1 %v10121_v28  ;;  %8109 = vmatprep.mubr.msk.f32.mxu0 %vm783_vm1, %v750_v62  ;;  %v8108_v10 = vld [vmem:[%s19958_s1 + $0x5f8] sm:$0xff]  ;;  %v8101_v12 = vld [vmem:[%s19958_s1 + $0x5c0] sm:$0xff]  ;;  %v10135_v14 = vpack.c.bf16 %v8099_v6, %v8095_v4  ;;  %v10089_v15 = vpack.c.bf16 %v8106_v8, %v8102_v7  ;;  %v8103_v16 = vld [vmem:[%s19958_s1 + $0x5d0] sm:$0xff] }
  0x3b   : > { %8117 = vmatprep.mubr.msk.f32.mxu1 %vm783_vm1, %v750_v62  ;;  %v8105_v13 = vld [vmem:[%s19958_s1 + $0x5e0] sm:$0xff]  ;;  %v12946_v18 = vld [vmem:[%s12855_s29 + $0x10] sm:$0xff]  ;;  %v10137_v19 = vpack.c.bf16 %v8108_v10, %v8104_v9  ;;  %v536_v21 = vld [vmem:[%s19958_s1 + $0x8] sm:$0xff] }
  0x3c   : > { %10076 = vmatpush1.bf16.msra.mxu0 %v10075_v34  ;;  %v12943_v17 = vld [vmem:[%s12855_s29] sm:$0xff]  ;;  %v8107_v20 = vld [vmem:[%s19958_s1 + $0x5f0] sm:$0xff]  ;;  %v540_v22 = vld [vmem:[%s19958_s1 + $0x28] sm:$0xff]  ;;  %v10091_v25 = vpack.c.bf16 %v8105_v13, %v8101_v12  ;;  %v746_v27 = vrot.slane %v12946_v18, 1 }
  0x3d   : > { %10124 = vmatpush1.bf16.msra.mxu1 %v10123_v35  ;;  %10078 = vmatprep.subr.bf16.mxu0 %v10077_v36  ;;  %v538_v23 = vld [vmem:[%s19958_s1 + $0x18] sm:$0xff]  ;;  %v745_v26 = vrot.slane %v12943_v17, 1  ;;  %v535_v28 = vld [vmem:[%s19958_s1] sm:$0xff]  ;;  %v10139_v30 = vpack.c.bf16 %v8107_v20, %v8103_v16  ;;  %v10141_v31 = vpack.c.bf16 %v540_v22, %v536_v21  ;;  %v537_v32 = vld [vmem:[%s19958_s1 + $0x10] sm:$0xff] }
  0x3e   : > { %10126 = vmatprep.subr.bf16.mxu1 %v10125_v40  ;;  %v542_v24 = vld [vmem:[%s19958_s1 + $0x38] sm:$0xff]  ;;  %v539_v29 = vld [vmem:[%s19958_s1 + $0x20] sm:$0xff]  ;;  %v541_v33 = vld [vmem:[%s19958_s1 + $0x30] sm:$0xff] }
  0x3f   : > { %v544_v34 = vld [vmem:[%s19958_s1 + $0x48] sm:$0xff]  ;;  %v10189_v35 = vpack.c.bf16 %v542_v24, %v538_v23  ;;  %v546_v37 = vld [vmem:[%s19958_s1 + $0x58] sm:$0xff]  ;;  %v543_v40 = vld [vmem:[%s19958_s1 + $0x40] sm:$0xff]  ;;  %v747_v43 = vsel %vm744_vm0, %v745_v26, %v746_v27  ;;  %v10143_v44 = vpack.c.bf16 %v539_v29, %v535_v28 }
  0x40   : > { %10080 = vmatpush1.bf16.msra.mxu0 %v10079_v46  ;;  %v548_v36 = vld [vmem:[%s19958_s1 + $0x68] sm:$0xff]  ;;  %v550_v39 = vld [vmem:[%s19958_s1 + $0x78] sm:$0xff]  ;;  %v547_v41 = vld [vmem:[%s19958_s1 + $0x60] sm:$0xff]  ;;  %v10191_v46 = vpack.c.bf16 %v541_v33, %v537_v32 }
  0x41   : > { %10128 = vmatpush1.bf16.msra.mxu1 %v10127_v49  ;;  %10082 = vmatprep.subr.bf16.mxu0 %v10081_v50  ;;  %v12987_v38 = vld [vmem:[%s12855_s29 + $0x28] sm:$0xff]  ;;  %v13001_v45 = vld [vmem:[%s12855_s29 + $0x20] sm:$0xff]  ;;  %v10145_v49 = vpack.c.bf16 %v548_v36, %v544_v34  ;;  %v545_v50 = vld [vmem:[%s19958_s1 + $0x50] sm:$0xff]  ;;  %v10193_v53 = vpack.c.bf16 %v550_v39, %v546_v37  ;;  %v10147_v54 = vpack.c.bf16 %v547_v41, %v543_v40 }
  0x42   : > { %10130 = vmatprep.subr.bf16.mxu1 %v10129_v56  ;;  %v753_v42 = vrot.slane %v12987_v38, 1  ;;  %v549_v51 = vld [vmem:[%s19958_s1 + $0x70] sm:$0xff]  ;;  %v751_v52 = vrot.slane %v13001_v45, 1  ;;  %v552_v56 = vld [vmem:[%s19958_s1 + $0x88] sm:$0xff]  ;;  %v13017_v58 = vld [vmem:[%s12855_s29 + $0x38] sm:$0xff] }
  0x43   : > { %v556_v57 = vld [vmem:[%s19958_s1 + $0xa8] sm:$0xff]  ;;  %v554_v59 = vld [vmem:[%s19958_s1 + $0x98] sm:$0xff]  ;;  %v757_v62 = vrot.slane %v13017_v58, 1  ;;  %v551_v2 = vld [vmem:[%s19958_s1 + $0x80] sm:$0xff]  ;;  %v10195_v6 = vpack.c.bf16 %v549_v51, %v545_v50 }
  0x44   : > { %10084 = vmatpush1.bf16.msra.mxu0 %v10083_v63  ;;  %v558_v60 = vld [vmem:[%s19958_s1 + $0xb8] sm:$0xff]  ;;  %v754_v61 = vsel %vm744_vm0, %v749_v55, %v753_v42  ;;  %v13030_v63 = vld [vmem:[%s12855_s29 + $0x30] sm:$0xff]  ;;  %v752_v3 = vsel %vm744_vm0, %v746_v27, %v751_v52  ;;  %v1372_v55 = vrot.slane %v13001_v45, 2  ;;  %v10149_v7 = vpack.c.bf16 %v556_v57, %v552_v56  ;;  %v555_v8 = vld [vmem:[%s19958_s1 + $0xa0] sm:$0xff] }
  0x45   : > { %10132 = vmatpush1.bf16.msra.mxu1 %v10131_v0  ;;  %10086 = vmatprep.subr.bf16.mxu0 %v10085_v1  ;;  %v1374_v0 = vrot.slane %v12987_v38, 2  ;;  %v1378_v1 = vrot.slane %v13017_v58, 2  ;;  %v755_v4 = vrot.slane %v13030_v63, 1  ;;  %v553_v9 = vld [vmem:[%s19958_s1 + $0x90] sm:$0xff]  ;;  %v13048_v10 = vld [vmem:[%s12855_s29 + $0x48] sm:$0xff]  ;;  %v10197_v12 = vpack.c.bf16 %v558_v60, %v554_v59  ;;  %v566_v20 = vld [vmem:[%s19958_s1 + $0xf8] sm:$0xff] }
  0x46   : > { %10134 = vmatprep.subr.bf16.mxu1 %v10133_v5  ;;  %v1376_v5 = vrot.slane %v13030_v63, 2  ;;  %v557_v13 = vld [vmem:[%s19958_s1 + $0xb0] sm:$0xff]  ;;  %v758_v21 = vsel %vm744_vm0, %v753_v42, %v757_v62  ;;  %v761_v22 = vrot.slane %v13048_v10, 1  ;;  %v13082_v23 = vld [vmem:[%s12855_s29 + $0x40] sm:$0xff]  ;;  %v1382_v24 = vrot.slane %v13048_v10, 2  ;;  %v13091_v29 = vld [vmem:[%s12855_s29 + $0x58] sm:$0xff] }
  0x47   : > { %v559_v26 = vld [vmem:[%s19958_s1 + $0xc0] sm:$0xff]  ;;  %v756_v27 = vsel %vm744_vm0, %v751_v52, %v755_v4  ;;  %v759_v28 = vrot.slane %v13082_v23, 1  ;;  %v561_v34 = vld [vmem:[%s19958_s1 + $0xd0] sm:$0xff]  ;;  %v1386_v37 = vrot.slane %v13091_v29, 2  ;;  %v568_v40 = vld [vmem:[%s19958_s1 + $0x108] sm:$0xff]  ;;  %v765_v50 = vrot.slane %v13091_v29, 1 }
  0x48   : > { %10088 = vmatpush1.bf16.msra.mxu0 %v10087_v11  ;;  %v13053_v11 = vsel %vm1365_vm2, %v1374_v0, %v1378_v1  ;;  %v13068_v16 = vsel %vm1365_vm2, %v1372_v55, %v1376_v5  ;;  %v563_v33 = vld [vmem:[%s19958_s1 + $0xe0] sm:$0xff]  ;;  %v13104_v36 = vsel %vm1365_vm2, %v1378_v1, %v1382_v24  ;;  %v572_v41 = vld [vmem:[%s19958_s1 + $0x128] sm:$0xff]  ;;  %v13115_v42 = vld [vmem:[%s12855_s29 + $0x50] sm:$0xff] }
  0x49   : > { %10136 = vmatpush1.bf16.msra.mxu1 %v10135_v14  ;;  %10090 = vmatprep.subr.bf16.mxu0 %v10089_v15  ;;  %v560_v14 = vld [vmem:[%s19958_s1 + $0xc8] sm:$0xff]  ;;  %v13134_v51 = vsel %vm1365_vm2, %v1382_v24, %v1386_v37  ;;  %v10155_v52 = vpack.c.bf16 %v563_v33, %v559_v26  ;;  %v763_v56 = vrot.slane %v13115_v42, 1  ;;  %v1384_v59 = vrot.slane %v13115_v42, 2  ;;  %v569_v1 = vld [vmem:[%s19958_s1 + $0x110] sm:$0xff]  ;;  %v13189_v26 = vld [vmem:[%s12855_s29 + $0x78] sm:$0xff] }
  0x4a   : > { %10138 = vmatprep.subr.bf16.mxu1 %v10137_v19  ;;  %v564_v15 = vld [vmem:[%s19958_s1 + $0xe8] sm:$0xff]  ;;  %v562_v19 = vld [vmem:[%s19958_s1 + $0xd8] sm:$0xff]  ;;  %v13204_v33 = vrot.slane %v13189_v26, 2  ;;  %vm17133_vm7 = vmpackc.low %vm4591_vm5, %vm12495_vm6 }
  0x4b   : > { %v10153_v32 = vpack.c.bf16 %v564_v15, %v560_v14  ;;  %v10201_v39 = vpack.c.bf16 %v566_v20, %v562_v19  ;;  %v13142_v57 = vld [vmem:[%s12855_s29 + $0x68] sm:$0xff]  ;;  %v766_v14 = vsel %vm744_vm0, %v761_v22, %v765_v50  ;;  %v764_v24 = vsel %vm744_vm0, %v759_v28, %v763_v56  ;;  %vm11426_vm10 = vmpackc.low %vm1365_vm2, %vm12495_vm6 }
  0x4c   : > { %10092 = vmatpush1.bf16.msra.mxu0 %v10091_v25  ;;  %v10151_v25 = vpack.c.bf16 %v555_v8, %v551_v2  ;;  %v13152_v2 = vld [vmem:[%s12855_s29 + $0x60] sm:$0xff]  ;;  %v769_v15 = vrot.slane %v13142_v57, 1  ;;  %vm11628_vm13 = vmpackc.low %vm6392_vm12, %vm12495_vm6 }
  0x4d   : > { %10140 = vmatpush1.bf16.msra.mxu1 %v10139_v30  ;;  %10142 = vmatprep.subr.bf16.mxu0 %v10141_v31  ;;  %v1380_v30 = vrot.slane %v13082_v23, 2  ;;  %v10199_v31 = vpack.c.bf16 %v557_v13, %v553_v9  ;;  %v1388_v9 = vrot.slane %v13152_v2, 2  ;;  %v582_v13 = vld [vmem:[%s19958_s1 + $0x178] sm:$0xff] }
  0x4e   : > { %10190 = vmatprep.subr.bf16.mxu1 %v10189_v35  ;;  %v565_v35 = vld [vmem:[%s19958_s1 + $0xf0] sm:$0xff] }
  0x4f   : > { %865 = vmatmul.mubr.f32.vlgmr.msra.gmra.mrb[0].mxu0 %v747_v43  ;;  %v10203_v60 = vpack.c.bf16 %v565_v35, %v561_v34  ;;  %v13166_v8 = vsel %vm1365_vm2, %v1380_v30, %v1384_v59  ;;  %v581_v35 = vld [vmem:[%s19958_s1 + $0x170] sm:$0xff] }
  0x50   : > { %978 = vmatmul.mubr.f32.vlgmr.msra.gmra.mrb[0].mxu1 %v747_v43  ;;  %10144 = vmatpush1.bf16.msra.mxu0 %v10143_v44  ;;  %v13118_v43 = vsel %vm1365_vm2, %v1376_v5, %v1380_v30  ;;  %v570_v44 = vld [vmem:[%s19958_s1 + $0x118] sm:$0xff]  ;;  %v573_v5 = vld [vmem:[%s19958_s1 + $0x130] sm:$0xff] }
  0x51   : > { %10192 = vmatpush1.bf16.msra.mxu1 %v10191_v46  ;;  %10146 = vmatprep.subr.bf16.mxu0 %v10145_v49  ;;  %v574_v46 = vld [vmem:[%s19958_s1 + $0x138] sm:$0xff]  ;;  %v762_v49 = vsel %vm744_vm0, %v757_v62, %v761_v22  ;;  %v571_v62 = vld [vmem:[%s19958_s1 + $0x120] sm:$0xff]  ;;  %v13192_v22 = vsel %vm1365_vm2, %v1384_v59, %v1388_v9 }
  0x52   : > { %10194 = vmatprep.subr.bf16.mxu1 %v10193_v53  ;;  %8110 = vmatprep.mubr.msk.f32.mxu0 %vm783_vm1, %v754_v61  ;;  %v567_v53 = vld [vmem:[%s19958_s1 + $0x100] sm:$0xff] }
  0x53   : > { %8118 = vmatprep.mubr.msk.f32.mxu1 %vm783_vm1, %v754_v61  ;;  %871 = vmatmul.mubr.f32.gmra.mrb[2].mxu0 %v752_v3  ;;  %v10157_v61 = vpack.c.bf16 %v572_v41, %v568_v40  ;;  %v10159_v20 = vpack.c.bf16 %v571_v62, %v567_v53  ;;  %v586_v41 = vld [vmem:[%s19958_s1 + $0x198] sm:$0xff]  ;;  %v587_v62 = vld [vmem:[%s19958_s1 + $0x1a0] sm:$0xff] }
  0x54   : > { %10148 = vmatpush1.bf16.msra.mxu0 %v10147_v54  ;;  %984 = vmatmul.mubr.f32.gmra.mrb[2].mxu1 %v752_v3  ;;  %v760_v54 = vsel %vm744_vm0, %v755_v4, %v759_v28  ;;  %v1390_v3 = vrot.slane %v13142_v57, 2  ;;  %v10205_v4 = vpack.c.bf16 %v574_v46, %v570_v44  ;;  %v13201_v28 = vld [vmem:[%s12855_s29 + $0x70] sm:$0xff]  ;;  %v590_v44 = vld [vmem:[%s19958_s1 + $0x1b8] sm:$0xff]  ;;  %v770_v46 = vsel %vm744_vm0, %v765_v50, %v769_v15  ;;  %v583_v50 = vld [vmem:[%s19958_s1 + $0x180] sm:$0xff] }
  0x55   : > { %10196 = vmatpush1.bf16.msra.mxu1 %v10195_v6  ;;  %10150 = vmatprep.subr.bf16.mxu0 %v10149_v7  ;;  %v576_v6 = vld [vmem:[%s19958_s1 + $0x148] sm:$0xff]  ;;  %v13217_v40 = vrot.slane %v13201_v28, 2  ;;  %v13236_v59 = vrot.slane %v13201_v28, 1 }
  0x56   : > { %10198 = vmatprep.subr.bf16.mxu1 %v10197_v12  ;;  %8111 = vmatprep.mubr.msk.f32.mxu0 %vm783_vm1, %v758_v21  ;;  %v580_v7 = vld [vmem:[%s19958_s1 + $0x168] sm:$0xff]  ;;  %v578_v12 = vld [vmem:[%s19958_s1 + $0x158] sm:$0xff]  ;;  %v13181_v19 = vsel %vm1365_vm2, %v1386_v37, %v1390_v3 }
  0x57   : > { %8119 = vmatprep.mubr.msk.f32.mxu1 %vm783_vm1, %v758_v21  ;;  %877 = vmatmul.mubr.f32.gmra.mrb[4].mxu0 %v756_v27  ;;  %v575_v21 = vld [vmem:[%s19958_s1 + $0x140] sm:$0xff]  ;;  %v10161_v30 = vpack.c.bf16 %v580_v7, %v576_v6  ;;  %v10209_v34 = vpack.c.bf16 %v582_v13, %v578_v12  ;;  %v584_v37 = vld [vmem:[%s19958_s1 + $0x188] sm:$0xff]  ;;  %v594_v7 = vld [vmem:[%s19958_s1 + $0x1d8] sm:$0xff]  ;;  %v10167_v13 = vpack.c.bf16 %v587_v62, %v583_v50 }
  0x58   : > { %10152 = vmatpush1.bf16.msra.mxu0 %v10151_v25  ;;  %990 = vmatmul.mubr.f32.gmra.mrb[4].mxu1 %v756_v27  ;;  %v767_v25 = vrot.slane %v13152_v2, 1  ;;  %v10207_v27 = vpack.c.bf16 %v573_v5, %v569_v1  ;;  %v585_v1 = vld [vmem:[%s19958_s1 + $0x190] sm:$0xff]  ;;  %v592_v5 = vld [vmem:[%s19958_s1 + $0x1c8] sm:$0xff]  ;;  %v610_v62 = vld [vmem:[%s19958_s1 + $0x258] sm:$0xff] }
  0x59   : > { %10200 = vmatpush1.bf16.msra.mxu1 %v10199_v31  ;;  %10154 = vmatprep.subr.bf16.mxu0 %v10153_v32  ;;  %v579_v31 = vld [vmem:[%s19958_s1 + $0x160] sm:$0xff]  ;;  %v577_v32 = vld [vmem:[%s19958_s1 + $0x150] sm:$0xff]  ;;  %v596_v6 = vld [vmem:[%s19958_s1 + $0x1e8] sm:$0xff] }
  0x5a   : > { %10202 = vmatprep.subr.bf16.mxu1 %v10201_v39  ;;  %8112 = vmatprep.mubr.msk.f32.mxu0 %vm783_vm1, %v762_v49  ;;  %v588_v39 = vld [vmem:[%s19958_s1 + $0x1a8] sm:$0xff]  ;;  %v10163_v53 = vpack.c.bf16 %v579_v31, %v575_v21  ;;  %v10169_v21 = vpack.c.bf16 %v596_v6, %v592_v5  ;;  %v607_v6 = vld [vmem:[%s19958_s1 + $0x240] sm:$0xff] }
  0x5b   : > { %8120 = vmatprep.mubr.msk.f32.mxu1 %vm783_vm1, %v762_v49  ;;  %883 = vmatmul.mubr.f32.gmra.mrb[6].mxu0 %v760_v54  ;;  %v13228_v49 = vrot.slane %v13189_v26, 1  ;;  %v600_v31 = vld [vmem:[%s19958_s1 + $0x208] sm:$0xff] }
  0x5c   : > { %10156 = vmatpush1.bf16.msra.mxu0 %v10155_v52  ;;  %996 = vmatmul.mubr.f32.gmra.mrb[6].mxu1 %v760_v54  ;;  %v13232_v52 = vsel %vm1365_vm2, %v1390_v3, %v13204_v33  ;;  %v768_v54 = vsel %vm744_vm0, %v763_v56, %v767_v25  ;;  %v13249_v56 = vsel %vm1365_vm2, %v1388_v9, %v13217_v40  ;;  %v598_v9 = vld [vmem:[%s19958_s1 + $0x1f8] sm:$0xff]  ;;  %v612_v50 = vld [vmem:[%s19958_s1 + $0x268] sm:$0xff] }
  0x5d   : > { %10204 = vmatpush1.bf16.msra.mxu1 %v10203_v60  ;;  %10158 = vmatprep.subr.bf16.mxu0 %v10157_v61  ;;  %v10211_v60 = vpack.c.bf16 %v581_v35, %v577_v32  ;;  %v10165_v61 = vpack.c.bf16 %v588_v39, %v584_v37  ;;  %v10213_v3 = vpack.c.bf16 %v590_v44, %v586_v41  ;;  %v604_v32 = vld [vmem:[%s19958_s1 + $0x228] sm:$0xff]  ;;  %v606_v35 = vld [vmem:[%s19958_s1 + $0x238] sm:$0xff]  ;;  %v599_v44 = vld [vmem:[%s19958_s1 + $0x200] sm:$0xff] }
  0x5e   : > { %10206 = vmatprep.subr.bf16.mxu1 %v10205_v4  ;;  %8113 = vmatprep.mubr.msk.f32.mxu0 %vm783_vm1, %v766_v14  ;;  %v589_v4 = vld [vmem:[%s19958_s1 + $0x1b0] sm:$0xff]  ;;  %v774_v12 = vsel %vm744_vm0, %v769_v15, %v13228_v49  ;;  %v10173_v41 = vpack.c.bf16 %v604_v32, %v600_v31 }
  0x5f   : > { %8121 = vmatprep.mubr.msk.f32.mxu1 %vm783_vm1, %v766_v14  ;;  %889 = vmatmul.mubr.f32.gmra.mrb[8].mxu0 %v764_v24  ;;  %v772_v14 = vsel %vm744_vm0, %v767_v25, %v13236_v59  ;;  %v593_v15 = vld [vmem:[%s19958_s1 + $0x1d0] sm:$0xff] }
  0x60   : > { %10160 = vmatpush1.bf16.msra.mxu0 %v10159_v20  ;;  %1002 = vmatmul.mubr.f32.gmra.mrb[8].mxu1 %v764_v24  ;;  %v10215_v20 = vpack.c.bf16 %v589_v4, %v585_v1  ;;  %v591_v24 = vld [vmem:[%s19958_s1 + $0x1c0] sm:$0xff]  ;;  %v597_v25 = vld [vmem:[%s19958_s1 + $0x1f0] sm:$0xff]  ;;  %v614_v1 = vld [vmem:[%s19958_s1 + $0x278] sm:$0xff] }
  0x61   : > { %10208 = vmatpush1.bf16.msra.mxu1 %v10207_v27  ;;  %10162 = vmatprep.subr.bf16.mxu0 %v10161_v30  ;;  %v595_v27 = vld [vmem:[%s19958_s1 + $0x1e0] sm:$0xff]  ;;  %v10217_v30 = vpack.c.bf16 %v598_v9, %v594_v7  ;;  %v10219_v39 = vpack.c.bf16 %v597_v25, %v593_v15  ;;  %v10225_v9 = vpack.c.bf16 %v614_v1, %v610_v62  ;;  %v617_v25 = vld [vmem:[%s19958_s1 + $0x290] sm:$0xff]  ;;  %v8142_v62 = vld [vmem:[%s19958_s1 + $0x608] sm:$0xff] }
  0x62   : > { %10210 = vmatprep.subr.bf16.mxu1 %v10209_v34  ;;  %8114 = vmatprep.mubr.msk.f32.mxu0 %vm783_vm1, %v770_v46  ;;  %v602_v34 = vld [vmem:[%s19958_s1 + $0x218] sm:$0xff]  ;;  %v10171_v37 = vpack.c.bf16 %v595_v27, %v591_v24  ;;  %v611_v7 = vld [vmem:[%s19958_s1 + $0x260] sm:$0xff]  ;;  %v621_v32 = vld [vmem:[%s19958_s1 + $0x2b0] sm:$0xff] }
  0x63   : > { %8122 = vmatprep.mubr.msk.f32.mxu1 %vm783_vm1, %v770_v46  ;;  %895 = vmatmul.mubr.f32.gmra.mrb[10].mxu0 %v768_v54  ;;  %v603_v46 = vld [vmem:[%s19958_s1 + $0x220] sm:$0xff]  ;;  %v8146_v1 = vld [vmem:[%s19958_s1 + $0x628] sm:$0xff] }
  0x64   : > { %10164 = vmatpush1.bf16.msra.mxu0 %v10163_v53  ;;  %1008 = vmatmul.mubr.f32.gmra.mrb[10].mxu1 %v768_v54  ;;  %v601_v53 = vld [vmem:[%s19958_s1 + $0x210] sm:$0xff]  ;;  %v10221_v54 = vpack.c.bf16 %v606_v35, %v602_v34  ;;  %v615_v15 = vld [vmem:[%s19958_s1 + $0x280] sm:$0xff]  ;;  %v624_v34 = vld [vmem:[%s19958_s1 + $0x2c8] sm:$0xff] }
  0x65   : > { %10212 = vmatpush1.bf16.msra.mxu1 %v10211_v60  ;;  %10166 = vmatprep.subr.bf16.mxu0 %v10165_v61  ;;  %v605_v60 = vld [vmem:[%s19958_s1 + $0x230] sm:$0xff]  ;;  %v608_v61 = vld [vmem:[%s19958_s1 + $0x248] sm:$0xff] }
  0x66   : > { %10214 = vmatprep.subr.bf16.mxu1 %v10213_v3  ;;  %8115 = vmatprep.mubr.msk.f32.mxu0 %vm783_vm1, %v774_v12  ;;  %v10175_v3 = vpack.c.bf16 %v603_v46, %v599_v44  ;;  %v10223_v4 = vpack.c.bf16 %v605_v60, %v601_v53  ;;  %v10177_v5 = vpack.c.bf16 %v612_v50, %v608_v61  ;;  %v628_v35 = vld [vmem:[%s19958_s1 + $0x2e8] sm:$0xff]  ;;  %v623_v53 = vld [vmem:[%s19958_s1 + $0x2c0] sm:$0xff]  ;;  %v625_v60 = vld [vmem:[%s19958_s1 + $0x2d0] sm:$0xff] }
  0x67   : > { %8123 = vmatprep.mubr.msk.f32.mxu1 %vm783_vm1, %v774_v12  ;;  %901 = vmatmul.mubr.f32.gmra.mrb[12].mxu0 %v772_v14  ;;  %v616_v12 = vld [vmem:[%s19958_s1 + $0x288] sm:$0xff]  ;;  %v10231_v44 = vpack.c.bf16 %v621_v32, %v617_v25  ;;  %v10185_v46 = vpack.c.bf16 %v628_v35, %v624_v34  ;;  %v629_v50 = vld [vmem:[%s19958_s1 + $0x2f0] sm:$0xff]  ;;  %v8149_v25 = vld [vmem:[%s19958_s1 + $0x640] sm:$0xff] }
  0x68   : > { %10168 = vmatpush1.bf16.msra.mxu0 %v10167_v13  ;;  %1014 = vmatmul.mubr.f32.gmra.mrb[12].mxu1 %v772_v14  ;;  %v620_v13 = vld [vmem:[%s19958_s1 + $0x2a8] sm:$0xff]  ;;  %v618_v14 = vld [vmem:[%s19958_s1 + $0x298] sm:$0xff]  ;;  %v8151_v32 = vld [vmem:[%s19958_s1 + $0x650] sm:$0xff] }
  0x69   : > { %10216 = vmatpush1.bf16.msra.mxu1 %v10215_v20  ;;  %10170 = vmatprep.subr.bf16.mxu0 %v10169_v21  ;;  %v622_v20 = vld [vmem:[%s19958_s1 + $0x2b8] sm:$0xff]  ;;  %v10179_v21 = vpack.c.bf16 %v611_v7, %v607_v6  ;;  %v10181_v27 = vpack.c.bf16 %v620_v13, %v616_v12  ;;  %v10235_v6 = vpack.c.bf16 %v629_v50, %v625_v60  ;;  %v8147_v13 = vld [vmem:[%s19958_s1 + $0x630] sm:$0xff]  ;;  %v8157_v60 = vld [vmem:[%s19958_s1 + $0x680] sm:$0xff] }
  0x6a   : > { %10218 = vmatprep.subr.bf16.mxu1 %v10217_v30  ;;  %8116 = vmatprep.mubr.msk.f32.mxu0 %vm783_vm1, %v13228_v49  ;;  %v619_v30 = vld [vmem:[%s19958_s1 + $0x2a0] sm:$0xff]  ;;  %v10229_v31 = vpack.c.bf16 %v622_v20, %v618_v14  ;;  %v10237_v7 = vpack.c.bf16 %v8146_v1, %v8142_v62  ;;  %v8150_v14 = vld [vmem:[%s19958_s1 + $0x648] sm:$0xff]  ;;  %v8155_v35 = vld [vmem:[%s19958_s1 + $0x670] sm:$0xff] }
  0x6b   : > { %8124 = vmatprep.mubr.msk.f32.mxu1 %vm783_vm1, %v13228_v49  ;;  %907 = vmatmul.mubr.f32.gmra.mrb[14].mxu0 %v13236_v59  ;;  %v609_v49 = vld [vmem:[%s19958_s1 + $0x250] sm:$0xff]  ;;  %v8154_v20 = vld [vmem:[%s19958_s1 + $0x668] sm:$0xff] }
  0x6c   : > { %10172 = vmatpush1.bf16.msra.mxu0 %v10171_v37  ;;  %1020 = vmatmul.mubr.f32.gmra.mrb[14].mxu1 %v13236_v59  ;;  %v613_v59 = vld [vmem:[%s19958_s1 + $0x270] sm:$0xff]  ;;  %v626_v37 = vld [vmem:[%s19958_s1 + $0x2d8] sm:$0xff]  ;;  %v8166_v1 = vld [vmem:[%s19958_s1 + $0x6c8] sm:$0xff] }
  0x6d   : > { %10220 = vmatpush1.bf16.msra.mxu1 %v10219_v39  ;;  %10174 = vmatprep.subr.bf16.mxu0 %v10173_v41  ;;  %v10227_v24 = vpack.c.bf16 %v613_v59, %v609_v49  ;;  %v630_v39 = vld [vmem:[%s19958_s1 + $0x2f8] sm:$0xff]  ;;  %v10183_v41 = vpack.c.bf16 %v619_v30, %v615_v15  ;;  %v8141_v49 = vld [vmem:[%s19958_s1 + $0x600] sm:$0xff]  ;;  %v8143_v59 = vld [vmem:[%s19958_s1 + $0x610] sm:$0xff]  ;;  %v10241_v30 = vpack.c.bf16 %v8154_v20, %v8150_v14 }
  0x6e   : > { %10222 = vmatprep.subr.bf16.mxu1 %v10221_v54  ;;  %8125 = vmatprep.mubr.msk.f32.mxu0 %vm783_vm1, %v12873_v47  ;;  %v627_v54 = vld [vmem:[%s19958_s1 + $0x2e0] sm:$0xff]  ;;  %v10233_v61 = vpack.c.bf16 %v630_v39, %v626_v37  ;;  %v10287_v15 = vpack.c.bf16 %v8147_v13, %v8143_v59  ;;  %v8158_v37 = vld [vmem:[%s19958_s1 + $0x688] sm:$0xff]  ;;  %v8159_v50 = vld [vmem:[%s19958_s1 + $0x690] sm:$0xff] }
  0x6f   : > { %8133 = vmatprep.mubr.msk.f32.mxu1 %vm783_vm1, %v12873_v47  ;;  %v8162_v39 = vld [vmem:[%s19958_s1 + $0x6a8] sm:$0xff]  ;;  %v8163_v62 = vld [vmem:[%s19958_s1 + $0x6b0] sm:$0xff]  ;;  %v8169_v59 = vld [vmem:[%s19958_s1 + $0x6e0] sm:$0xff] }
  0x70   : > { %10176 = vmatpush1.bf16.msra.mxu0 %v10175_v3  ;;  %v8144_v3 = vld [vmem:[%s19958_s1 + $0x618] sm:$0xff]  ;;  %v8174_v14 = vld [vmem:[%s19958_s1 + $0x708] sm:$0xff] }
  0x71   : > { %10224 = vmatpush1.bf16.msra.mxu1 %v10223_v4  ;;  %10178 = vmatprep.subr.bf16.mxu0 %v10177_v5  ;;  %v8148_v4 = vld [vmem:[%s19958_s1 + $0x638] sm:$0xff]  ;;  %v10187_v5 = vpack.c.bf16 %v627_v54, %v623_v53  ;;  %v10291_v53 = vpack.c.bf16 %v8155_v35, %v8151_v32  ;;  %v10245_v54 = vpack.c.bf16 %v8162_v39, %v8158_v37  ;;  %v8178_v20 = vld [vmem:[%s19958_s1 + $0x728] sm:$0xff]  ;;  %v8175_v32 = vld [vmem:[%s19958_s1 + $0x710] sm:$0xff] }
  0x72   : > { %10226 = vmatprep.subr.bf16.mxu1 %v10225_v9  ;;  %v8145_v9 = vld [vmem:[%s19958_s1 + $0x620] sm:$0xff]  ;;  %v10285_v12 = vpack.c.bf16 %v8148_v4, %v8144_v3  ;;  %v8170_v3 = vld [vmem:[%s19958_s1 + $0x6e8] sm:$0xff]  ;;  %v8168_v4 = vld [vmem:[%s19958_s1 + $0x6d8] sm:$0xff] }
  0x73   : > { %v8179_v35 = vld [vmem:[%s19958_s1 + $0x730] sm:$0xff]  ;;  %v8182_v37 = vld [vmem:[%s19958_s1 + $0x748] sm:$0xff] }
  0x74   : > { %10180 = vmatpush1.bf16.msra.mxu0 %v10179_v21  ;;  %v8152_v21 = vld [vmem:[%s19958_s1 + $0x658] sm:$0xff]  ;;  %v8186_v39 = vld [vmem:[%s19958_s1 + $0x768] sm:$0xff] }
  0x75   : > { %10228 = vmatpush1.bf16.msra.mxu1 %v10227_v24  ;;  %10182 = vmatprep.subr.bf16.mxu0 %v10181_v27  ;;  %v8156_v24 = vld [vmem:[%s19958_s1 + $0x678] sm:$0xff]  ;;  %v10239_v27 = vpack.c.bf16 %v8145_v9, %v8141_v49  ;;  %v10249_v49 = vpack.c.bf16 %v8170_v3, %v8166_v1  ;;  %v8165_v9 = vld [vmem:[%s19958_s1 + $0x6c0] sm:$0xff] }
  0x76   : > { %10230 = vmatprep.subr.bf16.mxu1 %v10229_v31  ;;  %v8153_v31 = vld [vmem:[%s19958_s1 + $0x660] sm:$0xff]  ;;  %v10289_v34 = vpack.c.bf16 %v8156_v24, %v8152_v21  ;;  %v8176_v21 = vld [vmem:[%s19958_s1 + $0x718] sm:$0xff] }
  0x77   : > { %v8180_v24 = vld [vmem:[%s19958_s1 + $0x738] sm:$0xff] }
  0x78   : > { %10184 = vmatpush1.bf16.msra.mxu0 %v10183_v41  ;;  %v8160_v41 = vld [vmem:[%s19958_s1 + $0x698] sm:$0xff] }
  0x79   : > { %10232 = vmatpush1.bf16.msra.mxu1 %v10231_v44  ;;  %10186 = vmatprep.subr.bf16.mxu0 %v10185_v46  ;;  %v8164_v44 = vld [vmem:[%s19958_s1 + $0x6b8] sm:$0xff]  ;;  %v10243_v46 = vpack.c.bf16 %v8153_v31, %v8149_v25  ;;  %v8173_v25 = vld [vmem:[%s19958_s1 + $0x700] sm:$0xff] }
  0x7a   : > { %10234 = vmatprep.subr.bf16.mxu1 %v10233_v61  ;;  %v8161_v61 = vld [vmem:[%s19958_s1 + $0x6a0] sm:$0xff]  ;;  %v8192_v1 = vld [vmem:[%s19958_s1 + $0x798] sm:$0xff] }
  0x7b   : > { %v8177_v31 = vld [vmem:[%s19958_s1 + $0x720] sm:$0xff]  ;;  %v8196_v3 = vld [vmem:[%s19958_s1 + $0x7b8] sm:$0xff] }
  0x7c   : > { %10188 = vmatpush1.bf16.msra.mxu0 %v10187_v5  ;;  %v8172_v5 = vld [vmem:[%s19958_s1 + $0x6f8] sm:$0xff] }
  0x7d   : > { %10236 = vmatpush1.bf16.msra.mxu1 %v10235_v6  ;;  %10238 = vmatprep.subr.bf16.mxu0 %v10237_v7  ;;  %v10247_v6 = vpack.c.bf16 %v8161_v61, %v8157_v60  ;;  %v10295_v7 = vpack.c.bf16 %v8163_v62, %v8159_v50  ;;  %v10297_v13 = vpack.c.bf16 %v8172_v5, %v8168_v4  ;;  %v8181_v60 = vld [vmem:[%s19958_s1 + $0x740] sm:$0xff]  ;;  %v8194_v62 = vld [vmem:[%s19958_s1 + $0x7a8] sm:$0xff] }
  0x7e   : > { %10286 = vmatprep.subr.bf16.mxu1 %v10285_v12  ;;  %v8167_v12 = vld [vmem:[%s19958_s1 + $0x6d0] sm:$0xff]  ;;  %v8185_v61 = vld [vmem:[%s19958_s1 + $0x760] sm:$0xff] }
  0x7f   : > { %1107 = vmatmul.mubr.f32.vlgmr.msra.gmra.mrb[0].mxu0 %v12943_v17  ;;  %v10259_v4 = vpack.c.bf16 %v8185_v61, %v8181_v60  ;;  %v8216_v60 = vld [vmem:[%s19958_s1 + $0x858] sm:$0xff] }
  0x80   : > { %1220 = vmatmul.mubr.f32.vlgmr.msra.gmra.mrb[0].mxu1 %v12943_v17  ;;  %10240 = vmatpush1.bf16.msra.mxu0 %v10239_v27  ;;  %v10293_v17 = vpack.c.bf16 %v8164_v44, %v8160_v41  ;;  %v10251_v27 = vpack.c.bf16 %v8169_v59, %v8165_v9  ;;  %v8184_v41 = vld [vmem:[%s19958_s1 + $0x758] sm:$0xff]  ;;  %v10309_v9 = vpack.c.bf16 %v8196_v3, %v8192_v1  ;;  %v8198_v59 = vld [vmem:[%s19958_s1 + $0x7c8] sm:$0xff]  ;;  %v8215_v1 = vld [vmem:[%s19958_s1 + $0x850] sm:$0xff] }
  0x81   : > { %10288 = vmatpush1.bf16.msra.mxu1 %v10287_v15  ;;  %10242 = vmatprep.subr.bf16.mxu0 %v10241_v30  ;;  %v10253_v30 = vpack.c.bf16 %v8178_v20, %v8174_v14  ;;  %v8188_v44 = vld [vmem:[%s19958_s1 + $0x778] sm:$0xff] }
  0x82   : > { %10290 = vmatprep.subr.bf16.mxu1 %v10289_v34  ;;  %8126 = vmatprep.mubr.msk.f32.mxu0 %vm783_vm1, %v12876_v48  ;;  %v10301_v34 = vpack.c.bf16 %v8180_v24, %v8176_v21  ;;  %v10305_v50 = vpack.c.bf16 %v8188_v44, %v8184_v41  ;;  %v8197_v24 = vld [vmem:[%s19958_s1 + $0x7c0] sm:$0xff]  ;;  %v8220_v61 = vld [vmem:[%s19958_s1 + $0x878] sm:$0xff] }
  0x83   : > { %8134 = vmatprep.mubr.msk.f32.mxu1 %vm783_vm1, %v12876_v48  ;;  %1113 = vmatmul.mubr.f32.gmra.mrb[2].mxu0 %v12946_v18  ;;  %v8205_v44 = vld [vmem:[%s19958_s1 + $0x800] sm:$0xff]  ;;  %v10321_v3 = vpack.c.bf16 %v8220_v61, %v8216_v60  ;;  %v1894_v61 = vld [vmem:[%s19960_s3 + $0x410] sm:$0xff] }
  0x84   : > { %10244 = vmatpush1.bf16.msra.mxu0 %v10243_v46  ;;  %1226 = vmatmul.mubr.f32.gmra.mrb[2].mxu1 %v12946_v18  ;;  %v8171_v18 = vld [vmem:[%s19958_s1 + $0x6f0] sm:$0xff]  ;;  %v10255_v46 = vpack.c.bf16 %v8177_v31, %v8173_v25  ;;  %v8210_v25 = vld [vmem:[%s19958_s1 + $0x828] sm:$0xff]  ;;  %v8208_v31 = vld [vmem:[%s19958_s1 + $0x818] sm:$0xff] }
  0x85   : > { %10292 = vmatpush1.bf16.msra.mxu1 %v10291_v53  ;;  %10246 = vmatprep.subr.bf16.mxu0 %v10245_v54  ;;  %v10299_v15 = vpack.c.bf16 %v8171_v18, %v8167_v12  ;;  %v10303_v53 = vpack.c.bf16 %v8179_v35, %v8175_v32  ;;  %v10257_v54 = vpack.c.bf16 %v8186_v39, %v8182_v37  ;;  %v8202_v12 = vld [vmem:[%s19958_s1 + $0x7e8] sm:$0xff]  ;;  %v8204_v18 = vld [vmem:[%s19958_s1 + $0x7f8] sm:$0xff]  ;;  %v1370_v35 = vrot.slane %v12876_v48, 2 }
  0x86   : > { %10294 = vmatprep.subr.bf16.mxu1 %v10293_v17  ;;  %8127 = vmatprep.mubr.msk.f32.mxu0 %vm783_vm1, %v12987_v38  ;;  %v8190_v17 = vld [vmem:[%s19958_s1 + $0x788] sm:$0xff]  ;;  %v10265_v21 = vpack.c.bf16 %v8202_v12, %v8198_v59  ;;  %v8212_v32 = vld [vmem:[%s19958_s1 + $0x838] sm:$0xff]  ;;  %v8225_v59 = vld [vmem:[%s19958_s1 + $0x8a0] sm:$0xff] }
  0x87   : > { %8135 = vmatprep.mubr.msk.f32.mxu1 %vm783_vm1, %v12987_v38  ;;  %1119 = vmatmul.mubr.f32.gmra.mrb[4].mxu0 %v13001_v45  ;;  %v8223_v12 = vld [vmem:[%s19958_s1 + $0x890] sm:$0xff]  ;;  %v8261_v38 = vld [vmem:[%s19960_s3 + $0x800] sm:$0xff] }
  0x88   : > { %10248 = vmatpush1.bf16.msra.mxu0 %v10247_v6  ;;  %1232 = vmatmul.mubr.f32.gmra.mrb[4].mxu1 %v13001_v45  ;;  %v10261_v6 = vpack.c.bf16 %v8194_v62, %v8190_v17  ;;  %v8213_v62 = vld [vmem:[%s19958_s1 + $0x840] sm:$0xff]  ;;  %v1910_v45 = vld [vmem:[%s19960_s3 + $0x490] sm:$0xff] }
  0x89   : > { %10296 = vmatpush1.bf16.msra.mxu1 %v10295_v7  ;;  %10250 = vmatprep.subr.bf16.mxu0 %v10249_v49  ;;  %v8189_v7 = vld [vmem:[%s19958_s1 + $0x780] sm:$0xff] }
  0x8a   : > { %10298 = vmatprep.subr.bf16.mxu1 %v10297_v13  ;;  %8128 = vmatprep.mubr.msk.f32.mxu0 %vm783_vm1, %v13017_v58  ;;  %v8193_v49 = vld [vmem:[%s19958_s1 + $0x7a0] sm:$0xff]  ;;  %v8200_v13 = vld [vmem:[%s19958_s1 + $0x7d8] sm:$0xff] }
  0x8b   : > { %8136 = vmatprep.mubr.msk.f32.mxu1 %vm783_vm1, %v13017_v58  ;;  %1125 = vmatmul.mubr.f32.gmra.mrb[6].mxu0 %v13030_v63  ;;  %v8183_v58 = vld [vmem:[%s19958_s1 + $0x750] sm:$0xff]  ;;  %v10263_v14 = vpack.c.bf16 %v8193_v49, %v8189_v7  ;;  %v8228_v7 = vld [vmem:[%s19958_s1 + $0x8b8] sm:$0xff] }
  0x8c   : > { %10252 = vmatpush1.bf16.msra.mxu0 %v10251_v27  ;;  %1238 = vmatmul.mubr.f32.gmra.mrb[6].mxu1 %v13030_v63  ;;  %v8187_v63 = vld [vmem:[%s19958_s1 + $0x770] sm:$0xff]  ;;  %v8201_v27 = vld [vmem:[%s19958_s1 + $0x7e0] sm:$0xff] }
  0x8d   : > { %10300 = vmatpush1.bf16.msra.mxu1 %v10299_v15  ;;  %10254 = vmatprep.subr.bf16.mxu0 %v10253_v30  ;;  %v10307_v5 = vpack.c.bf16 %v8187_v63, %v8183_v58  ;;  %v10313_v15 = vpack.c.bf16 %v8204_v18, %v8200_v13  ;;  %v8206_v30 = vld [vmem:[%s19958_s1 + $0x808] sm:$0xff]  ;;  %v10267_v37 = vpack.c.bf16 %v8201_v27, %v8197_v24  ;;  %v8227_v18 = vld [vmem:[%s19958_s1 + $0x8b0] sm:$0xff]  ;;  %v8236_v24 = vld [vmem:[%s19958_s1 + $0x8f8] sm:$0xff] }
  0x8e   : > { %10302 = vmatprep.subr.bf16.mxu1 %v10301_v34  ;;  %8129 = vmatprep.mubr.msk.f32.mxu0 %vm783_vm1, %v13048_v10  ;;  %v1369_v34 = vrot.slane %v12873_v47, 2  ;;  %v10269_v41 = vpack.c.bf16 %v8210_v25, %v8206_v30  ;;  %v8207_v47 = vld [vmem:[%s19958_s1 + $0x810] sm:$0xff]  ;;  %v8233_v30 = vld [vmem:[%s19958_s1 + $0x8e0] sm:$0xff] }
  0x8f   : > { %8137 = vmatprep.mubr.msk.f32.mxu1 %vm783_vm1, %v13048_v10  ;;  %1131 = vmatmul.mubr.f32.gmra.mrb[8].mxu0 %v13082_v23  ;;  %v8191_v10 = vld [vmem:[%s19958_s1 + $0x790] sm:$0xff] }
  0x90   : > { %10256 = vmatpush1.bf16.msra.mxu0 %v10255_v46  ;;  %1244 = vmatmul.mubr.f32.gmra.mrb[8].mxu1 %v13082_v23  ;;  %v8195_v23 = vld [vmem:[%s19958_s1 + $0x7b0] sm:$0xff]  ;;  %v10317_v46 = vpack.c.bf16 %v8212_v32, %v8208_v31  ;;  %v1371_v58 = vsel %vm1365_vm2, %v1369_v34, %v1370_v35  ;;  %v8254_v34 = vld [vmem:[%s19960_s3 + $0x7c8] sm:$0xff] }
  0x91   : > { %10304 = vmatpush1.bf16.msra.mxu1 %v10303_v53  ;;  %10258 = vmatprep.subr.bf16.mxu0 %v10257_v54  ;;  %v10311_v20 = vpack.c.bf16 %v8195_v23, %v8191_v10  ;;  %v8214_v53 = vld [vmem:[%s19958_s1 + $0x848] sm:$0xff]  ;;  %v8221_v23 = vld [vmem:[%s19958_s1 + $0x880] sm:$0xff]  ;;  %v8231_v25 = vld [vmem:[%s19958_s1 + $0x8d0] sm:$0xff] }
  0x92   : > { %10306 = vmatprep.subr.bf16.mxu1 %v10305_v50  ;;  %8130 = vmatprep.mubr.msk.f32.mxu0 %vm783_vm1, %v13091_v29  ;;  %v8218_v54 = vld [vmem:[%s19958_s1 + $0x868] sm:$0xff]  ;;  %v10279_v27 = vpack.c.bf16 %v8225_v59, %v8221_v23  ;;  %v8235_v32 = vld [vmem:[%s19958_s1 + $0x8f0] sm:$0xff] }
  0x93   : > { %8138 = vmatprep.mubr.msk.f32.mxu1 %vm783_vm1, %v13091_v29  ;;  %1137 = vmatmul.mubr.f32.gmra.mrb[10].mxu0 %v13115_v42  ;;  %v8199_v29 = vld [vmem:[%s19958_s1 + $0x7d0] sm:$0xff]  ;;  %v10273_v17 = vpack.c.bf16 %v8218_v54, %v8214_v53  ;;  %v10331_v53 = vpack.c.bf16 %v8235_v32, %v8231_v25  ;;  %v8270_v23 = vld [vmem:[%s19960_s3 + $0x848] sm:$0xff] }
  0x94   : > { %10260 = vmatpush1.bf16.msra.mxu0 %v10259_v4  ;;  %1250 = vmatmul.mubr.f32.gmra.mrb[10].mxu1 %v13115_v42  ;;  %v8203_v42 = vld [vmem:[%s19958_s1 + $0x7f0] sm:$0xff]  ;;  %v8222_v4 = vld [vmem:[%s19958_s1 + $0x888] sm:$0xff] }
  0x95   : > { %10308 = vmatpush1.bf16.msra.mxu1 %v10307_v5  ;;  %10262 = vmatprep.subr.bf16.mxu0 %v10261_v6  ;;  %v10315_v39 = vpack.c.bf16 %v8203_v42, %v8199_v29  ;;  %v8226_v5 = vld [vmem:[%s19958_s1 + $0x8a8] sm:$0xff]  ;;  %v8224_v6 = vld [vmem:[%s19958_s1 + $0x898] sm:$0xff]  ;;  %v10327_v29 = vpack.c.bf16 %v8227_v18, %v8223_v12  ;;  %v8229_v42 = vld [vmem:[%s19958_s1 + $0x8c0] sm:$0xff] }
  0x96   : > { %10310 = vmatprep.subr.bf16.mxu1 %v10309_v9  ;;  %8131 = vmatprep.mubr.msk.f32.mxu0 %vm783_vm1, %v13142_v57  ;;  %v10277_v9 = vpack.c.bf16 %v8226_v5, %v8222_v4  ;;  %v10325_v13 = vpack.c.bf16 %v8228_v7, %v8224_v6  ;;  %v1902_v7 = vld [vmem:[%s19960_s3 + $0x450] sm:$0xff]  ;;  %v8274_v59 = vld [vmem:[%s19960_s3 + $0x868] sm:$0xff] }
  0x97   : > { %8139 = vmatprep.mubr.msk.f32.mxu1 %vm783_vm1, %v13142_v57  ;;  %1143 = vmatmul.mubr.f32.gmra.mrb[12].mxu0 %v13152_v2  ;;  %v8209_v57 = vld [vmem:[%s19958_s1 + $0x820] sm:$0xff]  ;;  %v1922_v32 = vld [vmem:[%s19960_s3 + $0x4f0] sm:$0xff] }
  0x98   : > { %10264 = vmatpush1.bf16.msra.mxu0 %v10263_v14  ;;  %1256 = vmatmul.mubr.f32.gmra.mrb[12].mxu1 %v13152_v2  ;;  %v8211_v2 = vld [vmem:[%s19958_s1 + $0x830] sm:$0xff]  ;;  %v10271_v50 = vpack.c.bf16 %v8209_v57, %v8205_v44  ;;  %v8230_v14 = vld [vmem:[%s19958_s1 + $0x8c8] sm:$0xff]  ;;  %v10283_v44 = vpack.c.bf16 %v8233_v30, %v8229_v42  ;;  %v12427_v57 = vld [vmem:[%s12855_s29] sm:$0xff] }
  0x99   : > { %10312 = vmatpush1.bf16.msra.mxu1 %v10311_v20  ;;  %10266 = vmatprep.subr.bf16.mxu0 %v10265_v21  ;;  %v10319_v63 = vpack.c.bf16 %v8211_v2, %v8207_v47  ;;  %v8234_v20 = vld [vmem:[%s19958_s1 + $0x8e8] sm:$0xff]  ;;  %v8232_v21 = vld [vmem:[%s19958_s1 + $0x8d8] sm:$0xff]  ;;  %v1366_v47 = vrot.slane %v12427_v57, 2 }
  0x9a   : > { %10314 = vmatprep.subr.bf16.mxu1 %v10313_v15  ;;  %8132 = vmatprep.mubr.msk.f32.mxu0 %vm783_vm1, %v13189_v26  ;;  %v10281_v15 = vpack.c.bf16 %v8234_v20, %v8230_v14  ;;  %v10329_v31 = vpack.c.bf16 %v8236_v24, %v8232_v21  ;;  %v8269_v14 = vld [vmem:[%s19960_s3 + $0x840] sm:$0xff]  ;;  %v10341_v20 = vpack.c.bf16 %v8274_v59, %v8270_v23  ;;  %v1919_v24 = vld [vmem:[%s19960_s3 + $0x4d8] sm:$0xff]  ;;  %v8290_v57 = vld [vmem:[%s19960_s3 + $0x8e8] sm:$0xff] }
  0x9b   : > { %8140 = vmatprep.mubr.msk.f32.mxu1 %vm783_vm1, %v13189_v26  ;;  %1149 = vmatmul.mubr.f32.gmra.mrb[14].mxu0 %v13201_v28  ;;  %v8217_v26 = vld [vmem:[%s19958_s1 + $0x860] sm:$0xff]  ;;  %v1955_v23 = vld [vmem:[%s19960_s3 + $0x5f8] sm:$0xff]  ;;  %v8310_v59 = vld [vmem:[%s19960_s3 + $0x988] sm:$0xff] }
  0x9c   : > { %10268 = vmatpush1.bf16.msra.mxu0 %v10267_v37  ;;  %1262 = vmatmul.mubr.f32.gmra.mrb[14].mxu1 %v13201_v28  ;;  %v8219_v28 = vld [vmem:[%s19958_s1 + $0x870] sm:$0xff]  ;;  %v10275_v49 = vpack.c.bf16 %v8217_v26, %v8213_v62  ;;  %v8258_v37 = vld [vmem:[%s19960_s3 + $0x7e8] sm:$0xff]  ;;  %v1907_v62 = vld [vmem:[%s19960_s3 + $0x478] sm:$0xff] }
  0x9d   : > { %10316 = vmatpush1.bf16.msra.mxu1 %v10315_v39  ;;  %10270 = vmatprep.subr.bf16.mxu0 %v10269_v41  ;;  %v10323_v10 = vpack.c.bf16 %v8219_v28, %v8215_v1  ;;  %v1895_v39 = vld [vmem:[%s19960_s3 + $0x418] sm:$0xff]  ;;  %v10333_v54 = vpack.c.bf16 %v8258_v37, %v8254_v34  ;;  %v8262_v1 = vld [vmem:[%s19960_s3 + $0x808] sm:$0xff]  ;;  %v1375_v28 = vsel %vm1365_vm2, %v1370_v35, %v1374_v0  ;;  %v8265_v0 = vld [vmem:[%s19960_s3 + $0x820] sm:$0xff] }
  0x9e   : > { %10318 = vmatprep.subr.bf16.mxu1 %v10317_v46  ;;  %8237 = vmatprep.mubr.msk.f32.mxu0 %vm783_vm1, %v1371_v58  ;;  %v1899_v41 = vld [vmem:[%s19960_s3 + $0x438] sm:$0xff]  ;;  %v12428_v46 = vld [vmem:[%s12855_s29 + $0x10] sm:$0xff]  ;;  %v8273_v21 = vld [vmem:[%s19960_s3 + $0x860] sm:$0xff]  ;;  %s12435_s29 = scalar_lea.vmem %s12434_s23, 32 }
  0x9f   : > { %8245 = vmatprep.mubr.msk.f32.mxu1 %vm783_vm1, %v1371_v58  ;;  %v1367_v2 = vrot.slane %v12428_v46, 2  ;;  %v10769_v60 = vpack.c.bf16 %v1899_v41, %v1895_v39  ;;  %v1898_v58 = vld [vmem:[%s19960_s3 + $0x430] sm:$0xff]  ;;  %v1911_v35 = vld [vmem:[%s19960_s3 + $0x498] sm:$0xff]  ;;  %v10343_v30 = vpack.c.bf16 %v8273_v21, %v8269_v14  ;;  %v8277_v34 = vld [vmem:[%s19960_s3 + $0x880] sm:$0xff] }
  0xa0   : > { %10272 = vmatpush1.bf16.msra.mxu0 %v10271_v50  ;;  %v8253_v50 = vld [vmem:[%s19960_s3 + $0x7c0] sm:$0xff]  ;;  %v10771_v4 = vpack.c.bf16 %v1898_v58, %v1894_v61  ;;  %v1927_v39 = vld [vmem:[%s19960_s3 + $0x518] sm:$0xff] }
  0xa1   : > { %10320 = vmatpush1.bf16.msra.mxu1 %v10319_v63  ;;  %10274 = vmatprep.subr.bf16.mxu0 %v10273_v17  ;;  %v8257_v63 = vld [vmem:[%s19960_s3 + $0x7e0] sm:$0xff]  ;;  %v1903_v17 = vld [vmem:[%s19960_s3 + $0x458] sm:$0xff]  ;;  %v1368_v26 = vsel %vm1365_vm2, %v1366_v47, %v1367_v2 }
  0xa2   : > { %10322 = vmatprep.subr.bf16.mxu1 %v10321_v3  ;;  %v8266_v3 = vld [vmem:[%s19960_s3 + $0x828] sm:$0xff]  ;;  %v10335_v5 = vpack.c.bf16 %v8257_v63, %v8253_v50  ;;  %v10773_v6 = vpack.c.bf16 %v1907_v62, %v1903_v17  ;;  %v8281_v37 = vld [vmem:[%s19960_s3 + $0x8a0] sm:$0xff]  ;;  %v1931_v41 = vld [vmem:[%s19960_s3 + $0x538] sm:$0xff] }
  0xa3   : > { %v10337_v48 = vpack.c.bf16 %v8266_v3, %v8262_v1  ;;  %v10347_v46 = vpack.c.bf16 %v8281_v37, %v8277_v34  ;;  %v1935_v61 = vld [vmem:[%s19960_s3 + $0x558] sm:$0xff]  ;;  %v8294_v50 = vld [vmem:[%s19960_s3 + $0x908] sm:$0xff]  ;;  %v1938_v1 = vld [vmem:[%s19960_s3 + $0x570] sm:$0xff] }
  0xa4   : > { %10276 = vmatpush1.bf16.msra.mxu0 %v10275_v49  ;;  %v1906_v49 = vld [vmem:[%s19960_s3 + $0x470] sm:$0xff]  ;;  %v1939_v58 = vld [vmem:[%s19960_s3 + $0x578] sm:$0xff]  ;;  %v8298_v63 = vld [vmem:[%s19960_s3 + $0x928] sm:$0xff] }
  0xa5   : > { %10324 = vmatpush1.bf16.msra.mxu1 %v10323_v10  ;;  %10278 = vmatprep.subr.bf16.mxu0 %v10277_v9  ;;  %v1915_v10 = vld [vmem:[%s19960_s3 + $0x4b8] sm:$0xff]  ;;  %v1373_v9 = vsel %vm1365_vm2, %v1367_v2, %v1372_v55  ;;  %v10775_v12 = vpack.c.bf16 %v1906_v49, %v1902_v7  ;;  %v1914_v55 = vld [vmem:[%s19960_s3 + $0x4b0] sm:$0xff]  ;;  %v8293_v3 = vld [vmem:[%s19960_s3 + $0x900] sm:$0xff] }
  0xa6   : > { %10326 = vmatprep.subr.bf16.mxu1 %v10325_v13  ;;  %v10339_v13 = vpack.c.bf16 %v8265_v0, %v8261_v38  ;;  %v10777_v18 = vpack.c.bf16 %v1915_v10, %v1911_v35  ;;  %v10779_v42 = vpack.c.bf16 %v1914_v55, %v1910_v45  ;;  %v1926_v2 = vld [vmem:[%s19960_s3 + $0x510] sm:$0xff]  ;;  %v8306_v7 = vld [vmem:[%s19960_s3 + $0x968] sm:$0xff]  ;;  %v8301_v35 = vld [vmem:[%s19960_s3 + $0x940] sm:$0xff] }
  0xa7   : > { %v1946_v0 = vld [vmem:[%s19960_s3 + $0x5b0] sm:$0xff]  ;;  %v8305_v10 = vld [vmem:[%s19960_s3 + $0x960] sm:$0xff]  ;;  %v1959_v21 = vld [vmem:[%s19960_s3 + $0x618] sm:$0xff] }
  0xa8   : > { %10280 = vmatpush1.bf16.msra.mxu0 %v10279_v27  ;;  %v1923_v27 = vld [vmem:[%s19960_s3 + $0x4f8] sm:$0xff]  ;;  %v1950_v45 = vld [vmem:[%s19960_s3 + $0x5d0] sm:$0xff]  ;;  %v8309_v14 = vld [vmem:[%s19960_s3 + $0x980] sm:$0xff] }
  0xa9   : > { %10328 = vmatpush1.bf16.msra.mxu1 %v10327_v29  ;;  %10282 = vmatprep.subr.bf16.mxu0 %v10281_v15  ;;  %v8278_v29 = vld [vmem:[%s19960_s3 + $0x888] sm:$0xff]  ;;  %v10781_v25 = vpack.c.bf16 %v1923_v27, %v1919_v24  ;;  %v1954_v55 = vld [vmem:[%s19960_s3 + $0x5f0] sm:$0xff]  ;;  %v1963_v24 = vld [vmem:[%s19960_s3 + $0x638] sm:$0xff] }
  0xaa   : > { %10330 = vmatprep.subr.bf16.mxu1 %v10329_v31  ;;  %v8282_v15 = vld [vmem:[%s19960_s3 + $0x8a8] sm:$0xff]  ;;  %v1918_v31 = vld [vmem:[%s19960_s3 + $0x4d0] sm:$0xff]  ;;  %v1967_v34 = vld [vmem:[%s19960_s3 + $0x658] sm:$0xff] }
  0xab   : > { %v10783_v47 = vpack.c.bf16 %v1922_v32, %v1918_v31  ;;  %v8318_v27 = vld [vmem:[%s19960_s3 + $0x9c8] sm:$0xff]  ;;  %v8317_v31 = vld [vmem:[%s19960_s3 + $0x9c0] sm:$0xff] }
  0xac   : > { %10284 = vmatpush1.bf16.msra.mxu0 %v10283_v44  ;;  %v8286_v44 = vld [vmem:[%s19960_s3 + $0x8c8] sm:$0xff]  ;;  %v8321_v32 = vld [vmem:[%s19960_s3 + $0x9e0] sm:$0xff] }
  0xad   : > { %10332 = vmatpush1.bf16.msra.mxu1 %v10331_v53  ;;  %10334 = vmatprep.subr.bf16.mxu0 %v10333_v54  ;;  %v1930_v53 = vld [vmem:[%s19960_s3 + $0x530] sm:$0xff]  ;;  %v8285_v54 = vld [vmem:[%s19960_s3 + $0x8c0] sm:$0xff]  ;;  %v8326_v37 = vld [vmem:[%s19960_s3 + $0xa08] sm:$0xff] }
  0xae   : > { %10770 = vmatprep.subr.bf16.mxu1 %v10769_v60  ;;  %v8289_v60 = vld [vmem:[%s19960_s3 + $0x8e0] sm:$0xff]  ;;  %v10787_v17 = vpack.c.bf16 %v1930_v53, %v1926_v2  ;;  %v1975_v53 = vld [vmem:[%s19960_s3 + $0x698] sm:$0xff] }
  0xaf   : > { %1485 = vmatmul.mubr.f32.vlgmr.msra.gmra.mrb[0].mxu0 %v1368_v26  ;;  %v10351_v62 = vpack.c.bf16 %v8289_v60, %v8285_v54  ;;  %v8329_v2 = vld [vmem:[%s19960_s3 + $0xa20] sm:$0xff]  ;;  %v1979_v54 = vld [vmem:[%s19960_s3 + $0x6b8] sm:$0xff]  ;;  %v8338_v60 = vld [vmem:[%s19960_s3 + $0xa68] sm:$0xff] }
  0xb0   : > { %1598 = vmatmul.mubr.f32.vlgmr.msra.gmra.mrb[0].mxu1 %v1368_v26  ;;  %8238 = vmatprep.mubr.msk.f32.mxu0 %vm783_vm1, %v1375_v28  ;;  %v1934_v26 = vld [vmem:[%s19960_s3 + $0x550] sm:$0xff] }
  0xb1   : > { %8246 = vmatprep.mubr.msk.f32.mxu1 %vm783_vm1, %v1375_v28  ;;  %10772 = vmatpush1.bf16.msra.mxu1 %v10771_v4  ;;  %v8297_v28 = vld [vmem:[%s19960_s3 + $0x920] sm:$0xff]  ;;  %v1943_v4 = vld [vmem:[%s19960_s3 + $0x598] sm:$0xff]  ;;  %v10791_v49 = vpack.c.bf16 %v1938_v1, %v1934_v26 }
  0xb2   : > { %10336 = vmatpush1.bf16.msra.mxu0 %v10335_v5  ;;  %10774 = vmatprep.subr.bf16.mxu1 %v10773_v6  ;;  %v1947_v5 = vld [vmem:[%s19960_s3 + $0x5b8] sm:$0xff]  ;;  %v8302_v6 = vld [vmem:[%s19960_s3 + $0x948] sm:$0xff]  ;;  %v10355_v38 = vpack.c.bf16 %v8297_v28, %v8293_v3  ;;  %v8337_v26 = vld [vmem:[%s19960_s3 + $0xa60] sm:$0xff] }
  0xb3   : > { %1491 = vmatmul.mubr.f32.gmra.mrb[2].mxu0 %v1373_v9  ;;  %10338 = vmatprep.subr.bf16.mxu0 %v10337_v48  ;;  %v1942_v48 = vld [vmem:[%s19960_s3 + $0x590] sm:$0xff]  ;;  %v1983_v1 = vld [vmem:[%s19960_s3 + $0x6d8] sm:$0xff]  ;;  %v8346_v28 = vld [vmem:[%s19960_s3 + $0xaa8] sm:$0xff] }
  0xb4   : > { %1604 = vmatmul.mubr.f32.gmra.mrb[2].mxu1 %v1373_v9  ;;  %8239 = vmatprep.mubr.msk.f32.mxu0 %vm783_vm1, %v13053_v11  ;;  %v1951_v9 = vld [vmem:[%s19960_s3 + $0x5d8] sm:$0xff] }
  0xb5   : > { %8247 = vmatprep.mubr.msk.f32.mxu1 %vm783_vm1, %v13053_v11  ;;  %10776 = vmatpush1.bf16.msra.mxu1 %v10775_v12  ;;  %v10345_v11 = vpack.c.bf16 %v8282_v15, %v8278_v29  ;;  %v8314_v12 = vld [vmem:[%s19960_s3 + $0x9a8] sm:$0xff]  ;;  %v10799_v15 = vpack.c.bf16 %v1954_v55, %v1950_v45  ;;  %v1987_v3 = vld [vmem:[%s19960_s3 + $0x6f8] sm:$0xff]  ;;  %v8353_v45 = vld [vmem:[%s19960_s3 + $0xae0] sm:$0xff] }
  0xb6   : > { %10340 = vmatpush1.bf16.msra.mxu0 %v10339_v13  ;;  %10778 = vmatprep.subr.bf16.mxu1 %v10777_v18  ;;  %v10795_v13 = vpack.c.bf16 %v1946_v0, %v1942_v48  ;;  %v10359_v18 = vpack.c.bf16 %v8305_v10, %v8301_v35  ;;  %v8322_v29 = vld [vmem:[%s19960_s3 + $0x9e8] sm:$0xff]  ;;  %v8345_v48 = vld [vmem:[%s19960_s3 + $0xaa0] sm:$0xff]  ;;  %v1991_v0 = vld [vmem:[%s19960_s3 + $0x718] sm:$0xff] }
  0xb7   : > { %1497 = vmatmul.mubr.f32.gmra.mrb[4].mxu0 %v13068_v16  ;;  %10342 = vmatprep.subr.bf16.mxu0 %v10341_v20  ;;  %v8313_v20 = vld [vmem:[%s19960_s3 + $0x9a0] sm:$0xff]  ;;  %v1995_v35 = vld [vmem:[%s19960_s3 + $0x738] sm:$0xff]  ;;  %v8354_v10 = vld [vmem:[%s19960_s3 + $0xae8] sm:$0xff] }
  0xb8   : > { %1610 = vmatmul.mubr.f32.gmra.mrb[4].mxu1 %v13068_v16  ;;  %8240 = vmatprep.mubr.msk.f32.mxu0 %vm783_vm1, %v13104_v36  ;;  %v10785_v16 = vpack.c.bf16 %v1931_v41, %v1927_v39  ;;  %v8330_v39 = vld [vmem:[%s19960_s3 + $0xa28] sm:$0xff]  ;;  %v1999_v55 = vld [vmem:[%s19960_s3 + $0x758] sm:$0xff] }
  0xb9   : > { %8248 = vmatprep.mubr.msk.f32.mxu1 %vm783_vm1, %v13104_v36  ;;  %10780 = vmatpush1.bf16.msra.mxu1 %v10779_v42  ;;  %v10349_v36 = vpack.c.bf16 %v8290_v57, %v8286_v44  ;;  %v10363_v42 = vpack.c.bf16 %v8313_v20, %v8309_v14  ;;  %v10367_v44 = vpack.c.bf16 %v8321_v32, %v8317_v31  ;;  %v2003_v14 = vld [vmem:[%s19960_s3 + $0x778] sm:$0xff] }
  0xba   : > { %10344 = vmatpush1.bf16.msra.mxu0 %v10343_v30  ;;  %10782 = vmatprep.subr.bf16.mxu1 %v10781_v25  ;;  %v1958_v30 = vld [vmem:[%s19960_s3 + $0x610] sm:$0xff]  ;;  %v2007_v31 = vld [vmem:[%s19960_s3 + $0x798] sm:$0xff] }
  0xbb   : > { %1503 = vmatmul.mubr.f32.gmra.mrb[6].mxu0 %v13118_v43  ;;  %10346 = vmatprep.subr.bf16.mxu0 %v10345_v11  ;;  %v1962_v25 = vld [vmem:[%s19960_s3 + $0x630] sm:$0xff]  ;;  %v1971_v11 = vld [vmem:[%s19960_s3 + $0x678] sm:$0xff] }
  0xbc   : > { %1616 = vmatmul.mubr.f32.gmra.mrb[6].mxu1 %v13118_v43  ;;  %8241 = vmatprep.mubr.msk.f32.mxu0 %vm783_vm1, %v13134_v51  ;;  %v10789_v43 = vpack.c.bf16 %v1939_v58, %v1935_v61  ;;  %v10803_v41 = vpack.c.bf16 %v1962_v25, %v1958_v30  ;;  %v10805_v57 = vpack.c.bf16 %v1971_v11, %v1967_v34  ;;  %v8357_v30 = vld [vmem:[%s19960_s3 + $0xb00] sm:$0xff]  ;;  %v2011_v32 = vld [vmem:[%s19960_s3 + $0x7b8] sm:$0xff]  ;;  %v2006_v34 = vld [vmem:[%s19960_s3 + $0x790] sm:$0xff] }
  0xbd   : > { %8249 = vmatprep.mubr.msk.f32.mxu1 %vm783_vm1, %v13134_v51  ;;  %10784 = vmatpush1.bf16.msra.mxu1 %v10783_v47  ;;  %v10353_v51 = vpack.c.bf16 %v8298_v63, %v8294_v50  ;;  %v1966_v47 = vld [vmem:[%s19960_s3 + $0x650] sm:$0xff]  ;;  %v10809_v50 = vpack.c.bf16 %v1979_v54, %v1975_v53  ;;  %v8361_v25 = vld [vmem:[%s19960_s3 + $0xb20] sm:$0xff]  ;;  %v8374_v54 = vld [vmem:[%s19960_s3 + $0xb88] sm:$0xff] }
  0xbe   : > { %10348 = vmatpush1.bf16.msra.mxu0 %v10347_v46  ;;  %10786 = vmatprep.subr.bf16.mxu1 %v10785_v16  ;;  %v8325_v46 = vld [vmem:[%s19960_s3 + $0xa00] sm:$0xff]  ;;  %v10369_v16 = vpack.c.bf16 %v8330_v39, %v8326_v37  ;;  %v1974_v63 = vld [vmem:[%s19960_s3 + $0x690] sm:$0xff]  ;;  %v10825_v37 = vpack.c.bf16 %v2011_v32, %v2007_v31 }
  0xbf   : > { %1509 = vmatmul.mubr.f32.gmra.mrb[8].mxu0 %v13166_v8  ;;  %10350 = vmatprep.subr.bf16.mxu0 %v10349_v36  ;;  %v8334_v36 = vld [vmem:[%s19960_s3 + $0xa48] sm:$0xff]  ;;  %v10371_v58 = vpack.c.bf16 %v8329_v2, %v8325_v46  ;;  %v2010_v11 = vld [vmem:[%s19960_s3 + $0x7b0] sm:$0xff]  ;;  %v8536_v46 = vld [vmem:[%s19960_s3 + $0xf98] sm:$0xff] }
  0xc0   : > { %1622 = vmatmul.mubr.f32.gmra.mrb[8].mxu1 %v13166_v8  ;;  %8242 = vmatprep.mubr.msk.f32.mxu0 %vm783_vm1, %v13181_v19  ;;  %v10793_v8 = vpack.c.bf16 %v1947_v5, %v1943_v4  ;;  %v10827_v39 = vpack.c.bf16 %v2010_v11, %v2006_v34  ;;  %v8540_v2 = vld [vmem:[%s19960_s3 + $0xfb8] sm:$0xff]  ;;  %v14249_v32 = vld [vmem:[%s19960_s3 + $0x1010] sm:$0xff] }
  0xc1   : > { %8250 = vmatprep.mubr.msk.f32.mxu1 %vm783_vm1, %v13181_v19  ;;  %10788 = vmatpush1.bf16.msra.mxu1 %v10787_v17  ;;  %v10357_v19 = vpack.c.bf16 %v8306_v7, %v8302_v6  ;;  %v1978_v17 = vld [vmem:[%s19960_s3 + $0x6b0] sm:$0xff]  ;;  %v10813_v6 = vpack.c.bf16 %v1987_v3, %v1983_v1  ;;  %v10953_v53 = vpack.c.bf16 %v8540_v2, %v8536_v46  ;;  %v14275_v46 = vld [vmem:[%s19960_s3 + $0xc08] sm:$0xff] }
  0xc2   : > { %10352 = vmatpush1.bf16.msra.mxu0 %v10351_v62  ;;  %10790 = vmatprep.subr.bf16.mxu1 %v10789_v43  ;;  %v8333_v62 = vld [vmem:[%s19960_s3 + $0xa40] sm:$0xff]  ;;  %v10373_v43 = vpack.c.bf16 %v8338_v60, %v8334_v36  ;;  %v10811_v4 = vpack.c.bf16 %v1978_v17, %v1974_v63  ;;  %v1982_v7 = vld [vmem:[%s19960_s3 + $0x6d0] sm:$0xff]  ;;  %v8378_v36 = vld [vmem:[%s19960_s3 + $0xba8] sm:$0xff] }
  0xc3   : > { %1515 = vmatmul.mubr.f32.gmra.mrb[10].mxu0 %v13192_v22  ;;  %10354 = vmatprep.subr.bf16.mxu0 %v10353_v51  ;;  %v8342_v51 = vld [vmem:[%s19960_s3 + $0xa88] sm:$0xff]  ;;  %v10375_v5 = vpack.c.bf16 %v8337_v26, %v8333_v62  ;;  %v10393_v60 = vpack.c.bf16 %v8378_v36, %v8374_v54  ;;  %v14254_v34 = vld [vmem:[%s19960_s3 + $0x1030] sm:$0xff] }
  0xc4   : > { %1628 = vmatmul.mubr.f32.gmra.mrb[10].mxu1 %v13192_v22  ;;  %8243 = vmatprep.mubr.msk.f32.mxu0 %vm783_vm1, %v13232_v52  ;;  %v10797_v22 = vpack.c.bf16 %v1955_v23, %v1951_v9  ;;  %v8382_v63 = vld [vmem:[%s19960_s3 + $0xbc8] sm:$0xff] }
  0xc5   : > { %8251 = vmatprep.mubr.msk.f32.mxu1 %vm783_vm1, %v13232_v52  ;;  %10792 = vmatpush1.bf16.msra.mxu1 %v10791_v49  ;;  %v10361_v52 = vpack.c.bf16 %v8314_v12, %v8310_v59  ;;  %v1986_v49 = vld [vmem:[%s19960_s3 + $0x6f0] sm:$0xff]  ;;  %v10817_v59 = vpack.c.bf16 %v1995_v35, %v1991_v0  ;;  %v8386_v17 = vld [vmem:[%s19960_s3 + $0xbe8] sm:$0xff] }
  0xc6   : > { %10356 = vmatpush1.bf16.msra.mxu0 %v10355_v38  ;;  %10794 = vmatprep.subr.bf16.mxu1 %v10793_v8  ;;  %v8341_v38 = vld [vmem:[%s19960_s3 + $0xa80] sm:$0xff]  ;;  %v10377_v8 = vpack.c.bf16 %v8346_v28, %v8342_v51  ;;  %v10815_v9 = vpack.c.bf16 %v1986_v49, %v1982_v7  ;;  %v1990_v12 = vld [vmem:[%s19960_s3 + $0x710] sm:$0xff]  ;;  %v10397_v62 = vpack.c.bf16 %v8386_v17, %v8382_v63 }
  0xc7   : > { %1521 = vmatmul.mubr.f32.gmra.mrb[12].mxu0 %v13249_v56  ;;  %10358 = vmatprep.subr.bf16.mxu0 %v10357_v19  ;;  %v8350_v19 = vld [vmem:[%s19960_s3 + $0xac8] sm:$0xff]  ;;  %v10379_v23 = vpack.c.bf16 %v8345_v48, %v8341_v38  ;;  %v1678_v51 = vld [vmem:[%s19959_s2] sm:$0xf]  ;;  %v8535_v0 = vld [vmem:[%s19960_s3 + $0xf90] sm:$0xff] }
  0xc8   : > { %1634 = vmatmul.mubr.f32.gmra.mrb[12].mxu1 %v13249_v56  ;;  %8244 = vmatprep.mubr.msk.f32.mxu0 %vm783_vm1, %v13204_v33  ;;  %v10801_v56 = vpack.c.bf16 %v1963_v24, %v1959_v21  ;;  %v10821_v21 = vpack.c.bf16 %v2003_v14, %v1999_v55  ;;  %v1998_v24 = vld [vmem:[%s19960_s3 + $0x750] sm:$0xff]  ;;  %v14220_v55 = vld [vmem:[%s19960_s3 + $0xbc0] sm:$0xff] }
  0xc9   : > { %8252 = vmatprep.mubr.msk.f32.mxu1 %vm783_vm1, %v13204_v33  ;;  %10796 = vmatpush1.bf16.msra.mxu1 %v10795_v13  ;;  %v10365_v33 = vpack.c.bf16 %v8322_v29, %v8318_v27  ;;  %v1994_v13 = vld [vmem:[%s19960_s3 + $0x730] sm:$0xff]  ;;  %vm7937_vm1 = vcmask 73728  }
  0xca   : > { %10360 = vmatpush1.bf16.msra.mxu0 %v10359_v18  ;;  %10798 = vmatprep.subr.bf16.mxu1 %v10797_v22  ;;  %v8349_v18 = vld [vmem:[%s19960_s3 + $0xac0] sm:$0xff]  ;;  %v10381_v22 = vpack.c.bf16 %v8354_v10, %v8350_v19  ;;  %v2002_v27 = vld [vmem:[%s19960_s3 + $0x770] sm:$0xff] }
  0xcb   : > { %1527 = vmatmul.mubr.f32.gmra.mrb[14].mxu0 %v13217_v40  ;;  %10362 = vmatprep.subr.bf16.mxu0 %v10361_v52  ;;  %v10819_v52 = vpack.c.bf16 %v1994_v13, %v1990_v12  ;;  %v10383_v20 = vpack.c.bf16 %v8353_v45, %v8349_v18  ;;  %v10823_v29 = vpack.c.bf16 %v2002_v27, %v1998_v24  ;;  %v14215_v45 = vld [vmem:[%s19960_s3 + $0xff0] sm:$0xff] }
  0xcc   : > { %1640 = vmatmul.mubr.f32.gmra.mrb[14].mxu1 %v13217_v40  ;;  %v1970_v40 = vld [vmem:[%s19960_s3 + $0x670] sm:$0xff] }
  0xcd   : > { %10800 = vmatpush1.bf16.msra.mxu1 %v10799_v15  ;;  %v10807_v61 = vpack.c.bf16 %v1970_v40, %v1966_v47  ;;  %v8358_v15 = vld [vmem:[%s19960_s3 + $0xb08] sm:$0xff]  ;;  %v8365_v47 = vld [vmem:[%s19960_s3 + $0xb40] sm:$0xff] }
  0xce   : > { %10364 = vmatpush1.bf16.msra.mxu0 %v10363_v42  ;;  %10802 = vmatprep.subr.bf16.mxu1 %v10801_v56  ;;  %v8362_v42 = vld [vmem:[%s19960_s3 + $0xb28] sm:$0xff]  ;;  %v8369_v40 = vld [vmem:[%s19960_s3 + $0xb60] sm:$0xff] }
  0xcf   : > { %10366 = vmatprep.subr.bf16.mxu0 %v10365_v33  ;;  %v10385_v56 = vpack.c.bf16 %v8362_v42, %v8358_v15  ;;  %v10387_v33 = vpack.c.bf16 %v8361_v25, %v8357_v30  ;;  %v14233_v15 = vld [vmem:[%s19960_s3 + $0x1018] sm:$0xff] }
  0xd0   : > { %v14238_v42 = vld [vmem:[%s19960_s3 + $0x1038] sm:$0xff] }
  0xd1   : > { %10804 = vmatpush1.bf16.msra.mxu1 %v10803_v41  ;;  %v8366_v41 = vld [vmem:[%s19960_s3 + $0xb48] sm:$0xff] }
  0xd2   : > { %10368 = vmatpush1.bf16.msra.mxu0 %v10367_v44  ;;  %10806 = vmatprep.subr.bf16.mxu1 %v10805_v57  ;;  %v8370_v44 = vld [vmem:[%s19960_s3 + $0xb68] sm:$0xff] }
  0xd3   : > { %10370 = vmatprep.subr.bf16.mxu0 %v10369_v16  ;;  %v10389_v57 = vpack.c.bf16 %v8370_v44, %v8366_v41  ;;  %v10391_v16 = vpack.c.bf16 %v8369_v40, %v8365_v47  ;;  %v10961_v40 = vpack.c.bf16 %v14238_v42, %v14233_v15  ;;  %v14367_v15 = vld [vmem:[%s19960_s3 + $0x10b8] sm:$0xff] }
  0xd5   : > { %10808 = vmatpush1.bf16.msra.mxu1 %v10807_v61  ;;  %v8373_v61 = vld [vmem:[%s19960_s3 + $0xb80] sm:$0xff] }
  0xd6   : > { %10372 = vmatpush1.bf16.msra.mxu0 %v10371_v58  ;;  %10810 = vmatprep.subr.bf16.mxu1 %v10809_v50  ;;  %v8377_v58 = vld [vmem:[%s19960_s3 + $0xba0] sm:$0xff] }
  0xd7   : > { %10374 = vmatprep.subr.bf16.mxu0 %v10373_v43  ;;  %v10395_v50 = vpack.c.bf16 %v8377_v58, %v8373_v61  ;;  %v1680_v43 = vlaneseq  ;;  %v10963_v61 = vpack.c.bf16 %v14254_v34, %v14249_v32  ;;  %v14291_v58 = vld [vmem:[%s19960_s3 + $0x1058] sm:$0xff] }
  0xd9   : > { %10812 = vmatpush1.bf16.msra.mxu1 %v10811_v4  ;;  %v14164_v26 = vshrl.u32 %v1680_v43, 7 }
  0xda   : > { %10376 = vmatpush1.bf16.msra.mxu0 %v10375_v5  ;;  %10814 = vmatprep.subr.bf16.mxu1 %v10813_v6 }
  0xdb   : > { %10378 = vmatprep.subr.bf16.mxu0 %v10377_v8  ;;  %20051 = vst [vmem:[#allocation11_spill] sm:$0xff] %v14164_v26  ;;  %v14167_v1 = vsub.s32 0, %v14164_v26  ;;  %v19981_v3 = vsub.s32 2, %v14164_v26  ;;  %v14174_v28 = vsub.s32 1, %v14164_v26  ;;  %v19980_v4 = vsub.s32 3, %v14164_v26 }
  0xdd   : > { %10816 = vmatpush1.bf16.msra.mxu1 %v10815_v9  ;;  %20052 = vst [vmem:[#allocation12_spill] sm:$0xff] %v14167_v1  ;;  %20053 = vst [vmem:[#allocation13_spill] sm:$0xff] %v14174_v28  ;;  %v14178_v5 = vrot.slane %v1678_v51, %v14167_v1  ;;  %v14182_v6 = vrot.slane %v1678_v51, %v19981_v3  ;;  %v14185_v7 = vrot.slane %v1678_v51, %v14174_v28  ;;  %v8539_v9 = vld [vmem:[%s19960_s3 + $0xfb0] sm:$0xff]  ;;  %v8612_v1 = vld [vmem:[%s19960_s3 + $0x11f8] sm:$0xff] }
  0xde   : > { %10380 = vmatpush1.bf16.msra.mxu0 %v10379_v23  ;;  %10818 = vmatprep.subr.bf16.mxu1 %v10817_v59  ;;  %v14189_v49 = vrot.slane %v1678_v51, %v19980_v4  ;;  %v8544_v23 = vld [vmem:[%s19960_s3 + $0xfd8] sm:$0xff]  ;;  %v10955_v24 = vpack.c.bf16 %v8539_v9, %v8535_v0 }
  0xdf   : > { %10382 = vmatprep.subr.bf16.mxu0 %v10381_v22  ;;  %v8548_v59 = vld [vmem:[%s19960_s3 + $0xff8] sm:$0xff]  ;;  %v14210_v22 = vld [vmem:[%s19960_s3 + $0xfd0] sm:$0xff] }
  0xe0   : > { %v10957_v27 = vpack.c.bf16 %v8548_v59, %v8544_v23 }
  0xe1   : > { %10820 = vmatpush1.bf16.msra.mxu1 %v10819_v52 }
  0xe2   : > { %10384 = vmatpush1.bf16.msra.mxu0 %v10383_v20  ;;  %10822 = vmatprep.subr.bf16.mxu1 %v10821_v21 }
  0xe3   : > { %10386 = vmatprep.subr.bf16.mxu0 %v10385_v56 }
  0xe5   : > { %10824 = vmatpush1.bf16.msra.mxu1 %v10823_v29  ;;  %v14228_v29 = vld [vmem:[%s19960_s3 + $0xbe0] sm:$0xff] }
  0xe6   : > { %10388 = vmatpush1.bf16.msra.mxu0 %v10387_v33  ;;  %10826 = vmatprep.subr.bf16.mxu1 %v10825_v37  ;;  %v10399_v47 = vpack.c.bf16 %v14228_v29, %v14220_v55  ;;  %v14362_v29 = vld [vmem:[%s19960_s3 + $0x1098] sm:$0xff] }
  0xe7   : > { %10390 = vmatprep.subr.bf16.mxu0 %v10389_v57  ;;  %v10959_v57 = vpack.c.bf16 %v14215_v45, %v14210_v22  ;;  %v14345_v22 = vld [vmem:[%s19960_s3 + $0xc48] sm:$0xff] }
  0xe8   : > { %v14350_v45 = vld [vmem:[%s19960_s3 + $0xc68] sm:$0xff] }
  0xe9   : > { %10828 = vmatpush1.bf16.msra.mxu1 %v10827_v39 }
  0xea   : > { %10392 = vmatpush1.bf16.msra.mxu0 %v10391_v16  ;;  %10954 = vmatprep.subr.bf16.mxu1 %v10953_v53  ;;  %v14280_v16 = vld [vmem:[%s19960_s3 + $0xc28] sm:$0xff] }
  0xeb   : > { %10394 = vmatprep.subr.bf16.mxu0 %v10393_v60 }
  0xee   : > { %10396 = vmatpush1.bf16.msra.mxu0 %v10395_v50  ;;  %v14296_v50 = vld [vmem:[%s19960_s3 + $0x1078] sm:$0xff] }
  0xef   : > { %10398 = vmatprep.subr.bf16.mxu0 %v10397_v62 }
 0x182   : > { %v1486_v38 = vpop.f32.mrb[0].mxu0 }
 0x183   : > { %v1599_v8 = vpop.f32.mrb[0].mxu1  ;;  %v1488_v48 = vpop.f32.mrb[1].mxu0  ;;  %v1700_v35 = vadd.f32 %v14178_v5, %v1486_v38 }
 0x184   : > { %v1702_v19 = vadd.f32 %v14182_v6, %v1599_v8  ;;  %v1601_v10 = vpop.f32.mrb[1].mxu1  ;;  %v1701_v12 = vadd.f32 %v14185_v7, %v1488_v48 }
 0x185   : > { %v1703_v13 = vadd.f32 %v14189_v49, %v1601_v10  ;;  %v14240_v56 = vmax.f32 %v1700_v35, 0.0  ;;  %v14313_v35 = vld [vmem:[%s19960_s3 + $0xc00] sm:$0xff]  ;;  %v14323_v10 = vld [vmem:[%s19960_s3 + $0x1050] sm:$0xff] }
 0x186   : > { %v1492_v18 = vpop.f32.mrb[2].mxu0  ;;  %v14242_v30 = vmax.f32 %v1702_v19, 0.0  ;;  %v14256_v11 = vmax.f32 %v1701_v12, 0.0  ;;  %v14318_v19 = vld [vmem:[%s19960_s3 + $0xc20] sm:$0xff]  ;;  %v10401_v12 = vpack.c.bf16 %v14280_v16, %v14275_v46  ;;  %v14398_v16 = vld [vmem:[%s19960_s3 + $0x1090] sm:$0xff] }
 0x187   : > { %v14222_v14 = vmax.f32 %v1703_v13, 0.0  ;;  %v1704_v52 = vadd.f32 %v14178_v5, %v1492_v18  ;;  %v1605_v20 = vpop.f32.mrb[2].mxu1  ;;  %v1494_v21 = vpop.f32.mrb[3].mxu0  ;;  %20054 = vst [vmem:[#allocation14_spill] sm:$0xff] %v14240_v56  ;;  %v2293_v63 = vrot.slane %v14240_v56, 1  ;;  %v10965_v13 = vpack.c.bf16 %v14296_v50, %v14291_v58  ;;  %v14340_v18 = vld [vmem:[%s19960_s3 + $0x1070] sm:$0xff] }
 0x188   : > { %v1706_v25 = vadd.f32 %v14182_v6, %v1605_v20  ;;  %v1705_v31 = vadd.f32 %v14185_v7, %v1494_v21  ;;  %v1607_v33 = vpop.f32.mrb[3].mxu1  ;;  %20055 = vst [vmem:[#allocation15_spill] sm:$0xff] %v14256_v11  ;;  %v2296_v48 = vrot.slane %v14256_v11, 1  ;;  %v14393_v46 = vld [vmem:[%s19960_s3 + $0xc60] sm:$0xff]  ;;  %v10405_v58 = vpack.c.bf16 %v14350_v45, %v14345_v22 }
 0x189   : > { %v14258_v37 = vmax.f32 %v1704_v52, 0.0  ;;  %v1707_v39 = vadd.f32 %v14189_v49, %v1607_v33  ;;  %8525 = vmatprep.mubr.msk.f32.mxu1 %vm2377_vm3, %v14222_v14  ;;  %v10969_v50 = vpack.c.bf16 %v14367_v15, %v14362_v29  ;;  %v14475_v29 = vld [vmem:[%s19960_s3 + $0x10d0] sm:$0xff] }
 0x18a   : > { %v14263_v41 = vmax.f32 %v1705_v31, 0.0  ;;  %3266 = vmatmul.mubr.f32.vlgmr.msra.gmra.mrb[16].mxu1 %v14242_v30  ;;  %v1498_v44 = vpop.f32.mrb[4].mxu0  ;;  %v14299_v17 = vmax.f32 %v1706_v25, 0.0 }
 0x18b   : > { %20056 = vst [vmem:[#allocation16_spill] sm:$0xff] %v14258_v37  ;;  %v2294_v2 = vrot.slane %v14258_v37, 1  ;;  %v14283_v53 = vmax.f32 %v1707_v39, 0.0  ;;  %10956 = vmatpush1.bf16.msra.mxu1 %v10955_v24  ;;  %v1708_v54 = vadd.f32 %v14178_v5, %v1498_v44  ;;  %v1611_v36 = vpop.f32.mrb[4].mxu1  ;;  %v1500_v60 = vpop.f32.mrb[5].mxu0  ;;  %v10403_v44 = vpack.c.bf16 %v14318_v19, %v14313_v35  ;;  %v14440_v19 = vld [vmem:[%s19960_s3 + $0x10d8] sm:$0xff] }
 0x18c   : > { %20057 = vst [vmem:[#allocation17_spill] sm:$0xff] %v14263_v41  ;;  %v1710_v62 = vadd.f32 %v14182_v6, %v1611_v36  ;;  %v1709_v43 = vadd.f32 %v14185_v7, %v1500_v60  ;;  %v1613_v51 = vpop.f32.mrb[5].mxu1  ;;  %10958 = vmatprep.subr.bf16.mxu1 %v10957_v27  ;;  %v2297_v0 = vrot.slane %v14263_v41, 1  ;;  %v20075_v26 = vrot.slane %v14263_v41, 2 }
 0x18d   : > { %v14303_v38 = vmax.f32 %v1708_v54, 0.0  ;;  %v1711_v8 = vadd.f32 %v14189_v49, %v1613_v51  ;;  %8526 = vmatprep.mubr.msk.f32.mxu1 %vm2377_vm3, %v14283_v53  ;;  %v14331_v59 = vsel %vm744_vm0, %v2293_v63, %v2294_v2  ;;  %v14413_v63 = vld [vmem:[%s19960_s3 + $0x10b0] sm:$0xff] }
 0x18e   : > { %v14325_v9 = vmax.f32 %v1709_v43, 0.0  ;;  %3272 = vmatmul.mubr.f32.gmra.mrb[18].mxu1 %v14299_v17  ;;  %v1504_v23 = vpop.f32.mrb[6].mxu0  ;;  %v14356_v24 = vsel %vm744_vm0, %v2296_v48, %v2297_v0  ;;  %v14369_v42 = vmax.f32 %v1710_v62, 0.0  ;;  %v14423_v62 = vld [vmem:[%s19960_s3 + $0xca8] sm:$0xff] }
 0x18f   : > { %20058 = vst [vmem:[#allocation18_spill] sm:$0xff] %v14303_v38  ;;  %v14352_v55 = vmax.f32 %v1711_v8, 0.0  ;;  %10960 = vmatpush1.bf16.msra.mxu1 %v10959_v57  ;;  %v1712_v52 = vadd.f32 %v14178_v5, %v1504_v23  ;;  %v1617_v20 = vpop.f32.mrb[6].mxu1  ;;  %v1506_v21 = vpop.f32.mrb[7].mxu0  ;;  %v2305_v27 = vrot.slane %v14303_v38, 1  ;;  %2458 = vmatprep.mubr.f32.mxu0 %v14356_v24  ;;  %v10967_v57 = vpack.c.bf16 %v14340_v18, %v14323_v10 }
 0x190   : > { %20059 = vst [vmem:[#allocation19_spill] sm:$0xff] %v14325_v9  ;;  %v1714_v25 = vadd.f32 %v14182_v6, %v1617_v20  ;;  %v1713_v31 = vadd.f32 %v14185_v7, %v1506_v21  ;;  %v1619_v33 = vpop.f32.mrb[7].mxu1  ;;  %10962 = vmatprep.subr.bf16.mxu1 %v10961_v40  ;;  %v2307_v32 = vrot.slane %v14325_v9, 1  ;;  %2459 = vmatmul.mubr.f32.vlgmr.msra.gmra.mrb[16].mxu0 %v14331_v59  ;;  %v14388_v40 = vld [vmem:[%s19960_s3 + $0xc40] sm:$0xff] }
 0x191   : > { %v14375_v34 = vmax.f32 %v1712_v52, 0.0  ;;  %v1715_v39 = vadd.f32 %v14189_v49, %v1619_v33  ;;  %8527 = vmatprep.mubr.msk.f32.mxu1 %vm2377_vm3, %v14352_v55  ;;  %10400 = vmatpush1.bf16.msra.mxu0 %v10399_v47  ;;  %v14418_v47 = vld [vmem:[%s19960_s3 + $0xc88] sm:$0xff]  ;;  %v10407_v20 = vpack.c.bf16 %v14393_v46, %v14388_v40  ;;  %v10971_v21 = vpack.c.bf16 %v14413_v63, %v14398_v16  ;;  %v14490_v40 = vld [vmem:[%s19960_s3 + $0x10f0] sm:$0xff] }
 0x192   : > { %v14400_v54 = vmax.f32 %v1713_v31, 0.0  ;;  %3278 = vmatmul.mubr.f32.gmra.mrb[20].mxu1 %v14369_v42  ;;  %v1510_v36 = vpop.f32.mrb[8].mxu0  ;;  %v14404_v60 = vsel %vm744_vm0, %v2297_v0, %v2307_v32  ;;  %v14434_v0 = vsel %vm744_vm0, %v2294_v2, %v2305_v27  ;;  %v14447_v10 = vmax.f32 %v1714_v25, 0.0  ;;  %10402 = vmatprep.subr.bf16.mxu0 %v10401_v12  ;;  %v14465_v12 = vld [vmem:[%s19960_s3 + $0xc80] sm:$0xff] }
 0x193   : > { %20060 = vst [vmem:[#allocation20_spill] sm:$0xff] %v14375_v34  ;;  %v14425_v43 = vmax.f32 %v1715_v39, 0.0  ;;  %10964 = vmatpush1.bf16.msra.mxu1 %v10963_v61  ;;  %v1716_v51 = vadd.f32 %v14178_v5, %v1510_v36  ;;  %v1623_v8 = vpop.f32.mrb[8].mxu1  ;;  %v1512_v48 = vpop.f32.mrb[9].mxu0  ;;  %2464 = vmatprep.mubr.f32.mxu0 %v14404_v60  ;;  %v2313_v35 = vrot.slane %v14375_v34, 1  ;;  %v14445_v61 = vld [vmem:[%s19960_s3 + $0x10f8] sm:$0xff]  ;;  %v10409_v33 = vpack.c.bf16 %v14423_v62, %v14418_v47 }
 0x194   : > { %20061 = vst [vmem:[#allocation21_spill] sm:$0xff] %v14400_v54  ;;  %v1718_v23 = vadd.f32 %v14182_v6, %v1623_v8  ;;  %v1717_v18 = vadd.f32 %v14185_v7, %v1512_v48  ;;  %v1625_v2 = vpop.f32.mrb[9].mxu1  ;;  %10966 = vmatprep.subr.bf16.mxu1 %v10965_v13  ;;  %v2315_v22 = vrot.slane %v14400_v54, 1  ;;  %2465 = vmatmul.mubr.f32.gmra.mrb[18].mxu0 %v14434_v0  ;;  %v14470_v13 = vld [vmem:[%s19960_s3 + $0xca0] sm:$0xff] }
 0x195   : > { %v14452_v45 = vmax.f32 %v1716_v51, 0.0  ;;  %v1719_v52 = vadd.f32 %v14189_v49, %v1625_v2  ;;  %8528 = vmatprep.mubr.msk.f32.mxu1 %vm2377_vm3, %v14425_v43  ;;  %10404 = vmatpush1.bf16.msra.mxu0 %v10403_v44  ;;  %v10973_v39 = vpack.c.bf16 %v14445_v61, %v14440_v19  ;;  %v14495_v44 = vld [vmem:[%s19960_s3 + $0xcc8] sm:$0xff]  ;;  %v14511_v47 = vsel %vm744_vm0, %v2305_v27, %v2313_v35  ;;  %v14517_v51 = vld [vmem:[%s19960_s3 + $0x1118] sm:$0xff] }
 0x196   : > { %v14477_v15 = vmax.f32 %v1717_v18, 0.0  ;;  %3284 = vmatmul.mubr.f32.gmra.mrb[22].mxu1 %v14447_v10  ;;  %v1516_v25 = vpop.f32.mrb[10].mxu0  ;;  %v14481_v31 = vsel %vm744_vm0, %v2307_v32, %v2315_v22  ;;  %v14500_v32 = vld [vmem:[%s19960_s3 + $0xce8] sm:$0xff]  ;;  %v14524_v8 = vmax.f32 %v1718_v23, 0.0  ;;  %10406 = vmatprep.subr.bf16.mxu0 %v10405_v58  ;;  %v10411_v23 = vpack.c.bf16 %v14470_v13, %v14465_v12  ;;  %v14542_v58 = vld [vmem:[%s19960_s3 + $0xcc0] sm:$0xff] }
 0x197   : > { %20062 = vst [vmem:[#allocation22_spill] sm:$0xff] %v14452_v45  ;;  %v14502_v46 = vmax.f32 %v1719_v52, 0.0  ;;  %10968 = vmatpush1.bf16.msra.mxu1 %v10967_v57  ;;  %v1720_v16 = vadd.f32 %v14178_v5, %v1516_v25  ;;  %v1629_v36 = vpop.f32.mrb[10].mxu1  ;;  %v1518_v63 = vpop.f32.mrb[11].mxu0  ;;  %2470 = vmatprep.mubr.f32.mxu0 %v14481_v31  ;;  %v19982_v62 = vrot.slane %v14452_v45, 1  ;;  %v14522_v57 = vld [vmem:[%s19960_s3 + $0x1138] sm:$0xff]  ;;  %v10975_v52 = vpack.c.bf16 %v14490_v40, %v14475_v29 }
 0x198   : > { %20063 = vst [vmem:[#allocation23_spill] sm:$0xff] %v14477_v15  ;;  %v1722_v48 = vadd.f32 %v14182_v6, %v1629_v36  ;;  %v1721_v19 = vadd.f32 %v14185_v7, %v1518_v63  ;;  %v1631_v27 = vpop.f32.mrb[11].mxu1  ;;  %10970 = vmatprep.subr.bf16.mxu1 %v10969_v50  ;;  %v2323_v61 = vrot.slane %v14477_v15, 1  ;;  %2471 = vmatmul.mubr.f32.gmra.mrb[20].mxu0 %v14511_v47  ;;  %v14547_v50 = vld [vmem:[%s19960_s3 + $0xce0] sm:$0xff]  ;;  %v14552_v25 = vld [vmem:[%s19960_s3 + $0x1110] sm:$0xff] }
 0x199   : > { %v14529_v18 = vmax.f32 %v1720_v16, 0.0  ;;  %v1723_v2 = vadd.f32 %v14189_v49, %v1631_v27  ;;  %8529 = vmatprep.mubr.msk.f32.mxu1 %vm2377_vm3, %v14502_v46  ;;  %10408 = vmatpush1.bf16.msra.mxu0 %v10407_v20  ;;  %v10413_v29 = vpack.c.bf16 %v14500_v32, %v14495_v44  ;;  %v10977_v40 = vpack.c.bf16 %v14522_v57, %v14517_v51  ;;  %v14567_v36 = vld [vmem:[%s19960_s3 + $0x1130] sm:$0xff]  ;;  %v14572_v20 = vld [vmem:[%s19960_s3 + $0xd08] sm:$0xff]  ;;  %v14594_v27 = vld [vmem:[%s19960_s3 + $0x1158] sm:$0xff] }
 0x19a   : > { %v14554_v16 = vmax.f32 %v1721_v19, 0.0  ;;  %3290 = vmatmul.mubr.f32.gmra.mrb[24].mxu1 %v14524_v8  ;;  %v1522_v12 = vpop.f32.mrb[12].mxu0  ;;  %v14558_v13 = vsel %vm744_vm0, %v2315_v22, %v2323_v61  ;;  %v14577_v22 = vld [vmem:[%s19960_s3 + $0xd28] sm:$0xff]  ;;  %v14588_v57 = vsel %vm744_vm0, %v2313_v35, %v19982_v62  ;;  %10410 = vmatprep.subr.bf16.mxu0 %v10409_v33 }
 0x19b   : > { %20064 = vst [vmem:[#allocation24_spill] sm:$0xff] %v14529_v18  ;;  %v14579_v63 = vmax.f32 %v1723_v2, 0.0  ;;  %10972 = vmatpush1.bf16.msra.mxu1 %v10971_v21  ;;  %v1724_v44 = vadd.f32 %v14178_v5, %v1522_v12  ;;  %v1635_v32 = vpop.f32.mrb[12].mxu1  ;;  %v1524_v51 = vpop.f32.mrb[13].mxu0  ;;  %2476 = vmatprep.mubr.f32.mxu0 %v14558_v13  ;;  %v14599_v21 = vld [vmem:[%s19960_s3 + $0x1178] sm:$0xff]  ;;  %v14601_v2 = vmax.f32 %v1722_v48, 0.0  ;;  %v10415_v48 = vpack.c.bf16 %v14547_v50, %v14542_v58 }
 0x19c   : > { %20065 = vst [vmem:[#allocation25_spill] sm:$0xff] %v14554_v16  ;;  %v1726_v12 = vadd.f32 %v14182_v6, %v1635_v32  ;;  %v1725_v4 = vadd.f32 %v14185_v7, %v1524_v51  ;;  %v1637_v35 = vpop.f32.mrb[13].mxu1  ;;  %10974 = vmatprep.subr.bf16.mxu1 %v10973_v39  ;;  %v2331_v3 = vrot.slane %v14554_v16, 1  ;;  %2477 = vmatmul.mubr.f32.gmra.mrb[22].mxu0 %v14588_v57 }
 0x19d   : > { %v14606_v62 = vmax.f32 %v1724_v44, 0.0  ;;  %v1727_v19 = vadd.f32 %v14189_v49, %v1637_v35  ;;  %8530 = vmatprep.mubr.msk.f32.mxu1 %vm2377_vm3, %v14579_v63  ;;  %v10979_v32 = vpack.c.bf16 %v14567_v36, %v14552_v25  ;;  %10412 = vmatpush1.bf16.msra.mxu0 %v10411_v23  ;;  %v10417_v44 = vpack.c.bf16 %v14577_v22, %v14572_v20  ;;  %v8421_v35 = vld [vmem:[%s19960_s3 + $0xd00] sm:$0xff] }
 0x19e   : > { %v14616_v51 = vmax.f32 %v1725_v4, 0.0  ;;  %3296 = vmatmul.mubr.f32.gmra.mrb[26].mxu1 %v14601_v2  ;;  %v1528_v33 = vpop.f32.mrb[14].mxu0  ;;  %v14620_v39 = vsel %vm744_vm0, %v2323_v61, %v2331_v3  ;;  %v10981_v58 = vpack.c.bf16 %v14599_v21, %v14594_v27  ;;  %v14629_v50 = vmax.f32 %v1726_v12, 0.0  ;;  %v8425_v27 = vld [vmem:[%s19960_s3 + $0xd20] sm:$0xff]  ;;  %10414 = vmatprep.subr.bf16.mxu0 %v10413_v29 }
 0x19f   : > { %v14631_v4 = vmax.f32 %v1727_v19, 0.0  ;;  %10976 = vmatpush1.bf16.msra.mxu1 %v10975_v52  ;;  %v1728_v23 = vadd.f32 %v14178_v5, %v1528_v33  ;;  %v1641_v25 = vpop.f32.mrb[14].mxu1  ;;  %v1530_v61 = vpop.f32.mrb[15].mxu0  ;;  %2482 = vmatprep.mubr.f32.mxu0 %v14620_v39  ;;  %v20067_v36 = vrot.slane %v14529_v18, 1  ;;  %v20068_v20 = vrot.slane %v14452_v45, 1  ;;  %v8591_v52 = vld [vmem:[%s19960_s3 + $0x1150] sm:$0xff] }
 0x1a0   : > { %20066 = vst [vmem:[#allocation26_spill] sm:$0xff] %v14616_v51  ;;  %v1730_v5 = vadd.f32 %v14182_v6, %v1641_v25  ;;  %v1729_v19 = vadd.f32 %v14185_v7, %v1530_v61  ;;  %v1643_v21 = vpop.f32.mrb[15].mxu1  ;;  %10978 = vmatprep.subr.bf16.mxu1 %v10977_v40  ;;  %v2339_v12 = vrot.slane %v14616_v51, 1  ;;  %v2337_v33 = vrot.slane %v14606_v62, 1  ;;  %v8434_v6 = vld [vmem:[%s19960_s3 + $0xd68] sm:$0xff] }
 0x1a1   : > { %v14640_v22 = vsel %vm744_vm0, %v20068_v20, %v20067_v36  ;;  %v8595_v36 = vld [vmem:[%s19960_s3 + $0x1170] sm:$0xff]  ;;  %v8430_v20 = vld [vmem:[%s19960_s3 + $0xd48] sm:$0xff]  ;;  %v14661_v7 = vmax.f32 %v1728_v23, 0.0  ;;  %v1731_v29 = vadd.f32 %v14189_v49, %v1643_v21  ;;  %8531 = vmatprep.mubr.msk.f32.mxu1 %vm2377_vm3, %v14631_v4  ;;  %10416 = vmatpush1.bf16.msra.mxu0 %v10415_v48  ;;  %v10419_v61 = vpack.c.bf16 %v8425_v27, %v8421_v35  ;;  %v8600_v49 = vld [vmem:[%s19960_s3 + $0x1198] sm:$0xff] }
 0x1a2   : > { %20069 = vst [vmem:[#allocation27_spill] sm:$0xff] %v14640_v22  ;;  %2483 = vmatmul.mubr.f32.gmra.mrb[24].mxu0 %v14640_v22  ;;  %v14667_v40 = vmax.f32 %v1729_v19, 0.0  ;;  %3302 = vmatmul.mubr.f32.gmra.mrb[28].mxu1 %v14629_v50  ;;  %v14671_v25 = vsel %vm744_vm0, %v2331_v3, %v2339_v12  ;;  %v8604_v23 = vld [vmem:[%s19960_s3 + $0x11b8] sm:$0xff]  ;;  %v10983_v48 = vpack.c.bf16 %v8595_v36, %v8591_v52  ;;  %v3566_v3 = vrot.slane %v14256_v11, 2  ;;  %v8429_v35 = vld [vmem:[%s19960_s3 + $0xd40] sm:$0xff] }
 0x1a3   : > { %20070 = vst [vmem:[#allocation28_spill] sm:$0xff] %v14661_v7  ;;  %20072 = vst [vmem:[#allocation30_spill] sm:$0xff] %v14671_v25  ;;  %v14680_v21 = vmax.f32 %v1731_v29, 0.0  ;;  %10980 = vmatpush1.bf16.msra.mxu1 %v10979_v32  ;;  %2488 = vmatprep.mubr.f32.mxu0 %v14671_v25  ;;  %v10421_v19 = vpack.c.bf16 %v8434_v6, %v8430_v20  ;;  %v8433_v27 = vld [vmem:[%s19960_s3 + $0xd60] sm:$0xff]  ;;  %v8599_v29 = vld [vmem:[%s19960_s3 + $0x1190] sm:$0xff]  ;;  %v14693_v28 = vmax.f32 %v1730_v5, 0.0 }
 0x1a4   : > { %20071 = vst [vmem:[#allocation29_spill] sm:$0xff] %v14667_v40  ;;  %10418 = vmatprep.subr.bf16.mxu0 %v10417_v44  ;;  %v20073_v32 = vrot.slane %v14529_v18, 1  ;;  %10982 = vmatprep.subr.bf16.mxu1 %v10981_v58  ;;  %v14701_v36 = vrot.slane %v14667_v40, 1  ;;  %v14704_v20 = vrot.slane %v14661_v7, 1  ;;  %v8603_v6 = vld [vmem:[%s19960_s3 + $0x11b0] sm:$0xff]  ;;  %v8438_v44 = vld [vmem:[%s19960_s3 + $0xd88] sm:$0xff]  ;;  %v10985_v58 = vpack.c.bf16 %v8604_v23, %v8600_v49 }
 0x1a5   : > { %v8442_v5 = vld [vmem:[%s19960_s3 + $0xda8] sm:$0xff]  ;;  %8532 = vmatprep.mubr.msk.f32.mxu1 %vm2377_vm3, %v14680_v21  ;;  %10420 = vmatpush1.bf16.msra.mxu0 %v10419_v61  ;;  %v14728_v11 = vsel %vm1365_vm2, %v3566_v3, %v20075_v26  ;;  %v10423_v49 = vpack.c.bf16 %v8433_v27, %v8429_v35  ;;  %v10987_v23 = vpack.c.bf16 %v8603_v6, %v8599_v29  ;;  %v8437_v61 = vld [vmem:[%s19960_s3 + $0xd80] sm:$0xff]  ;;  %v8607_v26 = vld [vmem:[%s19960_s3 + $0x11d0] sm:$0xff]  ;;  %v2302_v6 = vrot.slane %v14222_v14, 1 }
 0x1a6   : > { %v14698_v52 = vsel %vm744_vm0, %v20073_v32, %v2337_v33  ;;  %v8608_v32 = vld [vmem:[%s19960_s3 + $0x11d8] sm:$0xff]  ;;  %3308 = vmatmul.mubr.f32.gmra.mrb[30].mxu1 %v14693_v28  ;;  %20076 = vst [vmem:[#allocation32_spill] sm:$0xff] %v14728_v11  ;;  %v10425_v25 = vpack.c.bf16 %v8442_v5, %v8438_v44  ;;  %v8441_v22 = vld [vmem:[%s19960_s3 + $0xda0] sm:$0xff]  ;;  %10422 = vmatprep.subr.bf16.mxu0 %v10421_v19  ;;  %v8611_v3 = vld [vmem:[%s19960_s3 + $0x11f0] sm:$0xff]  ;;  %v19994_v19 = vrot.slane %v14283_v53, 1 }
 0x1a7   : > { %20074 = vst [vmem:[#allocation31_spill] sm:$0xff] %v14698_v52  ;;  %2489 = vmatmul.mubr.f32.gmra.mrb[26].mxu0 %v14698_v52  ;;  %v14732_v52 = vsel %vm744_vm0, %v2339_v12, %v14701_v36  ;;  %10984 = vmatpush1.bf16.msra.mxu1 %v10983_v48  ;;  %v14747_v12 = vsel %vm744_vm0, %v2337_v33, %v14704_v20  ;;  %v8446_v35 = vld [vmem:[%s19960_s3 + $0xdc8] sm:$0xff]  ;;  %v8620_v33 = vld [vmem:[%s19960_s3 + $0x1238] sm:$0xff] }
 0x1a8   : > { %3953 = vmatprep.mubr.f32.mxu1 %v14728_v11  ;;  %2494 = vmatprep.mubr.f32.mxu0 %v14732_v52  ;;  %v10989_v48 = vpack.c.bf16 %v8612_v1, %v8608_v32  ;;  %v8450_v27 = vld [vmem:[%s19960_s3 + $0xde8] sm:$0xff]  ;;  %v8616_v1 = vld [vmem:[%s19960_s3 + $0x1218] sm:$0xff]  ;;  %v10427_v29 = vpack.c.bf16 %v8441_v22, %v8437_v61  ;;  %v10991_v44 = vpack.c.bf16 %v8611_v3, %v8607_v26  ;;  %v8449_v32 = vld [vmem:[%s19960_s3 + $0xde0] sm:$0xff] }
 0x1a9   : > { %10986 = vmatprep.subr.bf16.mxu1 %v10985_v58  ;;  %10424 = vmatpush1.bf16.msra.mxu0 %v10423_v49  ;;  %v10429_v5 = vpack.c.bf16 %v8450_v27, %v8446_v35  ;;  %v8445_v58 = vld [vmem:[%s19960_s3 + $0xdc0] sm:$0xff]  ;;  %v8615_v49 = vld [vmem:[%s19960_s3 + $0x1210] sm:$0xff]  ;;  %v10993_v22 = vpack.c.bf16 %v8620_v33, %v8616_v1  ;;  %v8458_v61 = vld [vmem:[%s19960_s3 + $0xe28] sm:$0xff]  ;;  %v14790_v26 = vsel %vm744_vm0, %v2302_v6, %v19994_v19 }
 0x1aa   : > { %10426 = vmatprep.subr.bf16.mxu0 %v10425_v25  ;;  %v8619_v25 = vld [vmem:[%s19960_s3 + $0x1230] sm:$0xff]  ;;  %v8628_v3 = vld [vmem:[%s19960_s3 + $0x1278] sm:$0xff]  ;;  %v10431_v35 = vpack.c.bf16 %v8449_v32, %v8445_v58  ;;  %v8453_v33 = vld [vmem:[%s19960_s3 + $0xe00] sm:$0xff] }
 0x1ab   : > { %2495 = vmatmul.mubr.f32.gmra.mrb[28].mxu0 %v14747_v12  ;;  %10988 = vmatpush1.bf16.msra.mxu1 %v10987_v23  ;;  %v8454_v23 = vld [vmem:[%s19960_s3 + $0xe08] sm:$0xff]  ;;  %v10995_v27 = vpack.c.bf16 %v8619_v25, %v8615_v49  ;;  %v8457_v6 = vld [vmem:[%s19960_s3 + $0xe20] sm:$0xff]  ;;  %v8632_v32 = vld [vmem:[%s19960_s3 + $0x1298] sm:$0xff] }
 0x1ac   : > { %2500 = vmatprep.mubr.f32.mxu0 %v14701_v36  ;;  %10990 = vmatprep.subr.bf16.mxu1 %v10989_v48  ;;  %v8624_v48 = vld [vmem:[%s19960_s3 + $0x1258] sm:$0xff]  ;;  %v10433_v1 = vpack.c.bf16 %v8458_v61, %v8454_v23  ;;  %v8466_v58 = vld [vmem:[%s19960_s3 + $0xe68] sm:$0xff]  ;;  %v8461_v61 = vld [vmem:[%s19960_s3 + $0xe40] sm:$0xff] }
 0x1ad   : > { %10428 = vmatpush1.bf16.msra.mxu0 %v10427_v29  ;;  %v8623_v29 = vld [vmem:[%s19960_s3 + $0x1250] sm:$0xff]  ;;  %v10997_v19 = vpack.c.bf16 %v8628_v3, %v8624_v48  ;;  %v8636_v49 = vld [vmem:[%s19960_s3 + $0x12b8] sm:$0xff]  ;;  %v8465_v48 = vld [vmem:[%s19960_s3 + $0xe60] sm:$0xff] }
 0x1ae   : > { %10430 = vmatprep.subr.bf16.mxu0 %v10429_v5  ;;  %v8462_v5 = vld [vmem:[%s19960_s3 + $0xe48] sm:$0xff]  ;;  %v8631_v3 = vld [vmem:[%s19960_s3 + $0x1290] sm:$0xff]  ;;  %v11001_v11 = vpack.c.bf16 %v8636_v49, %v8632_v32 }
 0x1af   : > { %2501 = vmatmul.mubr.f32.gmra.mrb[30].mxu0 %v14704_v20  ;;  %10992 = vmatpush1.bf16.msra.mxu1 %v10991_v44  ;;  %v8627_v44 = vld [vmem:[%s19960_s3 + $0x1270] sm:$0xff]  ;;  %v10437_v23 = vpack.c.bf16 %v8466_v58, %v8462_v5  ;;  %v8469_v5 = vld [vmem:[%s19960_s3 + $0xe80] sm:$0xff] }
 0x1b0   : > { %8501 = vmatprep.mubr.msk.f32.mxu0 %vm2377_vm3, %v14790_v26  ;;  %10994 = vmatprep.subr.bf16.mxu1 %v10993_v22  ;;  %v10435_v22 = vpack.c.bf16 %v8457_v6, %v8453_v33  ;;  %v10999_v25 = vpack.c.bf16 %v8627_v44, %v8623_v29  ;;  %v8640_v33 = vld [vmem:[%s19960_s3 + $0x12d8] sm:$0xff]  ;;  %v10439_v6 = vpack.c.bf16 %v8465_v48, %v8461_v61  ;;  %v8473_v58 = vld [vmem:[%s19960_s3 + $0xea0] sm:$0xff]  ;;  %v8639_v32 = vld [vmem:[%s19960_s3 + $0x12d0] sm:$0xff] }
 0x1b1   : > { %10432 = vmatpush1.bf16.msra.mxu0 %v10431_v35  ;;  %v8635_v35 = vld [vmem:[%s19960_s3 + $0x12b0] sm:$0xff]  ;;  %v8648_v61 = vld [vmem:[%s19960_s3 + $0x1318] sm:$0xff]  ;;  %v10443_v48 = vpack.c.bf16 %v8473_v58, %v8469_v5 }
 0x1b2   : > { %10434 = vmatprep.subr.bf16.mxu0 %v10433_v1  ;;  %v8474_v1 = vld [vmem:[%s19960_s3 + $0xea8] sm:$0xff]  ;;  %v11003_v29 = vpack.c.bf16 %v8635_v35, %v8631_v3  ;;  %v8656_v5 = vld [vmem:[%s19960_s3 + $0x1358] sm:$0xff] }
 0x1b3   : > { %10996 = vmatpush1.bf16.msra.mxu1 %v10995_v27  ;;  %v8470_v27 = vld [vmem:[%s19960_s3 + $0xe88] sm:$0xff]  ;;  %v8660_v58 = vld [vmem:[%s19960_s3 + $0x1378] sm:$0xff] }
 0x1b4   : > { %10998 = vmatprep.subr.bf16.mxu1 %v10997_v19  ;;  %v8644_v19 = vld [vmem:[%s19960_s3 + $0x12f8] sm:$0xff]  ;;  %v10441_v44 = vpack.c.bf16 %v8474_v1, %v8470_v27  ;;  %v8477_v27 = vld [vmem:[%s19960_s3 + $0xec0] sm:$0xff] }
 0x1b5   : > { %10436 = vmatpush1.bf16.msra.mxu0 %v10435_v22  ;;  %v11005_v49 = vpack.c.bf16 %v8644_v19, %v8640_v33  ;;  %v8643_v22 = vld [vmem:[%s19960_s3 + $0x12f0] sm:$0xff]  ;;  %v8481_v1 = vld [vmem:[%s19960_s3 + $0xee0] sm:$0xff] }
 0x1b6   : > { %10438 = vmatprep.subr.bf16.mxu0 %v10437_v23  ;;  %v8482_v23 = vld [vmem:[%s19960_s3 + $0xee8] sm:$0xff]  ;;  %v11007_v3 = vpack.c.bf16 %v8643_v22, %v8639_v32  ;;  %v8647_v33 = vld [vmem:[%s19960_s3 + $0x1310] sm:$0xff]  ;;  %v10447_v32 = vpack.c.bf16 %v8481_v1, %v8477_v27  ;;  %v8664_v27 = vld [vmem:[%s19960_s3 + $0x1398] sm:$0xff] }
 0x1b7   : > { %11000 = vmatpush1.bf16.msra.mxu1 %v10999_v25  ;;  %v8478_v25 = vld [vmem:[%s19960_s3 + $0xec8] sm:$0xff]  ;;  %v8668_v1 = vld [vmem:[%s19960_s3 + $0x13b8] sm:$0xff] }
 0x1b8   : > { %11002 = vmatprep.subr.bf16.mxu1 %v11001_v11  ;;  %v8652_v11 = vld [vmem:[%s19960_s3 + $0x1338] sm:$0xff]  ;;  %v10445_v35 = vpack.c.bf16 %v8482_v23, %v8478_v25  ;;  %v8485_v25 = vld [vmem:[%s19960_s3 + $0xf00] sm:$0xff] }
 0x1b9   : > { %10440 = vmatpush1.bf16.msra.mxu0 %v10439_v6  ;;  %v11009_v19 = vpack.c.bf16 %v8652_v11, %v8648_v61  ;;  %v8651_v6 = vld [vmem:[%s19960_s3 + $0x1330] sm:$0xff]  ;;  %v8489_v23 = vld [vmem:[%s19960_s3 + $0xf20] sm:$0xff]  ;;  %v11013_v11 = vpack.c.bf16 %v8660_v58, %v8656_v5  ;;  %v11017_v5 = vpack.c.bf16 %v8668_v1, %v8664_v27 }
 0x1ba   : > { %10442 = vmatprep.subr.bf16.mxu0 %v10441_v44  ;;  %v8490_v44 = vld [vmem:[%s19960_s3 + $0xf28] sm:$0xff]  ;;  %v8655_v61 = vld [vmem:[%s19960_s3 + $0x1350] sm:$0xff] }
 0x1bb   : > { %11004 = vmatpush1.bf16.msra.mxu1 %v11003_v29  ;;  %v8486_v29 = vld [vmem:[%s19960_s3 + $0xf08] sm:$0xff]  ;;  %v8663_v58 = vld [vmem:[%s19960_s3 + $0x1390] sm:$0xff] }
 0x1bc   : > { %11006 = vmatprep.subr.bf16.mxu1 %v11005_v49  ;;  %v11011_v49 = vpack.c.bf16 %v8651_v6, %v8647_v33  ;;  %v10449_v22 = vpack.c.bf16 %v8490_v44, %v8486_v29  ;;  %v10451_v33 = vpack.c.bf16 %v8489_v23, %v8485_v25  ;;  %v8493_v29 = vld [vmem:[%s19960_s3 + $0xf40] sm:$0xff]  ;;  %v8260_v25 = vld [vmem:[%s19960_s3 + $0x7f8] sm:$0xff]  ;;  %v8255_v27 = vld [vmem:[%s19960_s3 + $0x7d0] sm:$0xff] }
 0x1bd   : > { %10444 = vmatpush1.bf16.msra.mxu0 %v10443_v48  ;;  %v8659_v48 = vld [vmem:[%s19960_s3 + $0x1370] sm:$0xff]  ;;  %v8497_v44 = vld [vmem:[%s19960_s3 + $0xf60] sm:$0xff]  ;;  %v8672_v23 = vld [vmem:[%s19960_s3 + $0x13d8] sm:$0xff] }
 0x1be   : > { %10446 = vmatprep.subr.bf16.mxu0 %v10445_v35  ;;  %v8498_v35 = vld [vmem:[%s19960_s3 + $0xf68] sm:$0xff]  ;;  %v8259_v1 = vld [vmem:[%s19960_s3 + $0x7f0] sm:$0xff] }
 0x1bf   : > { %11008 = vmatpush1.bf16.msra.mxu1 %v11007_v3  ;;  %v8494_v3 = vld [vmem:[%s19960_s3 + $0xf48] sm:$0xff] }
 0x1c0   : > { %11010 = vmatprep.subr.bf16.mxu1 %v11009_v19  ;;  %v11015_v19 = vpack.c.bf16 %v8659_v48, %v8655_v61  ;;  %v10453_v6 = vpack.c.bf16 %v8498_v35, %v8494_v3  ;;  %v8676_v61 = vld [vmem:[%s19960_s3 + $0x13f8] sm:$0xff]  ;;  %v3577_v48 = vrot.slane %v14325_v9, 2  ;;  %v3563_v3 = vrot.slane %v14240_v56, 2 }
 0x1c1   : > { %10448 = vmatpush1.bf16.msra.mxu0 %v10447_v32  ;;  %v8667_v32 = vld [vmem:[%s19960_s3 + $0x13b0] sm:$0xff]  ;;  %v8680_v9 = vld [vmem:[%s19960_s3 + $0x1418] sm:$0xff] }
 0x1c2   : > { %10450 = vmatprep.subr.bf16.mxu0 %v10449_v22  ;;  %v3564_v22 = vrot.slane %v14258_v37, 2  ;;  %v11019_v35 = vpack.c.bf16 %v8667_v32, %v8663_v58  ;;  %v2300_v37 = vrot.slane %v14299_v17, 1  ;;  %v2311_v58 = vrot.slane %v14352_v55, 1  ;;  %v8671_v32 = vld [vmem:[%s19960_s3 + $0x13d0] sm:$0xff]  ;;  %v8684_v56 = vld [vmem:[%s19960_s3 + $0x1438] sm:$0xff] }
 0x1c3   : > { %11012 = vmatpush1.bf16.msra.mxu1 %v11011_v49  ;;  %v8256_v49 = vld [vmem:[%s19960_s3 + $0x7d8] sm:$0xff] }
 0x1c4   : > { %11014 = vmatprep.subr.bf16.mxu1 %v11013_v11  ;;  %v10455_v11 = vpack.c.bf16 %v8497_v44, %v8493_v29  ;;  %v11021_v29 = vpack.c.bf16 %v8676_v61, %v8672_v23  ;;  %v8264_v44 = vld [vmem:[%s19960_s3 + $0x818] sm:$0xff]  ;;  %v10459_v61 = vpack.c.bf16 %v8259_v1, %v8255_v27  ;;  %v8263_v27 = vld [vmem:[%s19960_s3 + $0x810] sm:$0xff] }
 0x1c5   : > { %10452 = vmatpush1.bf16.msra.mxu0 %v10451_v33  ;;  %v10457_v33 = vpack.c.bf16 %v8260_v25, %v8256_v49  ;;  %v2299_v49 = vrot.slane %v14242_v30, 1  ;;  %v20078_v25 = vrot.slane %v14263_v41, 2  ;;  %v8267_v1 = vld [vmem:[%s19960_s3 + $0x830] sm:$0xff]  ;;  %v3583_v41 = vrot.slane %v14375_v34, 2 }
 0x1c6   : > { %10454 = vmatprep.subr.bf16.mxu0 %v10453_v6  ;;  %v14961_v6 = vsel %vm1365_vm2, %v3563_v3, %v3564_v22  ;;  %v3575_v3 = vrot.slane %v14303_v38, 2 }
 0x1c7   : > { %11016 = vmatpush1.bf16.msra.mxu1 %v11015_v19  ;;  %v8268_v19 = vld [vmem:[%s19960_s3 + $0x838] sm:$0xff]  ;;  %20077 = vst [vmem:[#allocation33_spill] sm:$0xff] %v14961_v6  ;;  %v14975_v23 = vsel %vm1365_vm2, %v20078_v25, %v3577_v48  ;;  %v14993_v25 = vsel %vm744_vm0, %v2299_v49, %v2300_v37 }
 0x1c8   : > { %11018 = vmatprep.subr.bf16.mxu1 %v11017_v5  ;;  %v8675_v5 = vld [vmem:[%s19960_s3 + $0x13f0] sm:$0xff]  ;;  %20079 = vst [vmem:[#allocation34_spill] sm:$0xff] %v14975_v23  ;;  %20080 = vst [vmem:[#allocation35_spill] sm:$0xff] %v14993_v25 }
 0x1c9   : > { %10456 = vmatpush1.bf16.msra.mxu0 %v10455_v11  ;;  %v3585_v11 = vrot.slane %v14400_v54, 2  ;;  %v11023_v38 = vpack.c.bf16 %v8675_v5, %v8671_v32  ;;  %v8679_v32 = vld [vmem:[%s19960_s3 + $0x1410] sm:$0xff]  ;;  %v15018_v54 = vsel %vm1365_vm2, %v3564_v22, %v3575_v3  ;;  %v3593_v22 = vrot.slane %v14477_v15, 2 }
 0x1ca   : > { %3954 = vmatmul.mubr.f32.vlgmr.msra.gmra.mrb[16].mxu1 %v14961_v6  ;;  %v10461_v6 = vpack.c.bf16 %v8268_v19, %v8264_v44  ;;  %10458 = vmatprep.subr.bf16.mxu0 %v10457_v33  ;;  %v8276_v44 = vld [vmem:[%s19960_s3 + $0x878] sm:$0xff]  ;;  %v20081_v19 = vrot.slane %v14283_v53, 1  ;;  %v2319_v33 = vrot.slane %v14425_v43, 1  ;;  %v8683_v5 = vld [vmem:[%s19960_s3 + $0x1430] sm:$0xff]  ;;  %20082 = vst [vmem:[#allocation36_spill] sm:$0xff] %v15018_v54 }
 0x1cb   : > { %3959 = vmatprep.mubr.f32.mxu1 %v14975_v23  ;;  %11020 = vmatpush1.bf16.msra.mxu1 %v11019_v35  ;;  %v2309_v23 = vrot.slane %v14369_v42, 1  ;;  %v8272_v35 = vld [vmem:[%s19960_s3 + $0x858] sm:$0xff]  ;;  %v15074_v34 = vsel %vm1365_vm2, %v3585_v11, %v3593_v22 }
 0x1cc   : > { %11022 = vmatprep.subr.bf16.mxu1 %v11021_v29  ;;  %2572 = vmatmul.mubr.f32.vlgmr.msra.gmra.mrb[16].mxu0 %v14993_v25  ;;  %v15006_v49 = vsel %vm744_vm0, %v20081_v19, %v2311_v58  ;;  %v11025_v29 = vpack.c.bf16 %v8684_v56, %v8680_v9  ;;  %v10463_v19 = vpack.c.bf16 %v8267_v1, %v8263_v27  ;;  %v8688_v56 = vld [vmem:[%s19960_s3 + $0x1458] sm:$0xff]  ;;  %v8271_v27 = vld [vmem:[%s19960_s3 + $0x850] sm:$0xff] }
 0x1cd   : > { %8502 = vmatprep.mubr.msk.f32.mxu0 %vm2377_vm3, %v15006_v49  ;;  %10460 = vmatpush1.bf16.msra.mxu0 %v10459_v61  ;;  %v8692_v9 = vld [vmem:[%s19960_s3 + $0x1478] sm:$0xff]  ;;  %v15029_v25 = vsel %vm1365_vm2, %v3577_v48, %v3585_v11  ;;  %v10465_v61 = vpack.c.bf16 %v8276_v44, %v8272_v35  ;;  %v8275_v1 = vld [vmem:[%s19960_s3 + $0x870] sm:$0xff]  ;;  %v11027_v48 = vpack.c.bf16 %v8683_v5, %v8679_v32 }
 0x1ce   : > { %3960 = vmatmul.mubr.f32.gmra.mrb[18].mxu1 %v15018_v54  ;;  %20083 = vst [vmem:[#allocation37_spill] sm:$0xff] %v15029_v25  ;;  %10462 = vmatprep.subr.bf16.mxu0 %v10461_v6  ;;  %v15040_v54 = vsel %vm744_vm0, %v2300_v37, %v2309_v23  ;;  %v2317_v6 = vrot.slane %v14447_v10, 1  ;;  %v8280_v35 = vld [vmem:[%s19960_s3 + $0x898] sm:$0xff]  ;;  %v15051_v15 = vsel %vm744_vm0, %v2311_v58, %v2319_v33  ;;  %v2327_v37 = vrot.slane %v14502_v46, 1  ;;  %v8687_v32 = vld [vmem:[%s19960_s3 + $0x1450] sm:$0xff] }
 0x1cf   : > { %3965 = vmatprep.mubr.f32.mxu1 %v15029_v25  ;;  %11024 = vmatpush1.bf16.msra.mxu1 %v11023_v38  ;;  %v8284_v44 = vld [vmem:[%s19960_s3 + $0x8b8] sm:$0xff]  ;;  %v11029_v38 = vpack.c.bf16 %v8692_v9, %v8688_v56  ;;  %v8691_v5 = vld [vmem:[%s19960_s3 + $0x1470] sm:$0xff]  ;;  %v15063_v25 = vsel %vm1365_vm2, %v3575_v3, %v3583_v41  ;;  %v10467_v58 = vpack.c.bf16 %v8275_v1, %v8271_v27  ;;  %v3601_v3 = vrot.slane %v14554_v16, 2 }
 0x1d0   : > { %2578 = vmatmul.mubr.f32.gmra.mrb[18].mxu0 %v15040_v54  ;;  %11026 = vmatprep.subr.bf16.mxu1 %v11025_v29  ;;  %20084 = vst [vmem:[#allocation38_spill] sm:$0xff] %v15063_v25  ;;  %v3591_v29 = vrot.slane %v14452_v45, 2  ;;  %v8696_v56 = vld [vmem:[%s19960_s3 + $0x1498] sm:$0xff]  ;;  %20085 = vst [vmem:[#allocation39_spill] sm:$0xff] %v15074_v34  ;;  %v8279_v27 = vld [vmem:[%s19960_s3 + $0x890] sm:$0xff]  ;;  %v11031_v11 = vpack.c.bf16 %v8691_v5, %v8687_v32  ;;  %v15096_v16 = vsel %vm744_vm0, %v2319_v33, %v2327_v37 }
 0x1d1   : > { %8503 = vmatprep.mubr.msk.f32.mxu0 %vm2377_vm3, %v15051_v15  ;;  %10464 = vmatpush1.bf16.msra.mxu0 %v10463_v19  ;;  %v8700_v9 = vld [vmem:[%s19960_s3 + $0x14b8] sm:$0xff]  ;;  %v10469_v19 = vpack.c.bf16 %v8284_v44, %v8280_v35  ;;  %v8283_v1 = vld [vmem:[%s19960_s3 + $0x8b0] sm:$0xff]  ;;  %v15119_v45 = vsel %vm1365_vm2, %v3593_v22, %v3601_v3 }
 0x1d2   : > { %3966 = vmatmul.mubr.f32.gmra.mrb[20].mxu1 %v15063_v25  ;;  %10466 = vmatprep.subr.bf16.mxu0 %v10465_v61  ;;  %v15085_v25 = vsel %vm744_vm0, %v2309_v23, %v2317_v6  ;;  %v2325_v61 = vrot.slane %v14524_v8, 1  ;;  %v8288_v35 = vld [vmem:[%s19960_s3 + $0x8d8] sm:$0xff]  ;;  %v2335_v23 = vrot.slane %v14579_v63, 1  ;;  %v8695_v32 = vld [vmem:[%s19960_s3 + $0x1490] sm:$0xff]  ;;  %v10471_v33 = vpack.c.bf16 %v8283_v1, %v8279_v27  ;;  %20087 = vst [vmem:[#allocation41_spill] sm:$0xff] %v15119_v45 }
 0x1d3   : > { %3971 = vmatprep.mubr.f32.mxu1 %v15074_v34  ;;  %11028 = vmatpush1.bf16.msra.mxu1 %v11027_v48  ;;  %v8292_v44 = vld [vmem:[%s19960_s3 + $0x8f8] sm:$0xff]  ;;  %v11033_v48 = vpack.c.bf16 %v8700_v9, %v8696_v56  ;;  %v8699_v5 = vld [vmem:[%s19960_s3 + $0x14b0] sm:$0xff]  ;;  %v15108_v34 = vsel %vm1365_vm2, %v3583_v41, %v3591_v29  ;;  %v3609_v41 = vrot.slane %v14616_v51, 2 }
 0x1d4   : > { %2584 = vmatmul.mubr.f32.gmra.mrb[20].mxu0 %v15085_v25  ;;  %11030 = vmatprep.subr.bf16.mxu1 %v11029_v38  ;;  %20086 = vst [vmem:[#allocation40_spill] sm:$0xff] %v15108_v34  ;;  %v3599_v38 = vrot.slane %v14529_v18, 2  ;;  %v8704_v56 = vld [vmem:[%s19960_s3 + $0x14d8] sm:$0xff]  ;;  %v8287_v27 = vld [vmem:[%s19960_s3 + $0x8d0] sm:$0xff]  ;;  %v11035_v22 = vpack.c.bf16 %v8699_v5, %v8695_v32  ;;  %v15141_v51 = vsel %vm744_vm0, %v2327_v37, %v2335_v23 }
 0x1d5   : > { %8504 = vmatprep.mubr.msk.f32.mxu0 %vm2377_vm3, %v15096_v16  ;;  %10468 = vmatpush1.bf16.msra.mxu0 %v10467_v58  ;;  %v8708_v9 = vld [vmem:[%s19960_s3 + $0x14f8] sm:$0xff]  ;;  %v10473_v58 = vpack.c.bf16 %v8292_v44, %v8288_v35  ;;  %v8291_v1 = vld [vmem:[%s19960_s3 + $0x8f0] sm:$0xff]  ;;  %v15164_v18 = vsel %vm1365_vm2, %v3601_v3, %v3609_v41 }
 0x1d6   : > { %3972 = vmatmul.mubr.f32.gmra.mrb[22].mxu1 %v15108_v34  ;;  %10470 = vmatprep.subr.bf16.mxu0 %v10469_v19  ;;  %v15130_v34 = vsel %vm744_vm0, %v2317_v6, %v2325_v61  ;;  %v2333_v19 = vrot.slane %v14601_v2, 1  ;;  %v8296_v35 = vld [vmem:[%s19960_s3 + $0x918] sm:$0xff]  ;;  %v2343_v6 = vrot.slane %v14631_v4, 1  ;;  %v8703_v32 = vld [vmem:[%s19960_s3 + $0x14d0] sm:$0xff]  ;;  %v10475_v37 = vpack.c.bf16 %v8291_v1, %v8287_v27  ;;  %20089 = vst [vmem:[#allocation43_spill] sm:$0xff] %v15164_v18 }
 0x1d7   : > { %3977 = vmatprep.mubr.f32.mxu1 %v15119_v45  ;;  %11032 = vmatpush1.bf16.msra.mxu1 %v11031_v11  ;;  %v8300_v44 = vld [vmem:[%s19960_s3 + $0x938] sm:$0xff]  ;;  %v11037_v11 = vpack.c.bf16 %v8708_v9, %v8704_v56  ;;  %v8707_v5 = vld [vmem:[%s19960_s3 + $0x14f0] sm:$0xff]  ;;  %v15153_v45 = vsel %vm1365_vm2, %v3591_v29, %v3599_v38  ;;  %v15167_v29 = vrot.slane %v14667_v40, 2 }
 0x1d8   : > { %2590 = vmatmul.mubr.f32.gmra.mrb[22].mxu0 %v15130_v34  ;;  %11034 = vmatprep.subr.bf16.mxu1 %v11033_v48  ;;  %20088 = vst [vmem:[#allocation42_spill] sm:$0xff] %v15153_v45  ;;  %v3607_v48 = vrot.slane %v14606_v62, 2  ;;  %v8712_v56 = vld [vmem:[%s19960_s3 + $0x1518] sm:$0xff]  ;;  %v8295_v27 = vld [vmem:[%s19960_s3 + $0x910] sm:$0xff]  ;;  %v11039_v3 = vpack.c.bf16 %v8707_v5, %v8703_v32  ;;  %v15188_v40 = vsel %vm744_vm0, %v2335_v23, %v2343_v6 }
 0x1d9   : > { %8505 = vmatprep.mubr.msk.f32.mxu0 %vm2377_vm3, %v15141_v51  ;;  %10472 = vmatpush1.bf16.msra.mxu0 %v10471_v33  ;;  %v8716_v9 = vld [vmem:[%s19960_s3 + $0x1538] sm:$0xff]  ;;  %20090 = vst [vmem:[#allocation44_spill] sm:$0xff] %v15167_v29  ;;  %v10477_v33 = vpack.c.bf16 %v8300_v44, %v8296_v35  ;;  %v8299_v1 = vld [vmem:[%s19960_s3 + $0x930] sm:$0xff] }
 0x1da   : > { %3978 = vmatmul.mubr.f32.gmra.mrb[24].mxu1 %v15153_v45  ;;  %10474 = vmatprep.subr.bf16.mxu0 %v10473_v58  ;;  %v15177_v45 = vsel %vm744_vm0, %v2325_v61, %v2333_v19  ;;  %v2341_v58 = vrot.slane %v14629_v50, 1  ;;  %v8304_v35 = vld [vmem:[%s19960_s3 + $0x958] sm:$0xff]  ;;  %v15191_v61 = vrot.slane %v14680_v21, 1  ;;  %v8711_v32 = vld [vmem:[%s19960_s3 + $0x1510] sm:$0xff]  ;;  %v15202_v23 = vsel %vm1365_vm2, %v3599_v38, %v3607_v48 }
 0x1db   : > { %3983 = vmatprep.mubr.f32.mxu1 %v15164_v18  ;;  %11036 = vmatpush1.bf16.msra.mxu1 %v11035_v22  ;;  %v8308_v44 = vld [vmem:[%s19960_s3 + $0x978] sm:$0xff]  ;;  %v11041_v22 = vpack.c.bf16 %v8716_v9, %v8712_v56  ;;  %v8715_v5 = vld [vmem:[%s19960_s3 + $0x1530] sm:$0xff]  ;;  %20091 = vst [vmem:[#allocation45_spill] sm:$0xff] %v15202_v23  ;;  %v15205_v18 = vrot.slane %v14661_v7, 2 }
 0x1dc   : > { %2596 = vmatmul.mubr.f32.gmra.mrb[24].mxu0 %v15177_v45  ;;  %11038 = vmatprep.subr.bf16.mxu1 %v11037_v11  ;;  %v10479_v11 = vpack.c.bf16 %v8299_v1, %v8295_v27  ;;  %v8720_v56 = vld [vmem:[%s19960_s3 + $0x1558] sm:$0xff]  ;;  %v10481_v38 = vpack.c.bf16 %v8308_v44, %v8304_v35  ;;  %v8303_v27 = vld [vmem:[%s19960_s3 + $0x950] sm:$0xff]  ;;  %v15226_v7 = vsel %vm744_vm0, %v2333_v19, %v2341_v58 }
 0x1dd   : > { %8506 = vmatprep.mubr.msk.f32.mxu0 %vm2377_vm3, %v15188_v40  ;;  %10476 = vmatpush1.bf16.msra.mxu0 %v10475_v37  ;;  %v8724_v9 = vld [vmem:[%s19960_s3 + $0x1578] sm:$0xff]  ;;  %v15216_v37 = vsel %vm1365_vm2, %v3609_v41, %v15167_v29  ;;  %v8307_v1 = vld [vmem:[%s19960_s3 + $0x970] sm:$0xff]  ;;  %v15229_v41 = vrot.slane %v14693_v28, 1 }
 0x1de   : > { %3984 = vmatmul.mubr.f32.gmra.mrb[26].mxu1 %v15202_v23  ;;  %20092 = vst [vmem:[#allocation46_spill] sm:$0xff] %v15216_v37  ;;  %10478 = vmatprep.subr.bf16.mxu0 %v10477_v33  ;;  %v11043_v23 = vpack.c.bf16 %v8715_v5, %v8711_v32  ;;  %v8312_v33 = vld [vmem:[%s19960_s3 + $0x998] sm:$0xff]  ;;  %v11045_v19 = vpack.c.bf16 %v8724_v9, %v8720_v56  ;;  %v8719_v44 = vld [vmem:[%s19960_s3 + $0x1550] sm:$0xff] }
 0x1df   : > { %3989 = vmatprep.mubr.f32.mxu1 %v15216_v37  ;;  %11040 = vmatpush1.bf16.msra.mxu1 %v11039_v3  ;;  %v8316_v35 = vld [vmem:[%s19960_s3 + $0x9b8] sm:$0xff]  ;;  %v15240_v3 = vsel %vm744_vm0, %v2343_v6, %v15191_v61  ;;  %v8723_v32 = vld [vmem:[%s19960_s3 + $0x1570] sm:$0xff]  ;;  %v15252_v5 = vsel %vm1365_vm2, %v3607_v48, %v15205_v18  ;;  %v10483_v6 = vpack.c.bf16 %v8307_v1, %v8303_v27 }
 0x1e0   : > { %2602 = vmatmul.mubr.f32.gmra.mrb[26].mxu0 %v15226_v7  ;;  %11042 = vmatprep.subr.bf16.mxu1 %v11041_v22  ;;  %v8728_v22 = vld [vmem:[%s19960_s3 + $0x1598] sm:$0xff]  ;;  %v10485_v37 = vpack.c.bf16 %v8316_v35, %v8312_v33  ;;  %v8311_v48 = vld [vmem:[%s19960_s3 + $0x990] sm:$0xff]  ;;  %v15271_v27 = vsel %vm744_vm0, %v2341_v58, %v15229_v41  ;;  %v11047_v1 = vpack.c.bf16 %v8723_v32, %v8719_v44  ;;  %v3572_v35 = vrot.slane %v14222_v14, 2 }
 0x1e1   : > { %8507 = vmatprep.mubr.msk.f32.mxu0 %vm2377_vm3, %v15240_v3  ;;  %10480 = vmatpush1.bf16.msra.mxu0 %v10479_v11  ;;  %v8732_v56 = vld [vmem:[%s19960_s3 + $0x15b8] sm:$0xff]  ;;  %v8315_v11 = vld [vmem:[%s19960_s3 + $0x9b0] sm:$0xff] }
 0x1e2   : > { %3990 = vmatmul.mubr.f32.gmra.mrb[28].mxu1 %v15252_v5  ;;  %10482 = vmatprep.subr.bf16.mxu0 %v10481_v38  ;;  %v8320_v38 = vld [vmem:[%s19960_s3 + $0x9d8] sm:$0xff]  ;;  %v11049_v9 = vpack.c.bf16 %v8732_v56, %v8728_v22  ;;  %v8727_v58 = vld [vmem:[%s19960_s3 + $0x1590] sm:$0xff]  ;;  %v10487_v44 = vpack.c.bf16 %v8315_v11, %v8311_v48  ;;  %v20093_v22 = vrot.slane %v14283_v53, 2 }
 0x1e3   : > { %3995 = vmatprep.mubr.f32.mxu1 %v15167_v29  ;;  %11044 = vmatpush1.bf16.msra.mxu1 %v11043_v23  ;;  %v8324_v33 = vld [vmem:[%s19960_s3 + $0x9f8] sm:$0xff]  ;;  %v8731_v23 = vld [vmem:[%s19960_s3 + $0x15b0] sm:$0xff] }
 0x1e4   : > { %2608 = vmatmul.mubr.f32.gmra.mrb[28].mxu0 %v15271_v27  ;;  %11046 = vmatprep.subr.bf16.mxu1 %v11045_v19  ;;  %v8736_v19 = vld [vmem:[%s19960_s3 + $0x15d8] sm:$0xff]  ;;  %v15299_v56 = vsel %vm1365_vm2, %v3572_v35, %v20093_v22  ;;  %v10489_v29 = vpack.c.bf16 %v8324_v33, %v8320_v38  ;;  %v8323_v48 = vld [vmem:[%s19960_s3 + $0x9f0] sm:$0xff]  ;;  %v11051_v11 = vpack.c.bf16 %v8731_v23, %v8727_v58 }
 0x1e5   : > { %8508 = vmatprep.mubr.msk.f32.mxu0 %vm2377_vm3, %v15191_v61  ;;  %10484 = vmatpush1.bf16.msra.mxu0 %v10483_v6  ;;  %v8740_v32 = vld [vmem:[%s19960_s3 + $0x15f8] sm:$0xff]  ;;  %v8319_v6 = vld [vmem:[%s19960_s3 + $0x9d0] sm:$0xff] }
 0x1e6   : > { %3996 = vmatmul.mubr.f32.gmra.mrb[30].mxu1 %v15205_v18  ;;  %10486 = vmatprep.subr.bf16.mxu0 %v10485_v37  ;;  %v8328_v35 = vld [vmem:[%s19960_s3 + $0xa18] sm:$0xff]  ;;  %v11053_v38 = vpack.c.bf16 %v8740_v32, %v8736_v19  ;;  %v8739_v33 = vld [vmem:[%s19960_s3 + $0x15f0] sm:$0xff]  ;;  %v10491_v58 = vpack.c.bf16 %v8323_v48, %v8319_v6 }
 0x1e7   : > { %11048 = vmatpush1.bf16.msra.mxu1 %v11047_v1  ;;  %8789 = vmatprep.mubr.msk.f32.mxu1 %vm2377_vm3, %v15299_v56  ;;  %v8332_v37 = vld [vmem:[%s19960_s3 + $0xa38] sm:$0xff]  ;;  %v8735_v1 = vld [vmem:[%s19960_s3 + $0x15d0] sm:$0xff] }
 0x1e8   : > { %2614 = vmatmul.mubr.f32.gmra.mrb[30].mxu0 %v15229_v41  ;;  %11050 = vmatprep.subr.bf16.mxu1 %v11049_v9  ;;  %v8744_v23 = vld [vmem:[%s19960_s3 + $0x1618] sm:$0xff]  ;;  %v10493_v19 = vpack.c.bf16 %v8332_v37, %v8328_v35  ;;  %v8327_v32 = vld [vmem:[%s19960_s3 + $0xa10] sm:$0xff] }
 0x1e9   : > { %10488 = vmatpush1.bf16.msra.mxu0 %v10487_v44  ;;  %2684 = vmatprep.mubr.f32.mxu0 %v14356_v24  ;;  %v8748_v9 = vld [vmem:[%s19960_s3 + $0x1638] sm:$0xff]  ;;  %v8331_v44 = vld [vmem:[%s19960_s3 + $0xa30] sm:$0xff]  ;;  %v11055_v24 = vpack.c.bf16 %v8739_v33, %v8735_v1 }
 0x1ea   : > { %10490 = vmatprep.subr.bf16.mxu0 %v10489_v29  ;;  %v8336_v22 = vld [vmem:[%s19960_s3 + $0xa58] sm:$0xff]  ;;  %v11057_v29 = vpack.c.bf16 %v8748_v9, %v8744_v23  ;;  %v8743_v48 = vld [vmem:[%s19960_s3 + $0x1610] sm:$0xff] }
 0x1eb   : > { %11052 = vmatpush1.bf16.msra.mxu1 %v11051_v11  ;;  %v8340_v6 = vld [vmem:[%s19960_s3 + $0xa78] sm:$0xff]  ;;  %v8747_v35 = vld [vmem:[%s19960_s3 + $0x1630] sm:$0xff]  ;;  %v10495_v11 = vpack.c.bf16 %v8331_v44, %v8327_v32 }
 0x1ec   : > { %11054 = vmatprep.subr.bf16.mxu1 %v11053_v38  ;;  %v8752_v37 = vld [vmem:[%s19960_s3 + $0x1658] sm:$0xff]  ;;  %v10497_v38 = vpack.c.bf16 %v8340_v6, %v8336_v22  ;;  %v8335_v33 = vld [vmem:[%s19960_s3 + $0xa50] sm:$0xff] }
 0x1ed   : > { %10492 = vmatpush1.bf16.msra.mxu0 %v10491_v58  ;;  %v8756_v1 = vld [vmem:[%s19960_s3 + $0x1678] sm:$0xff]  ;;  %v8339_v23 = vld [vmem:[%s19960_s3 + $0xa70] sm:$0xff]  ;;  %v11059_v58 = vpack.c.bf16 %v8747_v35, %v8743_v48 }
 0x1ee   : > { %10494 = vmatprep.subr.bf16.mxu0 %v10493_v19  ;;  %v8344_v9 = vld [vmem:[%s19960_s3 + $0xa98] sm:$0xff]  ;;  %v11061_v19 = vpack.c.bf16 %v8756_v1, %v8752_v37  ;;  %v8751_v44 = vld [vmem:[%s19960_s3 + $0x1650] sm:$0xff] }
 0x1ef   : > { %11056 = vmatpush1.bf16.msra.mxu1 %v11055_v24  ;;  %v8348_v32 = vld [vmem:[%s19960_s3 + $0xab8] sm:$0xff]  ;;  %v8755_v22 = vld [vmem:[%s19960_s3 + $0x1670] sm:$0xff]  ;;  %v10499_v24 = vpack.c.bf16 %v8339_v23, %v8335_v33 }
 0x1f0   : > { %11058 = vmatprep.subr.bf16.mxu1 %v11057_v29  ;;  %v8760_v6 = vld [vmem:[%s19960_s3 + $0x1698] sm:$0xff]  ;;  %v10501_v29 = vpack.c.bf16 %v8348_v32, %v8344_v9  ;;  %v8343_v35 = vld [vmem:[%s19960_s3 + $0xa90] sm:$0xff] }
 0x1f1   : > { %10496 = vmatpush1.bf16.msra.mxu0 %v10495_v11  ;;  %v8764_v48 = vld [vmem:[%s19960_s3 + $0x16b8] sm:$0xff]  ;;  %v8347_v37 = vld [vmem:[%s19960_s3 + $0xab0] sm:$0xff]  ;;  %v11063_v11 = vpack.c.bf16 %v8755_v22, %v8751_v44 }
 0x1f2   : > { %10498 = vmatprep.subr.bf16.mxu0 %v10497_v38  ;;  %v8352_v1 = vld [vmem:[%s19960_s3 + $0xad8] sm:$0xff]  ;;  %v11065_v38 = vpack.c.bf16 %v8764_v48, %v8760_v6  ;;  %v8759_v23 = vld [vmem:[%s19960_s3 + $0x1690] sm:$0xff] }
 0x1f3   : > { %11060 = vmatpush1.bf16.msra.mxu1 %v11059_v58  ;;  %v8356_v33 = vld [vmem:[%s19960_s3 + $0xaf8] sm:$0xff]  ;;  %v8763_v9 = vld [vmem:[%s19960_s3 + $0x16b0] sm:$0xff]  ;;  %v10503_v58 = vpack.c.bf16 %v8347_v37, %v8343_v35 }
 0x1f4   : > { %11062 = vmatprep.subr.bf16.mxu1 %v11061_v19  ;;  %v8768_v32 = vld [vmem:[%s19960_s3 + $0x16d8] sm:$0xff]  ;;  %v10505_v19 = vpack.c.bf16 %v8356_v33, %v8352_v1  ;;  %v8351_v22 = vld [vmem:[%s19960_s3 + $0xad0] sm:$0xff] }
 0x1f5   : > { %10500 = vmatpush1.bf16.msra.mxu0 %v10499_v24  ;;  %v8772_v44 = vld [vmem:[%s19960_s3 + $0x16f8] sm:$0xff]  ;;  %v8355_v6 = vld [vmem:[%s19960_s3 + $0xaf0] sm:$0xff]  ;;  %v11067_v24 = vpack.c.bf16 %v8763_v9, %v8759_v23 }
 0x1f6   : > { %10502 = vmatprep.subr.bf16.mxu0 %v10501_v29  ;;  %v8360_v48 = vld [vmem:[%s19960_s3 + $0xb18] sm:$0xff]  ;;  %v11069_v29 = vpack.c.bf16 %v8772_v44, %v8768_v32  ;;  %v8767_v37 = vld [vmem:[%s19960_s3 + $0x16d0] sm:$0xff] }
 0x1f7   : > { %11064 = vmatpush1.bf16.msra.mxu1 %v11063_v11  ;;  %v8364_v35 = vld [vmem:[%s19960_s3 + $0xb38] sm:$0xff]  ;;  %v8771_v1 = vld [vmem:[%s19960_s3 + $0x16f0] sm:$0xff]  ;;  %v10507_v11 = vpack.c.bf16 %v8355_v6, %v8351_v22 }
 0x1f8   : > { %11066 = vmatprep.subr.bf16.mxu1 %v11065_v38  ;;  %v8776_v33 = vld [vmem:[%s19960_s3 + $0x1718] sm:$0xff]  ;;  %v10509_v38 = vpack.c.bf16 %v8364_v35, %v8360_v48  ;;  %v8359_v9 = vld [vmem:[%s19960_s3 + $0xb10] sm:$0xff] }
 0x1f9   : > { %10504 = vmatpush1.bf16.msra.mxu0 %v10503_v58  ;;  %v8780_v23 = vld [vmem:[%s19960_s3 + $0x1738] sm:$0xff]  ;;  %v8363_v32 = vld [vmem:[%s19960_s3 + $0xb30] sm:$0xff]  ;;  %v11071_v58 = vpack.c.bf16 %v8771_v1, %v8767_v37 }
 0x1fa   : > { %10506 = vmatprep.subr.bf16.mxu0 %v10505_v19  ;;  %v8368_v44 = vld [vmem:[%s19960_s3 + $0xb58] sm:$0xff]  ;;  %v11073_v19 = vpack.c.bf16 %v8780_v23, %v8776_v33  ;;  %v8775_v6 = vld [vmem:[%s19960_s3 + $0x1710] sm:$0xff]  ;;  %v3570_v23 = vrot.slane %v14299_v17, 2 }
 0x1fb   : > { %11068 = vmatpush1.bf16.msra.mxu1 %v11067_v24  ;;  %v8372_v22 = vld [vmem:[%s19960_s3 + $0xb78] sm:$0xff]  ;;  %v8779_v48 = vld [vmem:[%s19960_s3 + $0x1730] sm:$0xff]  ;;  %v10511_v24 = vpack.c.bf16 %v8363_v32, %v8359_v9  ;;  %v3581_v9 = vrot.slane %v14352_v55, 2 }
 0x1fc   : > { %11070 = vmatprep.subr.bf16.mxu1 %v11069_v29  ;;  %v10513_v35 = vpack.c.bf16 %v8372_v22, %v8368_v44  ;;  %v8367_v37 = vld [vmem:[%s19960_s3 + $0xb50] sm:$0xff]  ;;  %v11075_v1 = vpack.c.bf16 %v8779_v48, %v8775_v6  ;;  %v8376_v33 = vld [vmem:[%s19960_s3 + $0xb98] sm:$0xff]  ;;  %v3569_v22 = vrot.slane %v14242_v30, 2 }
 0x1fd   : > { %10508 = vmatpush1.bf16.msra.mxu0 %v10507_v11  ;;  %v8371_v29 = vld [vmem:[%s19960_s3 + $0xb70] sm:$0xff]  ;;  %v8380_v11 = vld [vmem:[%s19960_s3 + $0xbb8] sm:$0xff] }
 0x1fe   : > { %10510 = vmatprep.subr.bf16.mxu0 %v10509_v38  ;;  %v10515_v38 = vpack.c.bf16 %v8371_v29, %v8367_v37  ;;  %v10517_v32 = vpack.c.bf16 %v8380_v11, %v8376_v33  ;;  %v8379_v44 = vld [vmem:[%s19960_s3 + $0xbb0] sm:$0xff]  ;;  %v8388_v6 = vld [vmem:[%s19960_s3 + $0xbf8] sm:$0xff]  ;;  %v15471_v48 = vsel %vm1365_vm2, %v3569_v22, %v3570_v23  ;;  %v20095_v37 = vrot.slane %v14283_v53, 2 }
 0x1ff   : > { %11072 = vmatpush1.bf16.msra.mxu1 %v11071_v58  ;;  %v8375_v58 = vld [vmem:[%s19960_s3 + $0xb90] sm:$0xff]  ;;  %20094 = vst [vmem:[#allocation47_spill] sm:$0xff] %v15471_v48 }
 0x200   : > { %11074 = vmatprep.subr.bf16.mxu1 %v11073_v19  ;;  %v8384_v19 = vld [vmem:[%s19960_s3 + $0xbd8] sm:$0xff]  ;;  %v15478_v29 = vsel %vm1365_vm2, %v20095_v37, %v3581_v9  ;;  %v8383_v11 = vld [vmem:[%s19960_s3 + $0xbd0] sm:$0xff]  ;;  %v3597_v37 = vrot.slane %v14502_v46, 2 }
 0x201   : > { %10512 = vmatpush1.bf16.msra.mxu0 %v10511_v24  ;;  %v10519_v24 = vpack.c.bf16 %v8379_v44, %v8375_v58  ;;  %20096 = vst [vmem:[#allocation48_spill] sm:$0xff] %v15478_v29  ;;  %v10521_v33 = vpack.c.bf16 %v8388_v6, %v8384_v19  ;;  %v8392_v58 = vld [vmem:[%s19960_s3 + $0xc18] sm:$0xff]  ;;  %v3587_v19 = vrot.slane %v14447_v10, 2 }
 0x202   : > { %10514 = vmatprep.subr.bf16.mxu0 %v10513_v35  ;;  %v3579_v35 = vrot.slane %v14369_v42, 2 }
 0x203   : > { %11076 = vmatpush1.bf16.msra.mxu1 %v11075_v1  ;;  %v3589_v1 = vrot.slane %v14425_v43, 2 }
 0x204   : > { %v15496_v44 = vsel %vm1365_vm2, %v3570_v23, %v3579_v35  ;;  %v8395_v23 = vld [vmem:[%s19960_s3 + $0xc30] sm:$0xff] }
 0x205   : > { %10516 = vmatpush1.bf16.msra.mxu0 %v10515_v38  ;;  %v8387_v38 = vld [vmem:[%s19960_s3 + $0xbf0] sm:$0xff]  ;;  %v15501_v6 = vsel %vm1365_vm2, %v3581_v9, %v3589_v1  ;;  %v8400_v9 = vld [vmem:[%s19960_s3 + $0xc58] sm:$0xff] }
 0x206   : > { %4067 = vmatmul.mubr.f32.vlgmr.msra.gmra.mrb[16].mxu1 %v15471_v48  ;;  %10518 = vmatprep.subr.bf16.mxu0 %v10517_v32  ;;  %v8396_v32 = vld [vmem:[%s19960_s3 + $0xc38] sm:$0xff]  ;;  %v10523_v22 = vpack.c.bf16 %v8387_v38, %v8383_v11  ;;  %20097 = vst [vmem:[#allocation49_spill] sm:$0xff] %v15501_v6  ;;  %v8391_v48 = vld [vmem:[%s19960_s3 + $0xc10] sm:$0xff]  ;;  %v3595_v38 = vrot.slane %v14524_v8, 2 }
 0x207   : > { %8790 = vmatprep.mubr.msk.f32.mxu1 %vm2377_vm3, %v15478_v29  ;;  %v10525_v29 = vpack.c.bf16 %v8396_v32, %v8392_v58  ;;  %v10527_v11 = vpack.c.bf16 %v8395_v23, %v8391_v48  ;;  %v15526_v58 = vsel %vm1365_vm2, %v3589_v1, %v3597_v37  ;;  %v3605_v32 = vrot.slane %v14579_v63, 2  ;;  %v8408_v48 = vld [vmem:[%s19960_s3 + $0xc98] sm:$0xff] }
 0x209   : > { %10520 = vmatpush1.bf16.msra.mxu0 %v10519_v24  ;;  %v8404_v24 = vld [vmem:[%s19960_s3 + $0xc78] sm:$0xff]  ;;  %v15551_v23 = vsel %vm1365_vm2, %v3597_v37, %v3605_v32 }
 0x20a   : > { %4073 = vmatmul.mubr.f32.gmra.mrb[18].mxu1 %v15496_v44  ;;  %10522 = vmatprep.subr.bf16.mxu0 %v10521_v33  ;;  %v15521_v33 = vsel %vm1365_vm2, %v3579_v35, %v3587_v19  ;;  %v8412_v35 = vld [vmem:[%s19960_s3 + $0xcb8] sm:$0xff] }
 0x20b   : > { %8791 = vmatprep.mubr.msk.f32.mxu1 %vm2377_vm3, %v15501_v6  ;;  %v10529_v6 = vpack.c.bf16 %v8404_v24, %v8400_v9  ;;  %v3613_v9 = vrot.slane %v14631_v4, 2  ;;  %v10533_v24 = vpack.c.bf16 %v8412_v35, %v8408_v48  ;;  %v15579_v48 = vrot.slane %v14680_v21, 2 }
 0x20c   : > { %2685 = vmatmul.mubr.f32.vlgmr.msra.gmra.mrb[32].mxu0 %v14331_v59  ;;  %v8399_v59 = vld [vmem:[%s19960_s3 + $0xc50] sm:$0xff] }
 0x20d   : > { %2690 = vmatprep.mubr.f32.mxu0 %v14404_v60  ;;  %10524 = vmatpush1.bf16.msra.mxu0 %v10523_v22  ;;  %v8403_v60 = vld [vmem:[%s19960_s3 + $0xc70] sm:$0xff]  ;;  %v3603_v22 = vrot.slane %v14601_v2, 2 }
 0x20e   : > { %4079 = vmatmul.mubr.f32.gmra.mrb[20].mxu1 %v15521_v33  ;;  %10526 = vmatprep.subr.bf16.mxu0 %v10525_v29  ;;  %v15546_v29 = vsel %vm1365_vm2, %v3587_v19, %v3595_v38  ;;  %v10531_v1 = vpack.c.bf16 %v8403_v60, %v8399_v59  ;;  %v8416_v19 = vld [vmem:[%s19960_s3 + $0xcd8] sm:$0xff]  ;;  %v3611_v59 = vrot.slane %v14629_v50, 2  ;;  %v15576_v60 = vsel %vm1365_vm2, %v3605_v32, %v3613_v9 }
 0x20f   : > { %8792 = vmatprep.mubr.msk.f32.mxu1 %vm2377_vm3, %v15526_v58  ;;  %v15571_v37 = vsel %vm1365_vm2, %v3595_v38, %v3603_v22  ;;  %v8424_v38 = vld [vmem:[%s19960_s3 + $0xd18] sm:$0xff] }
 0x210   : > { %2691 = vmatmul.mubr.f32.gmra.mrb[34].mxu0 %v14434_v0  ;;  %v8407_v0 = vld [vmem:[%s19960_s3 + $0xc90] sm:$0xff]  ;;  %v8428_v32 = vld [vmem:[%s19960_s3 + $0xd38] sm:$0xff] }
 0x211   : > { %2696 = vmatprep.mubr.f32.mxu0 %v14481_v31  ;;  %10528 = vmatpush1.bf16.msra.mxu0 %v10527_v11  ;;  %v8411_v31 = vld [vmem:[%s19960_s3 + $0xcb0] sm:$0xff] }
 0x212   : > { %4085 = vmatmul.mubr.f32.gmra.mrb[22].mxu1 %v15546_v29  ;;  %10530 = vmatprep.subr.bf16.mxu0 %v10529_v6  ;;  %v8420_v6 = vld [vmem:[%s19960_s3 + $0xcf8] sm:$0xff]  ;;  %v10535_v11 = vpack.c.bf16 %v8411_v31, %v8407_v0  ;;  %v15601_v0 = vrot.slane %v14693_v28, 2  ;;  %v15606_v31 = vsel %vm1365_vm2, %v3613_v9, %v15579_v48 }
 0x213   : > { %8793 = vmatprep.mubr.msk.f32.mxu1 %vm2377_vm3, %v15551_v23  ;;  %v10537_v35 = vpack.c.bf16 %v8420_v6, %v8416_v19  ;;  %v10541_v19 = vpack.c.bf16 %v8428_v32, %v8424_v38  ;;  %v8436_v9 = vld [vmem:[%s19960_s3 + $0xd78] sm:$0xff]  ;;  %v20098_v6 = vld [vmem:[#allocation27_spill] sm:$0xff]  ;;  %v8431_v38 = vld [vmem:[%s19960_s3 + $0xd50] sm:$0xff] }
 0x214   : > { %2697 = vmatmul.mubr.f32.gmra.mrb[36].mxu0 %v14511_v47  ;;  %v8415_v47 = vld [vmem:[%s19960_s3 + $0xcd0] sm:$0xff] }
 0x215   : > { %2702 = vmatprep.mubr.f32.mxu0 %v14558_v13  ;;  %10532 = vmatpush1.bf16.msra.mxu0 %v10531_v1  ;;  %v8419_v13 = vld [vmem:[%s19960_s3 + $0xcf0] sm:$0xff]  ;;  %v15598_v1 = vsel %vm1365_vm2, %v3603_v22, %v3611_v59  ;;  %v8432_v22 = vld [vmem:[%s19960_s3 + $0xd58] sm:$0xff] }
 0x216   : > { %4091 = vmatmul.mubr.f32.gmra.mrb[24].mxu1 %v15571_v37  ;;  %10534 = vmatprep.subr.bf16.mxu0 %v10533_v24  ;;  %v10539_v24 = vpack.c.bf16 %v8419_v13, %v8415_v47  ;;  %v10545_v13 = vpack.c.bf16 %v8436_v9, %v8432_v22  ;;  %v8435_v32 = vld [vmem:[%s19960_s3 + $0xd70] sm:$0xff] }
 0x217   : > { %8794 = vmatprep.mubr.msk.f32.mxu1 %vm2377_vm3, %v15576_v60  ;;  %v8439_v22 = vld [vmem:[%s19960_s3 + $0xd90] sm:$0xff] }
 0x218   : > { %2703 = vmatmul.mubr.f32.gmra.mrb[38].mxu0 %v14588_v57  ;;  %v8423_v57 = vld [vmem:[%s19960_s3 + $0xd10] sm:$0xff] }
 0x219   : > { %2708 = vmatprep.mubr.f32.mxu0 %v14620_v39  ;;  %10536 = vmatpush1.bf16.msra.mxu0 %v10535_v11  ;;  %v8427_v39 = vld [vmem:[%s19960_s3 + $0xd30] sm:$0xff]  ;;  %v20099_v11 = vld [vmem:[#allocation30_spill] sm:$0xff] }
 0x21a   : > { %4097 = vmatmul.mubr.f32.gmra.mrb[26].mxu1 %v15598_v1  ;;  %10538 = vmatprep.subr.bf16.mxu0 %v10537_v35  ;;  %v15626_v35 = vsel %vm1365_vm2, %v3611_v59, %v15601_v0  ;;  %v10543_v47 = vpack.c.bf16 %v8427_v39, %v8423_v57  ;;  %v8440_v59 = vld [vmem:[%s19960_s3 + $0xd98] sm:$0xff]  ;;  %v10547_v57 = vpack.c.bf16 %v8435_v32, %v8431_v38  ;;  %v8443_v9 = vld [vmem:[%s19960_s3 + $0xdb0] sm:$0xff] }
 0x21b   : > { %8795 = vmatprep.mubr.msk.f32.mxu1 %vm2377_vm3, %v15606_v31  ;;  %v8451_v38 = vld [vmem:[%s19960_s3 + $0xdf0] sm:$0xff]  ;;  %v8456_v32 = vld [vmem:[%s19960_s3 + $0xe18] sm:$0xff] }
 0x21c   : > { %2709 = vmatmul.mubr.f32.gmra.mrb[40].mxu0 %v20098_v6  ;;  %v8448_v6 = vld [vmem:[%s19960_s3 + $0xdd8] sm:$0xff] }
 0x21d   : > { %2714 = vmatprep.mubr.f32.mxu0 %v20099_v11  ;;  %10540 = vmatpush1.bf16.msra.mxu0 %v10539_v24  ;;  %v8444_v24 = vld [vmem:[%s19960_s3 + $0xdb8] sm:$0xff]  ;;  %v10551_v11 = vpack.c.bf16 %v8443_v9, %v8439_v22  ;;  %v8463_v22 = vld [vmem:[%s19960_s3 + $0xe50] sm:$0xff] }
 0x21e   : > { %4103 = vmatmul.mubr.f32.gmra.mrb[28].mxu1 %v15626_v35  ;;  %10542 = vmatprep.subr.bf16.mxu0 %v10541_v19  ;;  %v20100_v19 = vld [vmem:[#allocation31_spill] sm:$0xff]  ;;  %v10549_v39 = vpack.c.bf16 %v8444_v24, %v8440_v59  ;;  %v8455_v24 = vld [vmem:[%s19960_s3 + $0xe10] sm:$0xff] }
 0x21f   : > { %8796 = vmatprep.mubr.msk.f32.mxu1 %vm2377_vm3, %v15579_v48  ;;  %v8467_v9 = vld [vmem:[%s19960_s3 + $0xe70] sm:$0xff] }
 0x220   : > { %2715 = vmatmul.mubr.f32.gmra.mrb[42].mxu0 %v20100_v19  ;;  %v8459_v19 = vld [vmem:[%s19960_s3 + $0xe30] sm:$0xff] }
 0x221   : > { %2720 = vmatprep.mubr.f32.mxu0 %v14732_v52  ;;  %10544 = vmatpush1.bf16.msra.mxu0 %v10543_v47  ;;  %v8452_v52 = vld [vmem:[%s19960_s3 + $0xdf8] sm:$0xff] }
 0x222   : > { %4109 = vmatmul.mubr.f32.gmra.mrb[30].mxu1 %v15601_v0  ;;  %10546 = vmatprep.subr.bf16.mxu0 %v10545_v13  ;;  %v10553_v47 = vpack.c.bf16 %v8452_v52, %v8448_v6  ;;  %v8447_v13 = vld [vmem:[%s19960_s3 + $0xdd0] sm:$0xff]  ;;  %v8472_v6 = vld [vmem:[%s19960_s3 + $0xe98] sm:$0xff] }
 0x223   : > { %v8476_v52 = vld [vmem:[%s19960_s3 + $0xeb8] sm:$0xff] }
 0x224   : > { %2721 = vmatmul.mubr.f32.gmra.mrb[44].mxu0 %v14747_v12  ;;  %v10555_v12 = vpack.c.bf16 %v8451_v38, %v8447_v13  ;;  %v8471_v13 = vld [vmem:[%s19960_s3 + $0xe90] sm:$0xff] }
 0x225   : > { %2726 = vmatprep.mubr.f32.mxu0 %v14701_v36  ;;  %10548 = vmatpush1.bf16.msra.mxu0 %v10547_v57  ;;  %v8460_v36 = vld [vmem:[%s19960_s3 + $0xe38] sm:$0xff]  ;;  %v8475_v38 = vld [vmem:[%s19960_s3 + $0xeb0] sm:$0xff] }
 0x226   : > { %10550 = vmatprep.subr.bf16.mxu0 %v10549_v39  ;;  %v10557_v59 = vpack.c.bf16 %v8460_v36, %v8456_v32  ;;  %v8464_v57 = vld [vmem:[%s19960_s3 + $0xe58] sm:$0xff] }
 0x227   : > { %v8480_v32 = vld [vmem:[%s19960_s3 + $0xed8] sm:$0xff] }
 0x228   : > { %2727 = vmatmul.mubr.f32.gmra.mrb[46].mxu0 %v14704_v20  ;;  %v8468_v20 = vld [vmem:[%s19960_s3 + $0xe78] sm:$0xff] }
 0x229   : > { %10552 = vmatpush1.bf16.msra.mxu0 %v10551_v11  ;;  %8509 = vmatprep.mubr.msk.f32.mxu0 %vm2377_vm3, %v14790_v26  ;;  %v10559_v26 = vpack.c.bf16 %v8459_v19, %v8455_v24  ;;  %v10561_v39 = vpack.c.bf16 %v8468_v20, %v8464_v57  ;;  %v10563_v11 = vpack.c.bf16 %v8467_v9, %v8463_v22  ;;  %v8484_v36 = vld [vmem:[%s19960_s3 + $0xef8] sm:$0xff]  ;;  %v8479_v24 = vld [vmem:[%s19960_s3 + $0xed0] sm:$0xff] }
 0x22a   : > { %10554 = vmatprep.subr.bf16.mxu0 %v10553_v47  ;;  %v10565_v47 = vpack.c.bf16 %v8476_v52, %v8472_v6  ;;  %v8483_v19 = vld [vmem:[%s19960_s3 + $0xef0] sm:$0xff]  ;;  %v8488_v57 = vld [vmem:[%s19960_s3 + $0xf18] sm:$0xff] }
 0x22b   : > { %v8492_v20 = vld [vmem:[%s19960_s3 + $0xf38] sm:$0xff]  ;;  %v8487_v22 = vld [vmem:[%s19960_s3 + $0xf10] sm:$0xff] }
 0x22c   : > { %v8491_v9 = vld [vmem:[%s19960_s3 + $0xf30] sm:$0xff]  ;;  %v8496_v6 = vld [vmem:[%s19960_s3 + $0xf58] sm:$0xff] }
 0x22d   : > { %10556 = vmatpush1.bf16.msra.mxu0 %v10555_v12  ;;  %v10567_v12 = vpack.c.bf16 %v8475_v38, %v8471_v13  ;;  %v8500_v52 = vld [vmem:[%s19960_s3 + $0xf78] sm:$0xff]  ;;  %v8495_v13 = vld [vmem:[%s19960_s3 + $0xf50] sm:$0xff] }
 0x22e   : > { %10558 = vmatprep.subr.bf16.mxu0 %v10557_v59  ;;  %v10569_v59 = vpack.c.bf16 %v8484_v36, %v8480_v32  ;;  %v8499_v38 = vld [vmem:[%s19960_s3 + $0xf70] sm:$0xff]  ;;  %v1765_v32 = vld [vmem:[%s19960_s3 + $0x8] sm:$0xff] }
 0x22f   : > { %v1769_v36 = vld [vmem:[%s19960_s3 + $0x28] sm:$0xff] }
 0x231   : > { %10560 = vmatpush1.bf16.msra.mxu0 %v10559_v26  ;;  %v10571_v26 = vpack.c.bf16 %v8483_v19, %v8479_v24  ;;  %v1764_v24 = vld [vmem:[%s19960_s3] sm:$0xff] }
 0x232   : > { %10562 = vmatprep.subr.bf16.mxu0 %v10561_v39  ;;  %v10573_v39 = vpack.c.bf16 %v8492_v20, %v8488_v57  ;;  %v1768_v19 = vld [vmem:[%s19960_s3 + $0x20] sm:$0xff]  ;;  %v1773_v57 = vld [vmem:[%s19960_s3 + $0x48] sm:$0xff] }
 0x233   : > { %v1777_v20 = vld [vmem:[%s19960_s3 + $0x68] sm:$0xff] }
 0x235   : > { %10564 = vmatpush1.bf16.msra.mxu0 %v10563_v11  ;;  %v10575_v11 = vpack.c.bf16 %v8491_v9, %v8487_v22  ;;  %v1772_v22 = vld [vmem:[%s19960_s3 + $0x40] sm:$0xff] }
 0x236   : > { %10566 = vmatprep.subr.bf16.mxu0 %v10565_v47  ;;  %v10577_v47 = vpack.c.bf16 %v8500_v52, %v8496_v6  ;;  %v1776_v9 = vld [vmem:[%s19960_s3 + $0x60] sm:$0xff]  ;;  %v1781_v6 = vld [vmem:[%s19960_s3 + $0x88] sm:$0xff] }
 0x237   : > { %v1785_v52 = vld [vmem:[%s19960_s3 + $0xa8] sm:$0xff] }
 0x239   : > { %10568 = vmatpush1.bf16.msra.mxu0 %v10567_v12  ;;  %v10579_v12 = vpack.c.bf16 %v8499_v38, %v8495_v13  ;;  %v10589_v13 = vpack.c.bf16 %v1785_v52, %v1781_v6  ;;  %v1780_v38 = vld [vmem:[%s19960_s3 + $0x80] sm:$0xff] }
 0x23a   : > { %10570 = vmatprep.subr.bf16.mxu0 %v10569_v59  ;;  %v10581_v59 = vpack.c.bf16 %v1769_v36, %v1765_v32  ;;  %v1784_v32 = vld [vmem:[%s19960_s3 + $0xa0] sm:$0xff]  ;;  %v1789_v36 = vld [vmem:[%s19960_s3 + $0xc8] sm:$0xff] }
 0x23b   : > { %v1804_v6 = vld [vmem:[%s19960_s3 + $0x140] sm:$0xff] }
 0x23c   : > { %v1808_v52 = vld [vmem:[%s19960_s3 + $0x160] sm:$0xff] }
 0x23d   : > { %10572 = vmatpush1.bf16.msra.mxu0 %v10571_v26  ;;  %v10583_v26 = vpack.c.bf16 %v1768_v19, %v1764_v24  ;;  %v1788_v24 = vld [vmem:[%s19960_s3 + $0xc0] sm:$0xff] }
 0x23e   : > { %10574 = vmatprep.subr.bf16.mxu0 %v10573_v39  ;;  %v10585_v39 = vpack.c.bf16 %v1777_v20, %v1773_v57  ;;  %v1792_v19 = vld [vmem:[%s19960_s3 + $0xe0] sm:$0xff]  ;;  %v1797_v57 = vld [vmem:[%s19960_s3 + $0x108] sm:$0xff] }
 0x241   : > { %10576 = vmatpush1.bf16.msra.mxu0 %v10575_v11  ;;  %v20101_v11 = vld [vmem:[#allocation35_spill] sm:$0xff] }
 0x242   : > { %10578 = vmatprep.subr.bf16.mxu0 %v10577_v47  ;;  %v10587_v47 = vpack.c.bf16 %v1776_v9, %v1772_v22  ;;  %v1805_v22 = vld [vmem:[%s19960_s3 + $0x148] sm:$0xff] }
 0x245   : > { %10580 = vmatpush1.bf16.msra.mxu0 %v10579_v12  ;;  %v10591_v12 = vpack.c.bf16 %v1784_v32, %v1780_v38  ;;  %v1816_v38 = vld [vmem:[%s19960_s3 + $0x1a0] sm:$0xff]  ;;  %v1821_v32 = vld [vmem:[%s19960_s3 + $0x1c8] sm:$0xff] }
 0x246   : > { %10582 = vmatprep.subr.bf16.mxu0 %v10581_v59 }
 0x248   : > { %2798 = vmatmul.mubr.f32.vlgmr.msra.gmra.mrb[32].mxu0 %v20101_v11  ;;  %v1813_v11 = vld [vmem:[%s19960_s3 + $0x188] sm:$0xff] }
 0x249   : > { %8510 = vmatprep.mubr.msk.f32.mxu0 %vm2377_vm3, %v15006_v49  ;;  %10584 = vmatpush1.bf16.msra.mxu0 %v10583_v26  ;;  %v1793_v49 = vld [vmem:[%s19960_s3 + $0xe8] sm:$0xff]  ;;  %v1796_v26 = vld [vmem:[%s19960_s3 + $0x100] sm:$0xff] }
 0x24a   : > { %10586 = vmatprep.subr.bf16.mxu0 %v10585_v39  ;;  %v10593_v59 = vpack.c.bf16 %v1793_v49, %v1789_v36  ;;  %v1800_v39 = vld [vmem:[%s19960_s3 + $0x120] sm:$0xff] }
 0x24b   : > { %v1820_v49 = vld [vmem:[%s19960_s3 + $0x1c0] sm:$0xff] }
 0x24c   : > { %2804 = vmatmul.mubr.f32.gmra.mrb[34].mxu0 %v15040_v54  ;;  %v1801_v54 = vld [vmem:[%s19960_s3 + $0x128] sm:$0xff] }
 0x24d   : > { %8511 = vmatprep.mubr.msk.f32.mxu0 %vm2377_vm3, %v15051_v15  ;;  %10588 = vmatpush1.bf16.msra.mxu0 %v10587_v47  ;;  %v10595_v15 = vpack.c.bf16 %v1792_v19, %v1788_v24  ;;  %v10597_v20 = vpack.c.bf16 %v1801_v54, %v1797_v57  ;;  %v1828_v19 = vld [vmem:[%s19960_s3 + $0x200] sm:$0xff]  ;;  %v1837_v54 = vld [vmem:[%s19960_s3 + $0x248] sm:$0xff] }
 0x24e   : > { %10590 = vmatprep.subr.bf16.mxu0 %v10589_v13  ;;  %v1812_v13 = vld [vmem:[%s19960_s3 + $0x180] sm:$0xff] }
 0x24f   : > { %v1832_v57 = vld [vmem:[%s19960_s3 + $0x220] sm:$0xff] }
 0x250   : > { %2810 = vmatmul.mubr.f32.gmra.mrb[36].mxu0 %v15085_v25  ;;  %v10599_v25 = vpack.c.bf16 %v1800_v39, %v1796_v26  ;;  %v1836_v26 = vld [vmem:[%s19960_s3 + $0x240] sm:$0xff] }
 0x251   : > { %8512 = vmatprep.mubr.msk.f32.mxu0 %vm2377_vm3, %v15096_v16  ;;  %10592 = vmatpush1.bf16.msra.mxu0 %v10591_v12  ;;  %v1809_v16 = vld [vmem:[%s19960_s3 + $0x168] sm:$0xff]  ;;  %v1824_v12 = vld [vmem:[%s19960_s3 + $0x1e0] sm:$0xff] }
 0x252   : > { %10594 = vmatprep.subr.bf16.mxu0 %v10593_v59  ;;  %v10601_v9 = vpack.c.bf16 %v1809_v16, %v1805_v22  ;;  %v1829_v59 = vld [vmem:[%s19960_s3 + $0x208] sm:$0xff]  ;;  %v1840_v39 = vld [vmem:[%s19960_s3 + $0x260] sm:$0xff] }
 0x253   : > { %v1845_v22 = vld [vmem:[%s19960_s3 + $0x288] sm:$0xff]  ;;  %v10619_v16 = vpack.c.bf16 %v1840_v39, %v1836_v26  ;;  %v1880_v26 = vld [vmem:[%s19960_s3 + $0x3a0] sm:$0xff] }
 0x254   : > { %2816 = vmatmul.mubr.f32.gmra.mrb[38].mxu0 %v15130_v34  ;;  %v1817_v34 = vld [vmem:[%s19960_s3 + $0x1a8] sm:$0xff] }
 0x255   : > { %8513 = vmatprep.mubr.msk.f32.mxu0 %vm2377_vm3, %v15141_v51  ;;  %10596 = vmatpush1.bf16.msra.mxu0 %v10595_v15  ;;  %v10603_v51 = vpack.c.bf16 %v1808_v52, %v1804_v6  ;;  %v10605_v47 = vpack.c.bf16 %v1817_v34, %v1813_v11  ;;  %v10615_v15 = vpack.c.bf16 %v1832_v57, %v1828_v19  ;;  %v1848_v6 = vld [vmem:[%s19960_s3 + $0x2a0] sm:$0xff]  ;;  %v1853_v52 = vld [vmem:[%s19960_s3 + $0x2c8] sm:$0xff] }
 0x256   : > { %10598 = vmatprep.subr.bf16.mxu0 %v10597_v20  ;;  %v1857_v11 = vld [vmem:[%s19960_s3 + $0x2e8] sm:$0xff]  ;;  %v1872_v19 = vld [vmem:[%s19960_s3 + $0x360] sm:$0xff] }
 0x257   : > { %v1877_v57 = vld [vmem:[%s19960_s3 + $0x388] sm:$0xff] }
 0x258   : > { %2822 = vmatmul.mubr.f32.gmra.mrb[40].mxu0 %v15177_v45  ;;  %v1825_v45 = vld [vmem:[%s19960_s3 + $0x1e8] sm:$0xff] }
 0x259   : > { %8514 = vmatprep.mubr.msk.f32.mxu0 %vm2377_vm3, %v15188_v40  ;;  %10600 = vmatpush1.bf16.msra.mxu0 %v10599_v25  ;;  %v10607_v40 = vpack.c.bf16 %v1816_v38, %v1812_v13  ;;  %v10609_v36 = vpack.c.bf16 %v1825_v45, %v1821_v32  ;;  %v1856_v13 = vld [vmem:[%s19960_s3 + $0x2e0] sm:$0xff]  ;;  %v1861_v38 = vld [vmem:[%s19960_s3 + $0x308] sm:$0xff] }
 0x25a   : > { %10602 = vmatprep.subr.bf16.mxu0 %v10601_v9  ;;  %v1844_v9 = vld [vmem:[%s19960_s3 + $0x280] sm:$0xff]  ;;  %v1865_v32 = vld [vmem:[%s19960_s3 + $0x328] sm:$0xff] }
 0x25b   : > { %v10623_v34 = vpack.c.bf16 %v1848_v6, %v1844_v9  ;;  %v1885_v39 = vld [vmem:[%s19960_s3 + $0x3c8] sm:$0xff]  ;;  %v1888_v9 = vld [vmem:[%s19960_s3 + $0x3e0] sm:$0xff] }
 0x25c   : > { %2828 = vmatmul.mubr.f32.gmra.mrb[42].mxu0 %v15226_v7  ;;  %v1833_v7 = vld [vmem:[%s19960_s3 + $0x228] sm:$0xff] }
 0x25d   : > { %8515 = vmatprep.mubr.msk.f32.mxu0 %vm2377_vm3, %v15240_v3  ;;  %10604 = vmatpush1.bf16.msra.mxu0 %v10603_v51  ;;  %v10611_v3 = vpack.c.bf16 %v1824_v12, %v1820_v49  ;;  %v10613_v24 = vpack.c.bf16 %v1833_v7, %v1829_v59  ;;  %v10625_v51 = vpack.c.bf16 %v1857_v11, %v1853_v52  ;;  %v1864_v49 = vld [vmem:[%s19960_s3 + $0x320] sm:$0xff]  ;;  %v1869_v12 = vld [vmem:[%s19960_s3 + $0x348] sm:$0xff] }
 0x25e   : > { %10606 = vmatprep.subr.bf16.mxu0 %v10605_v47  ;;  %v1852_v47 = vld [vmem:[%s19960_s3 + $0x2c0] sm:$0xff]  ;;  %v1873_v59 = vld [vmem:[%s19960_s3 + $0x368] sm:$0xff] }
 0x25f   : > { %v10627_v45 = vpack.c.bf16 %v1856_v13, %v1852_v47  ;;  %v1893_v6 = vld [vmem:[%s19960_s3 + $0x408] sm:$0xff]  ;;  %v1896_v47 = vld [vmem:[%s19960_s3 + $0x420] sm:$0xff] }
 0x260   : > { %2834 = vmatmul.mubr.f32.gmra.mrb[44].mxu0 %v15271_v27  ;;  %v20102_v27 = vld [vmem:[#allocation15_spill] sm:$0xff] }
 0x261   : > { %8516 = vmatprep.mubr.msk.f32.mxu0 %vm2377_vm3, %v15191_v61  ;;  %10608 = vmatpush1.bf16.msra.mxu0 %v10607_v40  ;;  %v1841_v61 = vld [vmem:[%s19960_s3 + $0x268] sm:$0xff]  ;;  %v10629_v40 = vpack.c.bf16 %v1865_v32, %v1861_v38 }
 0x262   : > { %10610 = vmatprep.subr.bf16.mxu0 %v10609_v36  ;;  %v10617_v20 = vpack.c.bf16 %v1841_v61, %v1837_v54  ;;  %v1860_v36 = vld [vmem:[%s19960_s3 + $0x300] sm:$0xff]  ;;  %v1881_v54 = vld [vmem:[%s19960_s3 + $0x3a8] sm:$0xff] }
 0x263   : > { %v10631_v7 = vpack.c.bf16 %v1864_v49, %v1860_v36  ;;  %v1897_v52 = vld [vmem:[%s19960_s3 + $0x428] sm:$0xff]  ;;  %v1904_v36 = vld [vmem:[%s19960_s3 + $0x460] sm:$0xff] }
 0x264   : > { %2840 = vmatmul.mubr.f32.gmra.mrb[46].mxu0 %v15229_v41  ;;  %v1849_v41 = vld [vmem:[%s19960_s3 + $0x2a8] sm:$0xff] }
 0x265   : > { %10612 = vmatpush1.bf16.msra.mxu0 %v10611_v3  ;;  %2926 = vmatprep.mubr.f32.mxu0 %v20102_v27  ;;  %v10621_v25 = vpack.c.bf16 %v1849_v41, %v1845_v22  ;;  %v10633_v3 = vpack.c.bf16 %v1873_v59, %v1869_v12  ;;  %v1889_v22 = vld [vmem:[%s19960_s3 + $0x3e8] sm:$0xff]  ;;  %v20103_v59 = vld [vmem:[#allocation14_spill] sm:$0xff] }
 0x266   : > { %10614 = vmatprep.subr.bf16.mxu0 %v10613_v24  ;;  %v1868_v24 = vld [vmem:[%s19960_s3 + $0x340] sm:$0xff]  ;;  %v1901_v13 = vld [vmem:[%s19960_s3 + $0x448] sm:$0xff] }
 0x267   : > { %v10635_v61 = vpack.c.bf16 %v1872_v19, %v1868_v24  ;;  %v1905_v38 = vld [vmem:[%s19960_s3 + $0x468] sm:$0xff]  ;;  %v1908_v19 = vld [vmem:[%s19960_s3 + $0x480] sm:$0xff] }
 0x268   : > { %v1909_v49 = vld [vmem:[%s19960_s3 + $0x488] sm:$0xff] }
 0x269   : > { %10616 = vmatpush1.bf16.msra.mxu0 %v10615_v15  ;;  %v10637_v15 = vpack.c.bf16 %v1881_v54, %v1877_v57  ;;  %v1913_v12 = vld [vmem:[%s19960_s3 + $0x4a8] sm:$0xff]  ;;  %v1912_v57 = vld [vmem:[%s19960_s3 + $0x4a0] sm:$0xff] }
 0x26a   : > { %10618 = vmatprep.subr.bf16.mxu0 %v10617_v20  ;;  %v1876_v20 = vld [vmem:[%s19960_s3 + $0x380] sm:$0xff]  ;;  %v10653_v24 = vpack.c.bf16 %v1913_v12, %v1909_v49  ;;  %v1917_v54 = vld [vmem:[%s19960_s3 + $0x4c8] sm:$0xff] }
 0x26b   : > { %v10639_v41 = vpack.c.bf16 %v1880_v26, %v1876_v20  ;;  %v20106_v20 = vld [vmem:[#allocation19_spill] sm:$0xff]  ;;  %v10655_v26 = vpack.c.bf16 %v1912_v57, %v1908_v19  ;;  %v20112_v19 = vld [vmem:[#allocation25_spill] sm:$0xff] }
 0x26c   : > { %v1936_v49 = vld [vmem:[%s19960_s3 + $0x560] sm:$0xff]  ;;  %v1941_v12 = vld [vmem:[%s19960_s3 + $0x588] sm:$0xff] }
 0x26d   : > { %10620 = vmatpush1.bf16.msra.mxu0 %v10619_v16  ;;  %v10641_v16 = vpack.c.bf16 %v1889_v22, %v1885_v39  ;;  %v1916_v22 = vld [vmem:[%s19960_s3 + $0x4c0] sm:$0xff] }
 0x26e   : > { %10622 = vmatprep.subr.bf16.mxu0 %v10621_v25  ;;  %v1884_v25 = vld [vmem:[%s19960_s3 + $0x3c0] sm:$0xff] }
 0x26f   : > { %v10643_v11 = vpack.c.bf16 %v1888_v9, %v1884_v25  ;;  %v1929_v25 = vld [vmem:[%s19960_s3 + $0x528] sm:$0xff]  ;;  %v20107_v9 = vld [vmem:[#allocation18_spill] sm:$0xff] }
 0x271   : > { %10624 = vmatpush1.bf16.msra.mxu0 %v10623_v34  ;;  %v10645_v34 = vpack.c.bf16 %v1897_v52, %v1893_v6  ;;  %v20108_v6 = vld [vmem:[#allocation21_spill] sm:$0xff] }
 0x272   : > { %10626 = vmatprep.subr.bf16.mxu0 %v10625_v51  ;;  %v1892_v51 = vld [vmem:[%s19960_s3 + $0x400] sm:$0xff] }
 0x273   : > { %v10647_v32 = vpack.c.bf16 %v1896_v47, %v1892_v51  ;;  %v1928_v51 = vld [vmem:[%s19960_s3 + $0x520] sm:$0xff]  ;;  %v1933_v47 = vld [vmem:[%s19960_s3 + $0x548] sm:$0xff] }
 0x275   : > { %10628 = vmatpush1.bf16.msra.mxu0 %v10627_v45  ;;  %v10649_v45 = vpack.c.bf16 %v1905_v38, %v1901_v13  ;;  %v1937_v13 = vld [vmem:[%s19960_s3 + $0x568] sm:$0xff] }
 0x276   : > { %10630 = vmatprep.subr.bf16.mxu0 %v10629_v40  ;;  %v1900_v40 = vld [vmem:[%s19960_s3 + $0x440] sm:$0xff]  ;;  %v20109_v38 = vld [vmem:[#allocation20_spill] sm:$0xff] }
 0x279   : > { %10632 = vmatpush1.bf16.msra.mxu0 %v10631_v7  ;;  %v20104_v7 = vld [vmem:[#allocation17_spill] sm:$0xff] }
 0x27a   : > { %10634 = vmatprep.subr.bf16.mxu0 %v10633_v3  ;;  %v10651_v3 = vpack.c.bf16 %v1904_v36, %v1900_v40  ;;  %v10665_v40 = vpack.c.bf16 %v1937_v13, %v1933_v47  ;;  %v1932_v36 = vld [vmem:[%s19960_s3 + $0x540] sm:$0xff]  ;;  %v1961_v47 = vld [vmem:[%s19960_s3 + $0x628] sm:$0xff]  ;;  %v20115_v13 = vld [vmem:[#allocation29_spill] sm:$0xff] }
 0x27b   : > { %v10667_v57 = vpack.c.bf16 %v1936_v49, %v1932_v36  ;;  %v1956_v36 = vld [vmem:[%s19960_s3 + $0x600] sm:$0xff] }
 0x27c   : > { %v1960_v49 = vld [vmem:[%s19960_s3 + $0x620] sm:$0xff] }
 0x27d   : > { %10636 = vmatpush1.bf16.msra.mxu0 %v10635_v61  ;;  %v1921_v61 = vld [vmem:[%s19960_s3 + $0x4e8] sm:$0xff] }
 0x27e   : > { %10638 = vmatprep.subr.bf16.mxu0 %v10637_v15  ;;  %v20105_v15 = vld [vmem:[#allocation16_spill] sm:$0xff]  ;;  %v10657_v39 = vpack.c.bf16 %v1921_v61, %v1917_v54  ;;  %v1940_v61 = vld [vmem:[%s19960_s3 + $0x580] sm:$0xff] }
 0x281   : > { %10640 = vmatpush1.bf16.msra.mxu0 %v10639_v41  ;;  %v1920_v41 = vld [vmem:[%s19960_s3 + $0x4e0] sm:$0xff] }
 0x282   : > { %10642 = vmatprep.subr.bf16.mxu0 %v10641_v16  ;;  %v1925_v16 = vld [vmem:[%s19960_s3 + $0x508] sm:$0xff]  ;;  %v10659_v52 = vpack.c.bf16 %v1920_v41, %v1916_v22 }
 0x283   : > { %v1953_v22 = vld [vmem:[%s19960_s3 + $0x5e8] sm:$0xff] }
 0x284   : > { %v20113_v41 = vld [vmem:[#allocation24_spill] sm:$0xff] }
 0x285   : > { %10644 = vmatpush1.bf16.msra.mxu0 %v10643_v11  ;;  %v10661_v11 = vpack.c.bf16 %v1929_v25, %v1925_v16  ;;  %v20114_v16 = vld [vmem:[#allocation26_spill] sm:$0xff] }
 0x286   : > { %10646 = vmatprep.subr.bf16.mxu0 %v10645_v34  ;;  %v1924_v34 = vld [vmem:[%s19960_s3 + $0x500] sm:$0xff] }
 0x288   : > { %2927 = vmatmul.mubr.f32.vlgmr.msra.gmra.mrb[16].mxu0 %v20103_v59 }
 0x289   : > { %2932 = vmatprep.mubr.f32.mxu0 %v20104_v7  ;;  %10648 = vmatpush1.bf16.msra.mxu0 %v10647_v32  ;;  %v20110_v32 = vld [vmem:[#allocation23_spill] sm:$0xff] }
 0x28a   : > { %10650 = vmatprep.subr.bf16.mxu0 %v10649_v45  ;;  %v10663_v45 = vpack.c.bf16 %v1928_v51, %v1924_v34  ;;  %v1952_v34 = vld [vmem:[%s19960_s3 + $0x5e0] sm:$0xff]  ;;  %v1957_v51 = vld [vmem:[%s19960_s3 + $0x608] sm:$0xff] }
 0x28c   : > { %2933 = vmatmul.mubr.f32.gmra.mrb[18].mxu0 %v20105_v15 }
 0x28d   : > { %2938 = vmatprep.mubr.f32.mxu0 %v20106_v20  ;;  %10652 = vmatpush1.bf16.msra.mxu0 %v10651_v3  ;;  %v1945_v3 = vld [vmem:[%s19960_s3 + $0x5a8] sm:$0xff] }
 0x28e   : > { %10654 = vmatprep.subr.bf16.mxu0 %v10653_v24  ;;  %v20111_v24 = vld [vmem:[#allocation22_spill] sm:$0xff]  ;;  %v10669_v54 = vpack.c.bf16 %v1945_v3, %v1941_v12  ;;  %v1965_v12 = vld [vmem:[%s19960_s3 + $0x648] sm:$0xff] }
 0x28f   : > { %v1969_v3 = vld [vmem:[%s19960_s3 + $0x668] sm:$0xff] }
 0x290   : > { %2939 = vmatmul.mubr.f32.gmra.mrb[20].mxu0 %v20107_v9 }
 0x291   : > { %2944 = vmatprep.mubr.f32.mxu0 %v20108_v6  ;;  %10656 = vmatpush1.bf16.msra.mxu0 %v10655_v26  ;;  %v1944_v26 = vld [vmem:[%s19960_s3 + $0x5a0] sm:$0xff] }
 0x292   : > { %10658 = vmatprep.subr.bf16.mxu0 %v10657_v39  ;;  %v1949_v39 = vld [vmem:[%s19960_s3 + $0x5c8] sm:$0xff]  ;;  %v10671_v25 = vpack.c.bf16 %v1944_v26, %v1940_v61  ;;  %v10681_v61 = vpack.c.bf16 %v1969_v3, %v1965_v12  ;;  %v1964_v26 = vld [vmem:[%s19960_s3 + $0x640] sm:$0xff] }
 0x293   : > { %v1989_v12 = vld [vmem:[%s19960_s3 + $0x708] sm:$0xff] }
 0x294   : > { %2945 = vmatmul.mubr.f32.gmra.mrb[22].mxu0 %v20109_v38  ;;  %v1993_v3 = vld [vmem:[%s19960_s3 + $0x728] sm:$0xff] }
 0x295   : > { %2950 = vmatprep.mubr.f32.mxu0 %v20110_v32  ;;  %10660 = vmatpush1.bf16.msra.mxu0 %v10659_v52  ;;  %v10673_v52 = vpack.c.bf16 %v1953_v22, %v1949_v39  ;;  %v1968_v39 = vld [vmem:[%s19960_s3 + $0x660] sm:$0xff]  ;;  %v1973_v22 = vld [vmem:[%s19960_s3 + $0x688] sm:$0xff] }
 0x296   : > { %10662 = vmatprep.subr.bf16.mxu0 %v10661_v11  ;;  %v1948_v11 = vld [vmem:[%s19960_s3 + $0x5c0] sm:$0xff] }
 0x298   : > { %2951 = vmatmul.mubr.f32.gmra.mrb[24].mxu0 %v20111_v24 }
 0x299   : > { %2956 = vmatprep.mubr.f32.mxu0 %v20112_v19  ;;  %10664 = vmatpush1.bf16.msra.mxu0 %v10663_v45  ;;  %v10675_v45 = vpack.c.bf16 %v1952_v34, %v1948_v11  ;;  %v1972_v11 = vld [vmem:[%s19960_s3 + $0x680] sm:$0xff] }
 0x29a   : > { %10666 = vmatprep.subr.bf16.mxu0 %v10665_v40  ;;  %v10677_v40 = vpack.c.bf16 %v1961_v47, %v1957_v51  ;;  %v1976_v34 = vld [vmem:[%s19960_s3 + $0x6a0] sm:$0xff]  ;;  %v1981_v51 = vld [vmem:[%s19960_s3 + $0x6c8] sm:$0xff] }
 0x29b   : > { %v1985_v47 = vld [vmem:[%s19960_s3 + $0x6e8] sm:$0xff] }
 0x29c   : > { %2957 = vmatmul.mubr.f32.gmra.mrb[26].mxu0 %v20113_v41 }
 0x29d   : > { %2962 = vmatprep.mubr.f32.mxu0 %v20114_v16  ;;  %10668 = vmatpush1.bf16.msra.mxu0 %v10667_v57  ;;  %v20116_v57 = vld [vmem:[#allocation28_spill] sm:$0xff] }
 0x29e   : > { %10670 = vmatprep.subr.bf16.mxu0 %v10669_v54  ;;  %v10679_v54 = vpack.c.bf16 %v1960_v49, %v1956_v36  ;;  %v1980_v36 = vld [vmem:[%s19960_s3 + $0x6c0] sm:$0xff] }
 0x29f   : > { %v1984_v49 = vld [vmem:[%s19960_s3 + $0x6e0] sm:$0xff] }
 0x2a0   : > { %2963 = vmatmul.mubr.f32.gmra.mrb[28].mxu0 %v14606_v62 }
 0x2a1   : > { %2968 = vmatprep.mubr.f32.mxu0 %v20115_v13  ;;  %10672 = vmatpush1.bf16.msra.mxu0 %v10671_v25  ;;  %v1977_v25 = vld [vmem:[%s19960_s3 + $0x6a8] sm:$0xff] }
 0x2a2   : > { %10674 = vmatprep.subr.bf16.mxu0 %v10673_v52  ;;  %v10685_v52 = vpack.c.bf16 %v1977_v25, %v1973_v22  ;;  %v1997_v22 = vld [vmem:[%s19960_s3 + $0x748] sm:$0xff] }
 0x2a3   : > { %v2001_v25 = vld [vmem:[%s19960_s3 + $0x768] sm:$0xff] }
 0x2a4   : > { %2969 = vmatmul.mubr.f32.gmra.mrb[30].mxu0 %v20116_v57 }
 0x2a5   : > { %10676 = vmatpush1.bf16.msra.mxu0 %v10675_v45  ;;  %8517 = vmatprep.mubr.msk.f32.mxu0 %vm2377_vm3, %v14222_v14  ;;  %v10683_v14 = vpack.c.bf16 %v1968_v39, %v1964_v26  ;;  %v10687_v45 = vpack.c.bf16 %v1976_v34, %v1972_v11  ;;  %v1988_v26 = vld [vmem:[%s19960_s3 + $0x700] sm:$0xff] }
 0x2a6   : > { %10678 = vmatprep.subr.bf16.mxu0 %v10677_v40  ;;  %v10689_v40 = vpack.c.bf16 %v1985_v47, %v1981_v51  ;;  %v1992_v39 = vld [vmem:[%s19960_s3 + $0x720] sm:$0xff]  ;;  %v2005_v51 = vld [vmem:[%s19960_s3 + $0x788] sm:$0xff] }
 0x2a7   : > { %v1996_v11 = vld [vmem:[%s19960_s3 + $0x740] sm:$0xff]  ;;  %v2009_v47 = vld [vmem:[%s19960_s3 + $0x7a8] sm:$0xff] }
 0x2a8   : > { %v2000_v34 = vld [vmem:[%s19960_s3 + $0x760] sm:$0xff] }
 0x2a9   : > { %10680 = vmatpush1.bf16.msra.mxu0 %v10679_v54  ;;  %v10691_v54 = vpack.c.bf16 %v1984_v49, %v1980_v36  ;;  %v2004_v36 = vld [vmem:[%s19960_s3 + $0x780] sm:$0xff] }
 0x2aa   : > { %10682 = vmatprep.subr.bf16.mxu0 %v10681_v61  ;;  %v10693_v61 = vpack.c.bf16 %v1993_v3, %v1989_v12  ;;  %v2008_v49 = vld [vmem:[%s19960_s3 + $0x7a0] sm:$0xff]  ;;  %v1767_v12 = vld [vmem:[%s19960_s3 + $0x18] sm:$0xff] }
 0x2ab   : > { %v1771_v3 = vld [vmem:[%s19960_s3 + $0x38] sm:$0xff] }
 0x2ad   : > { %10684 = vmatpush1.bf16.msra.mxu0 %v10683_v14  ;;  %v10695_v14 = vpack.c.bf16 %v1992_v39, %v1988_v26  ;;  %v1766_v26 = vld [vmem:[%s19960_s3 + $0x10] sm:$0xff] }
 0x2ae   : > { %10686 = vmatprep.subr.bf16.mxu0 %v10685_v52  ;;  %v10697_v52 = vpack.c.bf16 %v2001_v25, %v1997_v22  ;;  %v1770_v39 = vld [vmem:[%s19960_s3 + $0x30] sm:$0xff]  ;;  %v1775_v22 = vld [vmem:[%s19960_s3 + $0x58] sm:$0xff] }
 0x2af   : > { %v1779_v25 = vld [vmem:[%s19960_s3 + $0x78] sm:$0xff] }
 0x2b1   : > { %10688 = vmatpush1.bf16.msra.mxu0 %v10687_v45  ;;  %v10699_v45 = vpack.c.bf16 %v2000_v34, %v1996_v11  ;;  %v1774_v11 = vld [vmem:[%s19960_s3 + $0x50] sm:$0xff] }
 0x2b2   : > { %10690 = vmatprep.subr.bf16.mxu0 %v10689_v40  ;;  %v10701_v40 = vpack.c.bf16 %v2009_v47, %v2005_v51  ;;  %v1778_v34 = vld [vmem:[%s19960_s3 + $0x70] sm:$0xff]  ;;  %v1783_v51 = vld [vmem:[%s19960_s3 + $0x98] sm:$0xff] }
 0x2b3   : > { %v1787_v47 = vld [vmem:[%s19960_s3 + $0xb8] sm:$0xff] }
 0x2b5   : > { %10692 = vmatpush1.bf16.msra.mxu0 %v10691_v54  ;;  %v10703_v54 = vpack.c.bf16 %v2008_v49, %v2004_v36  ;;  %v1782_v36 = vld [vmem:[%s19960_s3 + $0x90] sm:$0xff] }
 0x2b6   : > { %10694 = vmatprep.subr.bf16.mxu0 %v10693_v61  ;;  %v10705_v61 = vpack.c.bf16 %v1771_v3, %v1767_v12  ;;  %v1786_v49 = vld [vmem:[%s19960_s3 + $0xb0] sm:$0xff]  ;;  %v1791_v12 = vld [vmem:[%s19960_s3 + $0xd8] sm:$0xff] }
 0x2b9   : > { %10696 = vmatpush1.bf16.msra.mxu0 %v10695_v14  ;;  %v10707_v14 = vpack.c.bf16 %v1770_v39, %v1766_v26  ;;  %v1799_v26 = vld [vmem:[%s19960_s3 + $0x118] sm:$0xff] }
 0x2ba   : > { %10698 = vmatprep.subr.bf16.mxu0 %v10697_v52  ;;  %v10709_v52 = vpack.c.bf16 %v1779_v25, %v1775_v22  ;;  %v1798_v22 = vld [vmem:[%s19960_s3 + $0x110] sm:$0xff] }
 0x2bb   : > { %v1802_v25 = vld [vmem:[%s19960_s3 + $0x130] sm:$0xff] }
 0x2bd   : > { %10700 = vmatpush1.bf16.msra.mxu0 %v10699_v45  ;;  %v10711_v45 = vpack.c.bf16 %v1778_v34, %v1774_v11  ;;  %v1806_v11 = vld [vmem:[%s19960_s3 + $0x150] sm:$0xff] }
 0x2be   : > { %10702 = vmatprep.subr.bf16.mxu0 %v10701_v40  ;;  %v10713_v40 = vpack.c.bf16 %v1787_v47, %v1783_v51  ;;  %v1810_v34 = vld [vmem:[%s19960_s3 + $0x170] sm:$0xff]  ;;  %v1815_v51 = vld [vmem:[%s19960_s3 + $0x198] sm:$0xff] }
 0x2c1   : > { %10704 = vmatpush1.bf16.msra.mxu0 %v10703_v54  ;;  %v1790_v54 = vld [vmem:[%s19960_s3 + $0xd0] sm:$0xff] }
 0x2c2   : > { %10706 = vmatprep.subr.bf16.mxu0 %v10705_v61  ;;  %v1794_v61 = vld [vmem:[%s19960_s3 + $0xf0] sm:$0xff] }
 0x2c4   : > { %3040 = vmatmul.mubr.f32.vlgmr.msra.gmra.mrb[16].mxu0 %v14242_v30  ;;  %v1795_v30 = vld [vmem:[%s19960_s3 + $0xf8] sm:$0xff] }
 0x2c5   : > { %8518 = vmatprep.mubr.msk.f32.mxu0 %vm2377_vm3, %v14283_v53  ;;  %10708 = vmatpush1.bf16.msra.mxu0 %v10707_v14  ;;  %v10715_v53 = vpack.c.bf16 %v1786_v49, %v1782_v36  ;;  %v10717_v3 = vpack.c.bf16 %v1795_v30, %v1791_v12  ;;  %v1807_v14 = vld [vmem:[%s19960_s3 + $0x158] sm:$0xff] }
 0x2c6   : > { %10710 = vmatprep.subr.bf16.mxu0 %v10709_v52  ;;  %v1823_v36 = vld [vmem:[%s19960_s3 + $0x1d8] sm:$0xff] }
 0x2c8   : > { %3046 = vmatmul.mubr.f32.gmra.mrb[18].mxu0 %v14299_v17  ;;  %v1803_v17 = vld [vmem:[%s19960_s3 + $0x138] sm:$0xff] }
 0x2c9   : > { %8519 = vmatprep.mubr.msk.f32.mxu0 %vm2377_vm3, %v14352_v55  ;;  %10712 = vmatpush1.bf16.msra.mxu0 %v10711_v45  ;;  %v10719_v55 = vpack.c.bf16 %v1794_v61, %v1790_v54  ;;  %v10721_v39 = vpack.c.bf16 %v1803_v17, %v1799_v26  ;;  %v1814_v45 = vld [vmem:[%s19960_s3 + $0x190] sm:$0xff] }
 0x2ca   : > { %10714 = vmatprep.subr.bf16.mxu0 %v10713_v40  ;;  %v1818_v40 = vld [vmem:[%s19960_s3 + $0x1b0] sm:$0xff] }
 0x2cb   : > { %v10731_v49 = vpack.c.bf16 %v1818_v40, %v1814_v45  ;;  %v1855_v45 = vld [vmem:[%s19960_s3 + $0x2d8] sm:$0xff] }
 0x2cc   : > { %3052 = vmatmul.mubr.f32.gmra.mrb[20].mxu0 %v14369_v42  ;;  %v1811_v42 = vld [vmem:[%s19960_s3 + $0x178] sm:$0xff] }
 0x2cd   : > { %8520 = vmatprep.mubr.msk.f32.mxu0 %vm2377_vm3, %v14425_v43  ;;  %10716 = vmatpush1.bf16.msra.mxu0 %v10715_v53  ;;  %v10723_v43 = vpack.c.bf16 %v1802_v25, %v1798_v22  ;;  %v10725_v52 = vpack.c.bf16 %v1811_v42, %v1807_v14  ;;  %v1822_v53 = vld [vmem:[%s19960_s3 + $0x1d0] sm:$0xff]  ;;  %v1859_v40 = vld [vmem:[%s19960_s3 + $0x2f8] sm:$0xff] }
 0x2ce   : > { %10718 = vmatprep.subr.bf16.mxu0 %v10717_v3  ;;  %v1826_v3 = vld [vmem:[%s19960_s3 + $0x1f0] sm:$0xff] }
 0x2cf   : > { %v10735_v61 = vpack.c.bf16 %v1826_v3, %v1822_v53  ;;  %v1854_v53 = vld [vmem:[%s19960_s3 + $0x2d0] sm:$0xff] }
 0x2d0   : > { %3058 = vmatmul.mubr.f32.gmra.mrb[22].mxu0 %v14447_v10  ;;  %v1819_v10 = vld [vmem:[%s19960_s3 + $0x1b8] sm:$0xff]  ;;  %v1858_v3 = vld [vmem:[%s19960_s3 + $0x2f0] sm:$0xff] }
 0x2d1   : > { %8521 = vmatprep.mubr.msk.f32.mxu0 %vm2377_vm3, %v14502_v46  ;;  %10720 = vmatpush1.bf16.msra.mxu0 %v10719_v55  ;;  %v10727_v46 = vpack.c.bf16 %v1810_v34, %v1806_v11  ;;  %v10729_v47 = vpack.c.bf16 %v1819_v10, %v1815_v51  ;;  %v1830_v55 = vld [vmem:[%s19960_s3 + $0x210] sm:$0xff] }
 0x2d2   : > { %10722 = vmatprep.subr.bf16.mxu0 %v10721_v39  ;;  %v1834_v39 = vld [vmem:[%s19960_s3 + $0x230] sm:$0xff] }
 0x2d3   : > { %v10739_v25 = vpack.c.bf16 %v1834_v39, %v1830_v55 }
 0x2d4   : > { %3064 = vmatmul.mubr.f32.gmra.mrb[24].mxu0 %v14524_v8  ;;  %v1827_v8 = vld [vmem:[%s19960_s3 + $0x1f8] sm:$0xff] }
 0x2d5   : > { %8522 = vmatprep.mubr.msk.f32.mxu0 %vm2377_vm3, %v14579_v63  ;;  %10724 = vmatpush1.bf16.msra.mxu0 %v10723_v43  ;;  %v10733_v30 = vpack.c.bf16 %v1827_v8, %v1823_v36  ;;  %v1838_v43 = vld [vmem:[%s19960_s3 + $0x250] sm:$0xff] }
 0x2d6   : > { %10726 = vmatprep.subr.bf16.mxu0 %v10725_v52  ;;  %v1842_v52 = vld [vmem:[%s19960_s3 + $0x270] sm:$0xff] }
 0x2d7   : > { %v10743_v34 = vpack.c.bf16 %v1842_v52, %v1838_v43 }
 0x2d8   : > { %3070 = vmatmul.mubr.f32.gmra.mrb[26].mxu0 %v14601_v2  ;;  %v1831_v2 = vld [vmem:[%s19960_s3 + $0x218] sm:$0xff] }
 0x2d9   : > { %v16259_v63 = vpop.f32.mrb[16].mxu1  ;;  %8523 = vmatprep.mubr.msk.f32.mxu0 %vm2377_vm3, %v14631_v4  ;;  %10728 = vmatpush1.bf16.msra.mxu0 %v10727_v46  ;;  %v1835_v4 = vld [vmem:[%s19960_s3 + $0x238] sm:$0xff]  ;;  %v1846_v46 = vld [vmem:[%s19960_s3 + $0x290] sm:$0xff] }
 0x2da   : > { %v16263_v12 = vpop.f32.mrb[17].mxu1  ;;  %10730 = vmatprep.subr.bf16.mxu0 %v10729_v47  ;;  %v10737_v17 = vpack.c.bf16 %v1835_v4, %v1831_v2  ;;  %v1850_v47 = vld [vmem:[%s19960_s3 + $0x2b0] sm:$0xff]  ;;  %v1863_v2 = vld [vmem:[%s19960_s3 + $0x318] sm:$0xff] }
 0x2db   : > { %v10747_v8 = vpack.c.bf16 %v1850_v47, %v1846_v46  ;;  %v1867_v4 = vld [vmem:[%s19960_s3 + $0x338] sm:$0xff] }
 0x2dc   : > { %3076 = vmatmul.mubr.f32.gmra.mrb[28].mxu0 %v14629_v50  ;;  %v1839_v50 = vld [vmem:[%s19960_s3 + $0x258] sm:$0xff]  ;;  %v10753_v39 = vpack.c.bf16 %v1867_v4, %v1863_v2 }
 0x2dd   : > { %v16278_v54 = vpop.f32.mrb[18].mxu1  ;;  %8524 = vmatprep.mubr.msk.f32.mxu0 %vm2377_vm3, %v14680_v21  ;;  %10732 = vmatpush1.bf16.msra.mxu0 %v10731_v49  ;;  %v1843_v21 = vld [vmem:[%s19960_s3 + $0x278] sm:$0xff] }
 0x2de   : > { %v16282_v26 = vpop.f32.mrb[19].mxu1  ;;  %10734 = vmatprep.subr.bf16.mxu0 %v10733_v30  ;;  %v10741_v42 = vpack.c.bf16 %v1843_v21, %v1839_v50  ;;  %v10749_v30 = vpack.c.bf16 %v1859_v40, %v1855_v45  ;;  %v1862_v50 = vld [vmem:[%s19960_s3 + $0x310] sm:$0xff]  ;;  %v1879_v46 = vld [vmem:[%s19960_s3 + $0x398] sm:$0xff] }
 0x2df   : > { %v1866_v21 = vld [vmem:[%s19960_s3 + $0x330] sm:$0xff]  ;;  %v1883_v47 = vld [vmem:[%s19960_s3 + $0x3b8] sm:$0xff] }
 0x2e0   : > { %3082 = vmatmul.mubr.f32.gmra.mrb[30].mxu0 %v14693_v28  ;;  %v1847_v28 = vld [vmem:[%s19960_s3 + $0x298] sm:$0xff]  ;;  %v10755_v52 = vpack.c.bf16 %v1866_v21, %v1862_v50  ;;  %v1886_v50 = vld [vmem:[%s19960_s3 + $0x3d0] sm:$0xff] }
 0x2e1   : > { %v16297_v22 = vpop.f32.mrb[20].mxu1  ;;  %10736 = vmatpush1.bf16.msra.mxu0 %v10735_v61  ;;  %3152 = vmatprep.mubr.f32.mxu0 %v20102_v27  ;;  %v1851_v27 = vld [vmem:[%s19960_s3 + $0x2b8] sm:$0xff]  ;;  %v1890_v21 = vld [vmem:[%s19960_s3 + $0x3f0] sm:$0xff] }
 0x2e2   : > { %v16300_v14 = vpop.f32.mrb[21].mxu1  ;;  %10738 = vmatprep.subr.bf16.mxu0 %v10737_v17  ;;  %v10745_v10 = vpack.c.bf16 %v1851_v27, %v1847_v28  ;;  %v10751_v17 = vpack.c.bf16 %v1858_v3, %v1854_v53  ;;  %v1878_v53 = vld [vmem:[%s19960_s3 + $0x390] sm:$0xff]  ;;  %v1887_v2 = vld [vmem:[%s19960_s3 + $0x3d8] sm:$0xff] }
 0x2e3   : > { %v1882_v3 = vld [vmem:[%s19960_s3 + $0x3b0] sm:$0xff]  ;;  %v1891_v4 = vld [vmem:[%s19960_s3 + $0x3f8] sm:$0xff] }
 0x2e5   : > { %v16314_v11 = vpop.f32.mrb[22].mxu1  ;;  %10740 = vmatpush1.bf16.msra.mxu0 %v10739_v25  ;;  %v1871_v25 = vld [vmem:[%s19960_s3 + $0x358] sm:$0xff] }
 0x2e6   : > { %v16316_v51 = vpop.f32.mrb[23].mxu1  ;;  %10742 = vmatprep.subr.bf16.mxu0 %v10741_v42  ;;  %v1875_v42 = vld [vmem:[%s19960_s3 + $0x378] sm:$0xff] }
 0x2e7   : > { %v10757_v27 = vpack.c.bf16 %v1875_v42, %v1871_v25  ;;  %v8534_v25 = vld [vmem:[%s19960_s3 + $0xf88] sm:$0xff] }
 0x2e8   : > { %v8538_v42 = vld [vmem:[%s19960_s3 + $0xfa8] sm:$0xff] }
 0x2e9   : > { %v16330_v36 = vpop.f32.mrb[24].mxu1  ;;  %10744 = vmatpush1.bf16.msra.mxu0 %v10743_v34  ;;  %v1870_v34 = vld [vmem:[%s19960_s3 + $0x350] sm:$0xff] }
 0x2ea   : > { %v16332_v49 = vpop.f32.mrb[25].mxu1  ;;  %10746 = vmatprep.subr.bf16.mxu0 %v10745_v10  ;;  %v1874_v10 = vld [vmem:[%s19960_s3 + $0x370] sm:$0xff] }
 0x2eb   : > { %v10759_v40 = vpack.c.bf16 %v1874_v10, %v1870_v34  ;;  %v8533_v34 = vld [vmem:[%s19960_s3 + $0xf80] sm:$0xff] }
 0x2ec   : > { %v8537_v10 = vld [vmem:[%s19960_s3 + $0xfa0] sm:$0xff] }
 0x2ed   : > { %v16346_v61 = vpop.f32.mrb[26].mxu1  ;;  %10748 = vmatpush1.bf16.msra.mxu0 %v10747_v8 }
 0x2ee   : > { %v16348_v55 = vpop.f32.mrb[27].mxu1  ;;  %10750 = vmatprep.subr.bf16.mxu0 %v10749_v30  ;;  %v10761_v30 = vpack.c.bf16 %v1883_v47, %v1879_v46  ;;  %v8542_v46 = vld [vmem:[%s19960_s3 + $0xfc8] sm:$0xff] }
 0x2ef   : > { %v8546_v47 = vld [vmem:[%s19960_s3 + $0xfe8] sm:$0xff] }
 0x2f1   : > { %v16362_v43 = vpop.f32.mrb[28].mxu1  ;;  %10752 = vmatpush1.bf16.msra.mxu0 %v10751_v17  ;;  %v10763_v17 = vpack.c.bf16 %v1882_v3, %v1878_v53  ;;  %v8541_v53 = vld [vmem:[%s19960_s3 + $0xfc0] sm:$0xff] }
 0x2f2   : > { %v16364_v28 = vpop.f32.mrb[29].mxu1  ;;  %10754 = vmatprep.subr.bf16.mxu0 %v10753_v39  ;;  %v10765_v39 = vpack.c.bf16 %v1891_v4, %v1887_v2  ;;  %v8545_v3 = vld [vmem:[%s19960_s3 + $0xfe0] sm:$0xff]  ;;  %v8550_v2 = vld [vmem:[%s19960_s3 + $0x1008] sm:$0xff] }
 0x2f3   : > { %v8554_v4 = vld [vmem:[%s19960_s3 + $0x1028] sm:$0xff] }
 0x2f5   : > { %v16378_v45 = vpop.f32.mrb[30].mxu1  ;;  %10756 = vmatpush1.bf16.msra.mxu0 %v10755_v52  ;;  %v10767_v52 = vpack.c.bf16 %v1890_v21, %v1886_v50  ;;  %v8549_v50 = vld [vmem:[%s19960_s3 + $0x1000] sm:$0xff] }
 0x2f6   : > { %v16380_v8 = vpop.f32.mrb[31].mxu1  ;;  %10758 = vmatprep.subr.bf16.mxu0 %v10757_v27  ;;  %v10829_v27 = vpack.c.bf16 %v8538_v42, %v8534_v25  ;;  %v8553_v21 = vld [vmem:[%s19960_s3 + $0x1020] sm:$0xff]  ;;  %v8558_v25 = vld [vmem:[%s19960_s3 + $0x1048] sm:$0xff] }
 0x2f9   : > { %10760 = vmatpush1.bf16.msra.mxu0 %v10759_v40  ;;  %v10831_v40 = vpack.c.bf16 %v8537_v10, %v8533_v34  ;;  %v8566_v34 = vld [vmem:[%s19960_s3 + $0x1088] sm:$0xff] }
 0x2fa   : > { %10762 = vmatprep.subr.bf16.mxu0 %v10761_v30  ;;  %v10833_v30 = vpack.c.bf16 %v8546_v47, %v8542_v46  ;;  %v8565_v46 = vld [vmem:[%s19960_s3 + $0x1080] sm:$0xff] }
 0x2fb   : > { %v8569_v47 = vld [vmem:[%s19960_s3 + $0x10a0] sm:$0xff] }
 0x2fd   : > { %10764 = vmatpush1.bf16.msra.mxu0 %v10763_v17  ;;  %v10835_v17 = vpack.c.bf16 %v8545_v3, %v8541_v53  ;;  %v8573_v53 = vld [vmem:[%s19960_s3 + $0x10c0] sm:$0xff] }
 0x2fe   : > { %10766 = vmatprep.subr.bf16.mxu0 %v10765_v39  ;;  %v10837_v39 = vpack.c.bf16 %v8554_v4, %v8550_v2  ;;  %v8577_v3 = vld [vmem:[%s19960_s3 + $0x10e0] sm:$0xff]  ;;  %v8582_v2 = vld [vmem:[%s19960_s3 + $0x1108] sm:$0xff] }
 0x301   : > { %10768 = vmatpush1.bf16.msra.mxu0 %v10767_v52  ;;  %v8557_v52 = vld [vmem:[%s19960_s3 + $0x1040] sm:$0xff] }
 0x302   : > { %10830 = vmatprep.subr.bf16.mxu0 %v10829_v27  ;;  %v8561_v27 = vld [vmem:[%s19960_s3 + $0x1060] sm:$0xff] }
 0x304   : > { %3153 = vmatmul.mubr.f32.vlgmr.msra.gmra.mrb[32].mxu0 %v20103_v59  ;;  %v8562_v59 = vld [vmem:[%s19960_s3 + $0x1068] sm:$0xff] }
 0x305   : > { %3158 = vmatprep.mubr.f32.mxu0 %v20104_v7  ;;  %10832 = vmatpush1.bf16.msra.mxu0 %v10831_v40  ;;  %v10839_v7 = vpack.c.bf16 %v8553_v21, %v8549_v50  ;;  %v10841_v42 = vpack.c.bf16 %v8562_v59, %v8558_v25  ;;  %v8574_v40 = vld [vmem:[%s19960_s3 + $0x10c8] sm:$0xff]  ;;  %v8589_v25 = vld [vmem:[%s19960_s3 + $0x1140] sm:$0xff] }
 0x306   : > { %10834 = vmatprep.subr.bf16.mxu0 %v10833_v30  ;;  %v8590_v50 = vld [vmem:[%s19960_s3 + $0x1148] sm:$0xff]  ;;  %v8593_v59 = vld [vmem:[%s19960_s3 + $0x1160] sm:$0xff] }
 0x308   : > { %3159 = vmatmul.mubr.f32.gmra.mrb[34].mxu0 %v20105_v15  ;;  %v8570_v15 = vld [vmem:[%s19960_s3 + $0x10a8] sm:$0xff] }
 0x309   : > { %3164 = vmatprep.mubr.f32.mxu0 %v20106_v20  ;;  %10836 = vmatpush1.bf16.msra.mxu0 %v10835_v17  ;;  %v10843_v20 = vpack.c.bf16 %v8561_v27, %v8557_v52  ;;  %v10845_v10 = vpack.c.bf16 %v8570_v15, %v8566_v34  ;;  %v8581_v17 = vld [vmem:[%s19960_s3 + $0x1100] sm:$0xff]  ;;  %v8606_v34 = vld [vmem:[%s19960_s3 + $0x11c8] sm:$0xff] }
 0x30a   : > { %10838 = vmatprep.subr.bf16.mxu0 %v10837_v39  ;;  %v8585_v39 = vld [vmem:[%s19960_s3 + $0x1120] sm:$0xff] }
 0x30b   : > { %v8597_v52 = vld [vmem:[%s19960_s3 + $0x1180] sm:$0xff] }
 0x30c   : > { %3165 = vmatmul.mubr.f32.gmra.mrb[36].mxu0 %v20107_v9  ;;  %v8578_v9 = vld [vmem:[%s19960_s3 + $0x10e8] sm:$0xff]  ;;  %v8601_v27 = vld [vmem:[%s19960_s3 + $0x11a0] sm:$0xff] }
 0x30d   : > { %3170 = vmatprep.mubr.f32.mxu0 %v20108_v6  ;;  %10840 = vmatpush1.bf16.msra.mxu0 %v10839_v7  ;;  %v10847_v6 = vpack.c.bf16 %v8569_v47, %v8565_v46  ;;  %v10849_v30 = vpack.c.bf16 %v8578_v9, %v8574_v40  ;;  %v8598_v7 = vld [vmem:[%s19960_s3 + $0x1188] sm:$0xff]  ;;  %v10863_v15 = vpack.c.bf16 %v8601_v27, %v8597_v52  ;;  %v8609_v46 = vld [vmem:[%s19960_s3 + $0x11e0] sm:$0xff] }
 0x30e   : > { %10842 = vmatprep.subr.bf16.mxu0 %v10841_v42  ;;  %v8614_v47 = vld [vmem:[%s19960_s3 + $0x1208] sm:$0xff] }
 0x30f   : > { %v8646_v52 = vld [vmem:[%s19960_s3 + $0x1308] sm:$0xff] }
 0x310   : > { %3171 = vmatmul.mubr.f32.gmra.mrb[38].mxu0 %v20109_v38  ;;  %v8586_v38 = vld [vmem:[%s19960_s3 + $0x1128] sm:$0xff] }
 0x311   : > { %3176 = vmatprep.mubr.f32.mxu0 %v20110_v32  ;;  %10844 = vmatpush1.bf16.msra.mxu0 %v10843_v20  ;;  %v10851_v32 = vpack.c.bf16 %v8577_v3, %v8573_v53  ;;  %v10853_v4 = vpack.c.bf16 %v8586_v38, %v8582_v2  ;;  %v8622_v53 = vld [vmem:[%s19960_s3 + $0x1248] sm:$0xff] }
 0x312   : > { %10846 = vmatprep.subr.bf16.mxu0 %v10845_v10  ;;  %v8605_v10 = vld [vmem:[%s19960_s3 + $0x11c0] sm:$0xff]  ;;  %v8626_v3 = vld [vmem:[%s19960_s3 + $0x1268] sm:$0xff] }
 0x313   : > { %v10867_v40 = vpack.c.bf16 %v8609_v46, %v8605_v10  ;;  %v10873_v38 = vpack.c.bf16 %v8626_v3, %v8622_v53  ;;  %v8650_v27 = vld [vmem:[%s19960_s3 + $0x1328] sm:$0xff]  ;;  %v8661_v3 = vld [vmem:[%s19960_s3 + $0x1380] sm:$0xff] }
 0x314   : > { %3177 = vmatmul.mubr.f32.gmra.mrb[40].mxu0 %v20111_v24  ;;  %v8594_v24 = vld [vmem:[%s19960_s3 + $0x1168] sm:$0xff] }
 0x315   : > { %3182 = vmatprep.mubr.f32.mxu0 %v20112_v19  ;;  %10848 = vmatpush1.bf16.msra.mxu0 %v10847_v6  ;;  %v10855_v19 = vpack.c.bf16 %v8585_v39, %v8581_v17  ;;  %v10857_v21 = vpack.c.bf16 %v8594_v24, %v8590_v50  ;;  %v8613_v6 = vld [vmem:[%s19960_s3 + $0x1200] sm:$0xff]  ;;  %v8630_v17 = vld [vmem:[%s19960_s3 + $0x1288] sm:$0xff] }
 0x316   : > { %10850 = vmatprep.subr.bf16.mxu0 %v10849_v30  ;;  %v8617_v30 = vld [vmem:[%s19960_s3 + $0x1220] sm:$0xff]  ;;  %v8634_v39 = vld [vmem:[%s19960_s3 + $0x12a8] sm:$0xff] }
 0x317   : > { %v10871_v2 = vpack.c.bf16 %v8617_v30, %v8613_v6  ;;  %v10877_v24 = vpack.c.bf16 %v8634_v39, %v8630_v17  ;;  %v8658_v10 = vld [vmem:[%s19960_s3 + $0x1368] sm:$0xff]  ;;  %v8669_v39 = vld [vmem:[%s19960_s3 + $0x13c0] sm:$0xff] }
 0x318   : > { %3183 = vmatmul.mubr.f32.gmra.mrb[42].mxu0 %v20113_v41  ;;  %v8602_v41 = vld [vmem:[%s19960_s3 + $0x11a8] sm:$0xff] }
 0x319   : > { %3188 = vmatprep.mubr.f32.mxu0 %v20114_v16  ;;  %10852 = vmatpush1.bf16.msra.mxu0 %v10851_v32  ;;  %v10859_v16 = vpack.c.bf16 %v8593_v59, %v8589_v25  ;;  %v10861_v42 = vpack.c.bf16 %v8602_v41, %v8598_v7  ;;  %v8621_v32 = vld [vmem:[%s19960_s3 + $0x1240] sm:$0xff]  ;;  %v8638_v25 = vld [vmem:[%s19960_s3 + $0x12c8] sm:$0xff] }
 0x31a   : > { %10854 = vmatprep.subr.bf16.mxu0 %v10853_v4  ;;  %v8625_v4 = vld [vmem:[%s19960_s3 + $0x1260] sm:$0xff]  ;;  %v8642_v59 = vld [vmem:[%s19960_s3 + $0x12e8] sm:$0xff] }
 0x31b   : > { %v10875_v50 = vpack.c.bf16 %v8625_v4, %v8621_v32  ;;  %v10881_v41 = vpack.c.bf16 %v8642_v59, %v8638_v25  ;;  %v8666_v6 = vld [vmem:[%s19960_s3 + $0x13a8] sm:$0xff]  ;;  %v20119_v25 = vld [vmem:[#allocation34_spill] sm:$0xff] }
 0x31c   : > { %3189 = vmatmul.mubr.f32.gmra.mrb[44].mxu0 %v14606_v62  ;;  %v8610_v62 = vld [vmem:[%s19960_s3 + $0x11e8] sm:$0xff] }
 0x31d   : > { %3194 = vmatprep.mubr.f32.mxu0 %v20115_v13  ;;  %10856 = vmatpush1.bf16.msra.mxu0 %v10855_v19  ;;  %v20117_v13 = vld [vmem:[#allocation32_spill] sm:$0xff]  ;;  %v10865_v20 = vpack.c.bf16 %v8610_v62, %v8606_v34  ;;  %v8629_v19 = vld [vmem:[%s19960_s3 + $0x1280] sm:$0xff]  ;;  %v10885_v62 = vpack.c.bf16 %v8650_v27, %v8646_v52 }
 0x31e   : > { %10858 = vmatprep.subr.bf16.mxu0 %v10857_v21  ;;  %v8633_v21 = vld [vmem:[%s19960_s3 + $0x12a0] sm:$0xff]  ;;  %v8674_v32 = vld [vmem:[%s19960_s3 + $0x13e8] sm:$0xff] }
 0x31f   : > { %v10879_v7 = vpack.c.bf16 %v8633_v21, %v8629_v19  ;;  %v8682_v19 = vld [vmem:[%s19960_s3 + $0x1428] sm:$0xff]  ;;  %v20118_v21 = vld [vmem:[#allocation33_spill] sm:$0xff] }
 0x320   : > { %3195 = vmatmul.mubr.f32.gmra.mrb[46].mxu0 %v20116_v57  ;;  %v8618_v57 = vld [vmem:[%s19960_s3 + $0x1228] sm:$0xff] }
 0x321   : > { %10860 = vmatpush1.bf16.msra.mxu0 %v10859_v16  ;;  %3727 = vmatprep.mubr.f32.mxu0 %v20117_v13  ;;  %v10869_v9 = vpack.c.bf16 %v8618_v57, %v8614_v47  ;;  %v8637_v16 = vld [vmem:[%s19960_s3 + $0x12c0] sm:$0xff]  ;;  %v8690_v52 = vld [vmem:[%s19960_s3 + $0x1468] sm:$0xff] }
 0x322   : > { %10862 = vmatprep.subr.bf16.mxu0 %v10861_v42  ;;  %v8641_v42 = vld [vmem:[%s19960_s3 + $0x12e0] sm:$0xff]  ;;  %v20120_v27 = vld [vmem:[#allocation36_spill] sm:$0xff] }
 0x323   : > { %v10883_v34 = vpack.c.bf16 %v8641_v42, %v8637_v16  ;;  %v8645_v13 = vld [vmem:[%s19960_s3 + $0x1300] sm:$0xff]  ;;  %v8686_v42 = vld [vmem:[%s19960_s3 + $0x1448] sm:$0xff] }
 0x324   : > { %v8653_v57 = vld [vmem:[%s19960_s3 + $0x1340] sm:$0xff] }
 0x325   : > { %10864 = vmatpush1.bf16.msra.mxu0 %v10863_v15  ;;  %v8649_v15 = vld [vmem:[%s19960_s3 + $0x1320] sm:$0xff] }
 0x326   : > { %10866 = vmatprep.subr.bf16.mxu0 %v10865_v20  ;;  %v8654_v20 = vld [vmem:[%s19960_s3 + $0x1348] sm:$0xff]  ;;  %v10887_v46 = vpack.c.bf16 %v8649_v15, %v8645_v13  ;;  %v8681_v16 = vld [vmem:[%s19960_s3 + $0x1420] sm:$0xff]  ;;  %v10905_v13 = vpack.c.bf16 %v8690_v52, %v8686_v42  ;;  %v20128_v52 = vld [vmem:[#allocation45_spill] sm:$0xff] }
 0x327   : > { %v10889_v47 = vpack.c.bf16 %v8658_v10, %v8654_v20  ;;  %v8685_v15 = vld [vmem:[%s19960_s3 + $0x1440] sm:$0xff]  ;;  %v8694_v10 = vld [vmem:[%s19960_s3 + $0x1488] sm:$0xff] }
 0x328   : > { %v8689_v20 = vld [vmem:[%s19960_s3 + $0x1460] sm:$0xff]  ;;  %v8722_v42 = vld [vmem:[%s19960_s3 + $0x1568] sm:$0xff] }
 0x329   : > { %10868 = vmatpush1.bf16.msra.mxu0 %v10867_v40  ;;  %v8657_v40 = vld [vmem:[%s19960_s3 + $0x1360] sm:$0xff] }
 0x32a   : > { %10870 = vmatprep.subr.bf16.mxu0 %v10869_v9  ;;  %v8662_v9 = vld [vmem:[%s19960_s3 + $0x1388] sm:$0xff]  ;;  %v10891_v30 = vpack.c.bf16 %v8657_v40, %v8653_v57  ;;  %v10907_v40 = vpack.c.bf16 %v8689_v20, %v8685_v15  ;;  %v8721_v15 = vld [vmem:[%s19960_s3 + $0x1560] sm:$0xff] }
 0x32b   : > { %v10893_v53 = vpack.c.bf16 %v8666_v6, %v8662_v9  ;;  %v20123_v57 = vld [vmem:[#allocation39_spill] sm:$0xff] }
 0x32c   : > { %v8693_v6 = vld [vmem:[%s19960_s3 + $0x1480] sm:$0xff]  ;;  %v8726_v20 = vld [vmem:[%s19960_s3 + $0x1588] sm:$0xff] }
 0x32d   : > { %10872 = vmatpush1.bf16.msra.mxu0 %v10871_v2  ;;  %v8665_v2 = vld [vmem:[%s19960_s3 + $0x13a0] sm:$0xff] }
 0x32e   : > { %10874 = vmatprep.subr.bf16.mxu0 %v10873_v38  ;;  %v8670_v38 = vld [vmem:[%s19960_s3 + $0x13c8] sm:$0xff]  ;;  %v10895_v4 = vpack.c.bf16 %v8665_v2, %v8661_v3 }
 0x32f   : > { %v10897_v17 = vpack.c.bf16 %v8674_v32, %v8670_v38  ;;  %v8706_v3 = vld [vmem:[%s19960_s3 + $0x14e8] sm:$0xff]  ;;  %v20125_v38 = vld [vmem:[#allocation41_spill] sm:$0xff] }
 0x330   : > { %v20124_v2 = vld [vmem:[#allocation40_spill] sm:$0xff] }
 0x331   : > { %10876 = vmatpush1.bf16.msra.mxu0 %v10875_v50  ;;  %v8673_v50 = vld [vmem:[%s19960_s3 + $0x13e0] sm:$0xff] }
 0x332   : > { %10878 = vmatprep.subr.bf16.mxu0 %v10877_v24  ;;  %v8678_v24 = vld [vmem:[%s19960_s3 + $0x1408] sm:$0xff]  ;;  %v10899_v59 = vpack.c.bf16 %v8673_v50, %v8669_v39  ;;  %v8705_v39 = vld [vmem:[%s19960_s3 + $0x14e0] sm:$0xff] }
 0x333   : > { %v8710_v50 = vld [vmem:[%s19960_s3 + $0x1508] sm:$0xff] }
 0x335   : > { %10880 = vmatpush1.bf16.msra.mxu0 %v10879_v7  ;;  %v10901_v7 = vpack.c.bf16 %v8682_v19, %v8678_v24  ;;  %v8714_v24 = vld [vmem:[%s19960_s3 + $0x1528] sm:$0xff]  ;;  %v20126_v19 = vld [vmem:[#allocation42_spill] sm:$0xff] }
 0x336   : > { %10882 = vmatprep.subr.bf16.mxu0 %v10881_v41  ;;  %v8677_v41 = vld [vmem:[%s19960_s3 + $0x1400] sm:$0xff] }
 0x339   : > { %10884 = vmatpush1.bf16.msra.mxu0 %v10883_v34  ;;  %v20121_v34 = vld [vmem:[#allocation37_spill] sm:$0xff] }
 0x33a   : > { %10886 = vmatprep.subr.bf16.mxu0 %v10885_v62  ;;  %v10903_v62 = vpack.c.bf16 %v8681_v16, %v8677_v41  ;;  %v8713_v41 = vld [vmem:[%s19960_s3 + $0x1520] sm:$0xff]  ;;  %v8718_v16 = vld [vmem:[%s19960_s3 + $0x1548] sm:$0xff] }
 0x33d   : > { %10888 = vmatpush1.bf16.msra.mxu0 %v10887_v46  ;;  %v8698_v46 = vld [vmem:[%s19960_s3 + $0x14a8] sm:$0xff] }
 0x33e   : > { %10890 = vmatprep.subr.bf16.mxu0 %v10889_v47  ;;  %v20122_v47 = vld [vmem:[#allocation38_spill] sm:$0xff]  ;;  %v10909_v9 = vpack.c.bf16 %v8698_v46, %v8694_v10  ;;  %v8730_v10 = vld [vmem:[%s19960_s3 + $0x15a8] sm:$0xff] }
 0x33f   : > { %v20130_v46 = vld [vmem:[#allocation44_spill] sm:$0xff] }
 0x341   : > { %10892 = vmatpush1.bf16.msra.mxu0 %v10891_v30  ;;  %v8697_v30 = vld [vmem:[%s19960_s3 + $0x14a0] sm:$0xff] }
 0x342   : > { %10894 = vmatprep.subr.bf16.mxu0 %v10893_v53  ;;  %v8702_v53 = vld [vmem:[%s19960_s3 + $0x14c8] sm:$0xff]  ;;  %v10911_v32 = vpack.c.bf16 %v8697_v30, %v8693_v6 }
 0x343   : > { %v8734_v6 = vld [vmem:[%s19960_s3 + $0x15c8] sm:$0xff] }
 0x344   : > { %3728 = vmatmul.mubr.f32.vlgmr.msra.gmra.mrb[16].mxu0 %v20118_v21  ;;  %v20127_v21 = vld [vmem:[#allocation43_spill] sm:$0xff] }
 0x345   : > { %3733 = vmatprep.mubr.f32.mxu0 %v20119_v25  ;;  %10896 = vmatpush1.bf16.msra.mxu0 %v10895_v4  ;;  %v10913_v4 = vpack.c.bf16 %v8706_v3, %v8702_v53  ;;  %v8733_v3 = vld [vmem:[%s19960_s3 + $0x15c0] sm:$0xff] }
 0x346   : > { %10898 = vmatprep.subr.bf16.mxu0 %v10897_v17  ;;  %v8701_v17 = vld [vmem:[%s19960_s3 + $0x14c0] sm:$0xff] }
 0x347   : > { %v10915_v25 = vpack.c.bf16 %v8705_v39, %v8701_v17  ;;  %v8745_v17 = vld [vmem:[%s19960_s3 + $0x1620] sm:$0xff]  ;;  %v8750_v39 = vld [vmem:[%s19960_s3 + $0x1648] sm:$0xff] }
 0x348   : > { %3734 = vmatmul.mubr.f32.gmra.mrb[18].mxu0 %v20120_v27  ;;  %v20129_v27 = vld [vmem:[#allocation46_spill] sm:$0xff] }
 0x349   : > { %3739 = vmatprep.mubr.f32.mxu0 %v20121_v34  ;;  %10900 = vmatpush1.bf16.msra.mxu0 %v10899_v59  ;;  %v10917_v59 = vpack.c.bf16 %v8714_v24, %v8710_v50  ;;  %v8754_v50 = vld [vmem:[%s19960_s3 + $0x1668] sm:$0xff] }
 0x34a   : > { %10902 = vmatprep.subr.bf16.mxu0 %v10901_v7  ;;  %v8709_v7 = vld [vmem:[%s19960_s3 + $0x1500] sm:$0xff] }
 0x34b   : > { %v10919_v34 = vpack.c.bf16 %v8713_v41, %v8709_v7  ;;  %v8762_v7 = vld [vmem:[%s19960_s3 + $0x16a8] sm:$0xff] }
 0x34c   : > { %3740 = vmatmul.mubr.f32.gmra.mrb[20].mxu0 %v20122_v47 }
 0x34d   : > { %3745 = vmatprep.mubr.f32.mxu0 %v20123_v57  ;;  %10904 = vmatpush1.bf16.msra.mxu0 %v10903_v62  ;;  %v10921_v62 = vpack.c.bf16 %v8722_v42, %v8718_v16  ;;  %v10925_v57 = vpack.c.bf16 %v8730_v10, %v8726_v20  ;;  %v8757_v42 = vld [vmem:[%s19960_s3 + $0x1680] sm:$0xff]  ;;  %v8774_v10 = vld [vmem:[%s19960_s3 + $0x1708] sm:$0xff] }
 0x34e   : > { %10906 = vmatprep.subr.bf16.mxu0 %v10905_v13  ;;  %v8717_v13 = vld [vmem:[%s19960_s3 + $0x1540] sm:$0xff] }
 0x34f   : > { %v10923_v47 = vpack.c.bf16 %v8721_v15, %v8717_v13  ;;  %v8765_v15 = vld [vmem:[%s19960_s3 + $0x16c0] sm:$0xff] }
 0x350   : > { %3746 = vmatmul.mubr.f32.gmra.mrb[22].mxu0 %v20124_v2  ;;  %v8737_v2 = vld [vmem:[%s19960_s3 + $0x15e0] sm:$0xff] }
 0x351   : > { %3751 = vmatprep.mubr.f32.mxu0 %v20125_v38  ;;  %10908 = vmatpush1.bf16.msra.mxu0 %v10907_v40  ;;  %v8725_v40 = vld [vmem:[%s19960_s3 + $0x1580] sm:$0xff]  ;;  %v8742_v38 = vld [vmem:[%s19960_s3 + $0x1608] sm:$0xff] }
 0x352   : > { %10910 = vmatprep.subr.bf16.mxu0 %v10909_v9  ;;  %v8729_v9 = vld [vmem:[%s19960_s3 + $0x15a0] sm:$0xff] }
 0x353   : > { %v10927_v30 = vpack.c.bf16 %v8729_v9, %v8725_v40  ;;  %v8769_v20 = vld [vmem:[%s19960_s3 + $0x16e0] sm:$0xff] }
 0x354   : > { %3752 = vmatmul.mubr.f32.gmra.mrb[24].mxu0 %v20126_v19  ;;  %v10937_v19 = vpack.c.bf16 %v8754_v50, %v8750_v39  ;;  %v8773_v40 = vld [vmem:[%s19960_s3 + $0x1700] sm:$0xff] }
 0x355   : > { %3757 = vmatprep.mubr.f32.mxu0 %v20127_v21  ;;  %10912 = vmatpush1.bf16.msra.mxu0 %v10911_v32  ;;  %v8749_v21 = vld [vmem:[%s19960_s3 + $0x1640] sm:$0xff] }
 0x356   : > { %10914 = vmatprep.subr.bf16.mxu0 %v10913_v4  ;;  %v8741_v4 = vld [vmem:[%s19960_s3 + $0x1600] sm:$0xff] }
 0x357   : > { %v10935_v24 = vpack.c.bf16 %v8745_v17, %v8741_v4  ;;  %v8777_v9 = vld [vmem:[%s19960_s3 + $0x1720] sm:$0xff] }
 0x358   : > { %3758 = vmatmul.mubr.f32.gmra.mrb[26].mxu0 %v20128_v52  ;;  %v8761_v52 = vld [vmem:[%s19960_s3 + $0x16a0] sm:$0xff] }
 0x359   : > { %3763 = vmatprep.mubr.f32.mxu0 %v20129_v27  ;;  %10916 = vmatpush1.bf16.msra.mxu0 %v10915_v25  ;;  %v8753_v25 = vld [vmem:[%s19960_s3 + $0x1660] sm:$0xff]  ;;  %v8766_v27 = vld [vmem:[%s19960_s3 + $0x16c8] sm:$0xff] }
 0x35a   : > { %10918 = vmatprep.subr.bf16.mxu0 %v10917_v59  ;;  %v8758_v59 = vld [vmem:[%s19960_s3 + $0x1688] sm:$0xff]  ;;  %v10939_v41 = vpack.c.bf16 %v8753_v25, %v8749_v21 }
 0x35b   : > { %v10941_v16 = vpack.c.bf16 %v8762_v7, %v8758_v59 }
 0x35c   : > { %3764 = vmatmul.mubr.f32.gmra.mrb[28].mxu0 %v15252_v5  ;;  %v8738_v5 = vld [vmem:[%s19960_s3 + $0x15e8] sm:$0xff] }
 0x35d   : > { %3769 = vmatprep.mubr.f32.mxu0 %v20130_v46  ;;  %10920 = vmatpush1.bf16.msra.mxu0 %v10919_v34  ;;  %v10929_v53 = vpack.c.bf16 %v8738_v5, %v8734_v6  ;;  %v8770_v34 = vld [vmem:[%s19960_s3 + $0x16e8] sm:$0xff]  ;;  %v10951_v6 = vpack.c.bf16 %v8777_v9, %v8773_v40 }
 0x35e   : > { %10922 = vmatprep.subr.bf16.mxu0 %v10921_v62  ;;  %v10943_v62 = vpack.c.bf16 %v8761_v52, %v8757_v42  ;;  %v10945_v13 = vpack.c.bf16 %v8770_v34, %v8766_v27  ;;  %v8778_v46 = vld [vmem:[%s19960_s3 + $0x1728] sm:$0xff] }
 0x35f   : > { %v20131_v5 = vld [vmem:[#allocation47_spill] sm:$0xff] }
 0x360   : > { %3770 = vmatmul.mubr.f32.gmra.mrb[30].mxu0 %v15205_v18  ;;  %v8746_v18 = vld [vmem:[%s19960_s3 + $0x1628] sm:$0xff] }
 0x361   : > { %10924 = vmatpush1.bf16.msra.mxu0 %v10923_v47  ;;  %8781 = vmatprep.mubr.msk.f32.mxu0 %vm2377_vm3, %v15299_v56  ;;  %v10931_v56 = vpack.c.bf16 %v8737_v2, %v8733_v3  ;;  %v10933_v32 = vpack.c.bf16 %v8746_v18, %v8742_v38  ;;  %v10947_v47 = vpack.c.bf16 %v8769_v20, %v8765_v15 }
 0x362   : > { %10926 = vmatprep.subr.bf16.mxu0 %v10925_v57  ;;  %v10949_v57 = vpack.c.bf16 %v8778_v46, %v8774_v10 }
 0x365   : > { %10928 = vmatpush1.bf16.msra.mxu0 %v10927_v30  ;;  %v20132_v30 = vld [vmem:[#allocation48_spill] sm:$0xff] }
 0x366   : > { %10930 = vmatprep.subr.bf16.mxu0 %v10929_v53  ;;  %v20133_v53 = vld [vmem:[#allocation49_spill] sm:$0xff] }
 0x369   : > { %10932 = vmatpush1.bf16.msra.mxu0 %v10931_v56 }
 0x36a   : > { %10934 = vmatprep.subr.bf16.mxu0 %v10933_v32 }
 0x36d   : > { %10936 = vmatpush1.bf16.msra.mxu0 %v10935_v24 }
 0x36e   : > { %10938 = vmatprep.subr.bf16.mxu0 %v10937_v19 }
 0x371   : > { %10940 = vmatpush1.bf16.msra.mxu0 %v10939_v41 }
 0x372   : > { %10942 = vmatprep.subr.bf16.mxu0 %v10941_v16 }
 0x375   : > { %10944 = vmatpush1.bf16.msra.mxu0 %v10943_v62 }
 0x376   : > { %10946 = vmatprep.subr.bf16.mxu0 %v10945_v13 }
 0x379   : > { %10948 = vmatpush1.bf16.msra.mxu0 %v10947_v47 }
 0x37a   : > { %10950 = vmatprep.subr.bf16.mxu0 %v10949_v57 }
 0x37d   : > { %10952 = vmatpush1.bf16.msra.mxu0 %v10951_v6 }
 0x380   : > { %3841 = vmatmul.mubr.f32.vlgmr.msra.gmra.mrb[16].mxu0 %v20131_v5 }
 0x381   : > { %8782 = vmatprep.mubr.msk.f32.mxu0 %vm2377_vm3, %v20132_v30 }
 0x384   : > { %3847 = vmatmul.mubr.f32.gmra.mrb[18].mxu0 %v15496_v44  ;;  %v16830_v44 = vld [vmem:[%s19961_s4] sm:$0xf] }
 0x385   : > { %8783 = vmatprep.mubr.msk.f32.mxu0 %vm2377_vm3, %v20133_v53 }
 0x388   : > { %3853 = vmatmul.mubr.f32.gmra.mrb[20].mxu0 %v15521_v33  ;;  %v20134_v33 = vld [vmem:[#allocation11_spill] sm:$0xff] }
 0x389   : > { %8784 = vmatprep.mubr.msk.f32.mxu0 %vm2377_vm3, %v15526_v58  ;;  %v20135_v58 = vsub.s32 2, %v20134_v33 }
 0x38c   : > { %3859 = vmatmul.mubr.f32.gmra.mrb[22].mxu0 %v15546_v29  ;;  %v16835_v29 = vrot.slane %v16830_v44, %v20135_v58 }
 0x38d   : > { %8785 = vmatprep.mubr.msk.f32.mxu0 %vm2377_vm3, %v15551_v23 }
 0x390   : > { %3865 = vmatmul.mubr.f32.gmra.mrb[24].mxu0 %v15571_v37  ;;  %v20136_v37 = vsub.s32 3, %v20134_v33 }
 0x391   : > { %8786 = vmatprep.mubr.msk.f32.mxu0 %vm2377_vm3, %v15576_v60 }
 0x392   : > { %v16840_v60 = vrot.slane %v16830_v44, %v20136_v37 }
 0x394   : > { %3871 = vmatmul.mubr.f32.gmra.mrb[26].mxu0 %v15598_v1 }
 0x395   : > { %8787 = vmatprep.mubr.msk.f32.mxu0 %vm2377_vm3, %v15606_v31 }
 0x398   : > { %3877 = vmatmul.mubr.f32.gmra.mrb[28].mxu0 %v15626_v35 }
 0x399   : > { %8788 = vmatprep.mubr.msk.f32.mxu0 %vm2377_vm3, %v15579_v48 }
 0x39c   : > { %3883 = vmatmul.mubr.f32.gmra.mrb[30].mxu0 %v15601_v0 }
 0x3d7   : > { %v3154_v23 = vpop.f32.mrb[32].mxu0 }
 0x3d8   : > { %v11990_v48 = vadd.f32 %v16259_v63, %v3154_v23  ;;  %v3156_v1 = vpop.f32.mrb[33].mxu0 }
 0x3d9   : > { %v11991_v0 = vadd.f32 %v16263_v12, %v3156_v1 }
 0x3da   : > { %v4171_v31 = vadd.f32 %v11990_v48, %v16835_v29 }
 0x3db   : > { %v4172_v35 = vadd.f32 %v11991_v0, %v16840_v60  ;;  %v3160_v3 = vpop.f32.mrb[34].mxu0 }
 0x3dc   : > { %v11992_v2 = vadd.f32 %v16278_v54, %v3160_v3  ;;  %v3162_v38 = vpop.f32.mrb[35].mxu0  ;;  %v4203_v56 = vmax.f32 %v4171_v31, 0.0 }
 0x3dd   : > { %v11993_v18 = vadd.f32 %v16282_v26, %v3162_v38  ;;  %v4204_v4 = vmax.f32 %v4172_v35, 0.0 }
 0x3de   : > { %v4175_v32 = vadd.f32 %v11992_v2, %v16835_v29  ;;  %v4271_v21 = vrot.slane %v4203_v56, 1 }
 0x3df   : > { %v4176_v17 = vadd.f32 %v11993_v18, %v16840_v60  ;;  %v3166_v63 = vpop.f32.mrb[36].mxu0  ;;  %v4274_v59 = vrot.slane %v4204_v4, 1 }
 0x3e0   : > { %v4207_v39 = vmax.f32 %v4175_v32, 0.0  ;;  %v11994_v12 = vadd.f32 %v16297_v22, %v3166_v63  ;;  %v3168_v50 = vpop.f32.mrb[37].mxu0 }
 0x3e1   : > { %v4208_v24 = vmax.f32 %v4176_v17, 0.0  ;;  %v11995_v19 = vadd.f32 %v16300_v14, %v3168_v50 }
 0x3e2   : > { %v4272_v25 = vrot.slane %v4207_v39, 1  ;;  %v4179_v54 = vadd.f32 %v11994_v12, %v16835_v29 }
 0x3e3   : > { %v4275_v26 = vrot.slane %v4208_v24, 1  ;;  %v4180_v7 = vadd.f32 %v11995_v19, %v16840_v60  ;;  %v3172_v41 = vpop.f32.mrb[38].mxu0 }
 0x3e4   : > { %v4211_v16 = vmax.f32 %v4179_v54, 0.0  ;;  %v11996_v42 = vadd.f32 %v16314_v11, %v3172_v41  ;;  %v3174_v52 = vpop.f32.mrb[39].mxu0  ;;  %v4273_v27 = vsel %vm744_vm0, %v4271_v21, %v4272_v25 }
 0x3e5   : > { %v4212_v22 = vmax.f32 %v4180_v7, 0.0  ;;  %v11997_v34 = vadd.f32 %v16316_v51, %v3174_v52  ;;  %v16857_v62 = vmax.f32 %v4203_v56, %v4273_v27  ;;  %v4276_v14 = vsel %vm744_vm0, %v4274_v59, %v4275_v26 }
 0x3e6   : > { %v4281_v13 = vrot.slane %v4211_v16, 1  ;;  %v4183_v15 = vadd.f32 %v11996_v42, %v16835_v29  ;;  %v16861_v20 = vmax.f32 %v4204_v4, %v4276_v14 }
 0x3e7   : > { %v4283_v10 = vrot.slane %v4212_v22, 1  ;;  %v4184_v46 = vadd.f32 %v11997_v34, %v16840_v60  ;;  %v3178_v47 = vpop.f32.mrb[40].mxu0 }
 0x3e8   : > { %v4215_v11 = vmax.f32 %v4183_v15, 0.0  ;;  %v11998_v57 = vadd.f32 %v16330_v36, %v3178_v47  ;;  %v3180_v40 = vpop.f32.mrb[41].mxu0  ;;  %v4282_v9 = vsel %vm744_vm0, %v4272_v25, %v4281_v13 }
 0x3e9   : > { %v4216_v51 = vmax.f32 %v4184_v46, 0.0  ;;  %v11999_v6 = vadd.f32 %v16332_v49, %v3180_v40  ;;  %v16867_v5 = vmax.f32 %v4207_v39, %v4282_v9  ;;  %v4284_v30 = vsel %vm744_vm0, %v4275_v26, %v4283_v10 }
 0x3ea   : > { %v4289_v53 = vrot.slane %v4215_v11, 1  ;;  %v4187_v33 = vadd.f32 %v11998_v57, %v16835_v29  ;;  %v16871_v58 = vmax.f32 %v4208_v24, %v4284_v30  ;;  %v20137_v30 = vld [vmem:[#allocation12_spill] sm:$0xff] }
 0x3eb   : > { %v4291_v23 = vrot.slane %v4216_v51, 1  ;;  %v4188_v37 = vadd.f32 %v11999_v6, %v16840_v60  ;;  %v3184_v48 = vpop.f32.mrb[42].mxu0 }
 0x3ec   : > { %v4219_v36 = vmax.f32 %v4187_v33, 0.0  ;;  %v12000_v1 = vadd.f32 %v16346_v61, %v3184_v48  ;;  %v3186_v0 = vpop.f32.mrb[43].mxu0  ;;  %v4290_v31 = vsel %vm744_vm0, %v4281_v13, %v4289_v53  ;;  %v20138_v33 = vld [vmem:[#allocation13_spill] sm:$0xff] }
 0x3ed   : > { %v4220_v49 = vmax.f32 %v4188_v37, 0.0  ;;  %v12001_v35 = vadd.f32 %v16348_v55, %v3186_v0  ;;  %v16877_v3 = vmax.f32 %v4211_v16, %v4290_v31  ;;  %v4292_v2 = vsel %vm744_vm0, %v4283_v10, %v4291_v23 }
 0x3ee   : > { %v4297_v38 = vrot.slane %v4219_v36, 1  ;;  %v4191_v18 = vadd.f32 %v12000_v1, %v16835_v29  ;;  %v16881_v56 = vmax.f32 %v4212_v22, %v4292_v2 }
 0x3ef   : > { %v4299_v32 = vrot.slane %v4220_v49, 1  ;;  %v4192_v4 = vadd.f32 %v12001_v35, %v16840_v60  ;;  %v3190_v17 = vpop.f32.mrb[44].mxu0 }
 0x3f0   : > { %v4223_v61 = vmax.f32 %v4191_v18, 0.0  ;;  %v12002_v63 = vadd.f32 %v16362_v43, %v3190_v17  ;;  %v3192_v39 = vpop.f32.mrb[45].mxu0  ;;  %v4298_v12 = vsel %vm744_vm0, %v4289_v53, %v4297_v38  ;;  %v16934_v53 = vrot.slane %v16830_v44, %v20137_v30 }
 0x3f1   : > { %v4224_v55 = vmax.f32 %v4192_v4, 0.0  ;;  %v12003_v50 = vadd.f32 %v16364_v28, %v3192_v39  ;;  %v16887_v24 = vmax.f32 %v4215_v11, %v4298_v12  ;;  %v4300_v19 = vsel %vm744_vm0, %v4291_v23, %v4299_v32 }
 0x3f2   : > { %v4305_v21 = vrot.slane %v4223_v61, 1  ;;  %v4195_v25 = vadd.f32 %v12002_v63, %v16835_v29  ;;  %v16891_v54 = vmax.f32 %v4216_v51, %v4300_v19  ;;  %v16938_v23 = vrot.slane %v16830_v44, %v20138_v33 }
 0x3f3   : > { %v4307_v59 = vrot.slane %v4224_v55, 1  ;;  %v4196_v26 = vadd.f32 %v12003_v50, %v16840_v60  ;;  %v3196_v7 = vpop.f32.mrb[46].mxu0 }
 0x3f4   : > { %v4227_v43 = vmax.f32 %v4195_v25, 0.0  ;;  %v12004_v41 = vadd.f32 %v16378_v45, %v3196_v7  ;;  %v3198_v16 = vpop.f32.mrb[47].mxu0  ;;  %v4306_v42 = vsel %vm744_vm0, %v4297_v38, %v4305_v21 }
 0x3f5   : > { %v4228_v28 = vmax.f32 %v4196_v26, 0.0  ;;  %v12005_v52 = vadd.f32 %v16380_v8, %v3198_v16  ;;  %v16897_v27 = vmax.f32 %v4219_v36, %v4306_v42  ;;  %v4308_v22 = vsel %vm744_vm0, %v4299_v32, %v4307_v59 }
 0x3f6   : > { %v4313_v34 = vrot.slane %v4227_v43, 1  ;;  %v16901_v14 = vadd.f32 %v12004_v41, %v16835_v29  ;;  %v16903_v13 = vmax.f32 %v4220_v49, %v4308_v22 }
 0x3f7   : > { %v4315_v15 = vrot.slane %v4228_v28, 1  ;;  %v16906_v10 = vadd.f32 %v12005_v52, %v16840_v60 }
 0x3f8   : > { %v4231_v45 = vmax.f32 %v16901_v14, 0.0  ;;  %v4314_v46 = vsel %vm744_vm0, %v4305_v21, %v4313_v34 }
 0x3f9   : > { %v4232_v8 = vmax.f32 %v16906_v10, 0.0  ;;  %v16911_v47 = vmax.f32 %v4223_v61, %v4314_v46  ;;  %v4316_v11 = vsel %vm744_vm0, %v4307_v59, %v4315_v15 }
 0x3fa   : > { %v16916_v29 = vrot.slane %v4231_v45, 1  ;;  %v16918_v57 = vmax.f32 %v4224_v55, %v4316_v11 }
 0x3fb   : > { %v16922_v60 = vrot.slane %v4232_v8, 1 }
 0x3fc   : > { %v4322_v40 = vsel %vm744_vm0, %v4313_v34, %v16916_v29 }
 0x3fd   : > { %v16926_v9 = vmax.f32 %v4227_v43, %v4322_v40  ;;  %v4324_v51 = vsel %vm744_vm0, %v4315_v15, %v16922_v60 }
 0x3fe   : > { %v16930_v6 = vmax.f32 %v4228_v28, %v4324_v51 }
 0x453   : > { %v3842_v37 = vpop.f32.mrb[16].mxu0 }
 0x454   : > { %v4169_v48 = vadd.f32 %v16934_v53, %v3842_v37  ;;  %v3844_v36 = vpop.f32.mrb[17].mxu0 }
 0x455   : > { %v4170_v1 = vadd.f32 %v16938_v23, %v3844_v36 }
 0x456   : > { %v4201_v31 = vmax.f32 %v4169_v48, 0.0 }
 0x457   : > { %v3848_v0 = vpop.f32.mrb[18].mxu0  ;;  %v4202_v2 = vmax.f32 %v4170_v1, 0.0 }
 0x458   : > { %v4173_v49 = vadd.f32 %v16934_v53, %v3848_v0  ;;  %v3850_v35 = vpop.f32.mrb[19].mxu0  ;;  %v4265_v17 = vrot.slane %v4201_v31, 1 }
 0x459   : > { %v4174_v38 = vadd.f32 %v16938_v23, %v3850_v35  ;;  %v4268_v39 = vrot.slane %v4202_v2, 1 }
 0x45a   : > { %v4205_v18 = vmax.f32 %v4173_v49, 0.0 }
 0x45b   : > { %v4206_v32 = vmax.f32 %v4174_v38, 0.0  ;;  %v3854_v4 = vpop.f32.mrb[20].mxu0 }
 0x45c   : > { %v4266_v44 = vrot.slane %v4205_v18, 1  ;;  %v4177_v61 = vadd.f32 %v16934_v53, %v3854_v4  ;;  %v3856_v63 = vpop.f32.mrb[21].mxu0 }
 0x45d   : > { %v4269_v12 = vrot.slane %v4206_v32, 1  ;;  %v4178_v55 = vadd.f32 %v16938_v23, %v3856_v63 }
 0x45e   : > { %v4209_v50 = vmax.f32 %v4177_v61, 0.0  ;;  %v4267_v19 = vsel %vm744_vm0, %v4265_v17, %v4266_v44 }
 0x45f   : > { %v4210_v21 = vmax.f32 %v4178_v55, 0.0  ;;  %v3860_v25 = vpop.f32.mrb[22].mxu0  ;;  %v4270_v59 = vsel %vm744_vm0, %v4268_v39, %v4269_v12  ;;  %v16948_v26 = vmax.f32 %v4201_v31, %v4267_v19 }
 0x460   : > { %v4277_v7 = vrot.slane %v4209_v50, 1  ;;  %v4181_v43 = vadd.f32 %v16934_v53, %v3860_v25  ;;  %v3862_v41 = vpop.f32.mrb[23].mxu0  ;;  %v16951_v16 = vmax.f32 %v4202_v2, %v4270_v59 }
 0x461   : > { %v4279_v42 = vrot.slane %v4210_v21, 1  ;;  %v4182_v28 = vadd.f32 %v16938_v23, %v3862_v41 }
 0x462   : > { %v4213_v52 = vmax.f32 %v4181_v43, 0.0  ;;  %v12327_v22 = vpack.i.bf16 %v16857_v62, %v16951_v16  ;;  %v4278_v34 = vsel %vm744_vm0, %v4266_v44, %v4277_v7 }
 0x463   : > { %v4214_v15 = vmax.f32 %v4182_v28, 0.0  ;;  %v3866_v46 = vpop.f32.mrb[24].mxu0  ;;  %v16957_v11 = vmax.f32 %v4205_v18, %v4278_v34  ;;  %v4280_v40 = vsel %vm744_vm0, %v4269_v12, %v4279_v42 }
 0x464   : > { %v4285_v51 = vrot.slane %v4213_v52, 1  ;;  %v4185_v37 = vadd.f32 %v16934_v53, %v3866_v46  ;;  %12328 = vrot.lane.b32.xlu0 %v12327_v22, %s12493_s17  ;;  %v3868_v48 = vpop.f32.mrb[25].mxu0  ;;  %v16962_v36 = vmax.f32 %v4206_v32, %v4280_v40 }
 0x465   : > { %v4287_v1 = vrot.slane %v4214_v15, 1  ;;  %v4186_v0 = vadd.f32 %v16938_v23, %v3868_v48  ;;  %v12332_v31 = vpack.i.bf16 %v16957_v11, %v16948_v26 }
 0x466   : > { %v4217_v49 = vmax.f32 %v4185_v37, 0.0  ;;  %v12337_v35 = vpack.i.bf16 %v16867_v5, %v16962_v36  ;;  %v4286_v2 = vsel %vm744_vm0, %v4277_v7, %v4285_v51 }
 0x467   : > { %v4218_v38 = vmax.f32 %v4186_v0, 0.0  ;;  %12333 = vrot.lane.b32.xlu1 %v12332_v31, %s12493_s17  ;;  %v3872_v18 = vpop.f32.mrb[26].mxu0  ;;  %v4288_v4 = vsel %vm744_vm0, %v4279_v42, %v4287_v1  ;;  %v16972_v32 = vmax.f32 %v4209_v50, %v4286_v2 }
 0x468   : > { %v4293_v17 = vrot.slane %v4217_v49, 1  ;;  %v4189_v44 = vadd.f32 %v16934_v53, %v3872_v18  ;;  %12338 = vrot.lane.b32.xlu0 %v12337_v35, %s12493_s17  ;;  %v3874_v61 = vpop.f32.mrb[27].mxu0  ;;  %v16976_v63 = vmax.f32 %v4210_v21, %v4288_v4 }
 0x469   : > { %v4295_v39 = vrot.slane %v4218_v38, 1  ;;  %v4190_v12 = vadd.f32 %v16938_v23, %v3874_v61 }
 0x46a   : > { %v4221_v55 = vmax.f32 %v4189_v44, 0.0  ;;  %v12342_v19 = vpack.i.bf16 %v16877_v3, %v16976_v63  ;;  %v4294_v25 = vsel %vm744_vm0, %v4285_v51, %v4293_v17 }
 0x46b   : > { %v4222_v59 = vmax.f32 %v4190_v12, 0.0  ;;  %v3878_v50 = vpop.f32.mrb[28].mxu0  ;;  %v16982_v7 = vmax.f32 %v4213_v52, %v4294_v25  ;;  %v4296_v43 = vsel %vm744_vm0, %v4287_v1, %v4295_v39 }
 0x46c   : > { %v4301_v41 = vrot.slane %v4221_v55, 1  ;;  %v4193_v42 = vadd.f32 %v16934_v53, %v3878_v50  ;;  %12343 = vrot.lane.b32.xlu1 %v12342_v19, %s12493_s17  ;;  %v3880_v21 = vpop.f32.mrb[29].mxu0  ;;  %v16987_v28 = vmax.f32 %v4214_v15, %v4296_v43 }
 0x46d   : > { %v4303_v22 = vrot.slane %v4222_v59, 1  ;;  %v4194_v34 = vadd.f32 %v16938_v23, %v3880_v21  ;;  %v12347_v46 = vpack.i.bf16 %v16982_v7, %v16972_v32 }
 0x46e   : > { %v4225_v40 = vmax.f32 %v4193_v42, 0.0  ;;  %v12352_v52 = vpack.i.bf16 %v16887_v24, %v16987_v28  ;;  %v4302_v51 = vsel %vm744_vm0, %v4293_v17, %v4301_v41 }
 0x46f   : > { %v4226_v37 = vmax.f32 %v4194_v34, 0.0  ;;  %v3884_v48 = vpop.f32.mrb[30].mxu0  ;;  %v4304_v1 = vsel %vm744_vm0, %v4295_v39, %v4303_v22  ;;  %v16996_v0 = vmax.f32 %v4217_v49, %v4302_v51  ;;  %v17049_v34 = vmax.f32 %v4232_v8, %v16922_v60 }
 0x470   : > { %v4309_v15 = vrot.slane %v4225_v40, 1  ;;  %v4197_v31 = vadd.f32 %v16934_v53, %v3884_v48  ;;  %12348 = vrot.lane.b32.xlu1 %v12347_v46, %s12493_s17  ;;  %12353 = vrot.lane.b32.xlu0 %v12352_v52, %s12493_s17  ;;  %v3886_v35 = vpop.f32.mrb[31].mxu0  ;;  %v17001_v2 = vmax.f32 %v4218_v38, %v4304_v1  ;;  %v12397_v46 = vpack.i.bf16 %v16918_v57, %v16903_v13 }
 0x471   : > { %v4311_v18 = vrot.slane %v4226_v37, 1  ;;  %v4198_v4 = vadd.f32 %v16938_v23, %v3886_v35  ;;  %v12494_v52 = vmov 0.0   ;;  %v12402_v10 = vpack.i.bf16 %v17049_v34, %v16930_v6 }
 0x472   : > { %v4229_v17 = vmax.f32 %v4197_v31, 0.0  ;;  %v12357_v44 = vpack.i.bf16 %v16897_v27, %v17001_v2  ;;  %v4310_v49 = vsel %vm744_vm0, %v4301_v41, %v4309_v15  ;;  %4668 = vmatprep.mubr.f32.mxu0 %v12494_v52  ;;  %4757 = vmatprep.mubr.f32.mxu1 %v12494_v52 }
 0x473   : > { %v4230_v61 = vmax.f32 %v4198_v4, 0.0  ;;  %v17007_v39 = vmax.f32 %v4221_v55, %v4310_v49  ;;  %v4312_v53 = vsel %vm744_vm0, %v4303_v22, %v4311_v18  ;;  %v17021_v55 = vmax.f32 %v4231_v45, %v16916_v29 }
 0x474   : > { %v4317_v12 = vrot.slane %v4229_v17, 1  ;;  %12358 = vrot.lane.b32.xlu0 %v12357_v44, %s12493_s17  ;;  %v17011_v19 = vmax.f32 %v4222_v59, %v4312_v53  ;;  %v12387_v45 = vpack.i.bf16 %v16871_v58, %v16861_v20 }
 0x475   : > { %v4319_v38 = vrot.slane %v4230_v61, 1  ;;  %v12362_v23 = vpack.i.bf16 %v17007_v39, %v16996_v0 }
 0x476   : > { %v12367_v25 = vpack.i.bf16 %v16911_v47, %v17011_v19  ;;  %v4318_v50 = vsel %vm744_vm0, %v4309_v15, %v4317_v12  ;;  %v17034_v22 = vmax.f32 %v4229_v17, %v4317_v12 }
 0x477   : > { %v17023_v43 = vmax.f32 %v4230_v61, %v4319_v38  ;;  %v4320_v41 = vsel %vm744_vm0, %v4311_v18, %v4319_v38  ;;  %v17026_v59 = vmax.f32 %v4225_v40, %v4318_v50  ;;  %v12392_v40 = vpack.i.bf16 %v16891_v54, %v16881_v56 }
 0x478   : > { %12363 = vrot.lane.b32.xlu0 %v12362_v23, %s12493_s17  ;;  %12368 = vrot.lane.b32.xlu1 %v12367_v25, %s12493_s17  ;;  %v17030_v42 = vmax.f32 %v4226_v37, %v4320_v41 }
 0x479   : > { %v12372_v21 = vpack.i.bf16 %v17021_v55, %v17023_v43  ;;  %v12382_v29 = vpack.i.bf16 %v17034_v22, %v17026_v59 }
 0x47a   : > { %v12377_v14 = vpack.i.bf16 %v16926_v9, %v17030_v42 }
 0x47c   : > { %12373 = vrot.lane.b32.xlu0 %v12372_v21, %s12493_s17  ;;  %12378 = vrot.lane.b32.xlu1 %v12377_v14, %s12493_s17 }
 0x480   : > { %12388 = vrot.lane.b32.xlu0 %v12387_v45, %s12493_s17  ;;  %12383 = vrot.lane.b32.xlu1 %v12382_v29, %s12493_s17 }
 0x484   : > { %12398 = vrot.lane.b32.xlu0 %v12397_v46, %s12493_s17  ;;  %12393 = vrot.lane.b32.xlu1 %v12392_v40, %s12493_s17 }
 0x488   : > { %12403 = vrot.lane.b32.xlu1 %v12402_v10, %s12493_s17 }
 0x4d6   : > { %v17062_v8 = vpop.permute.xlu0 %12328 }
 0x4d7   : > { %v12331_v60 = vunpack.i.h.bf16 %v17062_v8  ;;  %v12330_v51 = vunpack.i.l.bf16 %v17062_v8 }
 0x4d9   : > { %v12334_v37 = vpop.permute.xlu1 %12333  ;;  %v4487_v31 = vsel %vm4485_vm4, %v12330_v51, %v12331_v60 }
 0x4da   : > { %v12336_v48 = vunpack.i.h.bf16 %v12334_v37  ;;  %v12335_v1 = vunpack.i.l.bf16 %v12334_v37  ;;  %v17066_v15 = vpop.permute.xlu0 %12338  ;;  %v4543_v12 = vmax.f32 %v16951_v16, %v4487_v31 }
 0x4db   : > { %v12341_v35 = vunpack.i.h.bf16 %v17066_v15  ;;  %v12340_v18 = vunpack.i.l.bf16 %v17066_v15 }
 0x4dc   : > { %v4486_v4 = vsel %vm4485_vm4, %v12335_v1, %v12330_v51 }
 0x4dd   : > { %v4542_v17 = vmax.f32 %v16948_v26, %v4486_v4  ;;  %v4489_v44 = vsel %vm4485_vm4, %v12336_v48, %v12340_v18  ;;  %v4490_v49 = vsel %vm4485_vm4, %v12340_v18, %v12341_v35 }
 0x4de   : > { %v4546_v61 = vmax.f32 %v16957_v11, %v4489_v44  ;;  %v17080_v53 = vpop.permute.xlu1 %12343  ;;  %v4547_v38 = vmax.f32 %v16962_v36, %v4490_v49 }
 0x4df   : > { %v12346_v23 = vunpack.i.h.bf16 %v17080_v53  ;;  %v12345_v25 = vunpack.i.l.bf16 %v17080_v53 }
 0x4e0   : > { %v11077_v50 = vpack.c.bf16 %v4547_v38, %v4543_v12  ;;  %v11079_v26 = vpack.c.bf16 %v4546_v61, %v4542_v17 }
 0x4e1   : > { %v4493_v41 = vsel %vm4485_vm4, %v12345_v25, %v12346_v23 }
 0x4e2   : > { %11078 = vmatprep.subr.bf16.mxu0 %v11077_v50  ;;  %v12349_v21 = vpop.permute.xlu1 %12348  ;;  %v17089_v14 = vpop.permute.xlu0 %12353  ;;  %v4551_v48 = vmax.f32 %v16976_v63, %v4493_v41 }
 0x4e3   : > { %v12351_v11 = vunpack.i.h.bf16 %v12349_v21  ;;  %v12350_v45 = vunpack.i.l.bf16 %v12349_v21  ;;  %v12356_v16 = vunpack.i.h.bf16 %v17089_v14  ;;  %v12355_v36 = vunpack.i.l.bf16 %v17089_v14  ;;  %11080 = vmatpush1.bf16.msra.mxu0 %v11079_v26 }
 0x4e5   : > { %v4492_v29 = vsel %vm4485_vm4, %v12350_v45, %v12345_v25  ;;  %v4495_v46 = vsel %vm4485_vm4, %v12351_v11, %v12355_v36  ;;  %v4496_v40 = vsel %vm4485_vm4, %v12355_v36, %v12356_v16 }
 0x4e6   : > { %v4550_v10 = vmax.f32 %v16972_v32, %v4492_v29  ;;  %v4554_v51 = vmax.f32 %v16982_v7, %v4495_v46  ;;  %v17100_v37 = vpop.permute.xlu0 %12358  ;;  %v4555_v1 = vmax.f32 %v16987_v28, %v4496_v40 }
 0x4e7   : > { %v12361_v31 = vunpack.i.h.bf16 %v17100_v37  ;;  %v12360_v18 = vunpack.i.l.bf16 %v17100_v37 }
 0x4e8   : > { %v11081_v4 = vpack.c.bf16 %v4555_v1, %v4551_v48  ;;  %v11083_v17 = vpack.c.bf16 %v4554_v51, %v4550_v10 }
 0x4e9   : > { %v4499_v44 = vsel %vm4485_vm4, %v12360_v18, %v12361_v31 }
 0x4ea   : > { %11082 = vmatprep.subr.bf16.mxu0 %v11081_v4  ;;  %v12364_v32 = vpop.permute.xlu0 %12363  ;;  %v12369_v49 = vpop.permute.xlu1 %12368  ;;  %v4559_v11 = vmax.f32 %v17001_v2, %v4499_v44 }
 0x4eb   : > { %v12366_v7 = vunpack.i.h.bf16 %v12364_v32  ;;  %v12365_v61 = vunpack.i.l.bf16 %v12364_v32  ;;  %v12371_v12 = vunpack.i.h.bf16 %v12369_v49  ;;  %v12370_v38 = vunpack.i.l.bf16 %v12369_v49  ;;  %11084 = vmatpush1.bf16.msra.mxu0 %v11083_v17 }
 0x4ed   : > { %v4498_v63 = vsel %vm4485_vm4, %v12365_v61, %v12360_v18  ;;  %v4501_v28 = vsel %vm4485_vm4, %v12366_v7, %v12370_v38  ;;  %v4502_v25 = vsel %vm4485_vm4, %v12370_v38, %v12371_v12 }
 0x4ee   : > { %v4558_v50 = vmax.f32 %v16996_v0, %v4498_v63  ;;  %v4562_v26 = vmax.f32 %v17007_v39, %v4501_v28  ;;  %v17114_v41 = vpop.permute.xlu0 %12373  ;;  %v17116_v21 = vpop.permute.xlu1 %12378  ;;  %v4563_v45 = vmax.f32 %v17011_v19, %v4502_v25 }
 0x4ef   : > { %v12376_v36 = vunpack.i.h.bf16 %v17114_v41  ;;  %v12375_v29 = vunpack.i.l.bf16 %v17114_v41  ;;  %v12381_v46 = vunpack.i.h.bf16 %v17116_v21  ;;  %v12380_v40 = vunpack.i.l.bf16 %v17116_v21  ;;  %v4575_v41 = vld [vmem:[%s19962_s5 + $0x8] sm:$0xff]  ;;  %v4792_v21 = vld [vmem:[%s19963_s6 + $0x50] sm:$0xff] }
 0x4f0   : > { %v11085_v10 = vpack.c.bf16 %v4563_v45, %v4559_v11  ;;  %v11087_v0 = vpack.c.bf16 %v4562_v26, %v4558_v50 }
 0x4f1   : > { %v4508_v39 = vsel %vm4485_vm4, %v12375_v29, %v12376_v36  ;;  %v4505_v2 = vsel %vm4485_vm4, %v12380_v40, %v12381_v46 }
 0x4f2   : > { %v4571_v19 = vmax.f32 %v17023_v43, %v4508_v39  ;;  %v4567_v51 = vmax.f32 %v17030_v42, %v4505_v2  ;;  %11086 = vmatprep.subr.bf16.mxu0 %v11085_v10  ;;  %v12389_v48 = vpop.permute.xlu0 %12388  ;;  %v12384_v1 = vpop.permute.xlu1 %12383 }
 0x4f3   : > { %v12391_v18 = vunpack.i.h.bf16 %v12389_v48  ;;  %v12390_v4 = vunpack.i.l.bf16 %v12389_v48  ;;  %v12386_v17 = vunpack.i.h.bf16 %v12384_v1  ;;  %v12385_v44 = vunpack.i.l.bf16 %v12384_v1  ;;  %11088 = vmatpush1.bf16.msra.mxu0 %v11087_v0  ;;  %v4782_v0 = vld [vmem:[%s19963_s6] sm:$0xff]  ;;  %v4788_v48 = vld [vmem:[%s19963_s6 + $0x30] sm:$0xff] }
 0x4f4   : > { %v11089_v49 = vpack.c.bf16 %v4571_v19, %v4567_v51  ;;  %v4787_v51 = vld [vmem:[%s19963_s6 + $0x28] sm:$0xff] }
 0x4f5   : > { %v4491_v43 = vsel %vm4485_vm4, %v12341_v35, %v12391_v18  ;;  %v4549_v42 = vmax.f32 %v16871_v58, %v12391_v18  ;;  %v4488_v7 = vsel %vm4485_vm4, %v12331_v60, %v12390_v4  ;;  %v4545_v61 = vmax.f32 %v16861_v20, %v12390_v4  ;;  %v4783_v58 = vld [vmem:[%s19963_s6 + $0x8] sm:$0xff]  ;;  %v4785_v20 = vld [vmem:[%s19963_s6 + $0x18] sm:$0xff] }
 0x4f6   : > { %v4548_v38 = vmax.f32 %v16867_v5, %v4491_v43  ;;  %v4544_v63 = vmax.f32 %v16857_v62, %v4488_v7  ;;  %v4507_v28 = vsel %vm4485_vm4, %v12386_v17, %v12375_v29  ;;  %v4504_v25 = vsel %vm4485_vm4, %v12385_v44, %v12380_v40  ;;  %v12399_v50 = vpop.permute.xlu0 %12398  ;;  %v12394_v15 = vpop.permute.xlu1 %12393  ;;  %11091 = vmatprep.subr.msk.bf16.mxu0 %vm17133_vm7, %v11089_v49  ;;  %v4793_v49 = vld [vmem:[%s19963_s6 + $0x58] sm:$0xff] }
 0x4f7   : > { %v4570_v5 = vmax.f32 %v17034_v22, %v4507_v28  ;;  %v4566_v62 = vmax.f32 %v17026_v59, %v4504_v25  ;;  %v12401_v8 = vunpack.i.h.bf16 %v12399_v50  ;;  %v12400_v60 = vunpack.i.l.bf16 %v12399_v50  ;;  %v4784_v22 = vld [vmem:[%s19963_s6 + $0x10] sm:$0xff] }
 0x4f8   : > { %v12396_v35 = vunpack.i.h.bf16 %v12394_v15  ;;  %v12395_v26 = vunpack.i.l.bf16 %v12394_v15  ;;  %v11095_v11 = vpack.c.bf16 %v4549_v42, %v4545_v61  ;;  %v11097_v45 = vpack.c.bf16 %v4548_v38, %v4544_v63  ;;  %v4576_v50 = vld [vmem:[%s19962_s5 + $0x10] sm:$0xff] }
 0x4f9   : > { %v11092_v29 = vpack.c.bf16 %v4570_v5, %v4566_v62  ;;  %v4503_v40 = vsel %vm4485_vm4, %v12371_v12, %v12401_v8  ;;  %v11113_v10 = vpack.c.bf16 %v4785_v20, %v4783_v58  ;;  %v4565_v59 = vmax.f32 %v16918_v57, %v12401_v8  ;;  %v4789_v57 = vld [vmem:[%s19963_s6 + $0x38] sm:$0xff]  ;;  %v4799_v20 = vld [vmem:[%s19963_s6 + $0x88] sm:$0xff] }
 0x4fa   : > { %v4500_v39 = vsel %vm4485_vm4, %v12361_v31, %v12400_v60  ;;  %v4561_v2 = vmax.f32 %v16903_v13, %v12400_v60  ;;  %v4497_v12 = vsel %vm4485_vm4, %v12356_v16, %v12396_v35  ;;  %11096 = vmatprep.subr.bf16.mxu1 %v11095_v11  ;;  %v12404_v19 = vpop.permute.xlu1 %12403  ;;  %v4557_v31 = vmax.f32 %v16891_v54, %v12396_v35  ;;  %v4786_v16 = vld [vmem:[%s19963_s6 + $0x20] sm:$0xff]  ;;  %v4801_v5 = vld [vmem:[%s19963_s6 + $0x98] sm:$0xff]  ;;  %v4800_v11 = vld [vmem:[%s19963_s6 + $0x90] sm:$0xff] }
 0x4fb   : > { %v4556_v37 = vmax.f32 %v16887_v24, %v4497_v12  ;;  %v4494_v13 = vsel %vm4485_vm4, %v12346_v23, %v12395_v26  ;;  %v4553_v14 = vmax.f32 %v16881_v56, %v12395_v26  ;;  %11098 = vmatpush1.bf16.msra.mxu1 %v11097_v45  ;;  %v12406_v24 = vunpack.i.h.bf16 %v12404_v19  ;;  %11094 = vmatpush1.bf16.msk.msra.mxu0 %vm17133_vm7, %v11092_v29  ;;  %v4574_v56 = vld [vmem:[%s19962_s5] sm:$0xff]  ;;  %v4577_v8 = vld [vmem:[%s19962_s5 + $0x18] sm:$0xff]  ;;  %v4803_v45 = vld [vmem:[%s19963_s6 + $0xa8] sm:$0xff] }
 0x4fc   : > { %v4552_v1 = vmax.f32 %v16877_v3, %v4494_v13  ;;  %v12405_v18 = vunpack.i.l.bf16 %v12404_v19  ;;  %v11115_v54 = vpack.c.bf16 %v4784_v22, %v4782_v0  ;;  %11114 = vmatprep.subr.bf16.mxu0 %v11113_v10  ;;  %v11117_v23 = vpack.c.bf16 %v4789_v57, %v4787_v51  ;;  %v4791_v3 = vld [vmem:[%s19963_s6 + $0x48] sm:$0xff]  ;;  %v4798_v26 = vld [vmem:[%s19963_s6 + $0x80] sm:$0xff]  ;;  %v4805_v29 = vld [vmem:[%s19963_s6 + $0xb8] sm:$0xff] }
 0x4fd   : > { %v11099_v53 = vpack.c.bf16 %v4557_v31, %v4553_v14  ;;  %v4564_v4 = vmax.f32 %v16911_v47, %v4503_v40  ;;  %v4560_v17 = vmax.f32 %v16897_v27, %v4500_v39  ;;  %v11119_v44 = vpack.c.bf16 %v4788_v48, %v4786_v16  ;;  %v4802_v10 = vld [vmem:[%s19963_s6 + $0xa0] sm:$0xff]  ;;  %v4804_v0 = vld [vmem:[%s19963_s6 + $0xb0] sm:$0xff]  ;;  %v4807_v22 = vld [vmem:[%s19963_s6 + $0xc8] sm:$0xff] }
 0x4fe   : > { %v4509_v43 = vsel %vm4485_vm4, %v12376_v36, %v12406_v24  ;;  %8799 = vmatmul.mubr.msk.f32.vlgmr.msra.gmra.mrb[48].mxu0 %vm4578_vm8, %v4574_v56  ;;  %v11101_v42 = vpack.c.bf16 %v4556_v37, %v4552_v1  ;;  %v11103_v47 = vpack.c.bf16 %v4565_v59, %v4561_v2  ;;  %v4573_v27 = vmax.f32 %v17049_v34, %v12406_v24  ;;  %v4790_v34 = vld [vmem:[%s19963_s6 + $0x40] sm:$0xff]  ;;  %v4809_v59 = vld [vmem:[%s19963_s6 + $0xd8] sm:$0xff]  ;;  %v4808_v19 = vld [vmem:[%s19963_s6 + $0xd0] sm:$0xff] }
 0x4ff   : > { %11100 = vmatprep.subr.bf16.mxu1 %v11099_v53  ;;  %v4506_v7 = vsel %vm4485_vm4, %v12381_v46, %v12405_v18  ;;  %v4569_v61 = vmax.f32 %v16930_v6, %v12405_v18  ;;  %4674 = vmatprep.mubr.f32.mxu0 %v12494_v52  ;;  %v11121_v36 = vpack.c.bf16 %v4793_v49, %v4791_v3  ;;  %v4795_v6 = vld [vmem:[%s19963_s6 + $0x68] sm:$0xff]  ;;  %v4797_v46 = vld [vmem:[%s19963_s6 + $0x78] sm:$0xff]  ;;  %v4806_v12 = vld [vmem:[%s19963_s6 + $0xc0] sm:$0xff] }
 0x500   : > { %11116 = vmatpush1.bf16.msra.mxu0 %v11115_v54  ;;  %11102 = vmatpush1.bf16.msra.mxu1 %v11101_v42  ;;  %v4572_v38 = vmax.f32 %v17021_v55, %v4509_v43  ;;  %v4568_v63 = vmax.f32 %v16926_v9, %v4506_v7  ;;  %v11105_v28 = vpack.c.bf16 %v4564_v4, %v4560_v17  ;;  %v4794_v55 = vld [vmem:[%s19963_s6 + $0x60] sm:$0xff]  ;;  %v4796_v9 = vld [vmem:[%s19963_s6 + $0x70] sm:$0xff]  ;;  %v4811_v51 = vld [vmem:[%s19963_s6 + $0xe8] sm:$0xff] }
 0x501   : > { %11118 = vmatprep.subr.bf16.mxu0 %v11117_v23  ;;  %11104 = vmatprep.subr.bf16.mxu1 %v11103_v47  ;;  %v11107_v25 = vpack.c.bf16 %v4573_v27, %v4569_v61  ;;  %v11123_v15 = vpack.c.bf16 %v4792_v21, %v4790_v34  ;;  %v11125_v58 = vpack.c.bf16 %v4797_v46, %v4795_v6  ;;  %v4813_v57 = vld [vmem:[%s19963_s6 + $0xf8] sm:$0xff]  ;;  %v4810_v13 = vld [vmem:[%s19963_s6 + $0xe0] sm:$0xff]  ;;  %v4812_v14 = vld [vmem:[%s19963_s6 + $0xf0] sm:$0xff] }
 0x502   : > { %8800 = vmatmul.mubr.msk.f32.gmra.mrb[50].mxu0 %vm4578_vm8, %v4575_v41  ;;  %v11110_v62 = vpack.c.bf16 %v4572_v38, %v4568_v63  ;;  %v11127_v60 = vpack.c.bf16 %v4796_v9, %v4794_v55  ;;  %v11129_v35 = vpack.c.bf16 %v4801_v5, %v4799_v20  ;;  %v11131_v32 = vpack.c.bf16 %v4800_v11, %v4798_v26  ;;  %v4815_v16 = vld [vmem:[%s19963_s6 + $0x108] sm:$0xff]  ;;  %v4817_v48 = vld [vmem:[%s19963_s6 + $0x118] sm:$0xff]  ;;  %v4814_v18 = vld [vmem:[%s19963_s6 + $0x100] sm:$0xff] }
 0x503   : > { %4680 = vmatprep.mubr.f32.mxu0 %v12494_v52  ;;  %v11133_v40 = vpack.c.bf16 %v4805_v29, %v4803_v45  ;;  %v11135_v39 = vpack.c.bf16 %v4804_v0, %v4802_v10  ;;  %v11137_v2 = vpack.c.bf16 %v4809_v59, %v4807_v22  ;;  %v11139_v37 = vpack.c.bf16 %v4808_v19, %v4806_v12  ;;  %v4819_v54 = vld [vmem:[%s19963_s6 + $0x128] sm:$0xff]  ;;  %v4821_v53 = vld [vmem:[%s19963_s6 + $0x138] sm:$0xff]  ;;  %v4818_v17 = vld [vmem:[%s19963_s6 + $0x120] sm:$0xff] }
 0x504   : > { %11120 = vmatpush1.bf16.msra.mxu0 %v11119_v44  ;;  %11106 = vmatpush1.bf16.msra.mxu1 %v11105_v28  ;;  %v11141_v31 = vpack.c.bf16 %v4813_v57, %v4811_v51  ;;  %v11143_v1 = vpack.c.bf16 %v4812_v14, %v4810_v13  ;;  %v11145_v24 = vpack.c.bf16 %v4817_v48, %v4815_v16  ;;  %v4820_v44 = vld [vmem:[%s19963_s6 + $0x130] sm:$0xff]  ;;  %v4823_v3 = vld [vmem:[%s19963_s6 + $0x148] sm:$0xff]  ;;  %v4825_v49 = vld [vmem:[%s19963_s6 + $0x158] sm:$0xff] }
 0x505   : > { %11122 = vmatprep.subr.bf16.mxu0 %v11121_v36  ;;  %11109 = vmatprep.subr.msk.bf16.mxu1 %vm17133_vm7, %v11107_v25  ;;  %v11149_v4 = vpack.c.bf16 %v4821_v53, %v4819_v54  ;;  %v11151_v43 = vpack.c.bf16 %v4820_v44, %v4818_v17  ;;  %v11153_v42 = vpack.c.bf16 %v4825_v49, %v4823_v3  ;;  %v4822_v47 = vld [vmem:[%s19963_s6 + $0x140] sm:$0xff]  ;;  %v4824_v27 = vld [vmem:[%s19963_s6 + $0x150] sm:$0xff]  ;;  %v4827_v7 = vld [vmem:[%s19963_s6 + $0x168] sm:$0xff] }
 0x506   : > { %8801 = vmatmul.mubr.msk.f32.gmra.mrb[52].mxu0 %vm4578_vm8, %v4576_v50  ;;  %v4829_v61 = vld [vmem:[%s19963_s6 + $0x178] sm:$0xff]  ;;  %v4826_v34 = vld [vmem:[%s19963_s6 + $0x160] sm:$0xff]  ;;  %v4828_v21 = vld [vmem:[%s19963_s6 + $0x170] sm:$0xff] }
 0x507   : > { %4686 = vmatprep.mubr.f32.mxu0 %v12494_v52  ;;  %v11157_v36 = vpack.c.bf16 %v4829_v61, %v4827_v7  ;;  %v4831_v6 = vld [vmem:[%s19963_s6 + $0x188] sm:$0xff]  ;;  %v4833_v46 = vld [vmem:[%s19963_s6 + $0x198] sm:$0xff]  ;;  %v11159_v38 = vpack.c.bf16 %v4828_v21, %v4826_v34  ;;  %v4830_v28 = vld [vmem:[%s19963_s6 + $0x180] sm:$0xff] }
 0x508   : > { %11124 = vmatpush1.bf16.msra.mxu0 %v11123_v15  ;;  %11112 = vmatpush1.bf16.msk.msra.mxu1 %vm17133_vm7, %v11110_v62  ;;  %v11161_v63 = vpack.c.bf16 %v4833_v46, %v4831_v6  ;;  %v4832_v25 = vld [vmem:[%s19963_s6 + $0x190] sm:$0xff]  ;;  %v4837_v15 = vld [vmem:[%s19963_s6 + $0x1b8] sm:$0xff]  ;;  %v4834_v9 = vld [vmem:[%s19963_s6 + $0x1a0] sm:$0xff] }
 0x509   : > { %11126 = vmatprep.subr.bf16.mxu0 %v11125_v58  ;;  %v11163_v58 = vpack.c.bf16 %v4832_v25, %v4830_v28  ;;  %v4836_v20 = vld [vmem:[%s19963_s6 + $0x1b0] sm:$0xff]  ;;  %v4839_v5 = vld [vmem:[%s19963_s6 + $0x1c8] sm:$0xff]  ;;  %v4841_v62 = vld [vmem:[%s19963_s6 + $0x1d8] sm:$0xff] }
 0x50a   : > { %8802 = vmatmul.mubr.msk.f32.gmra.mrb[54].mxu0 %vm4578_vm8, %v4577_v8  ;;  %v4840_v26 = vld [vmem:[%s19963_s6 + $0x1d0] sm:$0xff]  ;;  %v4843_v11 = vld [vmem:[%s19963_s6 + $0x1e8] sm:$0xff]  ;;  %v4845_v45 = vld [vmem:[%s19963_s6 + $0x1f8] sm:$0xff] }
 0x50b   : > { %8805 = vmatmul.mubr.msk.f32.vlgmr.msra.gmra.mrb[32].mxu1 %vm4578_vm8, %v4574_v56  ;;  %v4816_v56 = vld [vmem:[%s19963_s6 + $0x110] sm:$0xff]  ;;  %v4847_v22 = vld [vmem:[%s19963_s6 + $0x208] sm:$0xff]  ;;  %v4849_v59 = vld [vmem:[%s19963_s6 + $0x218] sm:$0xff] }
 0x50c   : > { %11128 = vmatpush1.bf16.msra.mxu0 %v11127_v60  ;;  %4763 = vmatprep.mubr.f32.mxu1 %v12494_v52  ;;  %v11147_v23 = vpack.c.bf16 %v4816_v56, %v4814_v18  ;;  %v11169_v60 = vpack.c.bf16 %v4841_v62, %v4839_v5  ;;  %v4844_v10 = vld [vmem:[%s19963_s6 + $0x1f0] sm:$0xff]  ;;  %v8816_v12 = vld [vmem:[%s19964_s7 + $0x218] sm:$0xff]  ;;  %v8813_v19 = vld [vmem:[%s19964_s7 + $0x200] sm:$0xff] }
 0x50d   : > { %11130 = vmatprep.subr.bf16.mxu0 %v11129_v35  ;;  %v4838_v35 = vld [vmem:[%s19963_s6 + $0x1c0] sm:$0xff]  ;;  %v8815_v57 = vld [vmem:[%s19964_s7 + $0x210] sm:$0xff] }
 0x50e   : > { %v11171_v29 = vpack.c.bf16 %v4840_v26, %v4838_v35  ;;  %v11231_v13 = vpack.c.bf16 %v8815_v57, %v8813_v19  ;;  %v8817_v16 = vld [vmem:[%s19964_s7 + $0x220] sm:$0xff]  ;;  %v8819_v48 = vld [vmem:[%s19964_s7 + $0x230] sm:$0xff]  ;;  %v8858_v57 = vld [vmem:[%s19964_s7 + $0x368] sm:$0xff] }
 0x50f   : > { %8806 = vmatmul.mubr.msk.f32.gmra.mrb[34].mxu1 %vm4578_vm8, %v4575_v41  ;;  %v11155_v41 = vpack.c.bf16 %v4824_v27, %v4822_v47  ;;  %v11235_v18 = vpack.c.bf16 %v8819_v48, %v8817_v16  ;;  %v8821_v54 = vld [vmem:[%s19964_s7 + $0x240] sm:$0xff]  ;;  %v8823_v53 = vld [vmem:[%s19964_s7 + $0x250] sm:$0xff]  ;;  %v8862_v48 = vld [vmem:[%s19964_s7 + $0x388] sm:$0xff] }
 0x510   : > { %11132 = vmatpush1.bf16.msra.mxu0 %v11131_v32  ;;  %4769 = vmatprep.mubr.f32.mxu1 %v12494_v52  ;;  %v11173_v32 = vpack.c.bf16 %v4845_v45, %v4843_v11  ;;  %v11239_v17 = vpack.c.bf16 %v8823_v53, %v8821_v54  ;;  %v8825_v3 = vld [vmem:[%s19964_s7 + $0x260] sm:$0xff]  ;;  %v8827_v49 = vld [vmem:[%s19964_s7 + $0x270] sm:$0xff]  ;;  %v8866_v53 = vld [vmem:[%s19964_s7 + $0x3a8] sm:$0xff] }
 0x511   : > { %11134 = vmatprep.subr.bf16.mxu0 %v11133_v40  ;;  %v4842_v40 = vld [vmem:[%s19963_s6 + $0x1e0] sm:$0xff]  ;;  %v11243_v47 = vpack.c.bf16 %v8827_v49, %v8825_v3  ;;  %v8831_v61 = vld [vmem:[%s19964_s7 + $0x290] sm:$0xff] }
 0x512   : > { %v11175_v0 = vpack.c.bf16 %v4844_v10, %v4842_v40  ;;  %v8829_v7 = vld [vmem:[%s19964_s7 + $0x280] sm:$0xff]  ;;  %v8835_v46 = vld [vmem:[%s19964_s7 + $0x2b0] sm:$0xff] }
 0x513   : > { %8807 = vmatmul.mubr.msk.f32.gmra.mrb[36].mxu1 %vm4578_vm8, %v4576_v50  ;;  %v4835_v50 = vld [vmem:[%s19963_s6 + $0x1a8] sm:$0xff]  ;;  %v11247_v34 = vpack.c.bf16 %v8831_v61, %v8829_v7  ;;  %v8833_v6 = vld [vmem:[%s19964_s7 + $0x2a0] sm:$0xff]  ;;  %v8843_v62 = vld [vmem:[%s19964_s7 + $0x2f0] sm:$0xff] }
 0x514   : > { %11136 = vmatpush1.bf16.msra.mxu0 %v11135_v39  ;;  %4775 = vmatprep.mubr.f32.mxu1 %v12494_v52  ;;  %v11165_v55 = vpack.c.bf16 %v4837_v15, %v4835_v50  ;;  %v11177_v39 = vpack.c.bf16 %v4849_v59, %v4847_v22  ;;  %v11251_v28 = vpack.c.bf16 %v8835_v46, %v8833_v6  ;;  %v8837_v50 = vld [vmem:[%s19964_s7 + $0x2c0] sm:$0xff]  ;;  %v8839_v15 = vld [vmem:[%s19964_s7 + $0x2d0] sm:$0xff]  ;;  %v8854_v59 = vld [vmem:[%s19964_s7 + $0x348] sm:$0xff] }
 0x515   : > { %11138 = vmatprep.subr.bf16.mxu0 %v11137_v2  ;;  %v8814_v2 = vld [vmem:[%s19964_s7 + $0x208] sm:$0xff]  ;;  %v8841_v5 = vld [vmem:[%s19964_s7 + $0x2e0] sm:$0xff]  ;;  %v8847_v45 = vld [vmem:[%s19964_s7 + $0x310] sm:$0xff] }
 0x516   : > { %v11229_v51 = vpack.c.bf16 %v8816_v12, %v8814_v2  ;;  %v11259_v35 = vpack.c.bf16 %v8843_v62, %v8841_v5  ;;  %v8845_v11 = vld [vmem:[%s19964_s7 + $0x300] sm:$0xff]  ;;  %v8851_v22 = vld [vmem:[%s19964_s7 + $0x330] sm:$0xff]  ;;  %v4855_v6 = vld [vmem:[%s19963_s6 + $0x248] sm:$0xff] }
 0x517   : > { %8808 = vmatmul.mubr.msk.f32.gmra.mrb[38].mxu1 %vm4578_vm8, %v4577_v8  ;;  %v11167_v8 = vpack.c.bf16 %v4836_v20, %v4834_v9  ;;  %v11255_v9 = vpack.c.bf16 %v8839_v15, %v8837_v50  ;;  %v11263_v40 = vpack.c.bf16 %v8847_v45, %v8845_v11  ;;  %v8853_v19 = vld [vmem:[%s19964_s7 + $0x340] sm:$0xff]  ;;  %v8859_v16 = vld [vmem:[%s19964_s7 + $0x370] sm:$0xff]  ;;  %v4857_v46 = vld [vmem:[%s19963_s6 + $0x258] sm:$0xff] }
 0x518   : > { %11140 = vmatpush1.bf16.msra.mxu0 %v11139_v37  ;;  %v8818_v37 = vld [vmem:[%s19964_s7 + $0x228] sm:$0xff]  ;;  %11230 = vmatprep.subr.bf16.mxu1 %v11229_v51  ;;  %v8855_v51 = vld [vmem:[%s19964_s7 + $0x350] sm:$0xff]  ;;  %v4858_v62 = vld [vmem:[%s19963_s6 + $0x260] sm:$0xff] }
 0x519   : > { %11142 = vmatprep.subr.bf16.mxu0 %v11141_v31  ;;  %v8820_v31 = vld [vmem:[%s19964_s7 + $0x238] sm:$0xff]  ;;  %11232 = vmatpush1.bf16.msra.mxu1 %v11231_v13  ;;  %v8863_v54 = vld [vmem:[%s19964_s7 + $0x390] sm:$0xff] }
 0x51a   : > { %v11233_v14 = vpack.c.bf16 %v8820_v31, %v8818_v37  ;;  %v8860_v37 = vld [vmem:[%s19964_s7 + $0x378] sm:$0xff]  ;;  %v11271_v31 = vpack.c.bf16 %v8855_v51, %v8853_v19  ;;  %v8867_v3 = vld [vmem:[%s19964_s7 + $0x3b0] sm:$0xff]  ;;  %v4866_v19 = vld [vmem:[%s19963_s6 + $0x2a0] sm:$0xff] }
 0x51b   : > { %v11273_v13 = vpack.c.bf16 %v8860_v37, %v8858_v57  ;;  %v4856_v50 = vld [vmem:[%s19963_s6 + $0x250] sm:$0xff]  ;;  %v4871_v37 = vld [vmem:[%s19963_s6 + $0x2c8] sm:$0xff] }
 0x51c   : > { %11144 = vmatpush1.bf16.msra.mxu0 %v11143_v1  ;;  %v8822_v1 = vld [vmem:[%s19964_s7 + $0x248] sm:$0xff]  ;;  %11234 = vmatprep.subr.bf16.mxu1 %v11233_v14  ;;  %v8857_v14 = vld [vmem:[%s19964_s7 + $0x360] sm:$0xff]  ;;  %v4868_v51 = vld [vmem:[%s19963_s6 + $0x2b0] sm:$0xff] }
 0x51d   : > { %11146 = vmatprep.subr.bf16.mxu0 %v11145_v24  ;;  %v8824_v24 = vld [vmem:[%s19964_s7 + $0x258] sm:$0xff]  ;;  %11236 = vmatpush1.bf16.msra.mxu1 %v11235_v18 }
 0x51e   : > { %v11237_v56 = vpack.c.bf16 %v8824_v24, %v8822_v1  ;;  %v8864_v1 = vld [vmem:[%s19964_s7 + $0x398] sm:$0xff]  ;;  %v11275_v24 = vpack.c.bf16 %v8859_v16, %v8857_v14  ;;  %v11199_v14 = vpack.c.bf16 %v4868_v51, %v4866_v19  ;;  %v8873_v19 = vld [vmem:[%s19964_s7 + $0x3e0] sm:$0xff] }
 0x51f   : > { %v11277_v18 = vpack.c.bf16 %v8864_v1, %v8862_v48  ;;  %v4870_v48 = vld [vmem:[%s19963_s6 + $0x2c0] sm:$0xff]  ;;  %v4872_v1 = vld [vmem:[%s19963_s6 + $0x2d0] sm:$0xff] }
 0x520   : > { %11148 = vmatpush1.bf16.msra.mxu0 %v11147_v23  ;;  %v8826_v23 = vld [vmem:[%s19964_s7 + $0x268] sm:$0xff]  ;;  %11238 = vmatprep.subr.bf16.mxu1 %v11237_v56  ;;  %v8861_v56 = vld [vmem:[%s19964_s7 + $0x380] sm:$0xff] }
 0x521   : > { %11150 = vmatprep.subr.bf16.mxu0 %v11149_v4  ;;  %v8828_v4 = vld [vmem:[%s19964_s7 + $0x278] sm:$0xff]  ;;  %11240 = vmatpush1.bf16.msra.mxu1 %v11239_v17 }
 0x522   : > { %v11241_v44 = vpack.c.bf16 %v8828_v4, %v8826_v23  ;;  %v8868_v23 = vld [vmem:[%s19964_s7 + $0x3b8] sm:$0xff]  ;;  %v11279_v4 = vpack.c.bf16 %v8863_v54, %v8861_v56 }
 0x523   : > { %v11281_v17 = vpack.c.bf16 %v8868_v23, %v8866_v53  ;;  %v4877_v56 = vld [vmem:[%s19963_s6 + $0x2f8] sm:$0xff]  ;;  %v11203_v53 = vpack.c.bf16 %v4872_v1, %v4870_v48 }
 0x524   : > { %11152 = vmatpush1.bf16.msra.mxu0 %v11151_v43  ;;  %v8830_v43 = vld [vmem:[%s19964_s7 + $0x288] sm:$0xff]  ;;  %11242 = vmatprep.subr.bf16.mxu1 %v11241_v44  ;;  %v8865_v44 = vld [vmem:[%s19964_s7 + $0x3a0] sm:$0xff] }
 0x525   : > { %11154 = vmatprep.subr.bf16.mxu0 %v11153_v42  ;;  %v8832_v42 = vld [vmem:[%s19964_s7 + $0x298] sm:$0xff]  ;;  %11244 = vmatpush1.bf16.msra.mxu1 %v11243_v47  ;;  %v11283_v49 = vpack.c.bf16 %v8867_v3, %v8865_v44  ;;  %v4851_v47 = vld [vmem:[%s19963_s6 + $0x228] sm:$0xff] }
 0x526   : > { %v11245_v27 = vpack.c.bf16 %v8832_v42, %v8830_v43  ;;  %v4846_v43 = vld [vmem:[%s19963_s6 + $0x200] sm:$0xff]  ;;  %v4848_v42 = vld [vmem:[%s19963_s6 + $0x210] sm:$0xff]  ;;  %v4879_v3 = vld [vmem:[%s19963_s6 + $0x308] sm:$0xff] }
 0x527   : > { %v11179_v61 = vpack.c.bf16 %v4848_v42, %v4846_v43 }
 0x528   : > { %11156 = vmatpush1.bf16.msra.mxu0 %v11155_v41  ;;  %v8834_v41 = vld [vmem:[%s19964_s7 + $0x2a8] sm:$0xff]  ;;  %11246 = vmatprep.subr.bf16.mxu1 %v11245_v27  ;;  %v4853_v27 = vld [vmem:[%s19963_s6 + $0x238] sm:$0xff] }
 0x529   : > { %11158 = vmatprep.subr.bf16.mxu0 %v11157_v36  ;;  %v8836_v36 = vld [vmem:[%s19964_s7 + $0x2b8] sm:$0xff]  ;;  %11248 = vmatpush1.bf16.msra.mxu1 %v11247_v34  ;;  %v4850_v34 = vld [vmem:[%s19963_s6 + $0x220] sm:$0xff] }
 0x52a   : > { %v11249_v21 = vpack.c.bf16 %v8836_v36, %v8834_v41  ;;  %v11181_v36 = vpack.c.bf16 %v4853_v27, %v4851_v47  ;;  %v4878_v27 = vld [vmem:[%s19963_s6 + $0x300] sm:$0xff] }
 0x52c   : > { %11160 = vmatpush1.bf16.msra.mxu0 %v11159_v38  ;;  %v8838_v38 = vld [vmem:[%s19964_s7 + $0x2c8] sm:$0xff]  ;;  %11250 = vmatprep.subr.bf16.mxu1 %v11249_v21  ;;  %v4852_v21 = vld [vmem:[%s19963_s6 + $0x230] sm:$0xff] }
 0x52d   : > { %11162 = vmatprep.subr.bf16.mxu0 %v11161_v63  ;;  %v8840_v63 = vld [vmem:[%s19964_s7 + $0x2d8] sm:$0xff]  ;;  %11252 = vmatpush1.bf16.msra.mxu1 %v11251_v28  ;;  %v11185_v28 = vpack.c.bf16 %v4857_v46, %v4855_v6  ;;  %v4884_v6 = vld [vmem:[%s19963_s6 + $0x330] sm:$0xff]  ;;  %v4887_v46 = vld [vmem:[%s19963_s6 + $0x348] sm:$0xff] }
 0x52e   : > { %v11253_v25 = vpack.c.bf16 %v8840_v63, %v8838_v38  ;;  %v11183_v38 = vpack.c.bf16 %v4852_v21, %v4850_v34  ;;  %v4882_v21 = vld [vmem:[%s19963_s6 + $0x320] sm:$0xff] }
 0x530   : > { %11164 = vmatpush1.bf16.msra.mxu0 %v11163_v58  ;;  %v8842_v58 = vld [vmem:[%s19964_s7 + $0x2e8] sm:$0xff]  ;;  %11254 = vmatprep.subr.bf16.mxu1 %v11253_v25  ;;  %v4854_v25 = vld [vmem:[%s19963_s6 + $0x240] sm:$0xff] }
 0x531   : > { %11166 = vmatprep.subr.bf16.mxu0 %v11165_v55  ;;  %v8844_v55 = vld [vmem:[%s19964_s7 + $0x2f8] sm:$0xff]  ;;  %11256 = vmatpush1.bf16.msra.mxu1 %v11255_v9  ;;  %v11187_v9 = vpack.c.bf16 %v4856_v50, %v4854_v25  ;;  %v4886_v25 = vld [vmem:[%s19963_s6 + $0x340] sm:$0xff]  ;;  %v4888_v50 = vld [vmem:[%s19963_s6 + $0x350] sm:$0xff] }
 0x532   : > { %v11257_v20 = vpack.c.bf16 %v8844_v55, %v8842_v58  ;;  %v4859_v58 = vld [vmem:[%s19963_s6 + $0x268] sm:$0xff]  ;;  %v4861_v55 = vld [vmem:[%s19963_s6 + $0x278] sm:$0xff] }
 0x533   : > { %v11189_v5 = vpack.c.bf16 %v4861_v55, %v4859_v58  ;;  %v4893_v58 = vld [vmem:[%s19963_s6 + $0x378] sm:$0xff]  ;;  %v11219_v55 = vpack.c.bf16 %v4888_v50, %v4886_v25 }
 0x534   : > { %11168 = vmatpush1.bf16.msra.mxu0 %v11167_v8  ;;  %v8846_v8 = vld [vmem:[%s19964_s7 + $0x308] sm:$0xff]  ;;  %11258 = vmatprep.subr.bf16.mxu1 %v11257_v20  ;;  %v5102_v25 = vld [vmem:[%s19964_s7 + $0x58] sm:$0xff] }
 0x535   : > { %11170 = vmatprep.subr.bf16.mxu0 %v11169_v60  ;;  %v8848_v60 = vld [vmem:[%s19964_s7 + $0x318] sm:$0xff]  ;;  %11260 = vmatpush1.bf16.msra.mxu1 %v11259_v35  ;;  %v4863_v35 = vld [vmem:[%s19963_s6 + $0x288] sm:$0xff] }
 0x536   : > { %v11261_v26 = vpack.c.bf16 %v8848_v60, %v8846_v8  ;;  %v4860_v8 = vld [vmem:[%s19963_s6 + $0x270] sm:$0xff] }
 0x537   : > { %v11191_v11 = vpack.c.bf16 %v4860_v8, %v4858_v62  ;;  %v4895_v62 = vld [vmem:[%s19963_s6 + $0x388] sm:$0xff]  ;;  %v4897_v8 = vld [vmem:[%s19963_s6 + $0x398] sm:$0xff] }
 0x538   : > { %11172 = vmatpush1.bf16.msra.mxu0 %v11171_v29  ;;  %v8850_v29 = vld [vmem:[%s19964_s7 + $0x328] sm:$0xff]  ;;  %11262 = vmatprep.subr.bf16.mxu1 %v11261_v26  ;;  %v4865_v26 = vld [vmem:[%s19963_s6 + $0x298] sm:$0xff] }
 0x539   : > { %11174 = vmatprep.subr.bf16.mxu0 %v11173_v32  ;;  %v8852_v32 = vld [vmem:[%s19964_s7 + $0x338] sm:$0xff]  ;;  %11264 = vmatpush1.bf16.msra.mxu1 %v11263_v40  ;;  %v4864_v40 = vld [vmem:[%s19963_s6 + $0x290] sm:$0xff] }
 0x53a   : > { %v11265_v10 = vpack.c.bf16 %v8852_v32, %v8850_v29  ;;  %v11193_v29 = vpack.c.bf16 %v4865_v26, %v4863_v35  ;;  %v4862_v32 = vld [vmem:[%s19963_s6 + $0x280] sm:$0xff]  ;;  %v11225_v35 = vpack.c.bf16 %v4897_v8, %v4895_v62 }
 0x53b   : > { %v4894_v26 = vld [vmem:[%s19963_s6 + $0x380] sm:$0xff] }
 0x53c   : > { %11176 = vmatpush1.bf16.msra.mxu0 %v11175_v0  ;;  %v8849_v0 = vld [vmem:[%s19964_s7 + $0x320] sm:$0xff]  ;;  %11266 = vmatprep.subr.bf16.mxu1 %v11265_v10 }
 0x53d   : > { %11178 = vmatprep.subr.bf16.mxu0 %v11177_v39  ;;  %v8856_v39 = vld [vmem:[%s19964_s7 + $0x358] sm:$0xff]  ;;  %v11267_v2 = vpack.c.bf16 %v8851_v22, %v8849_v0  ;;  %v4867_v22 = vld [vmem:[%s19963_s6 + $0x2a8] sm:$0xff]  ;;  %v5099_v8 = vld [vmem:[%s19964_s7 + $0x40] sm:$0xff] }
 0x53e   : > { %v11269_v12 = vpack.c.bf16 %v8856_v39, %v8854_v59  ;;  %v4869_v59 = vld [vmem:[%s19963_s6 + $0x2b8] sm:$0xff] }
 0x53f   : > { %11268 = vmatpush1.bf16.msra.mxu1 %v11267_v2  ;;  %v11195_v2 = vpack.c.bf16 %v4864_v40, %v4862_v32  ;;  %v4898_v32 = vld [vmem:[%s19963_s6 + $0x3a0] sm:$0xff]  ;;  %v8870_v40 = vld [vmem:[%s19964_s7 + $0x3c8] sm:$0xff] }
 0x540   : > { %11270 = vmatprep.subr.bf16.mxu1 %v11269_v12  ;;  %v11197_v12 = vpack.c.bf16 %v4869_v59, %v4867_v22  ;;  %v8871_v59 = vld [vmem:[%s19964_s7 + $0x3d0] sm:$0xff] }
 0x543   : > { %11272 = vmatpush1.bf16.msra.mxu1 %v11271_v31  ;;  %v4873_v31 = vld [vmem:[%s19963_s6 + $0x2d8] sm:$0xff] }
 0x544   : > { %11274 = vmatprep.subr.bf16.mxu1 %v11273_v13  ;;  %v11201_v16 = vpack.c.bf16 %v4873_v31, %v4871_v37  ;;  %v5092_v31 = vld [vmem:[%s19964_s7 + $0x8] sm:$0xff] }
 0x547   : > { %11276 = vmatpush1.bf16.msra.mxu1 %v11275_v24 }
 0x548   : > { %11278 = vmatprep.subr.bf16.mxu1 %v11277_v18  ;;  %v4875_v18 = vld [vmem:[%s19963_s6 + $0x2e8] sm:$0xff] }
 0x549   : > { %v11205_v23 = vpack.c.bf16 %v4877_v56, %v4875_v18  ;;  %v5093_v18 = vld [vmem:[%s19964_s7 + $0x10] sm:$0xff]  ;;  %v5096_v56 = vld [vmem:[%s19964_s7 + $0x28] sm:$0xff] }
 0x54b   : > { %11280 = vmatpush1.bf16.msra.mxu1 %v11279_v4  ;;  %v4874_v4 = vld [vmem:[%s19963_s6 + $0x2e0] sm:$0xff] }
 0x54c   : > { %11282 = vmatprep.subr.bf16.mxu1 %v11281_v17  ;;  %v4876_v17 = vld [vmem:[%s19963_s6 + $0x2f0] sm:$0xff] }
 0x54d   : > { %v11207_v42 = vpack.c.bf16 %v4876_v17, %v4874_v4 }
 0x54f   : > { %11284 = vmatpush1.bf16.msra.mxu1 %v11283_v49  ;;  %v4881_v49 = vld [vmem:[%s19963_s6 + $0x318] sm:$0xff] }
 0x550   : > { %v11209_v47 = vpack.c.bf16 %v4881_v49, %v4879_v3 }
 0x5d1   : > { %v4670_v7 = vpop.f32.mrb[48].mxu0 }
 0x5d2   : > { %v4672_v41 = vpop.f32.mrb[49].mxu0 }
 0x5d3   : > { %4977 = vmatprep.mubr.f32.mxu0 %v4672_v41  ;;  %v4885_v41 = vld [vmem:[%s19963_s6 + $0x338] sm:$0xff] }
 0x5d4   : > { %4978 = vmatmul.mubr.f32.vlgmr.msra.gmra.mrb[56].mxu0 %v4670_v7  ;;  %v4880_v7 = vld [vmem:[%s19963_s6 + $0x310] sm:$0xff] }
 0x5d5   : > { %11180 = vmatpush1.bf16.msra.mxu0 %v11179_v61  ;;  %v4676_v63 = vpop.f32.mrb[50].mxu0  ;;  %v4883_v61 = vld [vmem:[%s19963_s6 + $0x328] sm:$0xff] }
 0x5d6   : > { %11182 = vmatprep.subr.bf16.mxu0 %v11181_v36  ;;  %v4678_v15 = vpop.f32.mrb[51].mxu0  ;;  %v11211_v36 = vpack.c.bf16 %v4880_v7, %v4878_v27  ;;  %v11213_v34 = vpack.c.bf16 %v4885_v41, %v4883_v61 }
 0x5d7   : > { %4983 = vmatprep.mubr.f32.mxu0 %v4678_v15  ;;  %v4891_v15 = vld [vmem:[%s19963_s6 + $0x368] sm:$0xff] }
 0x5d8   : > { %4984 = vmatmul.mubr.f32.gmra.mrb[58].mxu0 %v4676_v63  ;;  %v11215_v63 = vpack.c.bf16 %v4884_v6, %v4882_v21  ;;  %v5097_v21 = vld [vmem:[%s19964_s7 + $0x30] sm:$0xff] }
 0x5d9   : > { %11184 = vmatpush1.bf16.msra.mxu0 %v11183_v38  ;;  %v4682_v20 = vpop.f32.mrb[52].mxu0  ;;  %v4889_v38 = vld [vmem:[%s19963_s6 + $0x358] sm:$0xff] }
 0x5da   : > { %11186 = vmatprep.subr.bf16.mxu0 %v11185_v28  ;;  %v4684_v60 = vpop.f32.mrb[53].mxu0  ;;  %v11217_v28 = vpack.c.bf16 %v4889_v38, %v4887_v46 }
 0x5db   : > { %4989 = vmatprep.mubr.f32.mxu0 %v4684_v60 }
 0x5dc   : > { %4990 = vmatmul.mubr.f32.gmra.mrb[60].mxu0 %v4682_v20  ;;  %v4890_v20 = vld [vmem:[%s19963_s6 + $0x360] sm:$0xff] }
 0x5dd   : > { %11188 = vmatpush1.bf16.msra.mxu0 %v11187_v9  ;;  %v4688_v45 = vpop.f32.mrb[54].mxu0  ;;  %v11221_v9 = vpack.c.bf16 %v4893_v58, %v4891_v15 }
 0x5de   : > { %11190 = vmatprep.subr.bf16.mxu0 %v11189_v5  ;;  %v4690_v10 = vpop.f32.mrb[55].mxu0  ;;  %v17633_v0 = vpop.f32.mrb[32].mxu1  ;;  %v4892_v5 = vld [vmem:[%s19963_s6 + $0x370] sm:$0xff] }
 0x5df   : > { %4995 = vmatprep.mubr.f32.mxu0 %v4690_v10  ;;  %v4761_v39 = vpop.f32.mrb[33].mxu1  ;;  %v11223_v60 = vpack.c.bf16 %v4892_v5, %v4890_v20  ;;  %v8872_v10 = vld [vmem:[%s19964_s7 + $0x3d8] sm:$0xff] }
 0x5e0   : > { %4996 = vmatmul.mubr.f32.gmra.mrb[62].mxu0 %v4688_v45  ;;  %v11285_v22 = vpack.c.bf16 %v8872_v10, %v8870_v40 }
 0x5e1   : > { %11192 = vmatpush1.bf16.msra.mxu0 %v11191_v11  ;;  %8809 = vmatprep.mubr.msk.f32.mxu0 %vm4900_vm9, %v4761_v39  ;;  %v4896_v11 = vld [vmem:[%s19963_s6 + $0x390] sm:$0xff] }
 0x5e2   : > { %11194 = vmatprep.subr.bf16.mxu0 %v11193_v29  ;;  %v17648_v57 = vpop.f32.mrb[34].mxu1  ;;  %v11227_v45 = vpack.c.bf16 %v4896_v11, %v4894_v26  ;;  %v4899_v29 = vld [vmem:[%s19963_s6 + $0x3a8] sm:$0xff]  ;;  %11286 = vmatprep.subr.bf16.mxu1 %v11285_v22 }
 0x5e3   : > { %v17656_v13 = vpop.f32.mrb[35].mxu1 }
 0x5e5   : > { %11196 = vmatpush1.bf16.msra.mxu0 %v11195_v2  ;;  %v8874_v2 = vld [vmem:[%s19964_s7 + $0x3e8] sm:$0xff] }
 0x5e6   : > { %11198 = vmatprep.subr.bf16.mxu0 %v11197_v12  ;;  %v17664_v24 = vpop.f32.mrb[36].mxu1  ;;  %v8876_v12 = vld [vmem:[%s19964_s7 + $0x3f8] sm:$0xff] }
 0x5e7   : > { %v4773_v54 = vpop.f32.mrb[37].mxu1  ;;  %v11289_v51 = vpack.c.bf16 %v8876_v12, %v8874_v2  ;;  %v5103_v12 = vld [vmem:[%s19964_s7 + $0x60] sm:$0xff] }
 0x5e9   : > { %11200 = vmatpush1.bf16.msra.mxu0 %v11199_v14 }
 0x5ea   : > { %11202 = vmatprep.subr.bf16.mxu0 %v11201_v16  ;;  %v4777_v44 = vpop.f32.mrb[38].mxu1 }
 0x5eb   : > { %v4779_v43 = vpop.f32.mrb[39].mxu1 }
 0x5ed   : > { %11204 = vmatpush1.bf16.msra.mxu0 %v11203_v53 }
 0x5ee   : > { %11206 = vmatprep.subr.bf16.mxu0 %v11205_v23 }
 0x5f1   : > { %11208 = vmatpush1.bf16.msra.mxu0 %v11207_v42 }
 0x5f2   : > { %11210 = vmatprep.subr.bf16.mxu0 %v11209_v47 }
 0x5f5   : > { %11212 = vmatpush1.bf16.msra.mxu0 %v11211_v36 }
 0x5f6   : > { %11214 = vmatprep.subr.bf16.mxu0 %v11213_v34  ;;  %v5095_v34 = vld [vmem:[%s19964_s7 + $0x20] sm:$0xff] }
 0x5f9   : > { %11216 = vmatpush1.bf16.msra.mxu0 %v11215_v63 }
 0x5fa   : > { %11218 = vmatprep.subr.bf16.mxu0 %v11217_v28  ;;  %v5100_v28 = vld [vmem:[%s19964_s7 + $0x48] sm:$0xff] }
 0x5fb   : > { %v11301_v62 = vpack.c.bf16 %v5102_v25, %v5100_v28 }
 0x5fd   : > { %11220 = vmatpush1.bf16.msra.mxu0 %v11219_v55  ;;  %v11299_v55 = vpack.c.bf16 %v5097_v21, %v5095_v34  ;;  %v5119_v34 = vld [vmem:[%s19964_s7 + $0xe0] sm:$0xff]  ;;  %v5121_v21 = vld [vmem:[%s19964_s7 + $0xf0] sm:$0xff] }
 0x5fe   : > { %11222 = vmatprep.subr.bf16.mxu0 %v11221_v9  ;;  %v11323_v28 = vpack.c.bf16 %v5121_v21, %v5119_v34 }
 0x601   : > { %11224 = vmatpush1.bf16.msra.mxu0 %v11223_v60  ;;  %v5101_v60 = vld [vmem:[%s19964_s7 + $0x50] sm:$0xff] }
 0x602   : > { %11226 = vmatprep.subr.bf16.mxu0 %v11225_v35  ;;  %v11303_v22 = vpack.c.bf16 %v5101_v60, %v5099_v8  ;;  %v5127_v8 = vld [vmem:[%s19964_s7 + $0x120] sm:$0xff]  ;;  %v5129_v60 = vld [vmem:[%s19964_s7 + $0x130] sm:$0xff] }
 0x605   : > { %11228 = vmatpush1.bf16.msra.mxu0 %v11227_v45 }
 0x606   : > { %5054 = vmatprep.subr.mxu0 %v4899_v29  ;;  %v5104_v29 = vld [vmem:[%s19964_s7 + $0x68] sm:$0xff] }
 0x609   : > { %5055 = vmatpush1.msra.mxu0 %v4898_v32  ;;  %v5106_v32 = vld [vmem:[%s19964_s7 + $0x78] sm:$0xff] }
 0x60a   : > { %5067 = vmatmul.mubr.f32.vlgmr.msra.gmra.mrb[56].mxu0 %v17633_v0  ;;  %v8869_v0 = vld [vmem:[%s19964_s7 + $0x3c0] sm:$0xff]  ;;  %v11305_v2 = vpack.c.bf16 %v5106_v32, %v5104_v29  ;;  %v5134_v29 = vld [vmem:[%s19964_s7 + $0x158] sm:$0xff]  ;;  %v11331_v32 = vpack.c.bf16 %v5129_v60, %v5127_v8 }
 0x60b   : > { %8810 = vmatprep.mubr.msk.f32.mxu0 %vm4900_vm9, %v17656_v13  ;;  %v11287_v39 = vpack.c.bf16 %v8871_v59, %v8869_v0  ;;  %v5094_v13 = vld [vmem:[%s19964_s7 + $0x18] sm:$0xff] }
 0x60c   : > { %v11293_v14 = vpack.c.bf16 %v5094_v13, %v5092_v31 }
 0x60d   : > { %11288 = vmatpush1.bf16.msra.mxu1 %v11287_v39 }
 0x60e   : > { %5073 = vmatmul.mubr.f32.gmra.mrb[58].mxu0 %v17648_v57  ;;  %v8875_v57 = vld [vmem:[%s19964_s7 + $0x3f0] sm:$0xff]  ;;  %11290 = vmatprep.subr.bf16.mxu1 %v11289_v51 }
 0x60f   : > { %8811 = vmatprep.mubr.msk.f32.mxu0 %vm4900_vm9, %v4773_v54  ;;  %v11291_v37 = vpack.c.bf16 %v8875_v57, %v8873_v19  ;;  %v5105_v19 = vld [vmem:[%s19964_s7 + $0x70] sm:$0xff]  ;;  %v5108_v57 = vld [vmem:[%s19964_s7 + $0x88] sm:$0xff] }
 0x610   : > { %v11307_v31 = vpack.c.bf16 %v5105_v19, %v5103_v12 }
 0x611   : > { %11292 = vmatpush1.bf16.msra.mxu1 %v11291_v37  ;;  %v5110_v37 = vld [vmem:[%s19964_s7 + $0x98] sm:$0xff] }
 0x612   : > { %5079 = vmatmul.mubr.f32.gmra.mrb[60].mxu0 %v17664_v24  ;;  %11294 = vmatprep.subr.bf16.mxu1 %v11293_v14  ;;  %v5091_v24 = vld [vmem:[%s19964_s7] sm:$0xff]  ;;  %v11309_v13 = vpack.c.bf16 %v5110_v37, %v5108_v57  ;;  %v5137_v37 = vld [vmem:[%s19964_s7 + $0x170] sm:$0xff] }
 0x613   : > { %8812 = vmatprep.mubr.msk.f32.mxu0 %vm4900_vm9, %v4779_v43  ;;  %v11295_v27 = vpack.c.bf16 %v5093_v18, %v5091_v24  ;;  %v5107_v14 = vld [vmem:[%s19964_s7 + $0x80] sm:$0xff]  ;;  %v5109_v24 = vld [vmem:[%s19964_s7 + $0x90] sm:$0xff]  ;;  %v5112_v18 = vld [vmem:[%s19964_s7 + $0xa8] sm:$0xff] }
 0x614   : > { %v5135_v57 = vld [vmem:[%s19964_s7 + $0x160] sm:$0xff] }
 0x616   : > { %5085 = vmatmul.mubr.f32.gmra.mrb[62].mxu0 %v4777_v44  ;;  %v5098_v44 = vld [vmem:[%s19964_s7 + $0x38] sm:$0xff] }
 0x617   : > { %5727 = vmatprep.mubr.f32.mxu0 %v12494_v52  ;;  %v11297_v36 = vpack.c.bf16 %v5098_v44, %v5096_v56  ;;  %v5114_v56 = vld [vmem:[%s19964_s7 + $0xb8] sm:$0xff]  ;;  %v5116_v44 = vld [vmem:[%s19964_s7 + $0xc8] sm:$0xff] }
 0x6dd   : > { %v17782_v16 = vpop.f32.mrb[56].mxu0 }
 0x6de   : > { %v17784_v48 = vpop.f32.mrb[57].mxu0  ;;  %v5228_v54 = vrot.slane %v17782_v16, 1  ;;  %v5493_v53 = vrot.slane %v17782_v16, 2 }
 0x6df   : > { %v5231_v3 = vrot.slane %v17784_v48, 1  ;;  %v5496_v49 = vrot.slane %v17784_v48, 2 }
 0x6e1   : > { %v17786_v1 = vpop.f32.mrb[58].mxu0 }
 0x6e2   : > { %v5229_v23 = vrot.slane %v17786_v1, 1  ;;  %v5494_v4 = vrot.slane %v17786_v1, 2  ;;  %v17801_v17 = vpop.f32.mrb[59].mxu0 }
 0x6e3   : > { %v5232_v43 = vrot.slane %v17801_v17, 1  ;;  %v5497_v42 = vrot.slane %v17801_v17, 2 }
 0x6e4   : > { %v5230_v47 = vsel %vm744_vm0, %v5228_v54, %v5229_v23  ;;  %v17812_v7 = vsel %vm1365_vm2, %v5493_v53, %v5494_v4  ;;  %v11311_v54 = vpack.c.bf16 %v5109_v24, %v5107_v14  ;;  %v11313_v53 = vpack.c.bf16 %v5114_v56, %v5112_v18  ;;  %v5139_v18 = vld [vmem:[%s19964_s7 + $0x180] sm:$0xff]  ;;  %v5141_v56 = vld [vmem:[%s19964_s7 + $0x190] sm:$0xff] }
 0x6e5   : > { %v17814_v61 = vpop.f32.mrb[60].mxu0  ;;  %v5233_v41 = vsel %vm744_vm0, %v5231_v3, %v5232_v43  ;;  %v17824_v6 = vsel %vm1365_vm2, %v5496_v49, %v5497_v42  ;;  %v5118_v3 = vld [vmem:[%s19964_s7 + $0xd8] sm:$0xff]  ;;  %v11339_v14 = vpack.c.bf16 %v5137_v37, %v5135_v57  ;;  %v8889_v57 = vld [vmem:[%s19964_s7 + $0x460] sm:$0xff]  ;;  %v8891_v37 = vld [vmem:[%s19964_s7 + $0x470] sm:$0xff] }
 0x6e6   : > { %v5234_v46 = vrot.slane %v17814_v61, 1  ;;  %v5499_v38 = vrot.slane %v17814_v61, 2  ;;  %v17828_v63 = vpop.f32.mrb[61].mxu0  ;;  %5314 = vmatprep.mubr.f32.mxu1 %v5233_v41  ;;  %v11317_v49 = vpack.c.bf16 %v5118_v3, %v5116_v44  ;;  %v5143_v44 = vld [vmem:[%s19964_s7 + $0x1a0] sm:$0xff]  ;;  %v5145_v3 = vld [vmem:[%s19964_s7 + $0x1b0] sm:$0xff] }
 0x6e7   : > { %v5236_v50 = vrot.slane %v17828_v63, 1  ;;  %v5501_v15 = vrot.slane %v17828_v63, 2  ;;  %5315 = vmatmul.mubr.f32.vlgmr.msra.gmra.mrb[40].mxu1 %v5230_v47  ;;  %v5120_v47 = vld [vmem:[%s19964_s7 + $0xe8] sm:$0xff] }
 0x6e8   : > { %11296 = vmatpush1.bf16.msra.mxu1 %v11295_v27  ;;  %v5235_v58 = vsel %vm744_vm0, %v5229_v23, %v5234_v46  ;;  %v17840_v9 = vsel %vm1365_vm2, %v5494_v4, %v5499_v38  ;;  %v5111_v23 = vld [vmem:[%s19964_s7 + $0xa0] sm:$0xff]  ;;  %v5113_v4 = vld [vmem:[%s19964_s7 + $0xb0] sm:$0xff]  ;;  %v5122_v27 = vld [vmem:[%s19964_s7 + $0xf8] sm:$0xff] }
 0x6e9   : > { %v17842_v20 = vpop.f32.mrb[62].mxu0  ;;  %v5237_v5 = vsel %vm744_vm0, %v5232_v43, %v5236_v50  ;;  %11298 = vmatprep.subr.bf16.mxu1 %v11297_v36  ;;  %v17852_v35 = vsel %vm1365_vm2, %v5497_v42, %v5501_v15  ;;  %v5115_v43 = vld [vmem:[%s19964_s7 + $0xc0] sm:$0xff]  ;;  %v5117_v42 = vld [vmem:[%s19964_s7 + $0xd0] sm:$0xff]  ;;  %v11321_v36 = vpack.c.bf16 %v5122_v27, %v5120_v47 }
 0x6ea   : > { %v5238_v26 = vrot.slane %v17842_v20, 1  ;;  %v5503_v11 = vrot.slane %v17842_v20, 2  ;;  %v17856_v45 = vpop.f32.mrb[63].mxu0  ;;  %5320 = vmatprep.mubr.f32.mxu1 %v5237_v5  ;;  %v11319_v41 = vpack.c.bf16 %v5117_v42, %v5115_v43  ;;  %v11347_v43 = vpack.c.bf16 %v5145_v3, %v5143_v44  ;;  %v5147_v47 = vld [vmem:[%s19964_s7 + $0x1c0] sm:$0xff]  ;;  %v5149_v27 = vld [vmem:[%s19964_s7 + $0x1d0] sm:$0xff]  ;;  %v8904_v44 = vld [vmem:[%s19964_s7 + $0x4d8] sm:$0xff] }
 0x6eb   : > { %v5240_v40 = vrot.slane %v17856_v45, 1  ;;  %v5505_v10 = vrot.slane %v17856_v45, 2  ;;  %5321 = vmatmul.mubr.f32.gmra.mrb[42].mxu1 %v5235_v58  ;;  %v5128_v58 = vld [vmem:[%s19964_s7 + $0x128] sm:$0xff]  ;;  %v11351_v34 = vpack.c.bf16 %v5149_v27, %v5147_v47 }
 0x6ec   : > { %11300 = vmatpush1.bf16.msra.mxu1 %v11299_v55  ;;  %v5239_v0 = vsel %vm744_vm0, %v5234_v46, %v5238_v26  ;;  %v17870_v59 = vsel %vm1365_vm2, %v5499_v38, %v5503_v11  ;;  %v5124_v46 = vld [vmem:[%s19964_s7 + $0x108] sm:$0xff]  ;;  %v5126_v38 = vld [vmem:[%s19964_s7 + $0x118] sm:$0xff] }
 0x6ed   : > { %v5241_v39 = vsel %vm744_vm0, %v5236_v50, %v5240_v40  ;;  %11302 = vmatprep.subr.bf16.mxu1 %v11301_v62  ;;  %v17882_v51 = vsel %vm1365_vm2, %v5501_v15, %v5505_v10  ;;  %v11325_v25 = vpack.c.bf16 %v5126_v38, %v5124_v46  ;;  %v5123_v50 = vld [vmem:[%s19964_s7 + $0x100] sm:$0xff]  ;;  %v5125_v15 = vld [vmem:[%s19964_s7 + $0x110] sm:$0xff]  ;;  %v5130_v55 = vld [vmem:[%s19964_s7 + $0x138] sm:$0xff] }
 0x6ee   : > { %5326 = vmatprep.mubr.f32.mxu1 %v5241_v39  ;;  %v11327_v5 = vpack.c.bf16 %v5125_v15, %v5123_v50  ;;  %v11329_v62 = vpack.c.bf16 %v5130_v55, %v5128_v58  ;;  %v5136_v39 = vld [vmem:[%s19964_s7 + $0x168] sm:$0xff]  ;;  %v5151_v46 = vld [vmem:[%s19964_s7 + $0x1e0] sm:$0xff]  ;;  %v5153_v38 = vld [vmem:[%s19964_s7 + $0x1f0] sm:$0xff] }
 0x6ef   : > { %5327 = vmatmul.mubr.f32.gmra.mrb[44].mxu1 %v5239_v0  ;;  %v5131_v0 = vld [vmem:[%s19964_s7 + $0x140] sm:$0xff]  ;;  %v11355_v50 = vpack.c.bf16 %v5153_v38, %v5151_v46  ;;  %v8879_v55 = vld [vmem:[%s19964_s7 + $0x410] sm:$0xff] }
 0x6f0   : > { %11304 = vmatpush1.bf16.msra.mxu1 %v11303_v22  ;;  %5332 = vmatprep.mubr.f32.mxu1 %v5240_v40  ;;  %v5133_v22 = vld [vmem:[%s19964_s7 + $0x150] sm:$0xff]  ;;  %v8877_v58 = vld [vmem:[%s19964_s7 + $0x400] sm:$0xff] }
 0x6f1   : > { %11306 = vmatprep.subr.bf16.mxu1 %v11305_v2  ;;  %v5138_v2 = vld [vmem:[%s19964_s7 + $0x178] sm:$0xff]  ;;  %v11335_v12 = vpack.c.bf16 %v5133_v22, %v5131_v0  ;;  %v11359_v8 = vpack.c.bf16 %v8879_v55, %v8877_v58 }
 0x6f2   : > { %v11337_v19 = vpack.c.bf16 %v5138_v2, %v5136_v39  ;;  %v8885_v39 = vld [vmem:[%s19964_s7 + $0x440] sm:$0xff]  ;;  %v8887_v2 = vld [vmem:[%s19964_s7 + $0x450] sm:$0xff] }
 0x6f3   : > { %5333 = vmatmul.mubr.f32.gmra.mrb[46].mxu1 %v5238_v26  ;;  %v5132_v26 = vld [vmem:[%s19964_s7 + $0x148] sm:$0xff] }
 0x6f4   : > { %11308 = vmatpush1.bf16.msra.mxu1 %v11307_v31  ;;  %5403 = vmatprep.mubr.f32.mxu1 %v17784_v48  ;;  %v11315_v48 = vpack.c.bf16 %v5113_v4, %v5111_v23  ;;  %v11333_v40 = vpack.c.bf16 %v5134_v29, %v5132_v26  ;;  %v5140_v31 = vld [vmem:[%s19964_s7 + $0x188] sm:$0xff]  ;;  %v11343_v23 = vpack.c.bf16 %v5141_v56, %v5139_v18  ;;  %v8881_v26 = vld [vmem:[%s19964_s7 + $0x420] sm:$0xff]  ;;  %v8883_v29 = vld [vmem:[%s19964_s7 + $0x430] sm:$0xff] }
 0x6f5   : > { %11310 = vmatprep.subr.bf16.mxu1 %v11309_v13  ;;  %v5142_v13 = vld [vmem:[%s19964_s7 + $0x198] sm:$0xff]  ;;  %v11363_v0 = vpack.c.bf16 %v8883_v29, %v8881_v26  ;;  %v8898_v18 = vld [vmem:[%s19964_s7 + $0x4a8] sm:$0xff] }
 0x6f6   : > { %v11341_v24 = vpack.c.bf16 %v5142_v13, %v5140_v31  ;;  %v8894_v31 = vld [vmem:[%s19964_s7 + $0x488] sm:$0xff] }
 0x6f8   : > { %11312 = vmatpush1.bf16.msra.mxu1 %v11311_v54  ;;  %v5144_v54 = vld [vmem:[%s19964_s7 + $0x1a8] sm:$0xff] }
 0x6f9   : > { %11314 = vmatprep.subr.bf16.mxu1 %v11313_v53  ;;  %v5146_v53 = vld [vmem:[%s19964_s7 + $0x1b8] sm:$0xff] }
 0x6fa   : > { %v11345_v4 = vpack.c.bf16 %v5146_v53, %v5144_v54  ;;  %v8897_v53 = vld [vmem:[%s19964_s7 + $0x4a0] sm:$0xff] }
 0x6fc   : > { %11316 = vmatpush1.bf16.msra.mxu1 %v11315_v48  ;;  %v5148_v48 = vld [vmem:[%s19964_s7 + $0x1c8] sm:$0xff] }
 0x6fd   : > { %11318 = vmatprep.subr.bf16.mxu1 %v11317_v49  ;;  %v5150_v49 = vld [vmem:[%s19964_s7 + $0x1d8] sm:$0xff] }
 0x6fe   : > { %v11349_v42 = vpack.c.bf16 %v5150_v49, %v5148_v48  ;;  %v8901_v48 = vld [vmem:[%s19964_s7 + $0x4c0] sm:$0xff]  ;;  %v8903_v49 = vld [vmem:[%s19964_s7 + $0x4d0] sm:$0xff] }
 0x6ff   : > { %v11383_v47 = vpack.c.bf16 %v8903_v49, %v8901_v48 }
 0x700   : > { %11320 = vmatpush1.bf16.msra.mxu1 %v11319_v41  ;;  %v5152_v41 = vld [vmem:[%s19964_s7 + $0x1e8] sm:$0xff] }
 0x701   : > { %11322 = vmatprep.subr.bf16.mxu1 %v11321_v36  ;;  %v5154_v36 = vld [vmem:[%s19964_s7 + $0x1f8] sm:$0xff] }
 0x702   : > { %v11353_v21 = vpack.c.bf16 %v5154_v36, %v5152_v41  ;;  %v8905_v41 = vld [vmem:[%s19964_s7 + $0x4e0] sm:$0xff]  ;;  %v8907_v36 = vld [vmem:[%s19964_s7 + $0x4f0] sm:$0xff] }
 0x703   : > { %v11387_v46 = vpack.c.bf16 %v8907_v36, %v8905_v41 }
 0x704   : > { %11324 = vmatpush1.bf16.msra.mxu1 %v11323_v28  ;;  %v8878_v28 = vld [vmem:[%s19964_s7 + $0x408] sm:$0xff] }
 0x705   : > { %11326 = vmatprep.subr.bf16.mxu1 %v11325_v25  ;;  %v8880_v25 = vld [vmem:[%s19964_s7 + $0x418] sm:$0xff] }
 0x706   : > { %v11357_v15 = vpack.c.bf16 %v8880_v25, %v8878_v28  ;;  %v8909_v28 = vld [vmem:[%s19964_s7 + $0x500] sm:$0xff]  ;;  %v8911_v25 = vld [vmem:[%s19964_s7 + $0x510] sm:$0xff] }
 0x707   : > { %v11391_v58 = vpack.c.bf16 %v8911_v25, %v8909_v28 }
 0x708   : > { %11328 = vmatpush1.bf16.msra.mxu1 %v11327_v5  ;;  %v8882_v5 = vld [vmem:[%s19964_s7 + $0x428] sm:$0xff] }
 0x709   : > { %11330 = vmatprep.subr.bf16.mxu1 %v11329_v62  ;;  %v8884_v62 = vld [vmem:[%s19964_s7 + $0x438] sm:$0xff] }
 0x70a   : > { %v11361_v60 = vpack.c.bf16 %v8884_v62, %v8882_v5  ;;  %v8913_v5 = vld [vmem:[%s19964_s7 + $0x520] sm:$0xff]  ;;  %v8915_v62 = vld [vmem:[%s19964_s7 + $0x530] sm:$0xff] }
 0x70b   : > { %v11395_v26 = vpack.c.bf16 %v8915_v62, %v8913_v5 }
 0x70c   : > { %11332 = vmatpush1.bf16.msra.mxu1 %v11331_v32  ;;  %v8886_v32 = vld [vmem:[%s19964_s7 + $0x448] sm:$0xff] }
 0x70d   : > { %11334 = vmatprep.subr.bf16.mxu1 %v11333_v40  ;;  %v8888_v40 = vld [vmem:[%s19964_s7 + $0x458] sm:$0xff] }
 0x70e   : > { %v11365_v22 = vpack.c.bf16 %v8888_v40, %v8886_v32  ;;  %v8917_v32 = vld [vmem:[%s19964_s7 + $0x540] sm:$0xff]  ;;  %v8919_v40 = vld [vmem:[%s19964_s7 + $0x550] sm:$0xff] }
 0x710   : > { %11336 = vmatpush1.bf16.msra.mxu1 %v11335_v12  ;;  %v8890_v12 = vld [vmem:[%s19964_s7 + $0x468] sm:$0xff] }
 0x711   : > { %11338 = vmatprep.subr.bf16.mxu1 %v11337_v19 }
 0x714   : > { %11340 = vmatpush1.bf16.msra.mxu1 %v11339_v14  ;;  %v8893_v14 = vld [vmem:[%s19964_s7 + $0x480] sm:$0xff] }
 0x715   : > { %11342 = vmatprep.subr.bf16.mxu1 %v11341_v24  ;;  %v8895_v24 = vld [vmem:[%s19964_s7 + $0x490] sm:$0xff] }
 0x716   : > { %v11375_v56 = vpack.c.bf16 %v8895_v24, %v8893_v14 }
 0x718   : > { %11344 = vmatpush1.bf16.msra.mxu1 %v11343_v23  ;;  %v8899_v23 = vld [vmem:[%s19964_s7 + $0x4b0] sm:$0xff] }
 0x719   : > { %11346 = vmatprep.subr.bf16.mxu1 %v11345_v4  ;;  %v8902_v4 = vld [vmem:[%s19964_s7 + $0x4c8] sm:$0xff] }
 0x71a   : > { %v11381_v3 = vpack.c.bf16 %v8904_v44, %v8902_v4  ;;  %v8933_v4 = vld [vmem:[%s19964_s7 + $0x5c0] sm:$0xff]  ;;  %v8935_v44 = vld [vmem:[%s19964_s7 + $0x5d0] sm:$0xff] }
 0x71b   : > { %v11415_v48 = vpack.c.bf16 %v8935_v44, %v8933_v4  ;;  %v5642_v4 = vld [vmem:[%s19966_s9 + $0x10] sm:$0xff] }
 0x71c   : > { %11348 = vmatpush1.bf16.msra.mxu1 %v11347_v43  ;;  %v8906_v43 = vld [vmem:[%s19964_s7 + $0x4e8] sm:$0xff] }
 0x71d   : > { %11350 = vmatprep.subr.bf16.mxu1 %v11349_v42  ;;  %v8908_v42 = vld [vmem:[%s19964_s7 + $0x4f8] sm:$0xff] }
 0x71e   : > { %v11385_v27 = vpack.c.bf16 %v8908_v42, %v8906_v43  ;;  %v8937_v43 = vld [vmem:[%s19964_s7 + $0x5e0] sm:$0xff]  ;;  %v8939_v42 = vld [vmem:[%s19964_s7 + $0x5f0] sm:$0xff] }
 0x720   : > { %11352 = vmatpush1.bf16.msra.mxu1 %v11351_v34  ;;  %v8910_v34 = vld [vmem:[%s19964_s7 + $0x508] sm:$0xff] }
 0x721   : > { %11354 = vmatprep.subr.bf16.mxu1 %v11353_v21  ;;  %v8912_v21 = vld [vmem:[%s19964_s7 + $0x518] sm:$0xff] }
 0x722   : > { %v11389_v38 = vpack.c.bf16 %v8912_v21, %v8910_v34 }
 0x724   : > { %11356 = vmatpush1.bf16.msra.mxu1 %v11355_v50  ;;  %v8914_v50 = vld [vmem:[%s19964_s7 + $0x528] sm:$0xff] }
 0x725   : > { %11358 = vmatprep.subr.bf16.mxu1 %v11357_v15  ;;  %v8916_v15 = vld [vmem:[%s19964_s7 + $0x538] sm:$0xff] }
 0x726   : > { %v11393_v55 = vpack.c.bf16 %v8916_v15, %v8914_v50 }
 0x727   : > { %5404 = vmatmul.mubr.f32.vlgmr.msra.gmra.mrb[40].mxu1 %v17782_v16  ;;  %v8892_v16 = vld [vmem:[%s19964_s7 + $0x478] sm:$0xff] }
 0x728   : > { %5409 = vmatprep.mubr.f32.mxu1 %v17801_v17  ;;  %11360 = vmatpush1.bf16.msra.mxu1 %v11359_v8  ;;  %v11367_v17 = vpack.c.bf16 %v8887_v2, %v8885_v39  ;;  %v11369_v19 = vpack.c.bf16 %v8892_v16, %v8890_v12  ;;  %v8918_v8 = vld [vmem:[%s19964_s7 + $0x548] sm:$0xff]  ;;  %v11399_v39 = vpack.c.bf16 %v8919_v40, %v8917_v32  ;;  %v8921_v12 = vld [vmem:[%s19964_s7 + $0x560] sm:$0xff]  ;;  %v8923_v16 = vld [vmem:[%s19964_s7 + $0x570] sm:$0xff] }
 0x729   : > { %11362 = vmatprep.subr.bf16.mxu1 %v11361_v60  ;;  %v8920_v60 = vld [vmem:[%s19964_s7 + $0x558] sm:$0xff] }
 0x72a   : > { %v11397_v29 = vpack.c.bf16 %v8920_v60, %v8918_v8  ;;  %v8950_v32 = vld [vmem:[%s19967_s10 + $0x218] sm:$0xff] }
 0x72b   : > { %5410 = vmatmul.mubr.f32.gmra.mrb[42].mxu1 %v17786_v1  ;;  %v8896_v1 = vld [vmem:[%s19964_s7 + $0x498] sm:$0xff] }
 0x72c   : > { %5415 = vmatprep.mubr.f32.mxu1 %v17828_v63  ;;  %11364 = vmatpush1.bf16.msra.mxu1 %v11363_v0  ;;  %v11371_v63 = vpack.c.bf16 %v8891_v37, %v8889_v57  ;;  %v11373_v13 = vpack.c.bf16 %v8896_v1, %v8894_v31  ;;  %v8922_v0 = vld [vmem:[%s19964_s7 + $0x568] sm:$0xff]  ;;  %v11403_v57 = vpack.c.bf16 %v8923_v16, %v8921_v12  ;;  %v8925_v31 = vld [vmem:[%s19964_s7 + $0x580] sm:$0xff]  ;;  %v8927_v1 = vld [vmem:[%s19964_s7 + $0x590] sm:$0xff] }
 0x72d   : > { %11366 = vmatprep.subr.bf16.mxu1 %v11365_v22  ;;  %v8924_v22 = vld [vmem:[%s19964_s7 + $0x578] sm:$0xff]  ;;  %v11407_v14 = vpack.c.bf16 %v8927_v1, %v8925_v31  ;;  %v8947_v12 = vld [vmem:[%s19967_s10 + $0x200] sm:$0xff]  ;;  %v8949_v16 = vld [vmem:[%s19967_s10 + $0x210] sm:$0xff] }
 0x72e   : > { %v11401_v2 = vpack.c.bf16 %v8924_v22, %v8922_v0  ;;  %v8951_v1 = vld [vmem:[%s19967_s10 + $0x220] sm:$0xff] }
 0x72f   : > { %5416 = vmatmul.mubr.f32.gmra.mrb[44].mxu1 %v17814_v61  ;;  %v8900_v61 = vld [vmem:[%s19964_s7 + $0x4b8] sm:$0xff] }
 0x730   : > { %5421 = vmatprep.mubr.f32.mxu1 %v17856_v45  ;;  %11368 = vmatpush1.bf16.msra.mxu1 %v11367_v17  ;;  %v11377_v54 = vpack.c.bf16 %v8900_v61, %v8898_v18  ;;  %v8926_v17 = vld [vmem:[%s19964_s7 + $0x588] sm:$0xff]  ;;  %v8929_v18 = vld [vmem:[%s19964_s7 + $0x5a0] sm:$0xff]  ;;  %v8931_v61 = vld [vmem:[%s19964_s7 + $0x5b0] sm:$0xff] }
 0x731   : > { %11370 = vmatprep.subr.bf16.mxu1 %v11369_v19  ;;  %v8928_v19 = vld [vmem:[%s19964_s7 + $0x598] sm:$0xff] }
 0x732   : > { %v11405_v37 = vpack.c.bf16 %v8928_v19, %v8926_v17  ;;  %v8952_v17 = vld [vmem:[%s19967_s10 + $0x228] sm:$0xff]  ;;  %v8954_v19 = vld [vmem:[%s19967_s10 + $0x238] sm:$0xff] }
 0x733   : > { %5422 = vmatmul.mubr.f32.gmra.mrb[46].mxu1 %v17842_v20  ;;  %v11435_v31 = vpack.c.bf16 %v8954_v19, %v8952_v17  ;;  %v8987_v19 = vld [vmem:[%s19967_s10 + $0x340] sm:$0xff] }
 0x734   : > { %11372 = vmatpush1.bf16.msra.mxu1 %v11371_v63  ;;  %5579 = vmatprep.mubr.f32.mxu1 %v17824_v6  ;;  %v11379_v6 = vpack.c.bf16 %v8899_v23, %v8897_v53  ;;  %v8930_v63 = vld [vmem:[%s19964_s7 + $0x5a8] sm:$0xff]  ;;  %v11411_v53 = vpack.c.bf16 %v8931_v61, %v8929_v18 }
 0x735   : > { %11374 = vmatprep.subr.bf16.mxu1 %v11373_v13  ;;  %v8932_v13 = vld [vmem:[%s19964_s7 + $0x5b8] sm:$0xff] }
 0x736   : > { %v11409_v24 = vpack.c.bf16 %v8932_v13, %v8930_v63  ;;  %v8953_v63 = vld [vmem:[%s19967_s10 + $0x230] sm:$0xff]  ;;  %v8956_v13 = vld [vmem:[%s19967_s10 + $0x248] sm:$0xff] }
 0x737   : > { %v11437_v18 = vpack.c.bf16 %v8953_v63, %v8951_v1 }
 0x738   : > { %11376 = vmatpush1.bf16.msra.mxu1 %v11375_v56  ;;  %v8934_v56 = vld [vmem:[%s19964_s7 + $0x5c8] sm:$0xff] }
 0x739   : > { %11378 = vmatprep.subr.bf16.mxu1 %v11377_v54  ;;  %v8936_v54 = vld [vmem:[%s19964_s7 + $0x5d8] sm:$0xff] }
 0x73a   : > { %v11413_v23 = vpack.c.bf16 %v8936_v54, %v8934_v56  ;;  %v8955_v56 = vld [vmem:[%s19967_s10 + $0x240] sm:$0xff]  ;;  %v8957_v54 = vld [vmem:[%s19967_s10 + $0x250] sm:$0xff] }
 0x73b   : > { %v11441_v44 = vpack.c.bf16 %v8957_v54, %v8955_v56  ;;  %v8995_v54 = vld [vmem:[%s19967_s10 + $0x380] sm:$0xff] }
 0x73c   : > { %11380 = vmatpush1.bf16.msra.mxu1 %v11379_v6  ;;  %v8938_v6 = vld [vmem:[%s19964_s7 + $0x5e8] sm:$0xff] }
 0x73d   : > { %11382 = vmatprep.subr.bf16.mxu1 %v11381_v3  ;;  %v8940_v3 = vld [vmem:[%s19964_s7 + $0x5f8] sm:$0xff] }
 0x73e   : > { %v11417_v49 = vpack.c.bf16 %v8940_v3, %v8938_v6  ;;  %v8959_v3 = vld [vmem:[%s19967_s10 + $0x260] sm:$0xff] }
 0x740   : > { %11384 = vmatpush1.bf16.msra.mxu1 %v11383_v47  ;;  %v11419_v47 = vpack.c.bf16 %v8939_v42, %v8937_v43  ;;  %v8966_v43 = vld [vmem:[%s19967_s10 + $0x298] sm:$0xff] }
 0x741   : > { %11386 = vmatprep.subr.bf16.mxu1 %v11385_v27  ;;  %v5643_v42 = vld [vmem:[%s19966_s9 + $0x18] sm:$0xff] }
 0x744   : > { %11388 = vmatpush1.bf16.msra.mxu1 %v11387_v46 }
 0x745   : > { %11390 = vmatprep.subr.bf16.mxu1 %v11389_v38 }
 0x748   : > { %11392 = vmatpush1.bf16.msra.mxu1 %v11391_v58 }
 0x749   : > { %11394 = vmatprep.subr.bf16.mxu1 %v11393_v55 }
 0x74c   : > { %11396 = vmatpush1.bf16.msra.mxu1 %v11395_v26 }
 0x74d   : > { %11398 = vmatprep.subr.bf16.mxu1 %v11397_v29  ;;  %v8948_v29 = vld [vmem:[%s19967_s10 + $0x208] sm:$0xff] }
 0x750   : > { %11400 = vmatpush1.bf16.msra.mxu1 %v11399_v39 }
 0x751   : > { %11402 = vmatprep.subr.bf16.mxu1 %v11401_v2  ;;  %v11431_v2 = vpack.c.bf16 %v8950_v32, %v8948_v29  ;;  %v8984_v29 = vld [vmem:[%s19967_s10 + $0x328] sm:$0xff]  ;;  %v8986_v32 = vld [vmem:[%s19967_s10 + $0x338] sm:$0xff] }
 0x754   : > { %11404 = vmatpush1.bf16.msra.mxu1 %v11403_v57  ;;  %v5640_v57 = vld [vmem:[%s19966_s9] sm:$0xff] }
 0x755   : > { %11406 = vmatprep.subr.bf16.mxu1 %v11405_v37  ;;  %v11433_v37 = vpack.c.bf16 %v8949_v16, %v8947_v12  ;;  %v8990_v12 = vld [vmem:[%s19967_s10 + $0x358] sm:$0xff] }
 0x758   : > { %11408 = vmatpush1.bf16.msra.mxu1 %v11407_v14  ;;  %v8958_v14 = vld [vmem:[%s19967_s10 + $0x258] sm:$0xff] }
 0x759   : > { %11410 = vmatprep.subr.bf16.mxu1 %v11409_v24  ;;  %v5641_v24 = vld [vmem:[%s19966_s9 + $0x8] sm:$0xff]  ;;  %v11439_v61 = vpack.c.bf16 %v8958_v14, %v8956_v13  ;;  %v8991_v13 = vld [vmem:[%s19967_s10 + $0x360] sm:$0xff]  ;;  %v8993_v14 = vld [vmem:[%s19967_s10 + $0x370] sm:$0xff] }
 0x75c   : > { %11412 = vmatpush1.bf16.msra.mxu1 %v11411_v53  ;;  %v8960_v53 = vld [vmem:[%s19967_s10 + $0x268] sm:$0xff] }
 0x75d   : > { %11414 = vmatprep.subr.bf16.mxu1 %v11413_v23  ;;  %v8962_v23 = vld [vmem:[%s19967_s10 + $0x278] sm:$0xff] }
 0x75e   : > { %v11443_v6 = vpack.c.bf16 %v8962_v23, %v8960_v53  ;;  %v8997_v53 = vld [vmem:[%s19967_s10 + $0x390] sm:$0xff]  ;;  %v9000_v23 = vld [vmem:[%s19967_s10 + $0x3a8] sm:$0xff] }
 0x760   : > { %11416 = vmatpush1.bf16.msra.mxu1 %v11415_v48  ;;  %v8961_v48 = vld [vmem:[%s19967_s10 + $0x270] sm:$0xff] }
 0x761   : > { %11418 = vmatprep.subr.bf16.mxu1 %v11417_v49  ;;  %v8964_v49 = vld [vmem:[%s19967_s10 + $0x288] sm:$0xff] }
 0x764   : > { %11420 = vmatpush1.bf16.msra.mxu1 %v11419_v47  ;;  %v11445_v47 = vpack.c.bf16 %v8961_v48, %v8959_v3  ;;  %v8999_v3 = vld [vmem:[%s19967_s10 + $0x3a0] sm:$0xff]  ;;  %v9001_v48 = vld [vmem:[%s19967_s10 + $0x3b0] sm:$0xff] }
 0x767   : > { %5580 = vmatmul.mubr.f32.vlgmr.msra.gmra.mrb[40].mxu1 %v17812_v7  ;;  %v5612_v7 = vld [vmem:[%s19965_s8] sm:$0x3] }
 0x768   : > { %5585 = vmatprep.mubr.f32.mxu1 %v17852_v35  ;;  %v5617_v35 = vrot.slane %v5612_v7, %v20137_v30 }
 0x76b   : > { %5586 = vmatmul.mubr.f32.gmra.mrb[42].mxu1 %v17840_v9  ;;  %v5621_v9 = vrot.slane %v5612_v7, %v20138_v33  ;;  %v11447_v7 = vpack.c.bf16 %v8966_v43, %v8964_v49  ;;  %v11485_v49 = vpack.c.bf16 %v9001_v48, %v8999_v3  ;;  %v9004_v43 = vld [vmem:[%s19967_s10 + $0x3c8] sm:$0xff] }
 0x76c   : > { %5591 = vmatprep.mubr.f32.mxu1 %v17882_v51  ;;  %v5765_v48 = vld [vmem:[%s19967_s10 + $0x68] sm:$0xff] }
 0x76f   : > { %5592 = vmatmul.mubr.f32.gmra.mrb[44].mxu1 %v17870_v59 }
 0x770   : > { %5597 = vmatprep.mubr.f32.mxu1 %v5505_v10 }
 0x773   : > { %5598 = vmatmul.mubr.f32.gmra.mrb[46].mxu1 %v5503_v11 }
 0x774   : > { %6463 = vmatprep.mubr.f32.mxu1 %v12494_v52 }
 0x83a   : > { %v5581_v27 = vpop.f32.mrb[40].mxu1 }
 0x83b   : > { %v5583_v51 = vpop.f32.mrb[41].mxu1  ;;  %v5624_v41 = vadd.f32 %v5617_v35, %v5581_v27  ;;  %v8965_v27 = vld [vmem:[%s19967_s10 + $0x290] sm:$0xff] }
 0x83c   : > { %v5625_v59 = vadd.f32 %v5621_v9, %v5583_v51  ;;  %v8970_v51 = vld [vmem:[%s19967_s10 + $0x2b8] sm:$0xff] }
 0x83d   : > { %v5632_v20 = vmax.f32 %v5624_v41, 0.0 }
 0x83e   : > { %v5587_v36 = vpop.f32.mrb[42].mxu1  ;;  %v5633_v21 = vmax.f32 %v5625_v59, 0.0 }
 0x83f   : > { %v5626_v45 = vadd.f32 %v5617_v35, %v5587_v36  ;;  %v5589_v10 = vpop.f32.mrb[43].mxu1  ;;  %v8967_v36 = vld [vmem:[%s19967_s10 + $0x2a0] sm:$0xff] }
 0x840   : > { %v5627_v34 = vadd.f32 %v5621_v9, %v5589_v10  ;;  %v8972_v10 = vld [vmem:[%s19967_s10 + $0x2c8] sm:$0xff] }
 0x841   : > { %v5634_v11 = vmax.f32 %v5626_v45, 0.0  ;;  %v8969_v45 = vld [vmem:[%s19967_s10 + $0x2b0] sm:$0xff] }
 0x842   : > { %v5635_v46 = vmax.f32 %v5627_v34, 0.0  ;;  %v5593_v38 = vpop.f32.mrb[44].mxu1  ;;  %v8974_v34 = vld [vmem:[%s19967_s10 + $0x2d8] sm:$0xff] }
 0x843   : > { %v11423_v28 = vpack.c.bf16 %v5634_v11, %v5632_v20  ;;  %v5595_v25 = vpop.f32.mrb[45].mxu1  ;;  %v5628_v15 = vadd.f32 %v5617_v35, %v5593_v38  ;;  %v11453_v20 = vpack.c.bf16 %v8969_v45, %v8967_v36  ;;  %v11455_v11 = vpack.c.bf16 %v8974_v34, %v8972_v10  ;;  %v8976_v38 = vld [vmem:[%s19967_s10 + $0x2e8] sm:$0xff]  ;;  %v9009_v36 = vld [vmem:[%s19967_s10 + $0x3f0] sm:$0xff]  ;;  %v5755_v34 = vld [vmem:[%s19967_s10 + $0x18] sm:$0xff] }
 0x844   : > { %v11421_v50 = vpack.c.bf16 %v5635_v46, %v5633_v21  ;;  %v5629_v58 = vadd.f32 %v5621_v9, %v5595_v25  ;;  %v8971_v21 = vld [vmem:[%s19967_s10 + $0x2c0] sm:$0xff]  ;;  %v8973_v46 = vld [vmem:[%s19967_s10 + $0x2d0] sm:$0xff]  ;;  %v5753_v10 = vld [vmem:[%s19967_s10 + $0x8] sm:$0xff] }
 0x845   : > { %v5636_v60 = vmax.f32 %v5628_v15, 0.0  ;;  %v11457_v25 = vpack.c.bf16 %v8973_v46, %v8971_v21  ;;  %v8975_v15 = vld [vmem:[%s19967_s10 + $0x2e0] sm:$0xff] }
 0x846   : > { %v5599_v55 = vpop.f32.mrb[46].mxu1  ;;  %11422 = vmatprep.subr.bf16.mxu0 %v11421_v50  ;;  %v5637_v40 = vmax.f32 %v5629_v58, 0.0  ;;  %v8977_v58 = vld [vmem:[%s19967_s10 + $0x2f0] sm:$0xff] }
 0x847   : > { %v5630_v5 = vadd.f32 %v5617_v35, %v5599_v55  ;;  %v5601_v62 = vpop.f32.mrb[47].mxu1  ;;  %11424 = vmatpush1.bf16.msra.mxu0 %v11423_v28  ;;  %v8963_v35 = vld [vmem:[%s19967_s10 + $0x280] sm:$0xff]  ;;  %v8978_v28 = vld [vmem:[%s19967_s10 + $0x2f8] sm:$0xff]  ;;  %v8980_v55 = vld [vmem:[%s19967_s10 + $0x308] sm:$0xff] }
 0x848   : > { %v5631_v8 = vadd.f32 %v5621_v9, %v5601_v62  ;;  %v8968_v9 = vld [vmem:[%s19967_s10 + $0x2a8] sm:$0xff]  ;;  %v11449_v41 = vpack.c.bf16 %v8965_v27, %v8963_v35  ;;  %v11459_v50 = vpack.c.bf16 %v8978_v28, %v8976_v38  ;;  %v11461_v62 = vpack.c.bf16 %v8977_v58, %v8975_v15  ;;  %v9005_v35 = vld [vmem:[%s19967_s10 + $0x3d0] sm:$0xff]  ;;  %v5752_v38 = vld [vmem:[%s19967_s10] sm:$0xff] }
 0x849   : > { %v5638_v26 = vmax.f32 %v5630_v5, 0.0  ;;  %v11451_v59 = vpack.c.bf16 %v8970_v51, %v8968_v9  ;;  %v8982_v5 = vld [vmem:[%s19967_s10 + $0x318] sm:$0xff]  ;;  %v9008_v9 = vld [vmem:[%s19967_s10 + $0x3e8] sm:$0xff]  ;;  %v5754_v28 = vld [vmem:[%s19967_s10 + $0x10] sm:$0xff] }
 0x84a   : > { %v5639_v0 = vmax.f32 %v5631_v8, 0.0  ;;  %v11463_v8 = vpack.c.bf16 %v8982_v5, %v8980_v55  ;;  %v9010_v51 = vld [vmem:[%s19967_s10 + $0x3f8] sm:$0xff] }
 0x84b   : > { %v11428_v22 = vpack.c.bf16 %v5638_v26, %v5636_v60  ;;  %v8979_v60 = vld [vmem:[%s19967_s10 + $0x300] sm:$0xff]  ;;  %v8981_v26 = vld [vmem:[%s19967_s10 + $0x310] sm:$0xff] }
 0x84c   : > { %v11425_v39 = vpack.c.bf16 %v5639_v0, %v5637_v40  ;;  %v11465_v40 = vpack.c.bf16 %v8981_v26, %v8979_v60  ;;  %v11467_v0 = vpack.c.bf16 %v8986_v32, %v8984_v29 }
 0x84e   : > { %11427 = vmatprep.subr.msk.bf16.mxu0 %vm11426_vm10, %v11425_v39  ;;  %v8985_v39 = vld [vmem:[%s19967_s10 + $0x330] sm:$0xff] }
 0x84f   : > { %11430 = vmatpush1.bf16.msk.msra.mxu0 %vm11426_vm10, %v11428_v22  ;;  %v8983_v22 = vld [vmem:[%s19967_s10 + $0x320] sm:$0xff] }
 0x850   : > { %11432 = vmatprep.subr.bf16.mxu0 %v11431_v2  ;;  %v8988_v2 = vld [vmem:[%s19967_s10 + $0x348] sm:$0xff]  ;;  %v11469_v16 = vpack.c.bf16 %v8985_v39, %v8983_v22 }
 0x851   : > { %v11471_v17 = vpack.c.bf16 %v8990_v12, %v8988_v2  ;;  %v5756_v12 = vld [vmem:[%s19967_s10 + $0x20] sm:$0xff] }
 0x852   : > { %8943 = vmatmul.mubr.msk.f32.vlgmr.msra.gmra.mrb[64].mxu0 %vm5644_vm11, %v5640_v57  ;;  %v8989_v57 = vld [vmem:[%s19967_s10 + $0x350] sm:$0xff] }
 0x853   : > { %5733 = vmatprep.mubr.f32.mxu0 %v12494_v52  ;;  %11434 = vmatpush1.bf16.msra.mxu0 %v11433_v37  ;;  %v8992_v37 = vld [vmem:[%s19967_s10 + $0x368] sm:$0xff]  ;;  %v11473_v1 = vpack.c.bf16 %v8989_v57, %v8987_v19 }
 0x854   : > { %11436 = vmatprep.subr.bf16.mxu0 %v11435_v31  ;;  %v8994_v31 = vld [vmem:[%s19967_s10 + $0x378] sm:$0xff] }
 0x855   : > { %v11475_v63 = vpack.c.bf16 %v8994_v31, %v8992_v37  ;;  %v5761_v31 = vld [vmem:[%s19967_s10 + $0x48] sm:$0xff] }
 0x856   : > { %8944 = vmatmul.mubr.msk.f32.gmra.mrb[66].mxu0 %vm5644_vm11, %v5641_v24  ;;  %v8996_v24 = vld [vmem:[%s19967_s10 + $0x388] sm:$0xff] }
 0x857   : > { %5739 = vmatprep.mubr.f32.mxu0 %v12494_v52  ;;  %11438 = vmatpush1.bf16.msra.mxu0 %v11437_v18  ;;  %v8998_v18 = vld [vmem:[%s19967_s10 + $0x398] sm:$0xff] }
 0x858   : > { %11440 = vmatprep.subr.bf16.mxu0 %v11439_v61  ;;  %v11477_v61 = vpack.c.bf16 %v8993_v14, %v8991_v13  ;;  %v11479_v56 = vpack.c.bf16 %v8998_v18, %v8996_v24 }
 0x85a   : > { %8945 = vmatmul.mubr.msk.f32.gmra.mrb[68].mxu0 %vm5644_vm11, %v5642_v4  ;;  %v9002_v4 = vld [vmem:[%s19967_s10 + $0x3b8] sm:$0xff] }
 0x85b   : > { %5745 = vmatprep.mubr.f32.mxu0 %v12494_v52  ;;  %11442 = vmatpush1.bf16.msra.mxu0 %v11441_v44  ;;  %v11481_v44 = vpack.c.bf16 %v8997_v53, %v8995_v54  ;;  %v5760_v53 = vld [vmem:[%s19967_s10 + $0x40] sm:$0xff] }
 0x85c   : > { %11444 = vmatprep.subr.bf16.mxu0 %v11443_v6  ;;  %v11483_v6 = vpack.c.bf16 %v9002_v4, %v9000_v23  ;;  %v5762_v23 = vld [vmem:[%s19967_s10 + $0x50] sm:$0xff] }
 0x85e   : > { %8946 = vmatmul.mubr.msk.f32.gmra.mrb[70].mxu0 %vm5644_vm11, %v5643_v42  ;;  %v9006_v42 = vld [vmem:[%s19967_s10 + $0x3d8] sm:$0xff] }
 0x85f   : > { %11446 = vmatpush1.bf16.msra.mxu0 %v11445_v47  ;;  %v9003_v47 = vld [vmem:[%s19967_s10 + $0x3c0] sm:$0xff] }
 0x860   : > { %11448 = vmatprep.subr.bf16.mxu0 %v11447_v7  ;;  %v11487_v7 = vpack.c.bf16 %v9006_v42, %v9004_v43  ;;  %v11489_v27 = vpack.c.bf16 %v9005_v35, %v9003_v47 }
 0x863   : > { %11450 = vmatpush1.bf16.msra.mxu0 %v11449_v41  ;;  %v9007_v41 = vld [vmem:[%s19967_s10 + $0x3e0] sm:$0xff] }
 0x864   : > { %11452 = vmatprep.subr.bf16.mxu0 %v11451_v59  ;;  %v11491_v59 = vpack.c.bf16 %v9010_v51, %v9008_v9  ;;  %v11493_v45 = vpack.c.bf16 %v9009_v36, %v9007_v41  ;;  %v5764_v51 = vld [vmem:[%s19967_s10 + $0x60] sm:$0xff]  ;;  %v5766_v41 = vld [vmem:[%s19967_s10 + $0x70] sm:$0xff]  ;;  %v5769_v36 = vld [vmem:[%s19967_s10 + $0x88] sm:$0xff] }
 0x867   : > { %11454 = vmatpush1.bf16.msra.mxu0 %v11453_v20  ;;  %v11495_v20 = vpack.c.bf16 %v5755_v34, %v5753_v10  ;;  %v11509_v10 = vpack.c.bf16 %v5766_v41, %v5764_v51 }
 0x868   : > { %11456 = vmatprep.subr.bf16.mxu0 %v11455_v11 }
 0x86b   : > { %11458 = vmatpush1.bf16.msra.mxu0 %v11457_v25  ;;  %v5757_v25 = vld [vmem:[%s19967_s10 + $0x28] sm:$0xff] }
 0x86c   : > { %11460 = vmatprep.subr.bf16.mxu0 %v11459_v50 }
 0x86f   : > { %11462 = vmatpush1.bf16.msra.mxu0 %v11461_v62  ;;  %v5759_v62 = vld [vmem:[%s19967_s10 + $0x38] sm:$0xff] }
 0x870   : > { %11464 = vmatprep.subr.bf16.mxu0 %v11463_v8  ;;  %v11499_v2 = vpack.c.bf16 %v5759_v62, %v5757_v25  ;;  %v5775_v25 = vld [vmem:[%s19967_s10 + $0xb8] sm:$0xff]  ;;  %v5777_v62 = vld [vmem:[%s19967_s10 + $0xc8] sm:$0xff] }
 0x873   : > { %11466 = vmatpush1.bf16.msra.mxu0 %v11465_v40  ;;  %v11497_v40 = vpack.c.bf16 %v5754_v28, %v5752_v38  ;;  %v5770_v38 = vld [vmem:[%s19967_s10 + $0x90] sm:$0xff]  ;;  %v5773_v28 = vld [vmem:[%s19967_s10 + $0xa8] sm:$0xff] }
 0x874   : > { %11468 = vmatprep.subr.bf16.mxu0 %v11467_v0 }
 0x877   : > { %11470 = vmatpush1.bf16.msra.mxu0 %v11469_v16  ;;  %v5758_v16 = vld [vmem:[%s19967_s10 + $0x30] sm:$0xff] }
 0x878   : > { %11472 = vmatprep.subr.bf16.mxu0 %v11471_v17  ;;  %v11501_v24 = vpack.c.bf16 %v5758_v16, %v5756_v12  ;;  %v5780_v12 = vld [vmem:[%s19967_s10 + $0xe0] sm:$0xff]  ;;  %v5782_v16 = vld [vmem:[%s19967_s10 + $0xf0] sm:$0xff] }
 0x87b   : > { %11474 = vmatpush1.bf16.msra.mxu0 %v11473_v1  ;;  %v5763_v1 = vld [vmem:[%s19967_s10 + $0x58] sm:$0xff] }
 0x87c   : > { %11476 = vmatprep.subr.bf16.mxu0 %v11475_v63  ;;  %v11503_v54 = vpack.c.bf16 %v5763_v1, %v5761_v31  ;;  %v11525_v31 = vpack.c.bf16 %v5782_v16, %v5780_v12 }
 0x87f   : > { %11478 = vmatpush1.bf16.msra.mxu0 %v11477_v61 }
 0x880   : > { %11480 = vmatprep.subr.bf16.mxu0 %v11479_v56 }
 0x883   : > { %11482 = vmatpush1.bf16.msra.mxu0 %v11481_v44 }
 0x884   : > { %11484 = vmatprep.subr.bf16.mxu0 %v11483_v6 }
 0x887   : > { %11486 = vmatpush1.bf16.msra.mxu0 %v11485_v49  ;;  %v5767_v49 = vld [vmem:[%s19967_s10 + $0x78] sm:$0xff] }
 0x888   : > { %11488 = vmatprep.subr.bf16.mxu0 %v11487_v7  ;;  %v11505_v7 = vpack.c.bf16 %v5762_v23, %v5760_v53  ;;  %v11507_v9 = vpack.c.bf16 %v5767_v49, %v5765_v48  ;;  %v5788_v53 = vld [vmem:[%s19967_s10 + $0x120] sm:$0xff]  ;;  %v5790_v23 = vld [vmem:[%s19967_s10 + $0x130] sm:$0xff]  ;;  %v5795_v48 = vld [vmem:[%s19967_s10 + $0x158] sm:$0xff] }
 0x889   : > { %v11533_v49 = vpack.c.bf16 %v5790_v23, %v5788_v53 }
 0x88b   : > { %11490 = vmatpush1.bf16.msra.mxu0 %v11489_v27 }
 0x88c   : > { %11492 = vmatprep.subr.bf16.mxu0 %v11491_v59 }
 0x88f   : > { %11494 = vmatpush1.bf16.msra.mxu0 %v11493_v45  ;;  %v5771_v45 = vld [vmem:[%s19967_s10 + $0x98] sm:$0xff] }
 0x890   : > { %11496 = vmatprep.subr.bf16.mxu0 %v11495_v20  ;;  %v11511_v34 = vpack.c.bf16 %v5771_v45, %v5769_v36  ;;  %v5768_v20 = vld [vmem:[%s19967_s10 + $0x80] sm:$0xff]  ;;  %v5798_v45 = vld [vmem:[%s19967_s10 + $0x170] sm:$0xff] }
 0x891   : > { %v5796_v36 = vld [vmem:[%s19967_s10 + $0x160] sm:$0xff] }
 0x925   : > { %v18463_v11 = vpop.f32.mrb[64].mxu0 }
 0x926   : > { %v18465_v21 = vpop.f32.mrb[65].mxu0  ;;  %v5889_v50 = vrot.slane %v18463_v11, 1  ;;  %v6154_v15 = vrot.slane %v18463_v11, 2 }
 0x927   : > { %v5892_v8 = vrot.slane %v18465_v21, 1  ;;  %v6157_v60 = vrot.slane %v18465_v21, 2 }
 0x929   : > { %v18467_v46 = vpop.f32.mrb[66].mxu0 }
 0x92a   : > { %v5890_v58 = vrot.slane %v18467_v46, 1  ;;  %v6155_v55 = vrot.slane %v18467_v46, 2  ;;  %v18482_v5 = vpop.f32.mrb[67].mxu0 }
 0x92b   : > { %v5893_v26 = vrot.slane %v18482_v5, 1  ;;  %v6158_v29 = vrot.slane %v18482_v5, 2 }
 0x92c   : > { %v5891_v32 = vsel %vm744_vm0, %v5889_v50, %v5890_v58  ;;  %v18493_v0 = vsel %vm1365_vm2, %v6154_v15, %v6155_v55  ;;  %v11513_v50 = vpack.c.bf16 %v5770_v38, %v5768_v20  ;;  %v11515_v15 = vpack.c.bf16 %v5775_v25, %v5773_v28  ;;  %v5800_v28 = vld [vmem:[%s19967_s10 + $0x180] sm:$0xff]  ;;  %v5802_v25 = vld [vmem:[%s19967_s10 + $0x190] sm:$0xff] }
 0x92d   : > { %v18495_v22 = vpop.f32.mrb[68].mxu0  ;;  %v5894_v39 = vsel %vm744_vm0, %v5892_v8, %v5893_v26  ;;  %v18505_v17 = vsel %vm1365_vm2, %v6157_v60, %v6158_v29  ;;  %v5779_v8 = vld [vmem:[%s19967_s10 + $0xd8] sm:$0xff]  ;;  %v11541_v20 = vpack.c.bf16 %v5798_v45, %v5796_v36  ;;  %v9023_v36 = vld [vmem:[%s19967_s10 + $0x460] sm:$0xff]  ;;  %v9025_v45 = vld [vmem:[%s19967_s10 + $0x470] sm:$0xff] }
 0x92e   : > { %v5895_v19 = vrot.slane %v18495_v22, 1  ;;  %v6160_v57 = vrot.slane %v18495_v22, 2  ;;  %v18509_v37 = vpop.f32.mrb[69].mxu0  ;;  %5975 = vmatprep.mubr.f32.mxu0 %v5894_v39  ;;  %v11519_v60 = vpack.c.bf16 %v5779_v8, %v5777_v62  ;;  %v5804_v62 = vld [vmem:[%s19967_s10 + $0x1a0] sm:$0xff]  ;;  %v5806_v8 = vld [vmem:[%s19967_s10 + $0x1b0] sm:$0xff] }
 0x92f   : > { %v5897_v63 = vrot.slane %v18509_v37, 1  ;;  %v6162_v13 = vrot.slane %v18509_v37, 2  ;;  %5976 = vmatmul.mubr.f32.vlgmr.msra.gmra.mrb[72].mxu0 %v5891_v32  ;;  %v5781_v32 = vld [vmem:[%s19967_s10 + $0xe8] sm:$0xff] }
 0x930   : > { %11498 = vmatpush1.bf16.msra.mxu0 %v11497_v40  ;;  %v5896_v14 = vsel %vm744_vm0, %v5890_v58, %v5895_v19  ;;  %v18521_v18 = vsel %vm1365_vm2, %v6155_v55, %v6160_v57  ;;  %v5772_v58 = vld [vmem:[%s19967_s10 + $0xa0] sm:$0xff]  ;;  %v5774_v55 = vld [vmem:[%s19967_s10 + $0xb0] sm:$0xff]  ;;  %v5783_v40 = vld [vmem:[%s19967_s10 + $0xf8] sm:$0xff] }
 0x931   : > { %v18523_v61 = vpop.f32.mrb[70].mxu0  ;;  %v5898_v56 = vsel %vm744_vm0, %v5893_v26, %v5897_v63  ;;  %11500 = vmatprep.subr.bf16.mxu0 %v11499_v2  ;;  %v18533_v4 = vsel %vm1365_vm2, %v6158_v29, %v6162_v13  ;;  %v5776_v26 = vld [vmem:[%s19967_s10 + $0xc0] sm:$0xff]  ;;  %v5778_v29 = vld [vmem:[%s19967_s10 + $0xd0] sm:$0xff]  ;;  %v11523_v2 = vpack.c.bf16 %v5783_v40, %v5781_v32 }
 0x932   : > { %v5899_v44 = vrot.slane %v18523_v61, 1  ;;  %v6164_v6 = vrot.slane %v18523_v61, 2  ;;  %v18537_v3 = vpop.f32.mrb[71].mxu0  ;;  %5981 = vmatprep.mubr.f32.mxu0 %v5898_v56  ;;  %v11521_v39 = vpack.c.bf16 %v5778_v29, %v5776_v26  ;;  %v11549_v26 = vpack.c.bf16 %v5806_v8, %v5804_v62  ;;  %v5808_v32 = vld [vmem:[%s19967_s10 + $0x1c0] sm:$0xff]  ;;  %v5810_v40 = vld [vmem:[%s19967_s10 + $0x1d0] sm:$0xff]  ;;  %v9038_v62 = vld [vmem:[%s19967_s10 + $0x4d8] sm:$0xff] }
 0x933   : > { %v5901_v43 = vrot.slane %v18537_v3, 1  ;;  %v6166_v42 = vrot.slane %v18537_v3, 2  ;;  %5982 = vmatmul.mubr.f32.gmra.mrb[74].mxu0 %v5896_v14  ;;  %v5789_v14 = vld [vmem:[%s19967_s10 + $0x128] sm:$0xff]  ;;  %v11553_v12 = vpack.c.bf16 %v5810_v40, %v5808_v32 }
 0x934   : > { %11502 = vmatpush1.bf16.msra.mxu0 %v11501_v24  ;;  %v5900_v47 = vsel %vm744_vm0, %v5895_v19, %v5899_v44  ;;  %v18551_v35 = vsel %vm1365_vm2, %v6160_v57, %v6164_v6  ;;  %v5785_v19 = vld [vmem:[%s19967_s10 + $0x108] sm:$0xff]  ;;  %v5787_v57 = vld [vmem:[%s19967_s10 + $0x118] sm:$0xff] }
 0x935   : > { %v5902_v27 = vsel %vm744_vm0, %v5897_v63, %v5901_v43  ;;  %11504 = vmatprep.subr.bf16.mxu0 %v11503_v54  ;;  %v18563_v59 = vsel %vm1365_vm2, %v6162_v13, %v6166_v42  ;;  %v11527_v1 = vpack.c.bf16 %v5787_v57, %v5785_v19  ;;  %v5784_v63 = vld [vmem:[%s19967_s10 + $0x100] sm:$0xff]  ;;  %v5786_v13 = vld [vmem:[%s19967_s10 + $0x110] sm:$0xff]  ;;  %v5791_v24 = vld [vmem:[%s19967_s10 + $0x138] sm:$0xff] }
 0x936   : > { %5987 = vmatprep.mubr.f32.mxu0 %v5902_v27  ;;  %v11529_v56 = vpack.c.bf16 %v5786_v13, %v5784_v63  ;;  %v11531_v54 = vpack.c.bf16 %v5791_v24, %v5789_v14  ;;  %v5797_v27 = vld [vmem:[%s19967_s10 + $0x168] sm:$0xff]  ;;  %v5812_v19 = vld [vmem:[%s19967_s10 + $0x1e0] sm:$0xff]  ;;  %v5814_v57 = vld [vmem:[%s19967_s10 + $0x1f0] sm:$0xff] }
 0x937   : > { %5988 = vmatmul.mubr.f32.gmra.mrb[76].mxu0 %v5900_v47  ;;  %v5792_v47 = vld [vmem:[%s19967_s10 + $0x140] sm:$0xff]  ;;  %v11557_v63 = vpack.c.bf16 %v5814_v57, %v5812_v19  ;;  %v9013_v24 = vld [vmem:[%s19967_s10 + $0x410] sm:$0xff] }
 0x938   : > { %11506 = vmatpush1.bf16.msra.mxu0 %v11505_v7  ;;  %5993 = vmatprep.mubr.f32.mxu0 %v5901_v43  ;;  %v5794_v7 = vld [vmem:[%s19967_s10 + $0x150] sm:$0xff]  ;;  %v9011_v14 = vld [vmem:[%s19967_s10 + $0x400] sm:$0xff] }
 0x939   : > { %11508 = vmatprep.subr.bf16.mxu0 %v11507_v9  ;;  %v5799_v9 = vld [vmem:[%s19967_s10 + $0x178] sm:$0xff]  ;;  %v11537_v51 = vpack.c.bf16 %v5794_v7, %v5792_v47  ;;  %v11561_v53 = vpack.c.bf16 %v9013_v24, %v9011_v14 }
 0x93a   : > { %v11539_v41 = vpack.c.bf16 %v5799_v9, %v5797_v27  ;;  %v9019_v27 = vld [vmem:[%s19967_s10 + $0x440] sm:$0xff]  ;;  %v9021_v9 = vld [vmem:[%s19967_s10 + $0x450] sm:$0xff] }
 0x93b   : > { %5994 = vmatmul.mubr.f32.gmra.mrb[78].mxu0 %v5899_v44  ;;  %v5793_v44 = vld [vmem:[%s19967_s10 + $0x148] sm:$0xff] }
 0x93c   : > { %11510 = vmatpush1.bf16.msra.mxu0 %v11509_v10  ;;  %6064 = vmatprep.mubr.f32.mxu0 %v18465_v21  ;;  %v11517_v21 = vpack.c.bf16 %v5774_v55, %v5772_v58  ;;  %v11535_v43 = vpack.c.bf16 %v5795_v48, %v5793_v44  ;;  %v5801_v10 = vld [vmem:[%s19967_s10 + $0x188] sm:$0xff]  ;;  %v11545_v58 = vpack.c.bf16 %v5802_v25, %v5800_v28  ;;  %v9015_v44 = vld [vmem:[%s19967_s10 + $0x420] sm:$0xff]  ;;  %v9017_v48 = vld [vmem:[%s19967_s10 + $0x430] sm:$0xff] }
 0x93d   : > { %11512 = vmatprep.subr.bf16.mxu0 %v11511_v34  ;;  %v5803_v34 = vld [vmem:[%s19967_s10 + $0x198] sm:$0xff]  ;;  %v11565_v47 = vpack.c.bf16 %v9017_v48, %v9015_v44  ;;  %v9032_v28 = vld [vmem:[%s19967_s10 + $0x4a8] sm:$0xff] }
 0x93e   : > { %v11543_v38 = vpack.c.bf16 %v5803_v34, %v5801_v10  ;;  %v9028_v10 = vld [vmem:[%s19967_s10 + $0x488] sm:$0xff] }
 0x940   : > { %11514 = vmatpush1.bf16.msra.mxu0 %v11513_v50  ;;  %v5805_v50 = vld [vmem:[%s19967_s10 + $0x1a8] sm:$0xff] }
 0x941   : > { %11516 = vmatprep.subr.bf16.mxu0 %v11515_v15  ;;  %v5807_v15 = vld [vmem:[%s19967_s10 + $0x1b8] sm:$0xff] }
 0x942   : > { %v11547_v55 = vpack.c.bf16 %v5807_v15, %v5805_v50  ;;  %v9031_v15 = vld [vmem:[%s19967_s10 + $0x4a0] sm:$0xff] }
 0x944   : > { %11518 = vmatpush1.bf16.msra.mxu0 %v11517_v21  ;;  %v5809_v21 = vld [vmem:[%s19967_s10 + $0x1c8] sm:$0xff] }
 0x945   : > { %11520 = vmatprep.subr.bf16.mxu0 %v11519_v60  ;;  %v5811_v60 = vld [vmem:[%s19967_s10 + $0x1d8] sm:$0xff] }
 0x946   : > { %v11551_v29 = vpack.c.bf16 %v5811_v60, %v5809_v21  ;;  %v9035_v21 = vld [vmem:[%s19967_s10 + $0x4c0] sm:$0xff]  ;;  %v9037_v60 = vld [vmem:[%s19967_s10 + $0x4d0] sm:$0xff] }
 0x947   : > { %v11585_v32 = vpack.c.bf16 %v9037_v60, %v9035_v21 }
 0x948   : > { %11522 = vmatpush1.bf16.msra.mxu0 %v11521_v39  ;;  %v5813_v39 = vld [vmem:[%s19967_s10 + $0x1e8] sm:$0xff] }
 0x949   : > { %11524 = vmatprep.subr.bf16.mxu0 %v11523_v2  ;;  %v5815_v2 = vld [vmem:[%s19967_s10 + $0x1f8] sm:$0xff] }
 0x94a   : > { %v11555_v16 = vpack.c.bf16 %v5815_v2, %v5813_v39  ;;  %v9039_v39 = vld [vmem:[%s19967_s10 + $0x4e0] sm:$0xff]  ;;  %v9041_v2 = vld [vmem:[%s19967_s10 + $0x4f0] sm:$0xff] }
 0x94b   : > { %v11589_v19 = vpack.c.bf16 %v9041_v2, %v9039_v39 }
 0x94c   : > { %11526 = vmatpush1.bf16.msra.mxu0 %v11525_v31  ;;  %v9012_v31 = vld [vmem:[%s19967_s10 + $0x408] sm:$0xff] }
 0x94d   : > { %11528 = vmatprep.subr.bf16.mxu0 %v11527_v1  ;;  %v9014_v1 = vld [vmem:[%s19967_s10 + $0x418] sm:$0xff] }
 0x94e   : > { %v11559_v13 = vpack.c.bf16 %v9014_v1, %v9012_v31  ;;  %v9043_v31 = vld [vmem:[%s19967_s10 + $0x500] sm:$0xff]  ;;  %v9045_v1 = vld [vmem:[%s19967_s10 + $0x510] sm:$0xff] }
 0x94f   : > { %v11593_v14 = vpack.c.bf16 %v9045_v1, %v9043_v31 }
 0x950   : > { %11530 = vmatpush1.bf16.msra.mxu0 %v11529_v56  ;;  %v9016_v56 = vld [vmem:[%s19967_s10 + $0x428] sm:$0xff] }
 0x951   : > { %11532 = vmatprep.subr.bf16.mxu0 %v11531_v54  ;;  %v9018_v54 = vld [vmem:[%s19967_s10 + $0x438] sm:$0xff] }
 0x952   : > { %v11563_v23 = vpack.c.bf16 %v9018_v54, %v9016_v56  ;;  %v9047_v56 = vld [vmem:[%s19967_s10 + $0x520] sm:$0xff]  ;;  %v9049_v54 = vld [vmem:[%s19967_s10 + $0x530] sm:$0xff] }
 0x953   : > { %v11597_v44 = vpack.c.bf16 %v9049_v54, %v9047_v56 }
 0x954   : > { %11534 = vmatpush1.bf16.msra.mxu0 %v11533_v49  ;;  %v9020_v49 = vld [vmem:[%s19967_s10 + $0x448] sm:$0xff] }
 0x955   : > { %11536 = vmatprep.subr.bf16.mxu0 %v11535_v43  ;;  %v9022_v43 = vld [vmem:[%s19967_s10 + $0x458] sm:$0xff] }
 0x956   : > { %v11567_v7 = vpack.c.bf16 %v9022_v43, %v9020_v49  ;;  %v9051_v49 = vld [vmem:[%s19967_s10 + $0x540] sm:$0xff]  ;;  %v9053_v43 = vld [vmem:[%s19967_s10 + $0x550] sm:$0xff] }
 0x958   : > { %11538 = vmatpush1.bf16.msra.mxu0 %v11537_v51  ;;  %v9024_v51 = vld [vmem:[%s19967_s10 + $0x468] sm:$0xff] }
 0x959   : > { %11540 = vmatprep.subr.bf16.mxu0 %v11539_v41 }
 0x95c   : > { %11542 = vmatpush1.bf16.msra.mxu0 %v11541_v20  ;;  %v9027_v20 = vld [vmem:[%s19967_s10 + $0x480] sm:$0xff] }
 0x95d   : > { %11544 = vmatprep.subr.bf16.mxu0 %v11543_v38  ;;  %v9029_v38 = vld [vmem:[%s19967_s10 + $0x490] sm:$0xff] }
 0x95e   : > { %v11577_v25 = vpack.c.bf16 %v9029_v38, %v9027_v20 }
 0x960   : > { %11546 = vmatpush1.bf16.msra.mxu0 %v11545_v58  ;;  %v9033_v58 = vld [vmem:[%s19967_s10 + $0x4b0] sm:$0xff] }
 0x961   : > { %11548 = vmatprep.subr.bf16.mxu0 %v11547_v55  ;;  %v9036_v55 = vld [vmem:[%s19967_s10 + $0x4c8] sm:$0xff] }
 0x962   : > { %v11583_v8 = vpack.c.bf16 %v9038_v62, %v9036_v55  ;;  %v9067_v55 = vld [vmem:[%s19967_s10 + $0x5c0] sm:$0xff]  ;;  %v9069_v62 = vld [vmem:[%s19967_s10 + $0x5d0] sm:$0xff] }
 0x963   : > { %v11617_v21 = vpack.c.bf16 %v9069_v62, %v9067_v55 }
 0x964   : > { %11550 = vmatpush1.bf16.msra.mxu0 %v11549_v26  ;;  %v9040_v26 = vld [vmem:[%s19967_s10 + $0x4e8] sm:$0xff] }
 0x965   : > { %11552 = vmatprep.subr.bf16.mxu0 %v11551_v29  ;;  %v9042_v29 = vld [vmem:[%s19967_s10 + $0x4f8] sm:$0xff] }
 0x966   : > { %v11587_v40 = vpack.c.bf16 %v9042_v29, %v9040_v26  ;;  %v9071_v26 = vld [vmem:[%s19967_s10 + $0x5e0] sm:$0xff]  ;;  %v9073_v29 = vld [vmem:[%s19967_s10 + $0x5f0] sm:$0xff] }
 0x968   : > { %11554 = vmatpush1.bf16.msra.mxu0 %v11553_v12  ;;  %v9044_v12 = vld [vmem:[%s19967_s10 + $0x508] sm:$0xff] }
 0x969   : > { %11556 = vmatprep.subr.bf16.mxu0 %v11555_v16  ;;  %v9046_v16 = vld [vmem:[%s19967_s10 + $0x518] sm:$0xff] }
 0x96a   : > { %v11591_v57 = vpack.c.bf16 %v9046_v16, %v9044_v12 }
 0x96c   : > { %11558 = vmatpush1.bf16.msra.mxu0 %v11557_v63  ;;  %v9048_v63 = vld [vmem:[%s19967_s10 + $0x528] sm:$0xff] }
 0x96d   : > { %11560 = vmatprep.subr.bf16.mxu0 %v11559_v13  ;;  %v9050_v13 = vld [vmem:[%s19967_s10 + $0x538] sm:$0xff] }
 0x96e   : > { %v11595_v24 = vpack.c.bf16 %v9050_v13, %v9048_v63 }
 0x96f   : > { %6065 = vmatmul.mubr.f32.vlgmr.msra.gmra.mrb[72].mxu0 %v18463_v11  ;;  %v9026_v11 = vld [vmem:[%s19967_s10 + $0x478] sm:$0xff] }
 0x970   : > { %6070 = vmatprep.mubr.f32.mxu0 %v18482_v5  ;;  %11562 = vmatpush1.bf16.msra.mxu0 %v11561_v53  ;;  %v11569_v5 = vpack.c.bf16 %v9021_v9, %v9019_v27  ;;  %v11571_v41 = vpack.c.bf16 %v9026_v11, %v9024_v51  ;;  %v9052_v53 = vld [vmem:[%s19967_s10 + $0x548] sm:$0xff]  ;;  %v11601_v27 = vpack.c.bf16 %v9053_v43, %v9051_v49  ;;  %v9055_v51 = vld [vmem:[%s19967_s10 + $0x560] sm:$0xff]  ;;  %v9057_v11 = vld [vmem:[%s19967_s10 + $0x570] sm:$0xff] }
 0x971   : > { %11564 = vmatprep.subr.bf16.mxu0 %v11563_v23  ;;  %v9054_v23 = vld [vmem:[%s19967_s10 + $0x558] sm:$0xff] }
 0x972   : > { %v11599_v48 = vpack.c.bf16 %v9054_v23, %v9052_v53 }
 0x973   : > { %6071 = vmatmul.mubr.f32.gmra.mrb[74].mxu0 %v18467_v46  ;;  %v9030_v46 = vld [vmem:[%s19967_s10 + $0x498] sm:$0xff] }
 0x974   : > { %6076 = vmatprep.mubr.f32.mxu0 %v18509_v37  ;;  %11566 = vmatpush1.bf16.msra.mxu0 %v11565_v47  ;;  %v11573_v37 = vpack.c.bf16 %v9025_v45, %v9023_v36  ;;  %v11575_v34 = vpack.c.bf16 %v9030_v46, %v9028_v10  ;;  %v9056_v47 = vld [vmem:[%s19967_s10 + $0x568] sm:$0xff]  ;;  %v11605_v36 = vpack.c.bf16 %v9057_v11, %v9055_v51  ;;  %v9059_v10 = vld [vmem:[%s19967_s10 + $0x580] sm:$0xff]  ;;  %v9061_v46 = vld [vmem:[%s19967_s10 + $0x590] sm:$0xff] }
 0x975   : > { %11568 = vmatprep.subr.bf16.mxu0 %v11567_v7  ;;  %v9058_v7 = vld [vmem:[%s19967_s10 + $0x578] sm:$0xff]  ;;  %v11609_v20 = vpack.c.bf16 %v9061_v46, %v9059_v10 }
 0x976   : > { %v11603_v9 = vpack.c.bf16 %v9058_v7, %v9056_v47 }
 0x977   : > { %6077 = vmatmul.mubr.f32.gmra.mrb[76].mxu0 %v18495_v22  ;;  %v9034_v22 = vld [vmem:[%s19967_s10 + $0x4b8] sm:$0xff] }
 0x978   : > { %6082 = vmatprep.mubr.f32.mxu0 %v18537_v3  ;;  %11570 = vmatpush1.bf16.msra.mxu0 %v11569_v5  ;;  %v11579_v50 = vpack.c.bf16 %v9034_v22, %v9032_v28  ;;  %v9060_v5 = vld [vmem:[%s19967_s10 + $0x588] sm:$0xff]  ;;  %v9063_v28 = vld [vmem:[%s19967_s10 + $0x5a0] sm:$0xff]  ;;  %v9065_v22 = vld [vmem:[%s19967_s10 + $0x5b0] sm:$0xff] }
 0x979   : > { %11572 = vmatprep.subr.bf16.mxu0 %v11571_v41  ;;  %v9062_v41 = vld [vmem:[%s19967_s10 + $0x598] sm:$0xff] }
 0x97a   : > { %v11607_v45 = vpack.c.bf16 %v9062_v41, %v9060_v5 }
 0x97b   : > { %6083 = vmatmul.mubr.f32.gmra.mrb[78].mxu0 %v18523_v61 }
 0x97c   : > { %11574 = vmatpush1.bf16.msra.mxu0 %v11573_v37  ;;  %6240 = vmatprep.mubr.f32.mxu0 %v18505_v17  ;;  %v11581_v17 = vpack.c.bf16 %v9033_v58, %v9031_v15  ;;  %v9064_v37 = vld [vmem:[%s19967_s10 + $0x5a8] sm:$0xff]  ;;  %v11613_v15 = vpack.c.bf16 %v9065_v22, %v9063_v28 }
 0x97d   : > { %11576 = vmatprep.subr.bf16.mxu0 %v11575_v34  ;;  %v9066_v34 = vld [vmem:[%s19967_s10 + $0x5b8] sm:$0xff] }
 0x97e   : > { %v11611_v38 = vpack.c.bf16 %v9066_v34, %v9064_v37 }
 0x980   : > { %11578 = vmatpush1.bf16.msra.mxu0 %v11577_v25  ;;  %v9068_v25 = vld [vmem:[%s19967_s10 + $0x5c8] sm:$0xff] }
 0x981   : > { %11580 = vmatprep.subr.bf16.mxu0 %v11579_v50  ;;  %v9070_v50 = vld [vmem:[%s19967_s10 + $0x5d8] sm:$0xff] }
 0x982   : > { %v11615_v58 = vpack.c.bf16 %v9070_v50, %v9068_v25 }
 0x984   : > { %11582 = vmatpush1.bf16.msra.mxu0 %v11581_v17  ;;  %v9072_v17 = vld [vmem:[%s19967_s10 + $0x5e8] sm:$0xff] }
 0x985   : > { %11584 = vmatprep.subr.bf16.mxu0 %v11583_v8  ;;  %v9074_v8 = vld [vmem:[%s19967_s10 + $0x5f8] sm:$0xff] }
 0x986   : > { %v11619_v60 = vpack.c.bf16 %v9074_v8, %v9072_v17 }
 0x988   : > { %11586 = vmatpush1.bf16.msra.mxu0 %v11585_v32  ;;  %v11621_v32 = vpack.c.bf16 %v9073_v29, %v9071_v26 }
 0x989   : > { %11588 = vmatprep.subr.bf16.mxu0 %v11587_v40  ;;  %v6273_v40 = vld [vmem:[%s19968_s11] sm:$0x3] }
 0x98c   : > { %11590 = vmatpush1.bf16.msra.mxu0 %v11589_v19 }
 0x98d   : > { %11592 = vmatprep.subr.bf16.mxu0 %v11591_v57 }
 0x990   : > { %11594 = vmatpush1.bf16.msra.mxu0 %v11593_v14 }
 0x991   : > { %11596 = vmatprep.subr.bf16.mxu0 %v11595_v24 }
 0x994   : > { %11598 = vmatpush1.bf16.msra.mxu0 %v11597_v44 }
 0x995   : > { %11600 = vmatprep.subr.bf16.mxu0 %v11599_v48 }
 0x998   : > { %11602 = vmatpush1.bf16.msra.mxu0 %v11601_v27 }
 0x999   : > { %11604 = vmatprep.subr.bf16.mxu0 %v11603_v9 }
 0x99c   : > { %11606 = vmatpush1.bf16.msra.mxu0 %v11605_v36 }
 0x99d   : > { %11608 = vmatprep.subr.bf16.mxu0 %v11607_v45 }
 0x9a0   : > { %11610 = vmatpush1.bf16.msra.mxu0 %v11609_v20 }
 0x9a1   : > { %11612 = vmatprep.subr.bf16.mxu0 %v11611_v38 }
 0x9a4   : > { %11614 = vmatpush1.bf16.msra.mxu0 %v11613_v15 }
 0x9a5   : > { %11616 = vmatprep.subr.bf16.mxu0 %v11615_v58 }
 0x9a8   : > { %11618 = vmatpush1.bf16.msra.mxu0 %v11617_v21 }
 0x9a9   : > { %11620 = vmatprep.subr.bf16.mxu0 %v11619_v60 }
 0x9ac   : > { %11622 = vmatpush1.bf16.msra.mxu0 %v11621_v32 }
 0x9af   : > { %6241 = vmatmul.mubr.f32.vlgmr.msra.gmra.mrb[72].mxu0 %v18493_v0  ;;  %v6278_v0 = vrot.slane %v6273_v40, %v20137_v30 }
 0x9b0   : > { %6246 = vmatprep.mubr.f32.mxu0 %v18533_v4  ;;  %v6282_v4 = vrot.slane %v6273_v40, %v20138_v33 }
 0x9b3   : > { %6247 = vmatmul.mubr.f32.gmra.mrb[74].mxu0 %v18521_v18 }
 0x9b4   : > { %6252 = vmatprep.mubr.f32.mxu0 %v18563_v59 }
 0x9b7   : > { %6253 = vmatmul.mubr.f32.gmra.mrb[76].mxu0 %v18551_v35 }
 0x9b8   : > { %6258 = vmatprep.mubr.f32.mxu0 %v6166_v42 }
 0x9bb   : > { %6259 = vmatmul.mubr.f32.gmra.mrb[78].mxu0 %v6164_v6 }
 0xa82   : > { %v6242_v39 = vpop.f32.mrb[72].mxu0 }
 0xa83   : > { %v6285_v18 = vadd.f32 %v6278_v0, %v6242_v39  ;;  %v6244_v2 = vpop.f32.mrb[73].mxu0 }
 0xa84   : > { %v6286_v59 = vadd.f32 %v6282_v4, %v6244_v2 }
 0xa85   : > { %v6293_v35 = vmax.f32 %v6285_v18, 0.0 }
 0xa86   : > { %v6248_v12 = vpop.f32.mrb[74].mxu0  ;;  %v6294_v42 = vmax.f32 %v6286_v59, 0.0 }
 0xa87   : > { %v6287_v16 = vadd.f32 %v6278_v0, %v6248_v12  ;;  %v6250_v3 = vpop.f32.mrb[75].mxu0  ;;  %v6309_v31 = vrot.slane %v6293_v35, 1 }
 0xa88   : > { %v6288_v19 = vadd.f32 %v6282_v4, %v6250_v3  ;;  %v6312_v30 = vrot.slane %v6294_v42, 1 }
 0xa89   : > { %v6295_v61 = vmax.f32 %v6287_v16, 0.0 }
 0xa8a   : > { %v6296_v6 = vmax.f32 %v6288_v19, 0.0  ;;  %v6254_v57 = vpop.f32.mrb[76].mxu0 }
 0xa8b   : > { %v6310_v1 = vrot.slane %v6295_v61, 1  ;;  %v6289_v63 = vadd.f32 %v6278_v0, %v6254_v57  ;;  %v6256_v13 = vpop.f32.mrb[77].mxu0 }
 0xa8c   : > { %v6313_v14 = vrot.slane %v6296_v6, 1  ;;  %v6290_v33 = vadd.f32 %v6282_v4, %v6256_v13  ;;  %v6477_v13 = vld [vmem:[%s19970_s13 + $0x8] sm:$0xff] }
 0xa8d   : > { %v6297_v24 = vmax.f32 %v6289_v63, 0.0  ;;  %v6311_v56 = vsel %vm744_vm0, %v6309_v31, %v6310_v1  ;;  %v6476_v63 = vld [vmem:[%s19970_s13] sm:$0xff] }
 0xa8e   : > { %v6298_v54 = vmax.f32 %v6290_v33, 0.0  ;;  %v6260_v53 = vpop.f32.mrb[78].mxu0  ;;  %v6314_v23 = vsel %vm744_vm0, %v6312_v30, %v6313_v14  ;;  %v6331_v44 = vmax.f32 %v6293_v35, %v6311_v56  ;;  %v6383_v30 = vld [vmem:[%s19969_s12] sm:$0xff]  ;;  %v12496_v33 = vmov 0.0|0.0   ;;  %v6479_v56 = vld [vmem:[%s19970_s13 + $0x18] sm:$0xff] }
 0xa8f   : > { %v6315_v48 = vrot.slane %v6297_v24, 1  ;;  %v6291_v49 = vadd.f32 %v6278_v0, %v6260_v53  ;;  %v6262_v43 = vpop.f32.mrb[79].mxu0  ;;  %v6332_v47 = vmax.f32 %v6294_v42, %v6314_v23  ;;  %v6384_v53 = vld [vmem:[%s19969_s12 + $0x8] sm:$0x7f]  ;;  %v6480_v23 = vld [vmem:[%s19970_s13 + $0x20] sm:$0xff] }
 0xa90   : > { %v6317_v7 = vrot.slane %v6298_v54, 1  ;;  %v6292_v27 = vadd.f32 %v6282_v4, %v6262_v43  ;;  %v6483_v43 = vld [vmem:[%s19970_s13 + $0x38] sm:$0xff] }
 0xa91   : > { %v6299_v9 = vmax.f32 %v6291_v49, 0.0  ;;  %v12407_v51 = vpack.i.bf16 %v6332_v47, %v6331_v44  ;;  %v6316_v11 = vsel %vm744_vm0, %v6310_v1, %v6315_v48  ;;  %v6482_v49 = vld [vmem:[%s19970_s13 + $0x30] sm:$0xff] }
 0xa92   : > { %v6300_v5 = vmax.f32 %v6292_v27, 0.0  ;;  %v6318_v41 = vsel %vm744_vm0, %v6313_v14, %v6317_v7  ;;  %v6333_v36 = vmax.f32 %v6295_v61, %v6316_v11  ;;  %v11634_v14 = vpack.c.bf16 %v6477_v13, %v6476_v63  ;;  %v6485_v27 = vld [vmem:[%s19970_s13 + $0x48] sm:$0xff]  ;;  %v6487_v11 = vld [vmem:[%s19970_s13 + $0x58] sm:$0xff] }
 0xa93   : > { %v6319_v45 = vrot.slane %v6299_v9, 1  ;;  %12408 = vrot.lane.b32.xlu0 %v12407_v51, %s12493_s17  ;;  %v6334_v10 = vmax.f32 %v6296_v6, %v6318_v41  ;;  %v6486_v51 = vld [vmem:[%s19970_s13 + $0x50] sm:$0xff]  ;;  %v6488_v41 = vld [vmem:[%s19970_s13 + $0x60] sm:$0xff]  ;;  %v6597_v63 = vld [vmem:[%s19971_s14 + $0x48] sm:$0xff] }
 0xa94   : > { %v6321_v46 = vrot.slane %v6300_v5, 1 }
 0xa95   : > { %v6337_v37 = vmax.f32 %v6299_v9, %v6319_v45  ;;  %v12412_v34 = vpack.i.bf16 %v6334_v10, %v6333_v36  ;;  %v6320_v20 = vsel %vm744_vm0, %v6315_v48, %v6319_v45 }
 0xa96   : > { %v6338_v38 = vmax.f32 %v6300_v5, %v6321_v46  ;;  %v6322_v28 = vsel %vm744_vm0, %v6317_v7, %v6321_v46  ;;  %v6335_v22 = vmax.f32 %v6297_v24, %v6320_v20  ;;  %v6478_v24 = vld [vmem:[%s19970_s13 + $0x10] sm:$0xff]  ;;  %v6484_v7 = vld [vmem:[%s19970_s13 + $0x40] sm:$0xff]  ;;  %v11649_v5 = vpack.c.bf16 %v6487_v11, %v6486_v51  ;;  %v6491_v46 = vld [vmem:[%s19970_s13 + $0x78] sm:$0xff] }
 0xa97   : > { %12413 = vrot.lane.b32.xlu1 %v12412_v34, %s12493_s17  ;;  %v6336_v25 = vmax.f32 %v6298_v54, %v6322_v28  ;;  %v11637_v54 = vpack.c.bf16 %v6479_v56, %v6478_v24  ;;  %v11646_v9 = vpack.c.bf16 %v6485_v27, %v6484_v7  ;;  %v6492_v34 = vld [vmem:[%s19970_s13 + $0x80] sm:$0xff]  ;;  %v6493_v20 = vld [vmem:[%s19970_s13 + $0x88] sm:$0xff]  ;;  %v6494_v28 = vld [vmem:[%s19970_s13 + $0x90] sm:$0xff]  ;;  %vm12497_vm0 = vmmov 0  }
 0xa98   : > { %v12422_v50 = vpack.i.bf16 %v6338_v38, %v6337_v37  ;;  %v6600_v56 = vld [vmem:[%s19971_s14 + $0x60] sm:$0xff]  ;;  %v9086_v51 = vld [vmem:[%s19971_s14 + $0x98] sm:$0xff] }
 0xa99   : > { %v12417_v15 = vpack.i.bf16 %v6336_v25, %v6335_v22  ;;  %v9087_v11 = vld [vmem:[%s19971_s14 + $0xa0] sm:$0xff] }
 0xa9b   : > { %12423 = vrot.lane.b32.xlu1 %v12422_v50, %s12493_s17  ;;  %12418 = vrot.lane.b32.xlu0 %v12417_v15, %s12493_s17  ;;  %v6496_v50 = vld [vmem:[%s19970_s13 + $0xa0] sm:$0xff]  ;;  %v6497_v15 = vld [vmem:[%s19970_s13 + $0xa8] sm:$0xff]  ;;  %s513_s17 = scalar_lea.vmem [#allocation2], %s512_s30 }
 0xa9c   : > { %s7952_s24 = sshll.u32 %s513_s17, 4  ;;  %s19917_s24 = int_to_ptr.vmem [resolvable:$true] %s7952_s24 }
 0xa9d   : > { %s12429_s28 = scalar_lea.vmem %s19917_s24, 16  ;;  %p12436_p0 = scmp.lt.s32.totalorder %s19917_s24, %s12434_s23 }
 0xa9e   : > { %p12430_p11 = scmp.ne.s32.totalorder %s19917_s24, %s12429_s28  ;;  %p12437_p1 = scmp.lt.s32.totalorder %s12435_s29, %s12429_s28 }
 0xaa0   : > { %p12431_p12 = pnand %p12430_p11, %p12622_p5  ;;  %p12438_p2 = por %p12437_p1, %p12436_p0 }
 0xaa2   : > { %p12432_p13 = pneg %p12431_p12 }
 0xaa4   : > { %p12439_p3 = pnand %p12438_p2, %p12432_p13 }
 0xb05   : > { %v12409_v58 = vpop.permute.xlu0 %12408 }
 0xb06   : > { %v12411_v55 = vunpack.i.h.bf16 %v12409_v58  ;;  %v12410_v62 = vunpack.i.l.bf16 %v12409_v58  ;;  %v11664_v58 = vpack.c.bf16 %v6497_v15, %v6496_v50  ;;  %v9098_v50 = vld [vmem:[%s19971_s14 + $0xf0] sm:$0xff]  ;;  %v9099_v15 = vld [vmem:[%s19971_s14 + $0xf8] sm:$0xff] }
 0xb08   : > { %v6363_v8 = vsel %vm4485_vm4, %v12410_v62, %v12411_v55  ;;  %v6376_v32 = vmax.f32 %v6332_v47, %v12411_v55  ;;  %v11643_v47 = vpack.c.bf16 %v6483_v43, %v6482_v49  ;;  %v6498_v55 = vld [vmem:[%s19970_s13 + $0xb0] sm:$0xff]  ;;  %v6499_v62 = vld [vmem:[%s19970_s13 + $0xb8] sm:$0xff]  ;;  %v9084_v43 = vld [vmem:[%s19971_s14 + $0x88] sm:$0xff] }
 0xb09   : > { %v12414_v17 = vpop.permute.xlu1 %12413  ;;  %v6375_v40 = vmax.f32 %v6331_v44, %v6363_v8  ;;  %v6481_v44 = vld [vmem:[%s19970_s13 + $0x28] sm:$0xff]  ;;  %v6500_v8 = vld [vmem:[%s19970_s13 + $0xc0] sm:$0xff] }
 0xb0a   : > { %v12416_v21 = vunpack.i.h.bf16 %v12414_v17  ;;  %v12415_v60 = vunpack.i.l.bf16 %v12414_v17  ;;  %v11640_v48 = vpack.c.bf16 %v6481_v44, %v6480_v23  ;;  %v11667_v17 = vpack.c.bf16 %v6499_v62, %v6498_v55  ;;  %v6602_v23 = vld [vmem:[%s19971_s14 + $0x70] sm:$0xff]  ;;  %v9082_v44 = vld [vmem:[%s19971_s14 + $0x78] sm:$0xff] }
 0xb0b   : > { %v11718_v55 = vpack.c.bf16 %v9099_v15, %v9098_v50  ;;  %v9138_v15 = vld [vmem:[%s19971_s14 + $0x220] sm:$0xff] }
 0xb0c   : > { %v6378_v26 = vmax.f32 %v6334_v10, %v12416_v21  ;;  %v6364_v29 = vsel %vm4485_vm4, %v12415_v60, %v12416_v21  ;;  %v6490_v10 = vld [vmem:[%s19970_s13 + $0x70] sm:$0xff]  ;;  %v6501_v21 = vld [vmem:[%s19970_s13 + $0xc8] sm:$0xff] }
 0xb0d   : > { %v6377_v0 = vmax.f32 %v6333_v36, %v6364_v29  ;;  %v12424_v4 = vpop.permute.xlu1 %12423  ;;  %v12419_v39 = vpop.permute.xlu0 %12418  ;;  %v6489_v36 = vld [vmem:[%s19970_s13 + $0x68] sm:$0xff]  ;;  %v11670_v60 = vpack.c.bf16 %v6501_v21, %v6500_v8  ;;  %v6503_v29 = vld [vmem:[%s19970_s13 + $0xd8] sm:$0xff] }
 0xb0e   : > { %v12426_v18 = vunpack.i.h.bf16 %v12424_v4  ;;  %v12425_v2 = vunpack.i.l.bf16 %v12424_v4  ;;  %v12421_v59 = vunpack.i.h.bf16 %v12419_v39  ;;  %v12420_v12 = vunpack.i.l.bf16 %v12419_v39  ;;  %v6589_v4 = vld [vmem:[%s19971_s14 + $0x8] sm:$0xff] }
 0xb0f   : > { %v11623_v35 = vpack.c.bf16 %v6378_v26, %v6376_v32  ;;  %v11625_v16 = vpack.c.bf16 %v6377_v0, %v6375_v40  ;;  %v11652_v45 = vpack.c.bf16 %v6489_v36, %v6488_v41  ;;  %v6502_v26 = vld [vmem:[%s19970_s13 + $0xd0] sm:$0xff]  ;;  %v6504_v40 = vld [vmem:[%s19970_s13 + $0xe0] sm:$0xff]  ;;  %v9088_v41 = vld [vmem:[%s19971_s14 + $0xa8] sm:$0xff] }
 0xb10   : > { %v6382_v3 = vmax.f32 %v6338_v38, %v12426_v18  ;;  %v6366_v42 = vsel %vm4485_vm4, %v12425_v2, %v12426_v18  ;;  %v6380_v19 = vmax.f32 %v6336_v25, %v12421_v59  ;;  %v6365_v61 = vsel %vm4485_vm4, %v12420_v12, %v12421_v59  ;;  %v6588_v0 = vld [vmem:[%s19971_s14] sm:$0xff]  ;;  %v6590_v59 = vld [vmem:[%s19971_s14 + $0x10] sm:$0xff]  ;;  %v6591_v12 = vld [vmem:[%s19971_s14 + $0x18] sm:$0xff] }
 0xb11   : > { %v6381_v6 = vmax.f32 %v6337_v37, %v6366_v42  ;;  %v6379_v57 = vmax.f32 %v6335_v22, %v6365_v61  ;;  %11624 = vmatprep.subr.bf16.mxu1 %v11623_v35  ;;  %v11655_v37 = vpack.c.bf16 %v6491_v46, %v6490_v10  ;;  %v11658_v38 = vpack.c.bf16 %v6493_v20, %v6492_v34  ;;  %v6495_v22 = vld [vmem:[%s19970_s13 + $0x98] sm:$0xff]  ;;  %v6593_v42 = vld [vmem:[%s19971_s14 + $0x28] sm:$0xff]  ;;  %v9089_v36 = vld [vmem:[%s19971_s14 + $0xb0] sm:$0xff] }
 0xb12   : > { %v11627_v31 = vpack.c.bf16 %v6382_v3, %v6380_v19  ;;  %11626 = vmatpush1.bf16.msra.mxu1 %v11625_v16  ;;  %v11661_v25 = vpack.c.bf16 %v6495_v22, %v6494_v28  ;;  %v11673_v32 = vpack.c.bf16 %v6503_v29, %v6502_v26  ;;  %v11676_v18 = vpack.c.bf16 %v6589_v4, %v6588_v0  ;;  %v6592_v3 = vld [vmem:[%s19971_s14 + $0x20] sm:$0xff]  ;;  %v9090_v10 = vld [vmem:[%s19971_s14 + $0xb8] sm:$0xff]  ;;  %v9092_v34 = vld [vmem:[%s19971_s14 + $0xc8] sm:$0xff] }
 0xb13   : > { %v11630_v1 = vpack.c.bf16 %v6381_v6, %v6379_v57  ;;  %v11679_v35 = vpack.c.bf16 %v6591_v12, %v6590_v59  ;;  %v11682_v61 = vpack.c.bf16 %v6593_v42, %v6592_v3  ;;  %v6594_v6 = vld [vmem:[%s19971_s14 + $0x30] sm:$0xff]  ;;  %v6595_v57 = vld [vmem:[%s19971_s14 + $0x38] sm:$0xff]  ;;  %v9091_v46 = vld [vmem:[%s19971_s14 + $0xc0] sm:$0xff] }
 0xb14   : > { %11629 = vmatprep.subr.msk.bf16.mxu1 %vm11628_vm13, %v11627_v31  ;;  %v11685_v31 = vpack.c.bf16 %v6595_v57, %v6594_v6  ;;  %v9093_v20 = vld [vmem:[%s19971_s14 + $0xd0] sm:$0xff]  ;;  %v9094_v28 = vld [vmem:[%s19971_s14 + $0xd8] sm:$0xff]  ;;  %v9095_v22 = vld [vmem:[%s19971_s14 + $0xe0] sm:$0xff] }
 0xb15   : > { %v9101_v8 = vld [vmem:[%s19971_s14 + $0x108] sm:$0xff]  ;;  %v9103_v26 = vld [vmem:[%s19971_s14 + $0x118] sm:$0xff]  ;;  %v9106_v4 = vld [vmem:[%s19971_s14 + $0x130] sm:$0xff] }
 0xb16   : > { %11632 = vmatpush1.bf16.msk.msra.mxu1 %vm11628_vm13, %v11630_v1  ;;  %v6596_v1 = vld [vmem:[%s19971_s14 + $0x40] sm:$0xff]  ;;  %v9109_v59 = vld [vmem:[%s19971_s14 + $0x148] sm:$0xff] }
 0xb17   : > { %11633 = vmatprep.subr.bf16.mxu1 %v12496_v33  ;;  %v11688_v13 = vpack.c.bf16 %v6597_v63, %v6596_v1  ;;  %v9114_v42 = vld [vmem:[%s19971_s14 + $0x168] sm:$0xff]  ;;  %v9117_v1 = vld [vmem:[%s19971_s14 + $0x180] sm:$0xff] }
 0xb19   : > { %9077 = vmatmul.mubr.msk.f32.vlgmr.msra.gmra.mrb[48].mxu1 %vm6385_vm14, %v6383_v30  ;;  %v6598_v30 = vld [vmem:[%s19971_s14 + $0x50] sm:$0xff] }
 0xb1a   : > { %11635 = vmatpush1.bf16.msra.mxu1 %v11634_v14  ;;  %6469 = vmatprep.mubr.f32.mxu1 %v12494_v52  ;;  %v6599_v14 = vld [vmem:[%s19971_s14 + $0x58] sm:$0xff] }
 0xb1b   : > { %11636 = vmatprep.subr.bf16.mxu1 %v12496_v33  ;;  %v11691_v24 = vpack.c.bf16 %v6599_v14, %v6598_v30  ;;  %v9119_v30 = vld [vmem:[%s19971_s14 + $0x190] sm:$0xff] }
 0xb1d   : > { %9078 = vmatmul.mubr.msk.f32.gmra.mrb[50].mxu1 %vm6385_vm14, %v6384_v53 }
 0xb1e   : > { %11638 = vmatpush1.bf16.msra.mxu1 %v11637_v54  ;;  %v6601_v54 = vld [vmem:[%s19971_s14 + $0x68] sm:$0xff] }
 0xb1f   : > { %11639 = vmatprep.subr.bf16.mxu1 %v12496_v33  ;;  %v11694_v53 = vpack.c.bf16 %v6601_v54, %v6600_v56  ;;  %v9121_v56 = vld [vmem:[%s19971_s14 + $0x1a0] sm:$0xff] }
 0xb22   : > { %11641 = vmatpush1.bf16.msra.mxu1 %v11640_v48  ;;  %v9083_v48 = vld [vmem:[%s19971_s14 + $0x80] sm:$0xff] }
 0xb23   : > { %11642 = vmatprep.subr.bf16.mxu1 %v12496_v33  ;;  %v11697_v49 = vpack.c.bf16 %v9083_v48, %v9082_v44  ;;  %v9124_v48 = vld [vmem:[%s19971_s14 + $0x1b8] sm:$0xff] }
 0xb26   : > { %11644 = vmatpush1.bf16.msra.mxu1 %v11643_v47  ;;  %v9085_v47 = vld [vmem:[%s19971_s14 + $0x90] sm:$0xff] }
 0xb27   : > { %11645 = vmatprep.subr.bf16.mxu1 %v12496_v33 }
 0xb2a   : > { %11647 = vmatpush1.bf16.msra.mxu1 %v11646_v9  ;;  %v11700_v9 = vpack.c.bf16 %v9085_v47, %v9084_v43  ;;  %v9126_v47 = vld [vmem:[%s19971_s14 + $0x1c8] sm:$0xff] }
 0xb2b   : > { %11648 = vmatprep.subr.bf16.mxu1 %v12496_v33 }
 0xb2e   : > { %11650 = vmatpush1.bf16.msra.mxu1 %v11649_v5  ;;  %v11703_v5 = vpack.c.bf16 %v9087_v11, %v9086_v51  ;;  %v9130_v11 = vld [vmem:[%s19971_s14 + $0x1e0] sm:$0xff] }
 0xb2f   : > { %11651 = vmatprep.subr.bf16.mxu1 %v12496_v33 }
 0xb32   : > { %11653 = vmatpush1.bf16.msra.mxu1 %v11652_v45  ;;  %v11706_v45 = vpack.c.bf16 %v9089_v36, %v9088_v41  ;;  %v9128_v36 = vld [vmem:[%s19971_s14 + $0x1d8] sm:$0xff] }
 0xb33   : > { %11654 = vmatprep.subr.bf16.mxu1 %v12496_v33 }
 0xb36   : > { %11656 = vmatpush1.bf16.msra.mxu1 %v11655_v37  ;;  %v11709_v37 = vpack.c.bf16 %v9091_v46, %v9090_v10  ;;  %v9132_v46 = vld [vmem:[%s19971_s14 + $0x1f0] sm:$0xff] }
 0xb37   : > { %11657 = vmatprep.subr.bf16.mxu1 %v12496_v33 }
 0xb3a   : > { %11659 = vmatpush1.bf16.msra.mxu1 %v11658_v38  ;;  %v11712_v38 = vpack.c.bf16 %v9093_v20, %v9092_v34  ;;  %v9134_v20 = vld [vmem:[%s19971_s14 + $0x200] sm:$0xff] }
 0xb3b   : > { %11660 = vmatprep.subr.bf16.mxu1 %v12496_v33 }
 0xb3e   : > { %11662 = vmatpush1.bf16.msra.mxu1 %v11661_v25  ;;  %v11715_v25 = vpack.c.bf16 %v9095_v22, %v9094_v28  ;;  %v9136_v22 = vld [vmem:[%s19971_s14 + $0x210] sm:$0xff] }
 0xb3f   : > { %11663 = vmatprep.subr.bf16.mxu1 %v12496_v33 }
 0xb42   : > { %11665 = vmatpush1.bf16.msra.mxu1 %v11664_v58  ;;  %v9096_v58 = vld [vmem:[%s19971_s14 + $0xe8] sm:$0xff] }
 0xb43   : > { %11666 = vmatprep.subr.bf16.mxu1 %v12496_v33 }
 0xb46   : > { %11668 = vmatpush1.bf16.msra.mxu1 %v11667_v17  ;;  %v9100_v17 = vld [vmem:[%s19971_s14 + $0x100] sm:$0xff] }
 0xb47   : > { %11669 = vmatprep.subr.bf16.mxu1 %v12496_v33  ;;  %v11721_v21 = vpack.c.bf16 %v9101_v8, %v9100_v17  ;;  %v9141_v17 = vld [vmem:[%s19971_s14 + $0x238] sm:$0xff] }
 0xb4a   : > { %11671 = vmatpush1.bf16.msra.mxu1 %v11670_v60  ;;  %v9102_v60 = vld [vmem:[%s19971_s14 + $0x110] sm:$0xff] }
 0xb4b   : > { %11672 = vmatprep.subr.bf16.mxu1 %v12496_v33  ;;  %v11724_v29 = vpack.c.bf16 %v9103_v26, %v9102_v60  ;;  %v9143_v60 = vld [vmem:[%s19971_s14 + $0x248] sm:$0xff] }
 0xb4e   : > { %11674 = vmatpush1.bf16.msra.mxu1 %v11673_v32  ;;  %v9104_v32 = vld [vmem:[%s19971_s14 + $0x120] sm:$0xff] }
 0xb4f   : > { %6568 = vmatprep.subr.mxu1 %v12494_v52 }
 0xb52   : > { %6569 = vmatpush1.msra.mxu1 %v6504_v40  ;;  %v9105_v40 = vld [vmem:[%s19971_s14 + $0x128] sm:$0xff] }
 0xb53   : > { %11675 = vmatprep.subr.bf16.mxu1 %v12496_v33  ;;  %v11727_v0 = vpack.c.bf16 %v9105_v40, %v9104_v32  ;;  %v9147_v32 = vld [vmem:[%s19971_s14 + $0x260] sm:$0xff]  ;;  %v9144_v40 = vld [vmem:[%s19971_s14 + $0x250] sm:$0xff] }
 0xbec   : > { %v6465_v39 = vpop.f32.mrb[48].mxu1 }
 0xbed   : > { %v6467_v2 = vpop.f32.mrb[49].mxu1 }
 0xbee   : > { %9079 = vmatprep.mubr.msk.f32.mxu1 %vm6505_vm15, %v6467_v2  ;;  %v9108_v2 = vld [vmem:[%s19971_s14 + $0x140] sm:$0xff] }
 0xbef   : > { %6577 = vmatmul.mubr.f32.vlgmr.msra.gmra.mrb[52].mxu1 %v6465_v39  ;;  %v9107_v39 = vld [vmem:[%s19971_s14 + $0x138] sm:$0xff]  ;;  %v11733_v12 = vpack.c.bf16 %v9109_v59, %v9108_v2 }
 0xbf0   : > { %11677 = vmatpush3.bf16.msra.mxu1 %v11676_v18  ;;  %v6471_v16 = vpop.f32.mrb[50].mxu1  ;;  %v11730_v18 = vpack.c.bf16 %v9107_v39, %v9106_v4  ;;  %v9148_v39 = vld [vmem:[%s19971_s14 + $0x268] sm:$0xff]  ;;  %v9150_v59 = vld [vmem:[%s19971_s14 + $0x278] sm:$0xff] }
 0xbf1   : > { %11678 = vmatprep.subr.bf16.mxu1 %v12496_v33  ;;  %v6473_v19 = vpop.f32.mrb[51].mxu1 }
 0xbf2   : > { %9080 = vmatprep.mubr.msk.f32.mxu1 %vm6505_vm15, %v6473_v19  ;;  %v9115_v19 = vld [vmem:[%s19971_s14 + $0x170] sm:$0xff] }
 0xbf3   : > { %6582 = vmatmul.mubr.f32.gmra.mrb[54].mxu1 %v6471_v16  ;;  %v9111_v16 = vld [vmem:[%s19971_s14 + $0x158] sm:$0xff]  ;;  %v11739_v6 = vpack.c.bf16 %v9115_v19, %v9114_v42 }
 0xbf4   : > { %11680 = vmatpush3.bf16.msra.mxu1 %v11679_v35  ;;  %9580 = vmatprep.mubr.msk.f32.mxu1 %vm12497_vm0, %v12494_v52  ;;  %v9110_v35 = vld [vmem:[%s19971_s14 + $0x150] sm:$0xff]  ;;  %v9154_v19 = vld [vmem:[%s19971_s14 + $0x298] sm:$0xff] }
 0xbf5   : > { %11681 = vmatprep.subr.bf16.mxu1 %v12496_v33  ;;  %v11736_v3 = vpack.c.bf16 %v9111_v16, %v9110_v35  ;;  %v9152_v16 = vld [vmem:[%s19971_s14 + $0x288] sm:$0xff] }
 0xbf8   : > { %11683 = vmatpush3.bf16.msra.mxu1 %v11682_v61  ;;  %v9112_v61 = vld [vmem:[%s19971_s14 + $0x160] sm:$0xff] }
 0xbf9   : > { %11684 = vmatprep.subr.bf16.mxu1 %v12496_v33 }
 0xbfc   : > { %11686 = vmatpush3.bf16.msra.mxu1 %v11685_v31  ;;  %v9116_v31 = vld [vmem:[%s19971_s14 + $0x178] sm:$0xff] }
 0xbfd   : > { %11687 = vmatprep.subr.bf16.mxu1 %v12496_v33  ;;  %v11742_v63 = vpack.c.bf16 %v9117_v1, %v9116_v31  ;;  %v9157_v31 = vld [vmem:[%s19971_s14 + $0x2b0] sm:$0xff] }
 0xc00   : > { %11689 = vmatpush3.bf16.msra.mxu1 %v11688_v13  ;;  %v9118_v13 = vld [vmem:[%s19971_s14 + $0x188] sm:$0xff] }
 0xc01   : > { %11690 = vmatprep.subr.bf16.mxu1 %v12496_v33  ;;  %v11745_v14 = vpack.c.bf16 %v9119_v30, %v9118_v13  ;;  %v9159_v13 = vld [vmem:[%s19971_s14 + $0x2c0] sm:$0xff] }
 0xc04   : > { %11692 = vmatpush3.bf16.msra.mxu1 %v11691_v24  ;;  %v9120_v24 = vld [vmem:[%s19971_s14 + $0x198] sm:$0xff] }
 0xc05   : > { %11693 = vmatprep.subr.bf16.mxu1 %v12496_v33  ;;  %v11748_v54 = vpack.c.bf16 %v9121_v56, %v9120_v24  ;;  %v9163_v24 = vld [vmem:[%s19971_s14 + $0x2d8] sm:$0xff]  ;;  %v9160_v56 = vld [vmem:[%s19971_s14 + $0x2c8] sm:$0xff] }
 0xc08   : > { %11695 = vmatpush3.bf16.msra.mxu1 %v11694_v53  ;;  %v9122_v53 = vld [vmem:[%s19971_s14 + $0x1a8] sm:$0xff] }
 0xc09   : > { %9578 = vmatprep.subr.mxu1 %v12494_v52 }
 0xc0c   : > { %9579 = vmatpush3.msra.mxu1 %v6602_v23  ;;  %v9123_v23 = vld [vmem:[%s19971_s14 + $0x1b0] sm:$0xff] }
 0xc0d   : > { %11696 = vmatprep.subr.bf16.mxu1 %v12496_v33  ;;  %v11751_v44 = vpack.c.bf16 %v9123_v23, %v9122_v53  ;;  %v9164_v23 = vld [vmem:[%s19971_s14 + $0x2e0] sm:$0xff] }
 0xcc2   : > { %v19116_v7 = vpop.f32.mrb[52].mxu1 }
 0xcc3   : > { %9581 = vmatmul.mubr.msk.f32.vlgmr.msra.gmra.mrb[56].mxu1 %vm4485_vm4, %v19116_v7  ;;  %v6580_v27 = vpop.f32.mrb[53].mxu1  ;;  %v6693_v62 = vrot.slane %v19116_v7, 1  ;;  %v6783_v57 = vrot.slane %v19116_v7, 2  ;;  %v6873_v10 = vrot.slane %v19116_v7, 3  ;;  %v6963_v4 = vrot.slane %v19116_v7, 4 }
 0xcc4   : > { %11698 = vmatpush3.bf16.msra.mxu1 %v11697_v49  ;;  %9613 = vmatprep.mubr.msk.f32.mxu1 %vm12497_vm0, %v12494_v52  ;;  %v9125_v49 = vld [vmem:[%s19971_s14 + $0x1c0] sm:$0xff]  ;;  %v9127_v27 = vld [vmem:[%s19971_s14 + $0x1d0] sm:$0xff]  ;;  %v7053_v53 = vrot.slane %v19116_v7, 5 }
 0xcc5   : > { %11699 = vmatprep.subr.bf16.mxu1 %v12496_v33  ;;  %v11754_v43 = vpack.c.bf16 %v9125_v49, %v9124_v48  ;;  %v9166_v49 = vld [vmem:[%s19971_s14 + $0x2f0] sm:$0xff] }
 0xcc6   : > { %v19272_v51 = vpop.f32.mrb[54].mxu1 }
 0xcc7   : > { %v6585_v41 = vpop.f32.mrb[55].mxu1 }
 0xcc8   : > { %11701 = vmatpush3.bf16.msra.mxu1 %v11700_v9  ;;  %v11757_v9 = vpack.c.bf16 %v9127_v27, %v9126_v47  ;;  %v9168_v27 = vld [vmem:[%s19971_s14 + $0x300] sm:$0xff]  ;;  %v9171_v41 = vld [vmem:[%s19971_s14 + $0x318] sm:$0xff] }
 0xcc9   : > { %11702 = vmatprep.subr.bf16.mxu1 %v12496_v33 }
 0xccc   : > { %11704 = vmatpush3.bf16.msra.mxu1 %v11703_v5  ;;  %v9131_v5 = vld [vmem:[%s19971_s14 + $0x1e8] sm:$0xff] }
 0xccd   : > { %11705 = vmatprep.subr.bf16.mxu1 %v12496_v33 }
 0xcd0   : > { %11707 = vmatpush3.bf16.msra.mxu1 %v11706_v45  ;;  %v11760_v45 = vpack.c.bf16 %v9131_v5, %v9130_v11  ;;  %v9170_v5 = vld [vmem:[%s19971_s14 + $0x310] sm:$0xff] }
 0xcd1   : > { %11708 = vmatprep.subr.bf16.mxu1 %v12496_v33 }
 0xcd4   : > { %11710 = vmatpush3.bf16.msra.mxu1 %v11709_v37  ;;  %v9133_v37 = vld [vmem:[%s19971_s14 + $0x1f8] sm:$0xff] }
 0xcd5   : > { %11711 = vmatprep.subr.bf16.mxu1 %v12496_v33  ;;  %v11763_v34 = vpack.c.bf16 %v9133_v37, %v9132_v46  ;;  %v9174_v37 = vld [vmem:[%s19971_s14 + $0x330] sm:$0xff] }
 0xcd8   : > { %11713 = vmatpush3.bf16.msra.mxu1 %v11712_v38  ;;  %v9135_v38 = vld [vmem:[%s19971_s14 + $0x208] sm:$0xff] }
 0xcd9   : > { %11714 = vmatprep.subr.bf16.mxu1 %v12496_v33  ;;  %v11766_v28 = vpack.c.bf16 %v9135_v38, %v9134_v20  ;;  %v9178_v38 = vld [vmem:[%s19971_s14 + $0x348] sm:$0xff] }
 0xcdc   : > { %11716 = vmatpush3.bf16.msra.mxu1 %v11715_v25  ;;  %v9137_v25 = vld [vmem:[%s19971_s14 + $0x218] sm:$0xff] }
 0xcdd   : > { %9611 = vmatprep.subr.mxu1 %v12494_v52  ;;  %v11769_v50 = vpack.c.bf16 %v9137_v25, %v9136_v22  ;;  %v9176_v22 = vld [vmem:[%s19971_s14 + $0x340] sm:$0xff] }
 0xce0   : > { %9612 = vmatpush3.msra.mxu1 %v9096_v58  ;;  %v9139_v58 = vld [vmem:[%s19971_s14 + $0x228] sm:$0xff] }
 0xce1   : > { %9614 = vmatmul.mubr.msk.f32.vlgmr.msra.gmra.mrb[56].mxu1 %vm4485_vm4, %v6693_v62  ;;  %11717 = vmatprep.subr.bf16.mxu1 %v12496_v33  ;;  %v9140_v62 = vld [vmem:[%s19971_s14 + $0x230] sm:$0xff] }
 0xce2   : > { %11719 = vmatpush3.bf16.msra.mxu1 %v11718_v55  ;;  %9646 = vmatprep.mubr.msk.f32.mxu1 %vm12497_vm0, %v12494_v52  ;;  %v11772_v55 = vpack.c.bf16 %v9139_v58, %v9138_v15  ;;  %v11775_v8 = vpack.c.bf16 %v9141_v17, %v9140_v62  ;;  %v9180_v15 = vld [vmem:[%s19971_s14 + $0x358] sm:$0xff]  ;;  %v9181_v58 = vld [vmem:[%s19971_s14 + $0x360] sm:$0xff]  ;;  %v9182_v62 = vld [vmem:[%s19971_s14 + $0x368] sm:$0xff] }
 0xce3   : > { %11720 = vmatprep.subr.bf16.mxu1 %v12496_v33  ;;  %v9183_v17 = vld [vmem:[%s19971_s14 + $0x370] sm:$0xff] }
 0xce6   : > { %11722 = vmatpush3.bf16.msra.mxu1 %v11721_v21  ;;  %v9142_v21 = vld [vmem:[%s19971_s14 + $0x240] sm:$0xff] }
 0xce7   : > { %11723 = vmatprep.subr.bf16.mxu1 %v12496_v33  ;;  %v11778_v26 = vpack.c.bf16 %v9143_v60, %v9142_v21  ;;  %v9184_v21 = vld [vmem:[%s19971_s14 + $0x378] sm:$0xff]  ;;  %v9185_v60 = vld [vmem:[%s19971_s14 + $0x380] sm:$0xff] }
 0xcea   : > { %11725 = vmatpush3.bf16.msra.mxu1 %v11724_v29  ;;  %v9146_v29 = vld [vmem:[%s19971_s14 + $0x258] sm:$0xff] }
 0xceb   : > { %11726 = vmatprep.subr.bf16.mxu1 %v12496_v33 }
 0xcee   : > { %11728 = vmatpush3.bf16.msra.mxu1 %v11727_v0  ;;  %v11781_v0 = vpack.c.bf16 %v9147_v32, %v9146_v29  ;;  %v9186_v29 = vld [vmem:[%s19971_s14 + $0x388] sm:$0xff]  ;;  %v9187_v32 = vld [vmem:[%s19971_s14 + $0x390] sm:$0xff] }
 0xcef   : > { %11729 = vmatprep.subr.bf16.mxu1 %v12496_v33 }
 0xcf2   : > { %11731 = vmatpush3.bf16.msra.mxu1 %v11730_v18  ;;  %v9149_v18 = vld [vmem:[%s19971_s14 + $0x270] sm:$0xff] }
 0xcf3   : > { %11732 = vmatprep.subr.bf16.mxu1 %v12496_v33  ;;  %v11784_v2 = vpack.c.bf16 %v9149_v18, %v9148_v39  ;;  %v9190_v18 = vld [vmem:[%s19971_s14 + $0x3a8] sm:$0xff] }
 0xcf6   : > { %11734 = vmatpush3.bf16.msra.mxu1 %v11733_v12  ;;  %v9151_v12 = vld [vmem:[%s19971_s14 + $0x280] sm:$0xff] }
 0xcf7   : > { %11735 = vmatprep.subr.bf16.mxu1 %v12496_v33  ;;  %v11787_v35 = vpack.c.bf16 %v9151_v12, %v9150_v59  ;;  %v9194_v12 = vld [vmem:[%s19971_s14 + $0x3c0] sm:$0xff] }
 0xcfa   : > { %11737 = vmatpush3.bf16.msra.mxu1 %v11736_v3  ;;  %v9153_v3 = vld [vmem:[%s19971_s14 + $0x290] sm:$0xff] }
 0xcfb   : > { %9644 = vmatprep.subr.mxu1 %v12494_v52  ;;  %v11790_v42 = vpack.c.bf16 %v9153_v3, %v9152_v16  ;;  %v9192_v16 = vld [vmem:[%s19971_s14 + $0x3b8] sm:$0xff] }
 0xcfe   : > { %9645 = vmatpush3.msra.mxu1 %v9112_v61  ;;  %v9155_v61 = vld [vmem:[%s19971_s14 + $0x2a0] sm:$0xff] }
 0xcff   : > { %9647 = vmatmul.mubr.msk.f32.vlgmr.msra.gmra.mrb[56].mxu1 %vm4485_vm4, %v6783_v57  ;;  %11738 = vmatprep.subr.bf16.mxu1 %v12496_v33  ;;  %v9156_v57 = vld [vmem:[%s19971_s14 + $0x2a8] sm:$0xff] }
 0xd00   : > { %11740 = vmatpush3.bf16.msra.mxu1 %v11739_v6  ;;  %9679 = vmatprep.mubr.msk.f32.mxu1 %vm12497_vm0, %v12494_v52  ;;  %v11793_v6 = vpack.c.bf16 %v9155_v61, %v9154_v19  ;;  %v11796_v1 = vpack.c.bf16 %v9157_v31, %v9156_v57  ;;  %v9196_v19 = vld [vmem:[%s19971_s14 + $0x3d0] sm:$0xff]  ;;  %v9197_v61 = vld [vmem:[%s19971_s14 + $0x3d8] sm:$0xff]  ;;  %v9199_v57 = vld [vmem:[%s19971_s14 + $0x3e8] sm:$0xff] }
 0xd01   : > { %11741 = vmatprep.subr.bf16.mxu1 %v12496_v33 }
 0xd04   : > { %11743 = vmatpush3.bf16.msra.mxu1 %v11742_v63  ;;  %v9158_v63 = vld [vmem:[%s19971_s14 + $0x2b8] sm:$0xff] }
 0xd05   : > { %11744 = vmatprep.subr.bf16.mxu1 %v12496_v33  ;;  %v11799_v30 = vpack.c.bf16 %v9159_v13, %v9158_v63  ;;  %v9201_v63 = vld [vmem:[%s19971_s14 + $0x3f8] sm:$0xff] }
 0xd08   : > { %11746 = vmatpush3.bf16.msra.mxu1 %v11745_v14  ;;  %v9162_v14 = vld [vmem:[%s19971_s14 + $0x2d0] sm:$0xff] }
 0xd09   : > { %11747 = vmatprep.subr.bf16.mxu1 %v12496_v33 }
 0xd0c   : > { %11749 = vmatpush3.bf16.msra.mxu1 %v11748_v54  ;;  %v11802_v54 = vpack.c.bf16 %v9163_v24, %v9162_v14  ;;  %v9203_v14 = vld [vmem:[%s19971_s14 + $0x408] sm:$0xff] }
 0xd0d   : > { %11750 = vmatprep.subr.bf16.mxu1 %v12496_v33 }
 0xd10   : > { %11752 = vmatpush3.bf16.msra.mxu1 %v11751_v44  ;;  %v9165_v44 = vld [vmem:[%s19971_s14 + $0x2e8] sm:$0xff] }
 0xd11   : > { %11753 = vmatprep.subr.bf16.mxu1 %v12496_v33  ;;  %v11805_v48 = vpack.c.bf16 %v9165_v44, %v9164_v23  ;;  %v9206_v23 = vld [vmem:[%s19971_s14 + $0x420] sm:$0xff]  ;;  %v9207_v44 = vld [vmem:[%s19971_s14 + $0x428] sm:$0xff] }
 0xd14   : > { %11755 = vmatpush3.bf16.msra.mxu1 %v11754_v43  ;;  %v9167_v43 = vld [vmem:[%s19971_s14 + $0x2f8] sm:$0xff] }
 0xd15   : > { %11756 = vmatprep.subr.bf16.mxu1 %v12496_v33  ;;  %v11808_v47 = vpack.c.bf16 %v9167_v43, %v9166_v49  ;;  %v9210_v49 = vld [vmem:[%s19971_s14 + $0x438] sm:$0xff]  ;;  %v9211_v43 = vld [vmem:[%s19971_s14 + $0x440] sm:$0xff] }
 0xd18   : > { %11758 = vmatpush3.bf16.msra.mxu1 %v11757_v9  ;;  %v9169_v9 = vld [vmem:[%s19971_s14 + $0x308] sm:$0xff] }
 0xd19   : > { %9677 = vmatprep.subr.mxu1 %v12494_v52  ;;  %v11811_v11 = vpack.c.bf16 %v9169_v9, %v9168_v27  ;;  %v11865_v27 = vpack.c.bf16 %v9211_v43, %v9210_v49  ;;  %v9212_v9 = vld [vmem:[%s19971_s14 + $0x448] sm:$0xff]  ;;  %v9252_v43 = vld [vmem:[%s19971_s14 + $0x578] sm:$0xff] }
 0xd1c   : > { %9678 = vmatpush3.msra.mxu1 %v9128_v36  ;;  %v11814_v36 = vpack.c.bf16 %v9171_v41, %v9170_v5  ;;  %v9214_v41 = vld [vmem:[%s19971_s14 + $0x458] sm:$0xff] }
 0xd1d   : > { %9680 = vmatmul.mubr.msk.f32.vlgmr.msra.gmra.mrb[56].mxu1 %vm4485_vm4, %v6873_v10  ;;  %11759 = vmatprep.subr.bf16.mxu1 %v12496_v33  ;;  %v9173_v10 = vld [vmem:[%s19971_s14 + $0x328] sm:$0xff] }
 0xd1e   : > { %11761 = vmatpush3.bf16.msra.mxu1 %v11760_v45  ;;  %9712 = vmatprep.mubr.msk.f32.mxu1 %vm12497_vm0, %v12494_v52  ;;  %v9172_v45 = vld [vmem:[%s19971_s14 + $0x320] sm:$0xff] }
 0xd1f   : > { %11762 = vmatprep.subr.bf16.mxu1 %v12496_v33  ;;  %v11817_v46 = vpack.c.bf16 %v9173_v10, %v9172_v45  ;;  %v9216_v10 = vld [vmem:[%s19971_s14 + $0x468] sm:$0xff] }
 0xd22   : > { %11764 = vmatpush3.bf16.msra.mxu1 %v11763_v34  ;;  %v9175_v34 = vld [vmem:[%s19971_s14 + $0x338] sm:$0xff] }
 0xd23   : > { %11765 = vmatprep.subr.bf16.mxu1 %v12496_v33  ;;  %v11820_v20 = vpack.c.bf16 %v9175_v34, %v9174_v37  ;;  %v9218_v34 = vld [vmem:[%s19971_s14 + $0x478] sm:$0xff] }
 0xd26   : > { %11767 = vmatpush3.bf16.msra.mxu1 %v11766_v28  ;;  %v9179_v28 = vld [vmem:[%s19971_s14 + $0x350] sm:$0xff] }
 0xd27   : > { %11768 = vmatprep.subr.bf16.mxu1 %v12496_v33  ;;  %v11823_v25 = vpack.c.bf16 %v9179_v28, %v9178_v38  ;;  %v9220_v28 = vld [vmem:[%s19971_s14 + $0x488] sm:$0xff] }
 0xd2a   : > { %11770 = vmatpush3.bf16.msra.mxu1 %v11769_v50  ;;  %v7143_v50 = vrot.slane %v19116_v7, 6 }
 0xd2b   : > { %11771 = vmatprep.subr.bf16.mxu1 %v12496_v33 }
 0xd2e   : > { %11773 = vmatpush3.bf16.msra.mxu1 %v11772_v55  ;;  %v11826_v55 = vpack.c.bf16 %v9181_v58, %v9180_v15  ;;  %v9223_v15 = vld [vmem:[%s19971_s14 + $0x4a0] sm:$0xff] }
 0xd2f   : > { %11774 = vmatprep.subr.bf16.mxu1 %v12496_v33 }
 0xd32   : > { %11776 = vmatpush3.bf16.msra.mxu1 %v11775_v8  ;;  %v11829_v8 = vpack.c.bf16 %v9183_v17, %v9182_v62  ;;  %v9227_v62 = vld [vmem:[%s19971_s14 + $0x4b8] sm:$0xff]  ;;  %v9224_v17 = vld [vmem:[%s19971_s14 + $0x4a8] sm:$0xff] }
 0xd33   : > { %11777 = vmatprep.subr.bf16.mxu1 %v12496_v33 }
 0xd36   : > { %11779 = vmatpush3.bf16.msra.mxu1 %v11778_v26  ;;  %v11832_v26 = vpack.c.bf16 %v9185_v60, %v9184_v21  ;;  %v7413_v21 = vrot.slane %v19272_v51, 1  ;;  %v9228_v60 = vld [vmem:[%s19971_s14 + $0x4c0] sm:$0xff] }
 0xd37   : > { %9710 = vmatprep.subr.mxu1 %v12494_v52 }
 0xd3a   : > { %9711 = vmatpush3.msra.mxu1 %v9144_v40  ;;  %v11835_v40 = vpack.c.bf16 %v9187_v32, %v9186_v29  ;;  %v9230_v32 = vld [vmem:[%s19971_s14 + $0x4d0] sm:$0xff] }
 0xd3b   : > { %9713 = vmatmul.mubr.msk.f32.vlgmr.msra.gmra.mrb[56].mxu1 %vm4485_vm4, %v6963_v4  ;;  %11780 = vmatprep.subr.bf16.mxu1 %v12496_v33  ;;  %v9189_v4 = vld [vmem:[%s19971_s14 + $0x3a0] sm:$0xff] }
 0xd3c   : > { %11782 = vmatpush3.bf16.msra.mxu1 %v11781_v0  ;;  %9745 = vmatprep.mubr.msk.f32.mxu1 %vm12497_vm0, %v12494_v52  ;;  %v9188_v0 = vld [vmem:[%s19971_s14 + $0x398] sm:$0xff] }
 0xd3d   : > { %11783 = vmatprep.subr.bf16.mxu1 %v12496_v33  ;;  %v11838_v39 = vpack.c.bf16 %v9189_v4, %v9188_v0  ;;  %v9232_v4 = vld [vmem:[%s19971_s14 + $0x4e0] sm:$0xff] }
 0xd40   : > { %11785 = vmatpush3.bf16.msra.mxu1 %v11784_v2  ;;  %v9191_v2 = vld [vmem:[%s19971_s14 + $0x3b0] sm:$0xff] }
 0xd41   : > { %11786 = vmatprep.subr.bf16.mxu1 %v12496_v33  ;;  %v11841_v59 = vpack.c.bf16 %v9191_v2, %v9190_v18  ;;  %v9234_v2 = vld [vmem:[%s19971_s14 + $0x4f0] sm:$0xff] }
 0xd44   : > { %11788 = vmatpush3.bf16.msra.mxu1 %v11787_v35  ;;  %v9195_v35 = vld [vmem:[%s19971_s14 + $0x3c8] sm:$0xff] }
 0xd45   : > { %11789 = vmatprep.subr.bf16.mxu1 %v12496_v33  ;;  %v11844_v3 = vpack.c.bf16 %v9195_v35, %v9194_v12  ;;  %v9236_v35 = vld [vmem:[%s19971_s14 + $0x500] sm:$0xff] }
 0xd48   : > { %11791 = vmatpush3.bf16.msra.mxu1 %v11790_v42  ;;  %v7233_v42 = vrot.slane %v19116_v7, 7  ;;  %v9198_v7 = vld [vmem:[%s19971_s14 + $0x3e0] sm:$0xff] }
 0xd49   : > { %11792 = vmatprep.subr.bf16.mxu1 %v12496_v33  ;;  %v11850_v31 = vpack.c.bf16 %v9199_v57, %v9198_v7  ;;  %v9243_v7 = vld [vmem:[%s19971_s14 + $0x530] sm:$0xff]  ;;  %v9240_v57 = vld [vmem:[%s19971_s14 + $0x520] sm:$0xff] }
 0xd4c   : > { %11794 = vmatpush3.bf16.msra.mxu1 %v11793_v6  ;;  %v11847_v6 = vpack.c.bf16 %v9197_v61, %v9196_v19  ;;  %v9239_v19 = vld [vmem:[%s19971_s14 + $0x518] sm:$0xff] }
 0xd4d   : > { %11795 = vmatprep.subr.bf16.mxu1 %v12496_v33 }
 0xd50   : > { %11797 = vmatpush3.bf16.msra.mxu1 %v11796_v1  ;;  %v9200_v1 = vld [vmem:[%s19971_s14 + $0x3f0] sm:$0xff] }
 0xd51   : > { %11798 = vmatprep.subr.bf16.mxu1 %v12496_v33  ;;  %v11853_v13 = vpack.c.bf16 %v9201_v63, %v9200_v1  ;;  %v7503_v1 = vrot.slane %v19272_v51, 2  ;;  %v9244_v63 = vld [vmem:[%s19971_s14 + $0x538] sm:$0xff] }
 0xd54   : > { %11800 = vmatpush3.bf16.msra.mxu1 %v11799_v30  ;;  %v9202_v30 = vld [vmem:[%s19971_s14 + $0x400] sm:$0xff] }
 0xd55   : > { %9743 = vmatprep.subr.mxu1 %v12494_v52  ;;  %v11856_v24 = vpack.c.bf16 %v9203_v14, %v9202_v30  ;;  %v9246_v14 = vld [vmem:[%s19971_s14 + $0x548] sm:$0xff] }
 0xd58   : > { %9744 = vmatpush3.msra.mxu1 %v9160_v56  ;;  %v9204_v56 = vld [vmem:[%s19971_s14 + $0x410] sm:$0xff] }
 0xd59   : > { %9746 = vmatmul.mubr.msk.f32.vlgmr.msra.gmra.mrb[56].mxu1 %vm4485_vm4, %v7053_v53  ;;  %11801 = vmatprep.subr.bf16.mxu1 %v12496_v33 }
 0xd5a   : > { %11803 = vmatpush3.bf16.msra.mxu1 %v11802_v54  ;;  %9778 = vmatprep.mubr.msk.f32.mxu1 %vm12497_vm0, %v12494_v52  ;;  %v9205_v54 = vld [vmem:[%s19971_s14 + $0x418] sm:$0xff] }
 0xd5b   : > { %11804 = vmatprep.subr.bf16.mxu1 %v12496_v33  ;;  %v11859_v53 = vpack.c.bf16 %v9205_v54, %v9204_v56  ;;  %v9248_v54 = vld [vmem:[%s19971_s14 + $0x558] sm:$0xff] }
 0xd5e   : > { %11806 = vmatpush3.bf16.msra.mxu1 %v11805_v48  ;;  %v11862_v48 = vpack.c.bf16 %v9207_v44, %v9206_v23  ;;  %v9250_v44 = vld [vmem:[%s19971_s14 + $0x568] sm:$0xff] }
 0xd5f   : > { %11807 = vmatprep.subr.bf16.mxu1 %v12496_v33 }
 0xd62   : > { %11809 = vmatpush3.bf16.msra.mxu1 %v11808_v47  ;;  %v9208_v47 = vld [vmem:[%s19971_s14 + $0x430] sm:$0xff] }
 0xd63   : > { %11810 = vmatprep.subr.bf16.mxu1 %v12496_v33 }
 0xd66   : > { %11812 = vmatpush3.bf16.msra.mxu1 %v11811_v11  ;;  %v9213_v11 = vld [vmem:[%s19971_s14 + $0x450] sm:$0xff] }
 0xd67   : > { %11813 = vmatprep.subr.bf16.mxu1 %v12496_v33  ;;  %v11868_v5 = vpack.c.bf16 %v9213_v11, %v9212_v9  ;;  %v9254_v9 = vld [vmem:[%s19971_s14 + $0x588] sm:$0xff]  ;;  %v9255_v11 = vld [vmem:[%s19971_s14 + $0x590] sm:$0xff] }
 0xd6a   : > { %11815 = vmatpush3.bf16.msra.mxu1 %v11814_v36  ;;  %v9215_v36 = vld [vmem:[%s19971_s14 + $0x460] sm:$0xff] }
 0xd6b   : > { %11816 = vmatprep.subr.bf16.mxu1 %v12496_v33  ;;  %v11871_v45 = vpack.c.bf16 %v9215_v36, %v9214_v41  ;;  %v9258_v41 = vld [vmem:[%s19971_s14 + $0x5a0] sm:$0xff]  ;;  %v9259_v36 = vld [vmem:[%s19971_s14 + $0x5a8] sm:$0xff] }
 0xd6e   : > { %11818 = vmatpush3.bf16.msra.mxu1 %v11817_v46  ;;  %v9217_v46 = vld [vmem:[%s19971_s14 + $0x470] sm:$0xff] }
 0xd6f   : > { %11819 = vmatprep.subr.bf16.mxu1 %v12496_v33  ;;  %v11874_v37 = vpack.c.bf16 %v9217_v46, %v9216_v10  ;;  %v11928_v10 = vpack.c.bf16 %v9259_v36, %v9258_v41  ;;  %v7593_v46 = vrot.slane %v19272_v51, 3  ;;  %v9299_v41 = vld [vmem:[%s19971_s14 + $0x6d8] sm:$0xff] }
 0xd72   : > { %11821 = vmatpush3.bf16.msra.mxu1 %v11820_v20  ;;  %v9219_v20 = vld [vmem:[%s19971_s14 + $0x480] sm:$0xff] }
 0xd73   : > { %9776 = vmatprep.subr.mxu1 %v12494_v52  ;;  %v11877_v38 = vpack.c.bf16 %v9219_v20, %v9218_v34  ;;  %v9261_v34 = vld [vmem:[%s19971_s14 + $0x5b8] sm:$0xff] }
 0xd76   : > { %9777 = vmatpush3.msra.mxu1 %v9176_v22  ;;  %v9221_v22 = vld [vmem:[%s19971_s14 + $0x490] sm:$0xff] }
 0xd77   : > { %9779 = vmatmul.mubr.msk.f32.vlgmr.msra.gmra.mrb[56].mxu1 %vm4485_vm4, %v7143_v50  ;;  %11822 = vmatprep.subr.bf16.mxu1 %v12496_v33  ;;  %v9222_v50 = vld [vmem:[%s19971_s14 + $0x498] sm:$0xff] }
 0xd78   : > { %11824 = vmatpush3.bf16.msra.mxu1 %v11823_v25  ;;  %9811 = vmatprep.mubr.msk.f32.mxu1 %vm12497_vm0, %v12494_v52  ;;  %v11880_v25 = vpack.c.bf16 %v9221_v22, %v9220_v28  ;;  %v11883_v58 = vpack.c.bf16 %v9223_v15, %v9222_v50  ;;  %v9263_v28 = vld [vmem:[%s19971_s14 + $0x5c8] sm:$0xff]  ;;  %v9265_v50 = vld [vmem:[%s19971_s14 + $0x5d8] sm:$0xff] }
 0xd79   : > { %11825 = vmatprep.subr.bf16.mxu1 %v12496_v33 }
 0xd7c   : > { %11827 = vmatpush3.bf16.msra.mxu1 %v11826_v55  ;;  %v9226_v55 = vld [vmem:[%s19971_s14 + $0x4b0] sm:$0xff] }
 0xd7d   : > { %11828 = vmatprep.subr.bf16.mxu1 %v12496_v33 }
 0xd80   : > { %11830 = vmatpush3.bf16.msra.mxu1 %v11829_v8  ;;  %v11886_v8 = vpack.c.bf16 %v9227_v62, %v9226_v55  ;;  %v9267_v55 = vld [vmem:[%s19971_s14 + $0x5e8] sm:$0xff] }
 0xd81   : > { %11831 = vmatprep.subr.bf16.mxu1 %v12496_v33 }
 0xd84   : > { %11833 = vmatpush3.bf16.msra.mxu1 %v11832_v26  ;;  %v9229_v26 = vld [vmem:[%s19971_s14 + $0x4c8] sm:$0xff] }
 0xd85   : > { %11834 = vmatprep.subr.bf16.mxu1 %v12496_v33  ;;  %v11889_v29 = vpack.c.bf16 %v9229_v26, %v9228_v60  ;;  %v9270_v60 = vld [vmem:[%s19971_s14 + $0x600] sm:$0xff]  ;;  %v9271_v26 = vld [vmem:[%s19971_s14 + $0x608] sm:$0xff] }
 0xd88   : > { %11836 = vmatpush3.bf16.msra.mxu1 %v11835_v40  ;;  %v9231_v40 = vld [vmem:[%s19971_s14 + $0x4d8] sm:$0xff] }
 0xd89   : > { %11837 = vmatprep.subr.bf16.mxu1 %v12496_v33  ;;  %v11892_v0 = vpack.c.bf16 %v9231_v40, %v9230_v32  ;;  %v9274_v32 = vld [vmem:[%s19971_s14 + $0x618] sm:$0xff]  ;;  %v9275_v40 = vld [vmem:[%s19971_s14 + $0x620] sm:$0xff] }
 0xd8c   : > { %11839 = vmatpush3.bf16.msra.mxu1 %v11838_v39  ;;  %v9233_v39 = vld [vmem:[%s19971_s14 + $0x4e8] sm:$0xff] }
 0xd8d   : > { %11840 = vmatprep.subr.bf16.mxu1 %v12496_v33  ;;  %v11895_v18 = vpack.c.bf16 %v9233_v39, %v9232_v4  ;;  %v11949_v4 = vpack.c.bf16 %v9275_v40, %v9274_v32  ;;  %v7683_v39 = vrot.slane %v19272_v51, 4 }
 0xd90   : > { %11842 = vmatpush3.bf16.msra.mxu1 %v11841_v59  ;;  %v9235_v59 = vld [vmem:[%s19971_s14 + $0x4f8] sm:$0xff] }
 0xd91   : > { %9809 = vmatprep.subr.mxu1 %v12494_v52  ;;  %v11898_v12 = vpack.c.bf16 %v9235_v59, %v9234_v2  ;;  %v9277_v2 = vld [vmem:[%s19971_s14 + $0x630] sm:$0xff] }
 0xd94   : > { %9810 = vmatpush3.msra.mxu1 %v9192_v16  ;;  %v9237_v16 = vld [vmem:[%s19971_s14 + $0x508] sm:$0xff] }
 0xd95   : > { %9812 = vmatmul.mubr.msk.f32.vlgmr.msra.gmra.mrb[56].mxu1 %vm4485_vm4, %v7233_v42  ;;  %11843 = vmatprep.subr.bf16.mxu1 %v12496_v33  ;;  %v9238_v42 = vld [vmem:[%s19971_s14 + $0x510] sm:$0xff] }
 0xd96   : > { %11845 = vmatpush3.bf16.msra.mxu1 %v11844_v3  ;;  %9844 = vmatprep.mubr.msk.f32.mxu1 %vm12497_vm0, %v12494_v52  ;;  %v11901_v3 = vpack.c.bf16 %v9237_v16, %v9236_v35  ;;  %v11904_v61 = vpack.c.bf16 %v9239_v19, %v9238_v42  ;;  %v9279_v35 = vld [vmem:[%s19971_s14 + $0x640] sm:$0xff]  ;;  %v9281_v42 = vld [vmem:[%s19971_s14 + $0x650] sm:$0xff] }
 0xd97   : > { %11846 = vmatprep.subr.bf16.mxu1 %v12496_v33 }
 0xd9a   : > { %11848 = vmatpush3.bf16.msra.mxu1 %v11847_v6  ;;  %v9242_v6 = vld [vmem:[%s19971_s14 + $0x528] sm:$0xff] }
 0xd9b   : > { %11849 = vmatprep.subr.bf16.mxu1 %v12496_v33 }
 0xd9e   : > { %11851 = vmatpush3.bf16.msra.mxu1 %v11850_v31  ;;  %v11907_v31 = vpack.c.bf16 %v9243_v7, %v9242_v6  ;;  %v9283_v6 = vld [vmem:[%s19971_s14 + $0x660] sm:$0xff] }
 0xd9f   : > { %11852 = vmatprep.subr.bf16.mxu1 %v12496_v33 }
 0xda2   : > { %11854 = vmatpush3.bf16.msra.mxu1 %v11853_v13  ;;  %v9245_v13 = vld [vmem:[%s19971_s14 + $0x540] sm:$0xff] }
 0xda3   : > { %11855 = vmatprep.subr.bf16.mxu1 %v12496_v33  ;;  %v11910_v30 = vpack.c.bf16 %v9245_v13, %v9244_v63  ;;  %v9286_v63 = vld [vmem:[%s19971_s14 + $0x678] sm:$0xff]  ;;  %v9287_v13 = vld [vmem:[%s19971_s14 + $0x680] sm:$0xff] }
 0xda6   : > { %11857 = vmatpush3.bf16.msra.mxu1 %v11856_v24  ;;  %v9247_v24 = vld [vmem:[%s19971_s14 + $0x550] sm:$0xff] }
 0xda7   : > { %11858 = vmatprep.subr.bf16.mxu1 %v12496_v33  ;;  %v11913_v56 = vpack.c.bf16 %v9247_v24, %v9246_v14  ;;  %v9290_v14 = vld [vmem:[%s19971_s14 + $0x690] sm:$0xff]  ;;  %v9291_v24 = vld [vmem:[%s19971_s14 + $0x698] sm:$0xff] }
 0xdaa   : > { %11860 = vmatpush3.bf16.msra.mxu1 %v11859_v53  ;;  %v9249_v53 = vld [vmem:[%s19971_s14 + $0x560] sm:$0xff] }
 0xdab   : > { %11861 = vmatprep.subr.bf16.mxu1 %v12496_v33  ;;  %v11916_v23 = vpack.c.bf16 %v9249_v53, %v9248_v54  ;;  %v11970_v54 = vpack.c.bf16 %v9291_v24, %v9290_v14  ;;  %v7773_v53 = vrot.slane %v19272_v51, 5 }
 0xdae   : > { %11863 = vmatpush3.bf16.msra.mxu1 %v11862_v48  ;;  %v9251_v48 = vld [vmem:[%s19971_s14 + $0x570] sm:$0xff] }
 0xdaf   : > { %9842 = vmatprep.subr.mxu1 %v12494_v52  ;;  %v11919_v49 = vpack.c.bf16 %v9251_v48, %v9250_v44  ;;  %v9293_v44 = vld [vmem:[%s19971_s14 + $0x6a8] sm:$0xff] }
 0xdb2   : > { %9843 = vmatpush3.msra.mxu1 %v9208_v47  ;;  %v9253_v47 = vld [vmem:[%s19971_s14 + $0x580] sm:$0xff] }
 0xdb3   : > { %9845 = vmatmul.mubr.msk.f32.vlgmr.msra.gmra.mrb[56].mxu1 %vm4485_vm4, %v19272_v51  ;;  %11864 = vmatprep.subr.bf16.mxu1 %v12496_v33 }
 0xdb4   : > { %11866 = vmatpush3.bf16.msra.mxu1 %v11865_v27  ;;  %9877 = vmatprep.mubr.msk.f32.mxu1 %vm12497_vm0, %v12494_v52  ;;  %v11922_v27 = vpack.c.bf16 %v9253_v47, %v9252_v43  ;;  %v9295_v43 = vld [vmem:[%s19971_s14 + $0x6b8] sm:$0xff] }
 0xdb5   : > { %11867 = vmatprep.subr.bf16.mxu1 %v12496_v33 }
 0xdb8   : > { %11869 = vmatpush3.bf16.msra.mxu1 %v11868_v5  ;;  %v11925_v5 = vpack.c.bf16 %v9255_v11, %v9254_v9  ;;  %v9297_v9 = vld [vmem:[%s19971_s14 + $0x6c8] sm:$0xff] }
 0xdb9   : > { %11870 = vmatprep.subr.bf16.mxu1 %v12496_v33 }
 0xdbc   : > { %11872 = vmatpush3.bf16.msra.mxu1 %v11871_v45  ;;  %v9256_v45 = vld [vmem:[%s19971_s14 + $0x598] sm:$0xff] }
 0xdbd   : > { %11873 = vmatprep.subr.bf16.mxu1 %v12496_v33 }
 0xdc0   : > { %11875 = vmatpush3.bf16.msra.mxu1 %v11874_v37  ;;  %v9260_v37 = vld [vmem:[%s19971_s14 + $0x5b0] sm:$0xff] }
 0xdc1   : > { %11876 = vmatprep.subr.bf16.mxu1 %v12496_v33  ;;  %v11931_v20 = vpack.c.bf16 %v9261_v34, %v9260_v37  ;;  %v9302_v37 = vld [vmem:[%s19971_s14 + $0x6f0] sm:$0xff]  ;;  %v9303_v34 = vld [vmem:[%s19971_s14 + $0x6f8] sm:$0xff] }
 0xdc4   : > { %11878 = vmatpush3.bf16.msra.mxu1 %v11877_v38  ;;  %v9262_v38 = vld [vmem:[%s19971_s14 + $0x5c0] sm:$0xff] }
 0xdc5   : > { %11879 = vmatprep.subr.bf16.mxu1 %v12496_v33  ;;  %v11934_v22 = vpack.c.bf16 %v9263_v28, %v9262_v38  ;;  %v9304_v38 = vld [vmem:[%s19971_s14 + $0x700] sm:$0xff]  ;;  %v7863_v28 = vrot.slane %v19272_v51, 6 }
 0xdc8   : > { %11881 = vmatpush3.bf16.msra.mxu1 %v11880_v25  ;;  %v9264_v25 = vld [vmem:[%s19971_s14 + $0x5d0] sm:$0xff] }
 0xdc9   : > { %11882 = vmatprep.subr.bf16.mxu1 %v12496_v33  ;;  %v11937_v15 = vpack.c.bf16 %v9265_v50, %v9264_v25 }
 0xdcc   : > { %11884 = vmatpush3.bf16.msra.mxu1 %v11883_v58  ;;  %v9266_v58 = vld [vmem:[%s19971_s14 + $0x5e0] sm:$0xff] }
 0xdcd   : > { %9875 = vmatprep.subr.mxu1 %v12494_v52  ;;  %v11940_v62 = vpack.c.bf16 %v9267_v55, %v9266_v58 }
 0xdd0   : > { %9876 = vmatpush3.msra.mxu1 %v9224_v17  ;;  %v9268_v17 = vld [vmem:[%s19971_s14 + $0x5f0] sm:$0xff] }
 0xdd1   : > { %9878 = vmatmul.mubr.msk.f32.vlgmr.msra.gmra.mrb[56].mxu1 %vm4485_vm4, %v7413_v21  ;;  %11885 = vmatprep.subr.bf16.mxu1 %v12496_v33 }
 0xdd2   : > { %11887 = vmatpush3.bf16.msra.mxu1 %v11886_v8  ;;  %9910 = vmatprep.mubr.msk.f32.mxu1 %vm12497_vm0, %v12494_v52  ;;  %v9269_v8 = vld [vmem:[%s19971_s14 + $0x5f8] sm:$0xff] }
 0xdd3   : > { %11888 = vmatprep.subr.bf16.mxu1 %v12496_v33  ;;  %v11943_v21 = vpack.c.bf16 %v9269_v8, %v9268_v17 }
 0xdd6   : > { %11890 = vmatpush3.bf16.msra.mxu1 %v11889_v29  ;;  %v11946_v29 = vpack.c.bf16 %v9271_v26, %v9270_v60 }
 0xdd7   : > { %11891 = vmatprep.subr.bf16.mxu1 %v12496_v33 }
 0xdda   : > { %11893 = vmatpush3.bf16.msra.mxu1 %v11892_v0  ;;  %v9272_v0 = vld [vmem:[%s19971_s14 + $0x610] sm:$0xff] }
 0xddb   : > { %11894 = vmatprep.subr.bf16.mxu1 %v12496_v33 }
 0xdde   : > { %11896 = vmatpush3.bf16.msra.mxu1 %v11895_v18  ;;  %v9276_v18 = vld [vmem:[%s19971_s14 + $0x628] sm:$0xff] }
 0xddf   : > { %11897 = vmatprep.subr.bf16.mxu1 %v12496_v33  ;;  %v11952_v59 = vpack.c.bf16 %v9277_v2, %v9276_v18 }
 0xde2   : > { %11899 = vmatpush3.bf16.msra.mxu1 %v11898_v12  ;;  %v9278_v12 = vld [vmem:[%s19971_s14 + $0x638] sm:$0xff] }
 0xde3   : > { %11900 = vmatprep.subr.bf16.mxu1 %v12496_v33  ;;  %v11955_v16 = vpack.c.bf16 %v9279_v35, %v9278_v12 }
 0xde6   : > { %11902 = vmatpush3.bf16.msra.mxu1 %v11901_v3  ;;  %v9280_v3 = vld [vmem:[%s19971_s14 + $0x648] sm:$0xff] }
 0xde7   : > { %11903 = vmatprep.subr.bf16.mxu1 %v12496_v33  ;;  %v11958_v19 = vpack.c.bf16 %v9281_v42, %v9280_v3 }
 0xdea   : > { %11905 = vmatpush3.bf16.msra.mxu1 %v11904_v61  ;;  %v9282_v61 = vld [vmem:[%s19971_s14 + $0x658] sm:$0xff] }
 0xdeb   : > { %9908 = vmatprep.subr.mxu1 %v12494_v52  ;;  %v11961_v7 = vpack.c.bf16 %v9283_v6, %v9282_v61 }
 0xdee   : > { %9909 = vmatpush3.msra.mxu1 %v9240_v57  ;;  %v9284_v57 = vld [vmem:[%s19971_s14 + $0x668] sm:$0xff] }
 0xdef   : > { %9911 = vmatmul.mubr.msk.f32.vlgmr.msra.gmra.mrb[56].mxu1 %vm4485_vm4, %v7503_v1  ;;  %11906 = vmatprep.subr.bf16.mxu1 %v12496_v33 }
 0xdf0   : > { %11908 = vmatpush3.bf16.msra.mxu1 %v11907_v31  ;;  %9943 = vmatprep.mubr.msk.f32.mxu1 %vm12497_vm0, %v12494_v52  ;;  %v9285_v31 = vld [vmem:[%s19971_s14 + $0x670] sm:$0xff] }
 0xdf1   : > { %11909 = vmatprep.subr.bf16.mxu1 %v12496_v33  ;;  %v11964_v1 = vpack.c.bf16 %v9285_v31, %v9284_v57 }
 0xdf4   : > { %11911 = vmatpush3.bf16.msra.mxu1 %v11910_v30  ;;  %v11967_v30 = vpack.c.bf16 %v9287_v13, %v9286_v63 }
 0xdf5   : > { %11912 = vmatprep.subr.bf16.mxu1 %v12496_v33 }
 0xdf8   : > { %11914 = vmatpush3.bf16.msra.mxu1 %v11913_v56  ;;  %v9288_v56 = vld [vmem:[%s19971_s14 + $0x688] sm:$0xff] }
 0xdf9   : > { %11915 = vmatprep.subr.bf16.mxu1 %v12496_v33 }
 0xdfc   : > { %11917 = vmatpush3.bf16.msra.mxu1 %v11916_v23  ;;  %v9292_v23 = vld [vmem:[%s19971_s14 + $0x6a0] sm:$0xff] }
 0xdfd   : > { %11918 = vmatprep.subr.bf16.mxu1 %v12496_v33  ;;  %v11973_v48 = vpack.c.bf16 %v9293_v44, %v9292_v23 }
 0xe00   : > { %11920 = vmatpush3.bf16.msra.mxu1 %v11919_v49  ;;  %v9294_v49 = vld [vmem:[%s19971_s14 + $0x6b0] sm:$0xff] }
 0xe01   : > { %11921 = vmatprep.subr.bf16.mxu1 %v12496_v33  ;;  %v11976_v47 = vpack.c.bf16 %v9295_v43, %v9294_v49 }
 0xe04   : > { %11923 = vmatpush3.bf16.msra.mxu1 %v11922_v27  ;;  %v9296_v27 = vld [vmem:[%s19971_s14 + $0x6c0] sm:$0xff] }
 0xe05   : > { %11924 = vmatprep.subr.bf16.mxu1 %v12496_v33  ;;  %v11979_v11 = vpack.c.bf16 %v9297_v9, %v9296_v27 }
 0xe08   : > { %11926 = vmatpush3.bf16.msra.mxu1 %v11925_v5  ;;  %v9298_v5 = vld [vmem:[%s19971_s14 + $0x6d0] sm:$0xff] }
 0xe09   : > { %9941 = vmatprep.subr.mxu1 %v12494_v52  ;;  %v11982_v36 = vpack.c.bf16 %v9299_v41, %v9298_v5 }
 0xe0c   : > { %9942 = vmatpush3.msra.mxu1 %v9256_v45  ;;  %v9300_v45 = vld [vmem:[%s19971_s14 + $0x6e0] sm:$0xff] }
 0xe0d   : > { %9944 = vmatmul.mubr.msk.f32.vlgmr.msra.gmra.mrb[56].mxu1 %vm4485_vm4, %v7593_v46  ;;  %11927 = vmatprep.subr.bf16.mxu1 %v12496_v33 }
 0xe0e   : > { %11929 = vmatpush3.bf16.msra.mxu1 %v11928_v10  ;;  %9976 = vmatprep.mubr.msk.f32.mxu1 %vm12497_vm0, %v12494_v52  ;;  %v9301_v10 = vld [vmem:[%s19971_s14 + $0x6e8] sm:$0xff] }
 0xe0f   : > { %11930 = vmatprep.subr.bf16.mxu1 %v12496_v33  ;;  %v11985_v46 = vpack.c.bf16 %v9301_v10, %v9300_v45 }
 0xe12   : > { %11932 = vmatpush3.bf16.msra.mxu1 %v11931_v20  ;;  %v11988_v20 = vpack.c.bf16 %v9303_v34, %v9302_v37 }
 0xe13   : > { %11933 = vmatprep.subr.bf16.mxu1 %v12496_v33 }
 0xe16   : > { %11935 = vmatpush3.bf16.msra.mxu1 %v11934_v22  ;;  %v6587_v22 = vld [vmem:[%s19972_s15] sm:$0x1] }
 0xe17   : > { %11936 = vmatprep.subr.bf16.mxu1 %v12496_v33 }
 0xe1a   : > { %11938 = vmatpush3.bf16.msra.mxu1 %v11937_v15 }
 0xe1b   : > { %11939 = vmatprep.subr.bf16.mxu1 %v12496_v33 }
 0xe1e   : > { %11941 = vmatpush3.bf16.msra.mxu1 %v11940_v62 }
 0xe1f   : > { %11942 = vmatprep.subr.bf16.mxu1 %v12496_v33 }
 0xe22   : > { %11944 = vmatpush3.bf16.msra.mxu1 %v11943_v21 }
 0xe23   : > { %11945 = vmatprep.subr.bf16.mxu1 %v12496_v33 }
 0xe26   : > { %11947 = vmatpush3.bf16.msra.mxu1 %v11946_v29 }
 0xe27   : > { %9974 = vmatprep.subr.mxu1 %v12494_v52 }
 0xe2a   : > { %9975 = vmatpush3.msra.mxu1 %v9272_v0 }
 0xe2b   : > { %9977 = vmatmul.mubr.msk.f32.vlgmr.msra.gmra.mrb[56].mxu1 %vm4485_vm4, %v7683_v39  ;;  %11948 = vmatprep.subr.bf16.mxu1 %v12496_v33 }
 0xe2c   : > { %11950 = vmatpush3.bf16.msra.mxu1 %v11949_v4  ;;  %10009 = vmatprep.mubr.msk.f32.mxu1 %vm12497_vm0, %v12494_v52 }
 0xe2d   : > { %11951 = vmatprep.subr.bf16.mxu1 %v12496_v33 }
 0xe30   : > { %11953 = vmatpush3.bf16.msra.mxu1 %v11952_v59 }
 0xe31   : > { %11954 = vmatprep.subr.bf16.mxu1 %v12496_v33 }
 0xe34   : > { %11956 = vmatpush3.bf16.msra.mxu1 %v11955_v16 }
 0xe35   : > { %11957 = vmatprep.subr.bf16.mxu1 %v12496_v33 }
 0xe38   : > { %11959 = vmatpush3.bf16.msra.mxu1 %v11958_v19 }
 0xe39   : > { %11960 = vmatprep.subr.bf16.mxu1 %v12496_v33 }
 0xe3c   : > { %11962 = vmatpush3.bf16.msra.mxu1 %v11961_v7 }
 0xe3d   : > { %11963 = vmatprep.subr.bf16.mxu1 %v12496_v33 }
 0xe40   : > { %11965 = vmatpush3.bf16.msra.mxu1 %v11964_v1 }
 0xe41   : > { %11966 = vmatprep.subr.bf16.mxu1 %v12496_v33 }
 0xe44   : > { %11968 = vmatpush3.bf16.msra.mxu1 %v11967_v30 }
 0xe45   : > { %10007 = vmatprep.subr.mxu1 %v12494_v52 }
 0xe48   : > { %10008 = vmatpush3.msra.mxu1 %v9288_v56 }
 0xe49   : > { %10010 = vmatmul.mubr.msk.f32.vlgmr.msra.gmra.mrb[56].mxu1 %vm4485_vm4, %v7773_v53  ;;  %11969 = vmatprep.subr.bf16.mxu1 %v12496_v33 }
 0xe4a   : > { %11971 = vmatpush3.bf16.msra.mxu1 %v11970_v54  ;;  %10042 = vmatprep.mubr.msk.f32.mxu1 %vm12497_vm0, %v12494_v52 }
 0xe4b   : > { %11972 = vmatprep.subr.bf16.mxu1 %v12496_v33 }
 0xe4e   : > { %11974 = vmatpush3.bf16.msra.mxu1 %v11973_v48 }
 0xe4f   : > { %11975 = vmatprep.subr.bf16.mxu1 %v12496_v33 }
 0xe52   : > { %11977 = vmatpush3.bf16.msra.mxu1 %v11976_v47 }
 0xe53   : > { %11978 = vmatprep.subr.bf16.mxu1 %v12496_v33 }
 0xe56   : > { %11980 = vmatpush3.bf16.msra.mxu1 %v11979_v11 }
 0xe57   : > { %11981 = vmatprep.subr.bf16.mxu1 %v12496_v33 }
 0xe5a   : > { %11983 = vmatpush3.bf16.msra.mxu1 %v11982_v36 }
 0xe5b   : > { %11984 = vmatprep.subr.bf16.mxu1 %v12496_v33 }
 0xe5e   : > { %11986 = vmatpush3.bf16.msra.mxu1 %v11985_v46 }
 0xe5f   : > { %11987 = vmatprep.subr.bf16.mxu1 %v12496_v33 }
 0xe62   : > { %11989 = vmatpush3.bf16.msra.mxu1 %v11988_v20 }
 0xe63   : > { %10040 = vmatprep.subr.mxu1 %v12494_v52 }
 0xe66   : > { %10041 = vmatpush3.msra.mxu1 %v9304_v38 }
 0xe67   : > { %10043 = vmatmul.mubr.msk.f32.vlgmr.msra.gmra.mrb[56].mxu1 %vm4485_vm4, %v7863_v28 }
 0xf3a   : > { %v7932_v33 = vpop.f32.mrb[56].mxu1 }
 0xf3b   : > { %v12006_v52 = vadd.f32 %v7932_v33, %v6587_v22  ;;  %v10044_v25 = vpop.f32.mrb[57].mxu1 }
 0xf3d   : > { %7938 = vst.msk [vmem:[%s513_s17] sm:$0x1] %vm7937_vm1, %v12006_v52 }
 0xf3e   : > { %12442 = shalt.err (!%p12439_p3)
}
 0xf3f   : > { %s12443_s30 = scalar_lea.hbm %s19915_s26, 16  ;;  %s12447_s17 = scalar_lea.hbm %s19973_s16, 32 }
 0xf40   : > { %p12444_p4 = scmp.ne.s32.totalorder %s19915_s26, %s12443_s30  ;;  %p12448_p9 = scmp.lt.u32.totalorder %s19915_s26, %s19973_s16 }
 0xf41   : > { %p12449_p10 = scmp.lt.u32.totalorder %s12447_s17, %s12443_s30  ;;  %p12451_p12 = scmp.lt.u32.totalorder %s12443_s30, %s19915_s26 }
 0xf42   : > { %p12445_p7 = pnand %p12444_p4, %p12622_p5 }
 0xf43   : > { %p12450_p11 = por %p12449_p10, %p12448_p9 }
 0xf44   : > { %p12446_p8 = pneg %p12445_p7 }
 0xf45   : > { %p12452_p13 = por %p12451_p12, %p12450_p11 }
 0xf47   : > { %p12453_p0 = pnand %p12452_p13, %p12446_p8 }
 0xf49   : > { %12456 = shalt.err (!%p12453_p0)
}
 0xf4a   : > { %12283 = dma.vmem_to_hbm [thread:$0]  (%p12622_p5), %s19917_s24, 16, %s19915_s26, %s7940_s19  }
 0xf4b PF: > { %s20141_s28 = sld [smem:[#allocation7_spill]]  ;;  %s20142_s25 = sld [smem:[#allocation5_spill]] }
 0xf51   : > { %p12289_p1 = scmp.ge.s32.totalorder %s20141_s28, 2  ;;  %s7964_s29 = sand.u32 1, %s20142_s25  }
 0xf52   : > { %s7965_s27 = scalar_lea.sflag [#allocation3], %s7964_s29 }
 0xf53   : > { %p12286_p2 = pnand %p12289_p1, %p12626_p6 }
 0xf55   : > { %12474 = dma.done.wait (!%p12286_p2), %s7965_s27, 16  }
 0xf56   : > { %12476 = vsyncadd (!%p12286_p2), %s7965_s27, 4294967280  ;;  %s20144_s24 = sld [smem:[#allocation8_spill]]  ;;  %s20145_s30 = sld [smem:[#allocation6_spill]] }
 0xf57   : > { %s20146_s23 = sld [smem:[#allocation9_spill]]  ;;  %s20147_s21 = smov %s12483_s22 }
 0xf5c   : > { %p26_p3 = scmp.ge.s32.totalorder %s20144_s24, 4   ;;  %s20148_s22 = smov %s20145_s30 }
 0xf5e   :  { %28 = sbr.rel (!%p26_p3) target bundleno = 5 (0x5), region = 141 }
 0xf65   :  { %7969 = vsyncpa [#allocation3], 1 }
 0xf66   :  { %7971 = vsyncpa [#allocation3 + $0x1], 1 }

</bundles_post_ra>
